<compile_context>
chip_gen: v7x
topology: tpu7x:2x2x1
jax: 0.10.0
libtpu: 0.0.40
codegen_flags: <defaults>
</compile_context>

<pallas_src>
import jax
import jax.numpy as jnp
from jax.experimental import pallas as pl
from jax.experimental.pallas import tpu as pltpu

EPS = 1e-5
LANE = 128


def _rup(x, m):
    return (x + m - 1) // m * m


def _pick_config():
    """TILE_M / vmem limit per generation: big tiles on 128-MiB-VMEM chips (v5e/v6e),
    conservative on v7x's 64 MiB per-TC VMEM."""
    try:
        cap = pltpu.get_tpu_info().vmem_capacity_bytes
    except Exception:
        return 256, 48 * 1024 * 1024
    if cap >= 96 * 1024 * 1024:
        return 512, 96 * 1024 * 1024
    return 256, 48 * 1024 * 1024


TILE_M, VMEM_LIMIT = _pick_config()


# --------------------------------------------------------------------------- #
# Kernel A: 3x3 conv (9 tap-shifted matmuls from a haloed VMEM window, bf16 MXU,
#           f32 VMEM accumulator) + per-image BN batch stats.
#           Optionally fuses the downsample 1x1-conv batch stats (conv1 pass).
# --------------------------------------------------------------------------- #
def _conv3x3_stats(x_stored, w9, bias, mask_stored, wd=None, bd=None, *,
                   N, n_tiles, wp2, cin_p, cout_p, tile_m, halo):
    L_pad = n_tiles * tile_m
    with_ds = wd is not None

    def kernel(*refs):
        if with_ds:
            (xw0, xw1, xw2, w_ref, b_ref, msk_ref, wd_ref, bd_ref,
             y_ref, sum_ref, sq_ref, sumd_ref, sqd_ref, win_ref, acc_ref) = refs
        else:
            (xw0, xw1, xw2, w_ref, b_ref, msk_ref,
             y_ref, sum_ref, sq_ref, win_ref, acc_ref) = refs

        m = pl.program_id(1)

        @pl.when(m == 0)
        def _init():
            sum_ref[...] = jnp.zeros_like(sum_ref)
            sq_ref[...] = jnp.zeros_like(sq_ref)
            if with_ds:
                sumd_ref[...] = jnp.zeros_like(sumd_ref)
                sqd_ref[...] = jnp.zeros_like(sqd_ref)

        # Stage the haloed window: [ tail of prev block | current block | head of next ].
        # Window kept f32 so the (statically) shifted sublane slices stay on the safe
        # 32-bit path; MXU operands are cast back to bf16 per tap.
        win_ref[0:halo, :] = xw0[tile_m - halo:tile_m, :].astype(jnp.float32)
        win_ref[halo:halo + tile_m, :] = xw1[...].astype(jnp.float32)
        win_ref[halo + tile_m:halo + tile_m + halo, :] = xw2[0:halo, :].astype(jnp.float32)

        # 9 shifted matmuls accumulated in the f32 VMEM scratch.
        for kh in range(3):
            for kw in range(3):
                off = halo - wp2 - 1 + kh * wp2 + kw          # static offset
                xs = win_ref[off:off + tile_m, :].astype(jnp.bfloat16)
                contrib = jnp.dot(xs, w_ref[kh * 3 + kw],
                                  preferred_element_type=jnp.float32)
                if kh == 0 and kw == 0:
                    acc_ref[...] = contrib
                else:
                    acc_ref[...] += contrib

        msk = msk_ref[...]
        y = acc_ref[...] + b_ref[...]
        y_ref[...] = y.astype(y_ref.dtype)                    # bf16 to HBM

        # per-image BN statistics (masked to valid output positions)
        yv = y * msk
        sum_ref[...] += jnp.sum(yv, axis=0, keepdims=True)
        sq_ref[...] += jnp.sum(yv * y, axis=0, keepdims=True)

        if with_ds:
            # fused downsample 1x1-conv statistics (x tile already resident)
            yd = jnp.dot(xw1[...], wd_ref[...],
                         preferred_element_type=jnp.float32) + bd_ref[...]
            ydv = yd * msk
            sumd_ref[...] += jnp.sum(ydv, axis=0, keepdims=True)
            sqd_ref[...] += jnp.sum(ydv * yd, axis=0, keepdims=True)

    xblk = (None, tile_m, cin_p)
    in_specs = [
        pl.BlockSpec(xblk, lambda n, m: (n, m, 0)),
        pl.BlockSpec(xblk, lambda n, m: (n, m + 1, 0)),
        pl.BlockSpec(xblk, lambda n, m: (n, m + 2, 0)),
        pl.BlockSpec((9, cin_p, cout_p), lambda n, m: (0, 0, 0)),
        pl.BlockSpec((1, cout_p), lambda n, m: (0, 0)),
        pl.BlockSpec((tile_m, 1), lambda n, m: (m + 1, 0)),
    ]
    stats_shape = jax.ShapeDtypeStruct((N, 1, cout_p), jnp.float32)
    stats_spec = pl.BlockSpec((None, 1, cout_p), lambda n, m: (n, 0, 0))
    out_shape = [jax.ShapeDtypeStruct((N, L_pad, cout_p), jnp.bfloat16),
                 stats_shape, stats_shape]
    out_specs = [pl.BlockSpec((None, tile_m, cout_p), lambda n, m: (n, m, 0)),
                 stats_spec, stats_spec]
    inputs = [x_stored, x_stored, x_stored, w9, bias, mask_stored]
    if with_ds:
        in_specs += [pl.BlockSpec((cin_p, cout_p), lambda n, m: (0, 0)),
                     pl.BlockSpec((1, cout_p), lambda n, m: (0, 0))]
        inputs += [wd, bd]
        out_shape += [stats_shape, stats_shape]
        out_specs += [stats_spec, stats_spec]

    return pl.pallas_call(
        kernel,
        out_shape=tuple(out_shape),
        grid=(N, n_tiles),
        in_specs=in_specs,
        out_specs=tuple(out_specs),
        scratch_shapes=[pltpu.VMEM((tile_m + 2 * halo, cin_p), jnp.float32),
                        pltpu.VMEM((tile_m, cout_p), jnp.float32)],
        compiler_params=pltpu.CompilerParams(
            dimension_semantics=("parallel", "arbitrary"),
            vmem_limit_bytes=VMEM_LIMIT),
    )(*inputs)


# --------------------------------------------------------------------------- #
# Kernel B: BN1 + ReLU, fused, written straight into conv2's margined bf16 layout
# --------------------------------------------------------------------------- #
def _bn_relu_to_stored(y1, scale, shift, mask_stored, *, N, n_tiles, cp, tile_m):
    S = (n_tiles + 2) * tile_m

    def kernel(y_ref, sc_ref, sh_ref, msk_ref, o_ref):
        m = pl.program_id(1)
        is_margin = (m == 0) | (m == pl.num_programs(1) - 1)

        @pl.when(is_margin)
        def _zero():                       # zero halo-margin tiles only
            o_ref[...] = jnp.zeros_like(o_ref)

        @pl.when(jnp.logical_not(is_margin))
        def _body():
            a = y_ref[...].astype(jnp.float32) * sc_ref[...] + sh_ref[...]
            a = jnp.maximum(a, 0.0) * msk_ref[...]   # zero spatial padding rows
            o_ref[...] = a.astype(o_ref.dtype)

    vec = pl.BlockSpec((1, cp), lambda n, m: (0, 0))
    return pl.pallas_call(
        kernel,
        out_shape=jax.ShapeDtypeStruct((N, S, cp), jnp.bfloat16),
        grid=(N, n_tiles + 2),
        in_specs=[
            pl.BlockSpec((None, tile_m, cp),
                         lambda n, m: (n, jnp.clip(m - 1, 0, n_tiles - 1), 0)),
            vec, vec,
            pl.BlockSpec((tile_m, 1), lambda n, m: (m, 0)),
        ],
        out_specs=pl.BlockSpec((None, tile_m, cp), lambda n, m: (n, m, 0)),
        compiler_params=pltpu.CompilerParams(
            dimension_semantics=("parallel", "parallel"),
            vmem_limit_bytes=VMEM_LIMIT),
    )(y1, scale, shift, mask_stored)


# --------------------------------------------------------------------------- #
# Kernel C: BN2 + (downsample 1x1-conv BN  |  exact f32 identity) + add + ReLU
# --------------------------------------------------------------------------- #
def _final_epilogue(y2, scale2, shift2, skip, wd=None, dscale=None, dshift=None, *,
                    N, n_tiles, cin_p, cout_p, tile_m):
    L_pad = n_tiles * tile_m
    with_ds = wd is not None

    def kernel(*refs):
        if with_ds:
            y_ref, s2_ref, h2_ref, x_ref, wd_ref, ds_ref, dh_ref, o_ref = refs
        else:
            y_ref, s2_ref, h2_ref, x_ref, o_ref = refs
        bn2 = y_ref[...].astype(jnp.float32) * s2_ref[...] + h2_ref[...]
        if with_ds:
            yd = jnp.dot(x_ref[...], wd_ref[...], preferred_element_type=jnp.float32)
            idn = yd * ds_ref[...] + dh_ref[...]   # dh absorbs the conv bias bd
        else:
            idn = x_ref[...]                        # exact f32 residual
        o_ref[...] = jnp.maximum(bn2 + idn, 0.0)

    vec = pl.BlockSpec((1, cout_p), lambda n, m: (0, 0))
    in_specs = [pl.BlockSpec((None, tile_m, cout_p), lambda n, m: (n, m, 0)), vec, vec]
    if with_ds:
        in_specs += [pl.BlockSpec((None, tile_m, cin_p), lambda n, m: (n, m + 1, 0)),
                     pl.BlockSpec((cin_p, cout_p), lambda n, m: (0, 0)),
                     vec, vec]
        inputs = (y2, scale2, shift2, skip, wd, dscale, dshift)
    else:
        in_specs += [pl.BlockSpec((None, tile_m, cin_p), lambda n, m: (n, m, 0))]
        inputs = (y2, scale2, shift2, skip)

    return pl.pallas_call(
        kernel,
        out_shape=jax.ShapeDtypeStruct((N, L_pad, cout_p), jnp.float32),
        grid=(N, n_tiles),
        in_specs=in_specs,
        out_specs=pl.BlockSpec((None, tile_m, cout_p), lambda n, m: (n, m, 0)),
        compiler_params=pltpu.CompilerParams(
            dimension_semantics=("parallel", "parallel"),
            vmem_limit_bytes=VMEM_LIMIT),
    )(*inputs)


# --------------------------------------------------------------------------- #
# ResidualBlock forward
# --------------------------------------------------------------------------- #
def _finalize_stats(s, q, count):
    # per-image partial sums (N,1,C) -> global mean / rstd.
    # TODO(synk): E[x^2]-E[x]^2 in f32 can cancel for large-mean activations; a
    #             shifted / Welford merge would be more robust.
    s = jnp.sum(s, axis=0)
    q = jnp.sum(q, axis=0)
    mean = s / count
    var = jnp.maximum(q / count - mean * mean, 0.0)   # biased (training-mode) variance
    rstd = jax.lax.rsqrt(var + EPS)
    return mean, rstd


def residual_block(x_nchw, params):
    N, Cin, H, W = x_nchw.shape
    Cout = params["w1"].shape[0]
    cin_p = _rup(Cin, LANE)
    cout_p = _rup(Cout, LANE)

    hp2, wp2 = H + 2, W + 2
    tile_m = TILE_M
    halo = _rup(wp2 + 1, 16)
    assert halo <= tile_m, "TILE_M must cover one padded image row (+halo alignment)"
    L = hp2 * wp2                       # flattened padded spatial length
    n_tiles = pl.cdiv(L, tile_m)
    L_pad = n_tiles * tile_m
    S = (n_tiles + 2) * tile_m          # one zero-margin tile on each side
    count = float(N * H * W)

    # ---- NCHW -> channel/spatial padded NHWC, flattened "stored" bf16 layout ----
    xt = jnp.transpose(x_nchw, (0, 2, 3, 1))
    xt = jnp.pad(xt, ((0, 0), (1, 1), (1, 1), (0, cin_p - Cin)))
    xt = xt.reshape(N, L, cin_p)
    x_stored = jnp.pad(xt, ((0, 0), (tile_m, S - tile_m - L), (0, 0))
                       ).astype(jnp.bfloat16)

    # validity mask (1.0 at real output pixels) in stored coordinates
    s_idx = jnp.arange(L_pad)
    hh = s_idx // wp2
    ww = s_idx % wp2
    valid = (s_idx < L) & (hh >= 1) & (hh <= H) & (ww >= 1) & (ww <= W)
    mask_stored = jnp.pad(valid.astype(jnp.float32), (tile_m, tile_m)).reshape(S, 1)

    # ---- parameters: lane-padded, 3x3 weights as (tap, Cin, Cout) bf16 ----
    def pad_vec(v, cp):
        return jnp.pad(v.astype(jnp.float32), (0, cp - v.shape[0])).reshape(1, cp)

    def pad_w3x3(w, cip, cop):
        co, ci = w.shape[0], w.shape[1]
        wt = jnp.transpose(w, (2, 3, 1, 0)).reshape(9, ci, co)
        return jnp.pad(wt, ((0, 0), (0, cip - ci), (0, cop - co))).astype(jnp.bfloat16)

    w1 = pad_w3x3(params["w1"], cin_p, cout_p)
    b1 = pad_vec(params["b1"], cout_p)
    g1 = pad_vec(params["g1"], cout_p)
    be1 = pad_vec(params["be1"], cout_p)
    w2 = pad_w3x3(params["w2"], cout_p, cout_p)
    b2 = pad_vec(params["b2"], cout_p)
    g2 = pad_vec(params["g2"], cout_p)
    be2 = pad_vec(params["be2"], cout_p)

    with_ds = (Cin != Cout)
    ck = dict(N=N, n_tiles=n_tiles, wp2=wp2, tile_m=tile_m, halo=halo)

    # conv1 (+ fused downsample 1x1 stats) + BN1 batch stats
    if with_ds:
        wd = jnp.pad(params["wd"].reshape(Cout, Cin).T,
                     ((0, cin_p - Cin), (0, cout_p - Cout))).astype(jnp.bfloat16)
        bd = pad_vec(params["bd"], cout_p)
        gd = pad_vec(params["gd"], cout_p)
        bed = pad_vec(params["bed"], cout_p)
        y1, s1, q1, sd, qd = _conv3x3_stats(x_stored, w1, b1, mask_stored, wd, bd,
                                            cin_p=cin_p, cout_p=cout_p, **ck)
    else:
        y1, s1, q1 = _conv3x3_stats(x_stored, w1, b1, mask_stored,
                                    cin_p=cin_p, cout_p=cout_p, **ck)
    mean1, rstd1 = _finalize_stats(s1, q1, count)
    scale1 = g1 * rstd1
    shift1 = be1 - mean1 * scale1

    # BN1 + ReLU fused, written straight into conv2's margined bf16 layout
    a1_stored = _bn_relu_to_stored(y1, scale1, shift1, mask_stored,
                                   N=N, n_tiles=n_tiles, cp=cout_p, tile_m=tile_m)

    # conv2 + BN2 batch stats
    y2, s2, q2 = _conv3x3_stats(a1_stored, w2, b2, mask_stored,
                                cin_p=cout_p, cout_p=cout_p, **ck)
    mean2, rstd2 = _finalize_stats(s2, q2, count)
    scale2 = g2 * rstd2
    shift2 = be2 - mean2 * scale2

    # epilogue: BN2 + residual + ReLU
    if with_ds:
        meand, rstdd = _finalize_stats(sd, qd, count)
        dscale = gd * rstdd
        dshift = bed - meand * dscale + bd * dscale      # absorbs the 1x1 conv bias
        out = _final_epilogue(y2, scale2, shift2, x_stored, wd, dscale, dshift,
                              N=N, n_tiles=n_tiles, cin_p=cin_p, cout_p=cout_p,
                              tile_m=tile_m)
    else:
        # exact f32 skip connection in output (non-margined) coordinates
        x_lp = jnp.pad(xt, ((0, 0), (0, L_pad - L), (0, 0)))
        out = _final_epilogue(y2, scale2, shift2, x_lp,
                              N=N, n_tiles=n_tiles, cin_p=cin_p, cout_p=cout_p,
                              tile_m=tile_m)

    # back to NCHW exactly once
    out = out[:, :L, :].reshape(N, hp2, wp2, cout_p)[:, 1:H + 1, 1:W + 1, :Cout]
    return jnp.transpose(out, (0, 3, 1, 2))


# --------------------------------------------------------------------------- #
# pure-JAX f32 reference
# --------------------------------------------------------------------------- #
def _reference(x, params):
    def conv(x, w, b, pad):
        y = jax.lax.conv_general_dilated(
            x, w, (1, 1), [(pad, pad), (pad, pad)],
            dimension_numbers=("NCHW", "OIHW", "NCHW"))
        return y + b.reshape(1, -1, 1, 1)

    def bn(y, g, b):
        mean = y.mean(axis=(0, 2, 3), keepdims=True)
        var = y.var(axis=(0, 2, 3), keepdims=True)
        return (y - mean) / jnp.sqrt(var + EPS) * g.reshape(1, -1, 1, 1) \
            + b.reshape(1, -1, 1, 1)

    Cin = x.shape[1]
    Cout = params["w1"].shape[0]
    if Cin != Cout:
        identity = bn(conv(x, params["wd"], params["bd"], 0),
                      params["gd"], params["bed"])
    else:
        identity = x
    out = jnp.maximum(bn(conv(x, params["w1"], params["b1"], 1),
                         params["g1"], params["be1"]), 0.0)
    out = bn(conv(out, params["w2"], params["b2"], 1), params["g2"], params["be2"])
    return jnp.maximum(out + identity, 0.0)


def _make_params(key, cin, cout):
    ks = jax.random.split(key, 12)
    p = {
        "w1": 0.1 * jax.random.normal(ks[0], (cout, cin, 3, 3), jnp.float32),
        "b1": 0.1 * jax.random.normal(ks[1], (cout,), jnp.float32),
        "g1": 1.0 + 0.1 * jax.random.normal(ks[2], (cout,), jnp.float32),
        "be1": 0.1 * jax.random.normal(ks[3], (cout,), jnp.float32),
        "w2": 0.1 * jax.random.normal(ks[4], (cout, cout, 3, 3), jnp.float32),
        "b2": 0.1 * jax.random.normal(ks[5], (cout,), jnp.float32),
        "g2": 1.0 + 0.1 * jax.random.normal(ks[6], (cout,), jnp.float32),
        "be2": 0.1 * jax.random.normal(ks[7], (cout,), jnp.float32),
    }
    if cin != cout:
        p.update({
            "wd": 0.1 * jax.random.normal(ks[8], (cout, cin, 1, 1), jnp.float32),
            "bd": 0.1 * jax.random.normal(ks[9], (cout,), jnp.float32),
            "gd": 1.0 + 0.1 * jax.random.normal(ks[10], (cout,), jnp.float32),
            "bed": 0.1 * jax.random.normal(ks[11], (cout,), jnp.float32),
        })
    return p


if __name__ == "__main__":
    key = jax.random.PRNGKey(0)
    k1, k2, kx1, kx2 = jax.random.split(key, 4)
    fwd = jax.jit(residual_block)

    # bf16 MXU operands / bf16-stored activations (f32 accumulation & BN math)
    # -> tolerance looser than a pure-f32 kernel.
    ATOL = RTOL = 5e-2

    # ---- test 1: channels_in != channels_out (downsample branch) ----
    N, Cin, Cout, H, W = 2, 4, 8, 16, 16
    params = _make_params(k1, Cin, Cout)
    x = jax.random.normal(kx1, (N, Cin, H, W), jnp.float32)
    out = jax.block_until_ready(fwd(x, params))
    ref = _reference(x, params)
    assert out.shape == (N, Cout, H, W)
    err = float(jnp.max(jnp.abs(out - ref)))
    assert jnp.allclose(out, ref, atol=ATOL, rtol=RTOL), f"max abs err {err}"

    # ---- test 2: channels_in == channels_out (identity branch) ----
    N, Cin, Cout, H, W = 2, 8, 8, 16, 16
    params2 = _make_params(k2, Cin, Cout)
    x2 = jax.random.normal(kx2, (N, Cin, H, W), jnp.float32)
    out2 = jax.block_until_ready(fwd(x2, params2))
    ref2 = _reference(x2, params2)
    err2 = float(jnp.max(jnp.abs(out2 - ref2)))
    assert jnp.allclose(out2, ref2, atol=ATOL, rtol=RTOL), f"max abs err {err2}"

    print("KERNEL_OK")
</pallas_src>

<mosaic_0001>
module attributes {stable_mosaic.version = 11 : i64} {
  func.func @kernel(%arg0: i32, %arg1: i32, %arg2: memref<1x256x128xbf16, #tpu.memory_space<vmem>>, %arg3: memref<1x256x128xbf16, #tpu.memory_space<vmem>>, %arg4: memref<1x256x128xbf16, #tpu.memory_space<vmem>>, %arg5: memref<9x128x128xbf16, #tpu.memory_space<vmem>>, %arg6: memref<1x128xf32, #tpu.memory_space<vmem>>, %arg7: memref<256x1xf32, #tpu.memory_space<vmem>>, %arg8: memref<128x128xbf16, #tpu.memory_space<vmem>>, %arg9: memref<1x128xf32, #tpu.memory_space<vmem>>, %arg10: memref<1x256x128xbf16, #tpu.memory_space<vmem>>, %arg11: memref<1x1x128xf32, #tpu.memory_space<vmem>>, %arg12: memref<1x1x128xf32, #tpu.memory_space<vmem>>, %arg13: memref<1x1x128xf32, #tpu.memory_space<vmem>>, %arg14: memref<1x1x128xf32, #tpu.memory_space<vmem>>, %arg15: memref<320x128xf32, #tpu.memory_space<vmem>>, %arg16: memref<256x128xf32, #tpu.memory_space<vmem>>) attributes {dimension_semantics = [#tpu.dimension_semantics<parallel>, #tpu.dimension_semantics<arbitrary>], iteration_bounds = array<i64: 2, 2>, scalar_prefetch = 0 : i64, scratch_operands = 2 : i64, tpu.core_type = #tpu.core_type<tc>, window_params = [{transform_indices = @transform_0, window_bounds = array<i64: 1, 256, 128>}, {transform_indices = @transform_1, window_bounds = array<i64: 1, 256, 128>}, {transform_indices = @transform_2, window_bounds = array<i64: 1, 256, 128>}, {pipeline_mode = #tpu.pipeline_mode<synchronous>, transform_indices = @transform_3, window_bounds = array<i64: 9, 128, 128>}, {pipeline_mode = #tpu.pipeline_mode<synchronous>, transform_indices = @transform_4, window_bounds = array<i64: 1, 128>}, {transform_indices = @transform_5, window_bounds = array<i64: 256, 1>}, {pipeline_mode = #tpu.pipeline_mode<synchronous>, transform_indices = @transform_6, window_bounds = array<i64: 128, 128>}, {pipeline_mode = #tpu.pipeline_mode<synchronous>, transform_indices = @transform_7, window_bounds = array<i64: 1, 128>}, {transform_indices = @transform_8, window_bounds = array<i64: 1, 256, 128>}, {transform_indices = @transform_9, window_bounds = array<i64: 1, 1, 128>}, {transform_indices = @transform_10, window_bounds = array<i64: 1, 1, 128>}, {transform_indices = @transform_11, window_bounds = array<i64: 1, 1, 128>}, {transform_indices = @transform_12, window_bounds = array<i64: 1, 1, 128>}]} {
    %c0_i32 = arith.constant 0 : i32
    %0 = arith.cmpi eq, %arg1, %c0_i32 : i32
    %1 = arith.extui %0 : i1 to i32
    %c0_i32_0 = arith.constant 0 : i32
    %2 = arith.cmpi ne, %1, %c0_i32_0 : i32
    scf.if %2 {
      %cst_128 = arith.constant 0.000000e+00 : f32
      %139 = vector.broadcast %cst_128 : f32 to vector<1x128xf32>
      %c0_129 = arith.constant 0 : index
      %c0_130 = arith.constant 0 : index
      %c0_131 = arith.constant 0 : index
      %140 = vector.load %arg11[%c0_129, %c0_130, %c0_131] : memref<1x1x128xf32, #tpu.memory_space<vmem>>, vector<1x1x128xf32>
      %141 = vector.shape_cast %140 : vector<1x1x128xf32> to vector<1x128xf32>
      %142 = vector.shape_cast %139 : vector<1x128xf32> to vector<1x1x128xf32>
      tpu.vector_store %arg11[%c0_129, %c0_130, %c0_131], %142 {strides = array<i32>} : memref<1x1x128xf32, #tpu.memory_space<vmem>>, vector<1x1x128xf32>,
      %cst_132 = arith.constant 0.000000e+00 : f32
      %143 = vector.broadcast %cst_132 : f32 to vector<1x128xf32>
      %c0_133 = arith.constant 0 : index
      %c0_134 = arith.constant 0 : index
      %c0_135 = arith.constant 0 : index
      %144 = vector.load %arg12[%c0_133, %c0_134, %c0_135] : memref<1x1x128xf32, #tpu.memory_space<vmem>>, vector<1x1x128xf32>
      %145 = vector.shape_cast %144 : vector<1x1x128xf32> to vector<1x128xf32>
      %146 = vector.shape_cast %143 : vector<1x128xf32> to vector<1x1x128xf32>
      tpu.vector_store %arg12[%c0_133, %c0_134, %c0_135], %146 {strides = array<i32>} : memref<1x1x128xf32, #tpu.memory_space<vmem>>, vector<1x1x128xf32>,
      %cst_136 = arith.constant 0.000000e+00 : f32
      %147 = vector.broadcast %cst_136 : f32 to vector<1x128xf32>
      %c0_137 = arith.constant 0 : index
      %c0_138 = arith.constant 0 : index
      %c0_139 = arith.constant 0 : index
      %148 = vector.load %arg13[%c0_137, %c0_138, %c0_139] : memref<1x1x128xf32, #tpu.memory_space<vmem>>, vector<1x1x128xf32>
      %149 = vector.shape_cast %148 : vector<1x1x128xf32> to vector<1x128xf32>
      %150 = vector.shape_cast %147 : vector<1x128xf32> to vector<1x1x128xf32>
      tpu.vector_store %arg13[%c0_137, %c0_138, %c0_139], %150 {strides = array<i32>} : memref<1x1x128xf32, #tpu.memory_space<vmem>>, vector<1x1x128xf32>,
      %cst_140 = arith.constant 0.000000e+00 : f32
      %151 = vector.broadcast %cst_140 : f32 to vector<1x128xf32>
      %c0_141 = arith.constant 0 : index
      %c0_142 = arith.constant 0 : index
      %c0_143 = arith.constant 0 : index
      %152 = vector.load %arg14[%c0_141, %c0_142, %c0_143] : memref<1x1x128xf32, #tpu.memory_space<vmem>>, vector<1x1x128xf32>
      %153 = vector.shape_cast %152 : vector<1x1x128xf32> to vector<1x128xf32>
      %154 = vector.shape_cast %151 : vector<1x128xf32> to vector<1x1x128xf32>
      tpu.vector_store %arg14[%c0_141, %c0_142, %c0_143], %154 {strides = array<i32>} : memref<1x1x128xf32, #tpu.memory_space<vmem>>, vector<1x1x128xf32>,
    } else {
    }
    %c0 = arith.constant 0 : index
    %c224 = arith.constant 224 : index
    %c0_1 = arith.constant 0 : index
    %3 = vector.load %arg2[%c0, %c224, %c0_1] : memref<1x256x128xbf16, #tpu.memory_space<vmem>>, vector<1x32x128xbf16>
    %4 = vector.shape_cast %3 : vector<1x32x128xbf16> to vector<32x128xbf16>
    %5 = arith.extf %4 : vector<32x128xbf16> to vector<32x128xf32>
    %c0_2 = arith.constant 0 : index
    %c0_3 = arith.constant 0 : index
    %6 = vector.load %arg15[%c0_2, %c0_3] : memref<320x128xf32, #tpu.memory_space<vmem>>, vector<32x128xf32>
    tpu.vector_store %arg15[%c0_2, %c0_3], %5 {strides = array<i32>} : memref<320x128xf32, #tpu.memory_space<vmem>>, vector<32x128xf32>,
    %c0_4 = arith.constant 0 : index
    %c0_5 = arith.constant 0 : index
    %c0_6 = arith.constant 0 : index
    %7 = vector.load %arg3[%c0_4, %c0_5, %c0_6] : memref<1x256x128xbf16, #tpu.memory_space<vmem>>, vector<1x256x128xbf16>
    %8 = vector.shape_cast %7 : vector<1x256x128xbf16> to vector<256x128xbf16>
    %9 = arith.extf %8 : vector<256x128xbf16> to vector<256x128xf32>
    %c32 = arith.constant 32 : index
    %c0_7 = arith.constant 0 : index
    %10 = vector.load %arg15[%c32, %c0_7] : memref<320x128xf32, #tpu.memory_space<vmem>>, vector<256x128xf32>
    tpu.vector_store %arg15[%c32, %c0_7], %9 {strides = array<i32>} : memref<320x128xf32, #tpu.memory_space<vmem>>, vector<256x128xf32>,
    %c0_8 = arith.constant 0 : index
    %c0_9 = arith.constant 0 : index
    %c0_10 = arith.constant 0 : index
    %11 = vector.load %arg4[%c0_8, %c0_9, %c0_10] : memref<1x256x128xbf16, #tpu.memory_space<vmem>>, vector<1x32x128xbf16>
    %12 = vector.shape_cast %11 : vector<1x32x128xbf16> to vector<32x128xbf16>
    %13 = arith.extf %12 : vector<32x128xbf16> to vector<32x128xf32>
    %c288 = arith.constant 288 : index
    %c0_11 = arith.constant 0 : index
    %14 = vector.load %arg15[%c288, %c0_11] : memref<320x128xf32, #tpu.memory_space<vmem>>, vector<32x128xf32>
    tpu.vector_store %arg15[%c288, %c0_11], %13 {strides = array<i32>} : memref<320x128xf32, #tpu.memory_space<vmem>>, vector<32x128xf32>,
    %c13 = arith.constant 13 : index
    %c0_12 = arith.constant 0 : index
    %15 = vector.load %arg15[%c13, %c0_12] : memref<320x128xf32, #tpu.memory_space<vmem>>, vector<256x128xf32>
    %16 = arith.truncf %15 : vector<256x128xf32> to vector<256x128xbf16>
    %c0_13 = arith.constant 0 : index
    %c0_14 = arith.constant 0 : index
    %c0_15 = arith.constant 0 : index
    %17 = vector.load %arg5[%c0_13, %c0_14, %c0_15] : memref<9x128x128xbf16, #tpu.memory_space<vmem>>, vector<1x128x128xbf16>
    %18 = vector.shape_cast %17 : vector<1x128x128xbf16> to vector<128x128xbf16>
    %cst = arith.constant dense<0.000000e+00> : vector<256x128xf32>
    %19 = tpu.matmul %16, %18, %cst {dimension_numbers = #tpu.dot_dimension_numbers<[1], [0], [0], [1], [0, 0, 1, 1], [], []>} : vector<256x128xbf16>, vector<128x128xbf16>, vector<256x128xf32> -> vector<256x128xf32>
    %c0_16 = arith.constant 0 : index
    %c0_17 = arith.constant 0 : index
    %20 = vector.load %arg16[%c0_16, %c0_17] : memref<256x128xf32, #tpu.memory_space<vmem>>, vector<256x128xf32>
    tpu.vector_store %arg16[%c0_16, %c0_17], %19 {strides = array<i32>} : memref<256x128xf32, #tpu.memory_space<vmem>>, vector<256x128xf32>,
    %c14 = arith.constant 14 : index
    %c0_18 = arith.constant 0 : index
    %21 = vector.load %arg15[%c14, %c0_18] : memref<320x128xf32, #tpu.memory_space<vmem>>, vector<256x128xf32>
    %22 = arith.truncf %21 : vector<256x128xf32> to vector<256x128xbf16>
    %c1 = arith.constant 1 : index
    %c0_19 = arith.constant 0 : index
    %c0_20 = arith.constant 0 : index
    %23 = vector.load %arg5[%c1, %c0_19, %c0_20] : memref<9x128x128xbf16, #tpu.memory_space<vmem>>, vector<1x128x128xbf16>
    %24 = vector.shape_cast %23 : vector<1x128x128xbf16> to vector<128x128xbf16>
    %cst_21 = arith.constant dense<0.000000e+00> : vector<256x128xf32>
    %25 = tpu.matmul %22, %24, %cst_21 {dimension_numbers = #tpu.dot_dimension_numbers<[1], [0], [0], [1], [0, 0, 1, 1], [], []>} : vector<256x128xbf16>, vector<128x128xbf16>, vector<256x128xf32> -> vector<256x128xf32>
    %c0_22 = arith.constant 0 : index
    %c0_23 = arith.constant 0 : index
    %26 = vector.load %arg16[%c0_22, %c0_23] : memref<256x128xf32, #tpu.memory_space<vmem>>, vector<256x128xf32>
    %27 = arith.addf %26, %25 : vector<256x128xf32>
    %c0_24 = arith.constant 0 : index
    %c0_25 = arith.constant 0 : index
    %28 = vector.load %arg16[%c0_24, %c0_25] : memref<256x128xf32, #tpu.memory_space<vmem>>, vector<256x128xf32>
    tpu.vector_store %arg16[%c0_24, %c0_25], %27 {strides = array<i32>} : memref<256x128xf32, #tpu.memory_space<vmem>>, vector<256x128xf32>,
    %c15 = arith.constant 15 : index
    %c0_26 = arith.constant 0 : index
    %29 = vector.load %arg15[%c15, %c0_26] : memref<320x128xf32, #tpu.memory_space<vmem>>, vector<256x128xf32>
    %30 = arith.truncf %29 : vector<256x128xf32> to vector<256x128xbf16>
    %c2 = arith.constant 2 : index
    %c0_27 = arith.constant 0 : index
    %c0_28 = arith.constant 0 : index
    %31 = vector.load %arg5[%c2, %c0_27, %c0_28] : memref<9x128x128xbf16, #tpu.memory_space<vmem>>, vector<1x128x128xbf16>
    %32 = vector.shape_cast %31 : vector<1x128x128xbf16> to vector<128x128xbf16>
    %cst_29 = arith.constant dense<0.000000e+00> : vector<256x128xf32>
    %33 = tpu.matmul %30, %32, %cst_29 {dimension_numbers = #tpu.dot_dimension_numbers<[1], [0], [0], [1], [0, 0, 1, 1], [], []>} : vector<256x128xbf16>, vector<128x128xbf16>, vector<256x128xf32> -> vector<256x128xf32>
    %c0_30 = arith.constant 0 : index
    %c0_31 = arith.constant 0 : index
    %34 = vector.load %arg16[%c0_30, %c0_31] : memref<256x128xf32, #tpu.memory_space<vmem>>, vector<256x128xf32>
    %35 = arith.addf %34, %33 : vector<256x128xf32>
    %c0_32 = arith.constant 0 : index
    %c0_33 = arith.constant 0 : index
    %36 = vector.load %arg16[%c0_32, %c0_33] : memref<256x128xf32, #tpu.memory_space<vmem>>, vector<256x128xf32>
    tpu.vector_store %arg16[%c0_32, %c0_33], %35 {strides = array<i32>} : memref<256x128xf32, #tpu.memory_space<vmem>>, vector<256x128xf32>,
    %c31 = arith.constant 31 : index
    %c0_34 = arith.constant 0 : index
    %37 = vector.load %arg15[%c31, %c0_34] : memref<320x128xf32, #tpu.memory_space<vmem>>, vector<256x128xf32>
    %38 = arith.truncf %37 : vector<256x128xf32> to vector<256x128xbf16>
    %c3 = arith.constant 3 : index
    %c0_35 = arith.constant 0 : index
    %c0_36 = arith.constant 0 : index
    %39 = vector.load %arg5[%c3, %c0_35, %c0_36] : memref<9x128x128xbf16, #tpu.memory_space<vmem>>, vector<1x128x128xbf16>
    %40 = vector.shape_cast %39 : vector<1x128x128xbf16> to vector<128x128xbf16>
    %cst_37 = arith.constant dense<0.000000e+00> : vector<256x128xf32>
    %41 = tpu.matmul %38, %40, %cst_37 {dimension_numbers = #tpu.dot_dimension_numbers<[1], [0], [0], [1], [0, 0, 1, 1], [], []>} : vector<256x128xbf16>, vector<128x128xbf16>, vector<256x128xf32> -> vector<256x128xf32>
    %c0_38 = arith.constant 0 : index
    %c0_39 = arith.constant 0 : index
    %42 = vector.load %arg16[%c0_38, %c0_39] : memref<256x128xf32, #tpu.memory_space<vmem>>, vector<256x128xf32>
    %43 = arith.addf %42, %41 : vector<256x128xf32>
    %c0_40 = arith.constant 0 : index
    %c0_41 = arith.constant 0 : index
    %44 = vector.load %arg16[%c0_40, %c0_41] : memref<256x128xf32, #tpu.memory_space<vmem>>, vector<256x128xf32>
    tpu.vector_store %arg16[%c0_40, %c0_41], %43 {strides = array<i32>} : memref<256x128xf32, #tpu.memory_space<vmem>>, vector<256x128xf32>,
    %c32_42 = arith.constant 32 : index
    %c0_43 = arith.constant 0 : index
    %45 = vector.load %arg15[%c32_42, %c0_43] : memref<320x128xf32, #tpu.memory_space<vmem>>, vector<256x128xf32>
    %46 = arith.truncf %45 : vector<256x128xf32> to vector<256x128xbf16>
    %c4 = arith.constant 4 : index
    %c0_44 = arith.constant 0 : index
    %c0_45 = arith.constant 0 : index
    %47 = vector.load %arg5[%c4, %c0_44, %c0_45] : memref<9x128x128xbf16, #tpu.memory_space<vmem>>, vector<1x128x128xbf16>
    %48 = vector.shape_cast %47 : vector<1x128x128xbf16> to vector<128x128xbf16>
    %cst_46 = arith.constant dense<0.000000e+00> : vector<256x128xf32>
    %49 = tpu.matmul %46, %48, %cst_46 {dimension_numbers = #tpu.dot_dimension_numbers<[1], [0], [0], [1], [0, 0, 1, 1], [], []>} : vector<256x128xbf16>, vector<128x128xbf16>, vector<256x128xf32> -> vector<256x128xf32>
    %c0_47 = arith.constant 0 : index
    %c0_48 = arith.constant 0 : index
    %50 = vector.load %arg16[%c0_47, %c0_48] : memref<256x128xf32, #tpu.memory_space<vmem>>, vector<256x128xf32>
    %51 = arith.addf %50, %49 : vector<256x128xf32>
    %c0_49 = arith.constant 0 : index
    %c0_50 = arith.constant 0 : index
    %52 = vector.load %arg16[%c0_49, %c0_50] : memref<256x128xf32, #tpu.memory_space<vmem>>, vector<256x128xf32>
    tpu.vector_store %arg16[%c0_49, %c0_50], %51 {strides = array<i32>} : memref<256x128xf32, #tpu.memory_space<vmem>>, vector<256x128xf32>,
    %c33 = arith.constant 33 : index
    %c0_51 = arith.constant 0 : index
    %53 = vector.load %arg15[%c33, %c0_51] : memref<320x128xf32, #tpu.memory_space<vmem>>, vector<256x128xf32>
    %54 = arith.truncf %53 : vector<256x128xf32> to vector<256x128xbf16>
    %c5 = arith.constant 5 : index
    %c0_52 = arith.constant 0 : index
    %c0_53 = arith.constant 0 : index
    %55 = vector.load %arg5[%c5, %c0_52, %c0_53] : memref<9x128x128xbf16, #tpu.memory_space<vmem>>, vector<1x128x128xbf16>
    %56 = vector.shape_cast %55 : vector<1x128x128xbf16> to vector<128x128xbf16>
    %cst_54 = arith.constant dense<0.000000e+00> : vector<256x128xf32>
    %57 = tpu.matmul %54, %56, %cst_54 {dimension_numbers = #tpu.dot_dimension_numbers<[1], [0], [0], [1], [0, 0, 1, 1], [], []>} : vector<256x128xbf16>, vector<128x128xbf16>, vector<256x128xf32> -> vector<256x128xf32>
    %c0_55 = arith.constant 0 : index
    %c0_56 = arith.constant 0 : index
    %58 = vector.load %arg16[%c0_55, %c0_56] : memref<256x128xf32, #tpu.memory_space<vmem>>, vector<256x128xf32>
    %59 = arith.addf %58, %57 : vector<256x128xf32>
    %c0_57 = arith.constant 0 : index
    %c0_58 = arith.constant 0 : index
    %60 = vector.load %arg16[%c0_57, %c0_58] : memref<256x128xf32, #tpu.memory_space<vmem>>, vector<256x128xf32>
    tpu.vector_store %arg16[%c0_57, %c0_58], %59 {strides = array<i32>} : memref<256x128xf32, #tpu.memory_space<vmem>>, vector<256x128xf32>,
    %c49 = arith.constant 49 : index
    %c0_59 = arith.constant 0 : index
    %61 = vector.load %arg15[%c49, %c0_59] : memref<320x128xf32, #tpu.memory_space<vmem>>, vector<256x128xf32>
    %62 = arith.truncf %61 : vector<256x128xf32> to vector<256x128xbf16>
    %c6 = arith.constant 6 : index
    %c0_60 = arith.constant 0 : index
    %c0_61 = arith.constant 0 : index
    %63 = vector.load %arg5[%c6, %c0_60, %c0_61] : memref<9x128x128xbf16, #tpu.memory_space<vmem>>, vector<1x128x128xbf16>
    %64 = vector.shape_cast %63 : vector<1x128x128xbf16> to vector<128x128xbf16>
    %cst_62 = arith.constant dense<0.000000e+00> : vector<256x128xf32>
    %65 = tpu.matmul %62, %64, %cst_62 {dimension_numbers = #tpu.dot_dimension_numbers<[1], [0], [0], [1], [0, 0, 1, 1], [], []>} : vector<256x128xbf16>, vector<128x128xbf16>, vector<256x128xf32> -> vector<256x128xf32>
    %c0_63 = arith.constant 0 : index
    %c0_64 = arith.constant 0 : index
    %66 = vector.load %arg16[%c0_63, %c0_64] : memref<256x128xf32, #tpu.memory_space<vmem>>, vector<256x128xf32>
    %67 = arith.addf %66, %65 : vector<256x128xf32>
    %c0_65 = arith.constant 0 : index
    %c0_66 = arith.constant 0 : index
    %68 = vector.load %arg16[%c0_65, %c0_66] : memref<256x128xf32, #tpu.memory_space<vmem>>, vector<256x128xf32>
    tpu.vector_store %arg16[%c0_65, %c0_66], %67 {strides = array<i32>} : memref<256x128xf32, #tpu.memory_space<vmem>>, vector<256x128xf32>,
    %c50 = arith.constant 50 : index
    %c0_67 = arith.constant 0 : index
    %69 = vector.load %arg15[%c50, %c0_67] : memref<320x128xf32, #tpu.memory_space<vmem>>, vector<256x128xf32>
    %70 = arith.truncf %69 : vector<256x128xf32> to vector<256x128xbf16>
    %c7 = arith.constant 7 : index
    %c0_68 = arith.constant 0 : index
    %c0_69 = arith.constant 0 : index
    %71 = vector.load %arg5[%c7, %c0_68, %c0_69] : memref<9x128x128xbf16, #tpu.memory_space<vmem>>, vector<1x128x128xbf16>
    %72 = vector.shape_cast %71 : vector<1x128x128xbf16> to vector<128x128xbf16>
    %cst_70 = arith.constant dense<0.000000e+00> : vector<256x128xf32>
    %73 = tpu.matmul %70, %72, %cst_70 {dimension_numbers = #tpu.dot_dimension_numbers<[1], [0], [0], [1], [0, 0, 1, 1], [], []>} : vector<256x128xbf16>, vector<128x128xbf16>, vector<256x128xf32> -> vector<256x128xf32>
    %c0_71 = arith.constant 0 : index
    %c0_72 = arith.constant 0 : index
    %74 = vector.load %arg16[%c0_71, %c0_72] : memref<256x128xf32, #tpu.memory_space<vmem>>, vector<256x128xf32>
    %75 = arith.addf %74, %73 : vector<256x128xf32>
    %c0_73 = arith.constant 0 : index
    %c0_74 = arith.constant 0 : index
    %76 = vector.load %arg16[%c0_73, %c0_74] : memref<256x128xf32, #tpu.memory_space<vmem>>, vector<256x128xf32>
    tpu.vector_store %arg16[%c0_73, %c0_74], %75 {strides = array<i32>} : memref<256x128xf32, #tpu.memory_space<vmem>>, vector<256x128xf32>,
    %c51 = arith.constant 51 : index
    %c0_75 = arith.constant 0 : index
    %77 = vector.load %arg15[%c51, %c0_75] : memref<320x128xf32, #tpu.memory_space<vmem>>, vector<256x128xf32>
    %78 = arith.truncf %77 : vector<256x128xf32> to vector<256x128xbf16>
    %c8 = arith.constant 8 : index
    %c0_76 = arith.constant 0 : index
    %c0_77 = arith.constant 0 : index
    %79 = vector.load %arg5[%c8, %c0_76, %c0_77] : memref<9x128x128xbf16, #tpu.memory_space<vmem>>, vector<1x128x128xbf16>
    %80 = vector.shape_cast %79 : vector<1x128x128xbf16> to vector<128x128xbf16>
    %cst_78 = arith.constant dense<0.000000e+00> : vector<256x128xf32>
    %81 = tpu.matmul %78, %80, %cst_78 {dimension_numbers = #tpu.dot_dimension_numbers<[1], [0], [0], [1], [0, 0, 1, 1], [], []>} : vector<256x128xbf16>, vector<128x128xbf16>, vector<256x128xf32> -> vector<256x128xf32>
    %c0_79 = arith.constant 0 : index
    %c0_80 = arith.constant 0 : index
    %82 = vector.load %arg16[%c0_79, %c0_80] : memref<256x128xf32, #tpu.memory_space<vmem>>, vector<256x128xf32>
    %83 = arith.addf %82, %81 : vector<256x128xf32>
    %c0_81 = arith.constant 0 : index
    %c0_82 = arith.constant 0 : index
    %84 = vector.load %arg16[%c0_81, %c0_82] : memref<256x128xf32, #tpu.memory_space<vmem>>, vector<256x128xf32>
    tpu.vector_store %arg16[%c0_81, %c0_82], %83 {strides = array<i32>} : memref<256x128xf32, #tpu.memory_space<vmem>>, vector<256x128xf32>,
    %c0_83 = arith.constant 0 : index
    %c0_84 = arith.constant 0 : index
    %85 = vector.load %arg7[%c0_83, %c0_84] : memref<256x1xf32, #tpu.memory_space<vmem>>, vector<256x1xf32>
    %c0_85 = arith.constant 0 : index
    %c0_86 = arith.constant 0 : index
    %86 = vector.load %arg16[%c0_85, %c0_86] : memref<256x128xf32, #tpu.memory_space<vmem>>, vector<256x128xf32>
    %c0_87 = arith.constant 0 : index
    %c0_88 = arith.constant 0 : index
    %87 = vector.load %arg6[%c0_87, %c0_88] : memref<1x128xf32, #tpu.memory_space<vmem>>, vector<1x128xf32>
    %88 = vector.broadcast %87 : vector<1x128xf32> to vector<256x128xf32>
    %89 = arith.addf %86, %88 : vector<256x128xf32>
    %90 = arith.truncf %89 : vector<256x128xf32> to vector<256x128xbf16>
    %c0_89 = arith.constant 0 : index
    %c0_90 = arith.constant 0 : index
    %c0_91 = arith.constant 0 : index
    %91 = vector.load %arg10[%c0_89, %c0_90, %c0_91] : memref<1x256x128xbf16, #tpu.memory_space<vmem>>, vector<1x256x128xbf16>
    %92 = vector.shape_cast %91 : vector<1x256x128xbf16> to vector<256x128xbf16>
    %93 = vector.shape_cast %90 : vector<256x128xbf16> to vector<1x256x128xbf16>
    tpu.vector_store %arg10[%c0_89, %c0_90, %c0_91], %93 {strides = array<i32>} : memref<1x256x128xbf16, #tpu.memory_space<vmem>>, vector<1x256x128xbf16>,
    %94 = vector.broadcast %85 : vector<256x1xf32> to vector<256x128xf32>
    %95 = arith.mulf %89, %94 : vector<256x128xf32>
    %c0_92 = arith.constant 0 : index
    %c0_93 = arith.constant 0 : index
    %c0_94 = arith.constant 0 : index
    %96 = vector.load %arg11[%c0_92, %c0_93, %c0_94] : memref<1x1x128xf32, #tpu.memory_space<vmem>>, vector<1x1x128xf32>
    %97 = vector.shape_cast %96 : vector<1x1x128xf32> to vector<1x128xf32>
    %cst_95 = arith.constant dense<0.000000e+00> : vector<128xf32>
    %98 = vector.multi_reduction <add>, %95, %cst_95 [0] : vector<256x128xf32> to vector<128xf32>
    %99 = vector.shape_cast %98 : vector<128xf32> to vector<1x128xf32>
    %100 = arith.addf %97, %99 : vector<1x128xf32>
    %c0_96 = arith.constant 0 : index
    %c0_97 = arith.constant 0 : index
    %c0_98 = arith.constant 0 : index
    %101 = vector.load %arg11[%c0_96, %c0_97, %c0_98] : memref<1x1x128xf32, #tpu.memory_space<vmem>>, vector<1x1x128xf32>
    %102 = vector.shape_cast %101 : vector<1x1x128xf32> to vector<1x128xf32>
    %103 = vector.shape_cast %100 : vector<1x128xf32> to vector<1x1x128xf32>
    tpu.vector_store %arg11[%c0_96, %c0_97, %c0_98], %103 {strides = array<i32>} : memref<1x1x128xf32, #tpu.memory_space<vmem>>, vector<1x1x128xf32>,
    %c0_99 = arith.constant 0 : index
    %c0_100 = arith.constant 0 : index
    %c0_101 = arith.constant 0 : index
    %104 = vector.load %arg12[%c0_99, %c0_100, %c0_101] : memref<1x1x128xf32, #tpu.memory_space<vmem>>, vector<1x1x128xf32>
    %105 = vector.shape_cast %104 : vector<1x1x128xf32> to vector<1x128xf32>
    %106 = arith.mulf %95, %89 : vector<256x128xf32>
    %cst_102 = arith.constant dense<0.000000e+00> : vector<128xf32>
    %107 = vector.multi_reduction <add>, %106, %cst_102 [0] : vector<256x128xf32> to vector<128xf32>
    %108 = vector.shape_cast %107 : vector<128xf32> to vector<1x128xf32>
    %109 = arith.addf %105, %108 : vector<1x128xf32>
    %c0_103 = arith.constant 0 : index
    %c0_104 = arith.constant 0 : index
    %c0_105 = arith.constant 0 : index
    %110 = vector.load %arg12[%c0_103, %c0_104, %c0_105] : memref<1x1x128xf32, #tpu.memory_space<vmem>>, vector<1x1x128xf32>
    %111 = vector.shape_cast %110 : vector<1x1x128xf32> to vector<1x128xf32>
    %112 = vector.shape_cast %109 : vector<1x128xf32> to vector<1x1x128xf32>
    tpu.vector_store %arg12[%c0_103, %c0_104, %c0_105], %112 {strides = array<i32>} : memref<1x1x128xf32, #tpu.memory_space<vmem>>, vector<1x1x128xf32>,
    %c0_106 = arith.constant 0 : index
    %c0_107 = arith.constant 0 : index
    %c0_108 = arith.constant 0 : index
    %113 = vector.load %arg3[%c0_106, %c0_107, %c0_108] : memref<1x256x128xbf16, #tpu.memory_space<vmem>>, vector<1x256x128xbf16>
    %114 = vector.shape_cast %113 : vector<1x256x128xbf16> to vector<256x128xbf16>
    %c0_109 = arith.constant 0 : index
    %c0_110 = arith.constant 0 : index
    %115 = vector.load %arg8[%c0_109, %c0_110] : memref<128x128xbf16, #tpu.memory_space<vmem>>, vector<128x128xbf16>
    %cst_111 = arith.constant dense<0.000000e+00> : vector<256x128xf32>
    %116 = tpu.matmul %114, %115, %cst_111 {dimension_numbers = #tpu.dot_dimension_numbers<[1], [0], [0], [1], [0, 0, 1, 1], [], []>} : vector<256x128xbf16>, vector<128x128xbf16>, vector<256x128xf32> -> vector<256x128xf32>
    %c0_112 = arith.constant 0 : index
    %c0_113 = arith.constant 0 : index
    %117 = vector.load %arg9[%c0_112, %c0_113] : memref<1x128xf32, #tpu.memory_space<vmem>>, vector<1x128xf32>
    %118 = vector.broadcast %117 : vector<1x128xf32> to vector<256x128xf32>
    %119 = arith.addf %116, %118 : vector<256x128xf32>
    %120 = vector.broadcast %85 : vector<256x1xf32> to vector<256x128xf32>
    %121 = arith.mulf %119, %120 : vector<256x128xf32>
    %c0_114 = arith.constant 0 : index
    %c0_115 = arith.constant 0 : index
    %c0_116 = arith.constant 0 : index
    %122 = vector.load %arg13[%c0_114, %c0_115, %c0_116] : memref<1x1x128xf32, #tpu.memory_space<vmem>>, vector<1x1x128xf32>
    %123 = vector.shape_cast %122 : vector<1x1x128xf32> to vector<1x128xf32>
    %cst_117 = arith.constant dense<0.000000e+00> : vector<128xf32>
    %124 = vector.multi_reduction <add>, %121, %cst_117 [0] : vector<256x128xf32> to vector<128xf32>
    %125 = vector.shape_cast %124 : vector<128xf32> to vector<1x128xf32>
    %126 = arith.addf %123, %125 : vector<1x128xf32>
    %c0_118 = arith.constant 0 : index
    %c0_119 = arith.constant 0 : index
    %c0_120 = arith.constant 0 : index
    %127 = vector.load %arg13[%c0_118, %c0_119, %c0_120] : memref<1x1x128xf32, #tpu.memory_space<vmem>>, vector<1x1x128xf32>
    %128 = vector.shape_cast %127 : vector<1x1x128xf32> to vector<1x128xf32>
    %129 = vector.shape_cast %126 : vector<1x128xf32> to vector<1x1x128xf32>
    tpu.vector_store %arg13[%c0_118, %c0_119, %c0_120], %129 {strides = array<i32>} : memref<1x1x128xf32, #tpu.memory_space<vmem>>, vector<1x1x128xf32>,
    %c0_121 = arith.constant 0 : index
    %c0_122 = arith.constant 0 : index
    %c0_123 = arith.constant 0 : index
    %130 = vector.load %arg14[%c0_121, %c0_122, %c0_123] : memref<1x1x128xf32, #tpu.memory_space<vmem>>, vector<1x1x128xf32>
    %131 = vector.shape_cast %130 : vector<1x1x128xf32> to vector<1x128xf32>
    %132 = arith.mulf %121, %119 : vector<256x128xf32>
    %cst_124 = arith.constant dense<0.000000e+00> : vector<128xf32>
    %133 = vector.multi_reduction <add>, %132, %cst_124 [0] : vector<256x128xf32> to vector<128xf32>
    %134 = vector.shape_cast %133 : vector<128xf32> to vector<1x128xf32>
    %135 = arith.addf %131, %134 : vector<1x128xf32>
    %c0_125 = arith.constant 0 : index
    %c0_126 = arith.constant 0 : index
    %c0_127 = arith.constant 0 : index
    %136 = vector.load %arg14[%c0_125, %c0_126, %c0_127] : memref<1x1x128xf32, #tpu.memory_space<vmem>>, vector<1x1x128xf32>
    %137 = vector.shape_cast %136 : vector<1x1x128xf32> to vector<1x128xf32>
    %138 = vector.shape_cast %135 : vector<1x128xf32> to vector<1x1x128xf32>
    tpu.vector_store %arg14[%c0_125, %c0_126, %c0_127], %138 {strides = array<i32>} : memref<1x1x128xf32, #tpu.memory_space<vmem>>, vector<1x1x128xf32>,
    return
  }
  func.func @transform_0(%arg0: i32, %arg1: i32) -> (i32, i32, i32) {
    %c0_i32 = arith.constant 0 : i32
    %c0_i32_0 = arith.constant 0 : i32
    return %arg0, %arg1, %c0_i32 : i32, i32, i32
  }
  func.func @transform_1(%arg0: i32, %arg1: i32) -> (i32, i32, i32) {
    %c1_i32 = arith.constant 1 : i32
    %0 = arith.addi %arg1, %c1_i32 : i32
    %c0_i32 = arith.constant 0 : i32
    %c0_i32_0 = arith.constant 0 : i32
    return %arg0, %0, %c0_i32 : i32, i32, i32
  }
  func.func @transform_2(%arg0: i32, %arg1: i32) -> (i32, i32, i32) {
    %c2_i32 = arith.constant 2 : i32
    %0 = arith.addi %arg1, %c2_i32 : i32
    %c0_i32 = arith.constant 0 : i32
    %c0_i32_0 = arith.constant 0 : i32
    return %arg0, %0, %c0_i32 : i32, i32, i32
  }
  func.func @transform_3(%arg0: i32, %arg1: i32) -> (i32, i32, i32) {
    %c0_i32 = arith.constant 0 : i32
    %c0_i32_0 = arith.constant 0 : i32
    %c0_i32_1 = arith.constant 0 : i32
    %c0_i32_2 = arith.constant 0 : i32
    return %c0_i32, %c0_i32_0, %c0_i32_1 : i32, i32, i32
  }
  func.func @transform_4(%arg0: i32, %arg1: i32) -> (i32, i32) {
    %c0_i32 = arith.constant 0 : i32
    %c0_i32_0 = arith.constant 0 : i32
    %c0_i32_1 = arith.constant 0 : i32
    return %c0_i32, %c0_i32_0 : i32, i32
  }
  func.func @transform_5(%arg0: i32, %arg1: i32) -> (i32, i32) {
    %c1_i32 = arith.constant 1 : i32
    %0 = arith.addi %arg1, %c1_i32 : i32
    %c0_i32 = arith.constant 0 : i32
    %c0_i32_0 = arith.constant 0 : i32
    return %0, %c0_i32 : i32, i32
  }
  func.func @transform_6(%arg0: i32, %arg1: i32) -> (i32, i32) {
    %c0_i32 = arith.constant 0 : i32
    %c0_i32_0 = arith.constant 0 : i32
    %c0_i32_1 = arith.constant 0 : i32
    return %c0_i32, %c0_i32_0 : i32, i32
  }
  func.func @transform_7(%arg0: i32, %arg1: i32) -> (i32, i32) {
    %c0_i32 = arith.constant 0 : i32
    %c0_i32_0 = arith.constant 0 : i32
    %c0_i32_1 = arith.constant 0 : i32
    return %c0_i32, %c0_i32_0 : i32, i32
  }
  func.func @transform_8(%arg0: i32, %arg1: i32) -> (i32, i32, i32) {
    %c0_i32 = arith.constant 0 : i32
    %c0_i32_0 = arith.constant 0 : i32
    return %arg0, %arg1, %c0_i32 : i32, i32, i32
  }
  func.func @transform_9(%arg0: i32, %arg1: i32) -> (i32, i32, i32) {
    %c0_i32 = arith.constant 0 : i32
    %c0_i32_0 = arith.constant 0 : i32
    %c0_i32_1 = arith.constant 0 : i32
    return %arg0, %c0_i32, %c0_i32_0 : i32, i32, i32
  }
  func.func @transform_10(%arg0: i32, %arg1: i32) -> (i32, i32, i32) {
    %c0_i32 = arith.constant 0 : i32
    %c0_i32_0 = arith.constant 0 : i32
    %c0_i32_1 = arith.constant 0 : i32
    return %arg0, %c0_i32, %c0_i32_0 : i32, i32, i32
  }
  func.func @transform_11(%arg0: i32, %arg1: i32) -> (i32, i32, i32) {
    %c0_i32 = arith.constant 0 : i32
    %c0_i32_0 = arith.constant 0 : i32
    %c0_i32_1 = arith.constant 0 : i32
    return %arg0, %c0_i32, %c0_i32_0 : i32, i32, i32
  }
  func.func @transform_12(%arg0: i32, %arg1: i32) -> (i32, i32, i32) {
    %c0_i32 = arith.constant 0 : i32
    %c0_i32_0 = arith.constant 0 : i32
    %c0_i32_1 = arith.constant 0 : i32
    return %arg0, %c0_i32, %c0_i32_0 : i32, i32, i32
  }
}

module attributes {stable_mosaic.version = 11 : i64} {
  func.func @kernel(%arg0: i32, %arg1: i32, %arg2: memref<1x256x128xbf16, #tpu.memory_space<vmem>>, %arg3: memref<1x128xf32, #tpu.memory_space<vmem>>, %arg4: memref<1x128xf32, #tpu.memory_space<vmem>>, %arg5: memref<256x1xf32, #tpu.memory_space<vmem>>, %arg6: memref<1x256x128xbf16, #tpu.memory_space<vmem>>) attributes {dimension_semantics = [#tpu.dimension_semantics<parallel>, #tpu.dimension_semantics<parallel>], iteration_bounds = array<i64: 2, 4>, scalar_prefetch = 0 : i64, scratch_operands = 0 : i64, tpu.core_type = #tpu.core_type<tc>, window_params = [{transform_indices = @transform_0, window_bounds = array<i64: 1, 256, 128>}, {pipeline_mode = #tpu.pipeline_mode<synchronous>, transform_indices = @transform_1, window_bounds = array<i64: 1, 128>}, {pipeline_mode = #tpu.pipeline_mode<synchronous>, transform_indices = @transform_2, window_bounds = array<i64: 1, 128>}, {transform_indices = @transform_3, window_bounds = array<i64: 256, 1>}, {transform_indices = @transform_4, window_bounds = array<i64: 1, 256, 128>}]} {
    %c0_i32 = arith.constant 0 : i32
    %0 = arith.cmpi eq, %arg1, %c0_i32 : i32
    %c3_i32 = arith.constant 3 : i32
    %1 = arith.cmpi eq, %arg1, %c3_i32 : i32
    %2 = arith.ori %0, %1 : i1
    %3 = arith.extui %2 : i1 to i32
    %c0_i32_0 = arith.constant 0 : i32
    %4 = arith.cmpi ne, %3, %c0_i32_0 : i32
    scf.if %4 {
      %cst = arith.constant 0.000000e+00 : bf16
      %8 = vector.broadcast %cst : bf16 to vector<256x128xbf16>
      %c0 = arith.constant 0 : index
      %c0_2 = arith.constant 0 : index
      %c0_3 = arith.constant 0 : index
      %9 = vector.load %arg6[%c0, %c0_2, %c0_3] : memref<1x256x128xbf16, #tpu.memory_space<vmem>>, vector<1x256x128xbf16>
      %10 = vector.shape_cast %9 : vector<1x256x128xbf16> to vector<256x128xbf16>
      %11 = vector.shape_cast %8 : vector<256x128xbf16> to vector<1x256x128xbf16>
      tpu.vector_store %arg6[%c0, %c0_2, %c0_3], %11 {strides = array<i32>} : memref<1x256x128xbf16, #tpu.memory_space<vmem>>, vector<1x256x128xbf16>,
    } else {
    }
    %true = arith.constant true
    %5 = arith.xori %2, %true : i1
    %6 = arith.extui %5 : i1 to i32
    %c0_i32_1 = arith.constant 0 : i32
    %7 = arith.cmpi ne, %6, %c0_i32_1 : i32
    scf.if %7 {
      %c0 = arith.constant 0 : index
      %c0_2 = arith.constant 0 : index
      %c0_3 = arith.constant 0 : index
      %8 = vector.load %arg2[%c0, %c0_2, %c0_3] : memref<1x256x128xbf16, #tpu.memory_space<vmem>>, vector<1x256x128xbf16>
      %9 = vector.shape_cast %8 : vector<1x256x128xbf16> to vector<256x128xbf16>
      %10 = arith.extf %9 : vector<256x128xbf16> to vector<256x128xf32>
      %c0_4 = arith.constant 0 : index
      %c0_5 = arith.constant 0 : index
      %11 = vector.load %arg3[%c0_4, %c0_5] : memref<1x128xf32, #tpu.memory_space<vmem>>, vector<1x128xf32>
      %12 = vector.broadcast %11 : vector<1x128xf32> to vector<256x128xf32>
      %13 = arith.mulf %10, %12 : vector<256x128xf32>
      %c0_6 = arith.constant 0 : index
      %c0_7 = arith.constant 0 : index
      %14 = vector.load %arg4[%c0_6, %c0_7] : memref<1x128xf32, #tpu.memory_space<vmem>>, vector<1x128xf32>
      %15 = vector.broadcast %14 : vector<1x128xf32> to vector<256x128xf32>
      %16 = arith.addf %13, %15 : vector<256x128xf32>
      %cst = arith.constant 0.000000e+00 : f32
      %17 = vector.broadcast %cst : f32 to vector<256x128xf32>
      %18 = arith.maximumf %16, %17 : vector<256x128xf32>
      %c0_8 = arith.constant 0 : index
      %c0_9 = arith.constant 0 : index
      %19 = vector.load %arg5[%c0_8, %c0_9] : memref<256x1xf32, #tpu.memory_space<vmem>>, vector<256x1xf32>
      %20 = vector.broadcast %19 : vector<256x1xf32> to vector<256x128xf32>
      %21 = arith.mulf %18, %20 : vector<256x128xf32>
      %22 = arith.truncf %21 : vector<256x128xf32> to vector<256x128xbf16>
      %c0_10 = arith.constant 0 : index
      %c0_11 = arith.constant 0 : index
      %c0_12 = arith.constant 0 : index
      %23 = vector.load %arg6[%c0_10, %c0_11, %c0_12] : memref<1x256x128xbf16, #tpu.memory_space<vmem>>, vector<1x256x128xbf16>
      %24 = vector.shape_cast %23 : vector<1x256x128xbf16> to vector<256x128xbf16>
      %25 = vector.shape_cast %22 : vector<256x128xbf16> to vector<1x256x128xbf16>
      tpu.vector_store %arg6[%c0_10, %c0_11, %c0_12], %25 {strides = array<i32>} : memref<1x256x128xbf16, #tpu.memory_space<vmem>>, vector<1x256x128xbf16>,
    } else {
    }
    return
  }
  func.func @transform_0(%arg0: i32, %arg1: i32) -> (i32, i32, i32) {
    %c1_i32 = arith.constant 1 : i32
    %0 = arith.subi %arg1, %c1_i32 : i32
    %c0_i32 = arith.constant 0 : i32
    %c1_i32_0 = arith.constant 1 : i32
    %1 = arith.maxsi %c0_i32, %0 : i32
    %2 = arith.minsi %c1_i32_0, %1 : i32
    %c0_i32_1 = arith.constant 0 : i32
    %c0_i32_2 = arith.constant 0 : i32
    return %arg0, %2, %c0_i32_1 : i32, i32, i32
  }
  func.func @transform_1(%arg0: i32, %arg1: i32) -> (i32, i32) {
    %c0_i32 = arith.constant 0 : i32
    %c0_i32_0 = arith.constant 0 : i32
    %c0_i32_1 = arith.constant 0 : i32
    return %c0_i32, %c0_i32_0 : i32, i32
  }
  func.func @transform_2(%arg0: i32, %arg1: i32) -> (i32, i32) {
    %c0_i32 = arith.constant 0 : i32
    %c0_i32_0 = arith.constant 0 : i32
    %c0_i32_1 = arith.constant 0 : i32
    return %c0_i32, %c0_i32_0 : i32, i32
  }
  func.func @transform_3(%arg0: i32, %arg1: i32) -> (i32, i32) {
    %c0_i32 = arith.constant 0 : i32
    %c0_i32_0 = arith.constant 0 : i32
    return %arg1, %c0_i32 : i32, i32
  }
  func.func @transform_4(%arg0: i32, %arg1: i32) -> (i32, i32, i32) {
    %c0_i32 = arith.constant 0 : i32
    %c0_i32_0 = arith.constant 0 : i32
    return %arg0, %arg1, %c0_i32 : i32, i32, i32
  }
}

module attributes {stable_mosaic.version = 11 : i64} {
  func.func @kernel(%arg0: i32, %arg1: i32, %arg2: memref<1x256x128xbf16, #tpu.memory_space<vmem>>, %arg3: memref<1x256x128xbf16, #tpu.memory_space<vmem>>, %arg4: memref<1x256x128xbf16, #tpu.memory_space<vmem>>, %arg5: memref<9x128x128xbf16, #tpu.memory_space<vmem>>, %arg6: memref<1x128xf32, #tpu.memory_space<vmem>>, %arg7: memref<256x1xf32, #tpu.memory_space<vmem>>, %arg8: memref<1x256x128xbf16, #tpu.memory_space<vmem>>, %arg9: memref<1x1x128xf32, #tpu.memory_space<vmem>>, %arg10: memref<1x1x128xf32, #tpu.memory_space<vmem>>, %arg11: memref<320x128xf32, #tpu.memory_space<vmem>>, %arg12: memref<256x128xf32, #tpu.memory_space<vmem>>) attributes {dimension_semantics = [#tpu.dimension_semantics<parallel>, #tpu.dimension_semantics<arbitrary>], iteration_bounds = array<i64: 2, 2>, scalar_prefetch = 0 : i64, scratch_operands = 2 : i64, tpu.core_type = #tpu.core_type<tc>, window_params = [{transform_indices = @transform_0, window_bounds = array<i64: 1, 256, 128>}, {transform_indices = @transform_1, window_bounds = array<i64: 1, 256, 128>}, {transform_indices = @transform_2, window_bounds = array<i64: 1, 256, 128>}, {pipeline_mode = #tpu.pipeline_mode<synchronous>, transform_indices = @transform_3, window_bounds = array<i64: 9, 128, 128>}, {pipeline_mode = #tpu.pipeline_mode<synchronous>, transform_indices = @transform_4, window_bounds = array<i64: 1, 128>}, {transform_indices = @transform_5, window_bounds = array<i64: 256, 1>}, {transform_indices = @transform_6, window_bounds = array<i64: 1, 256, 128>}, {transform_indices = @transform_7, window_bounds = array<i64: 1, 1, 128>}, {transform_indices = @transform_8, window_bounds = array<i64: 1, 1, 128>}]} {
    %c0_i32 = arith.constant 0 : i32
    %0 = arith.cmpi eq, %arg1, %c0_i32 : i32
    %1 = arith.extui %0 : i1 to i32
    %c0_i32_0 = arith.constant 0 : i32
    %2 = arith.cmpi ne, %1, %c0_i32_0 : i32
    scf.if %2 {
      %cst_106 = arith.constant 0.000000e+00 : f32
      %113 = vector.broadcast %cst_106 : f32 to vector<1x128xf32>
      %c0_107 = arith.constant 0 : index
      %c0_108 = arith.constant 0 : index
      %c0_109 = arith.constant 0 : index
      %114 = vector.load %arg9[%c0_107, %c0_108, %c0_109] : memref<1x1x128xf32, #tpu.memory_space<vmem>>, vector<1x1x128xf32>
      %115 = vector.shape_cast %114 : vector<1x1x128xf32> to vector<1x128xf32>
      %116 = vector.shape_cast %113 : vector<1x128xf32> to vector<1x1x128xf32>
      tpu.vector_store %arg9[%c0_107, %c0_108, %c0_109], %116 {strides = array<i32>} : memref<1x1x128xf32, #tpu.memory_space<vmem>>, vector<1x1x128xf32>,
      %cst_110 = arith.constant 0.000000e+00 : f32
      %117 = vector.broadcast %cst_110 : f32 to vector<1x128xf32>
      %c0_111 = arith.constant 0 : index
      %c0_112 = arith.constant 0 : index
      %c0_113 = arith.constant 0 : index
      %118 = vector.load %arg10[%c0_111, %c0_112, %c0_113] : memref<1x1x128xf32, #tpu.memory_space<vmem>>, vector<1x1x128xf32>
      %119 = vector.shape_cast %118 : vector<1x1x128xf32> to vector<1x128xf32>
      %120 = vector.shape_cast %117 : vector<1x128xf32> to vector<1x1x128xf32>
      tpu.vector_store %arg10[%c0_111, %c0_112, %c0_113], %120 {strides = array<i32>} : memref<1x1x128xf32, #tpu.memory_space<vmem>>, vector<1x1x128xf32>,
    } else {
    }
    %c0 = arith.constant 0 : index
    %c224 = arith.constant 224 : index
    %c0_1 = arith.constant 0 : index
    %3 = vector.load %arg2[%c0, %c224, %c0_1] : memref<1x256x128xbf16, #tpu.memory_space<vmem>>, vector<1x32x128xbf16>
    %4 = vector.shape_cast %3 : vector<1x32x128xbf16> to vector<32x128xbf16>
    %5 = arith.extf %4 : vector<32x128xbf16> to vector<32x128xf32>
    %c0_2 = arith.constant 0 : index
    %c0_3 = arith.constant 0 : index
    %6 = vector.load %arg11[%c0_2, %c0_3] : memref<320x128xf32, #tpu.memory_space<vmem>>, vector<32x128xf32>
    tpu.vector_store %arg11[%c0_2, %c0_3], %5 {strides = array<i32>} : memref<320x128xf32, #tpu.memory_space<vmem>>, vector<32x128xf32>,
    %c0_4 = arith.constant 0 : index
    %c0_5 = arith.constant 0 : index
    %c0_6 = arith.constant 0 : index
    %7 = vector.load %arg3[%c0_4, %c0_5, %c0_6] : memref<1x256x128xbf16, #tpu.memory_space<vmem>>, vector<1x256x128xbf16>
    %8 = vector.shape_cast %7 : vector<1x256x128xbf16> to vector<256x128xbf16>
    %9 = arith.extf %8 : vector<256x128xbf16> to vector<256x128xf32>
    %c32 = arith.constant 32 : index
    %c0_7 = arith.constant 0 : index
    %10 = vector.load %arg11[%c32, %c0_7] : memref<320x128xf32, #tpu.memory_space<vmem>>, vector<256x128xf32>
    tpu.vector_store %arg11[%c32, %c0_7], %9 {strides = array<i32>} : memref<320x128xf32, #tpu.memory_space<vmem>>, vector<256x128xf32>,
    %c0_8 = arith.constant 0 : index
    %c0_9 = arith.constant 0 : index
    %c0_10 = arith.constant 0 : index
    %11 = vector.load %arg4[%c0_8, %c0_9, %c0_10] : memref<1x256x128xbf16, #tpu.memory_space<vmem>>, vector<1x32x128xbf16>
    %12 = vector.shape_cast %11 : vector<1x32x128xbf16> to vector<32x128xbf16>
    %13 = arith.extf %12 : vector<32x128xbf16> to vector<32x128xf32>
    %c288 = arith.constant 288 : index
    %c0_11 = arith.constant 0 : index
    %14 = vector.load %arg11[%c288, %c0_11] : memref<320x128xf32, #tpu.memory_space<vmem>>, vector<32x128xf32>
    tpu.vector_store %arg11[%c288, %c0_11], %13 {strides = array<i32>} : memref<320x128xf32, #tpu.memory_space<vmem>>, vector<32x128xf32>,
    %c13 = arith.constant 13 : index
    %c0_12 = arith.constant 0 : index
    %15 = vector.load %arg11[%c13, %c0_12] : memref<320x128xf32, #tpu.memory_space<vmem>>, vector<256x128xf32>
    %16 = arith.truncf %15 : vector<256x128xf32> to vector<256x128xbf16>
    %c0_13 = arith.constant 0 : index
    %c0_14 = arith.constant 0 : index
    %c0_15 = arith.constant 0 : index
    %17 = vector.load %arg5[%c0_13, %c0_14, %c0_15] : memref<9x128x128xbf16, #tpu.memory_space<vmem>>, vector<1x128x128xbf16>
    %18 = vector.shape_cast %17 : vector<1x128x128xbf16> to vector<128x128xbf16>
    %cst = arith.constant dense<0.000000e+00> : vector<256x128xf32>
    %19 = tpu.matmul %16, %18, %cst {dimension_numbers = #tpu.dot_dimension_numbers<[1], [0], [0], [1], [0, 0, 1, 1], [], []>} : vector<256x128xbf16>, vector<128x128xbf16>, vector<256x128xf32> -> vector<256x128xf32>
    %c0_16 = arith.constant 0 : index
    %c0_17 = arith.constant 0 : index
    %20 = vector.load %arg12[%c0_16, %c0_17] : memref<256x128xf32, #tpu.memory_space<vmem>>, vector<256x128xf32>
    tpu.vector_store %arg12[%c0_16, %c0_17], %19 {strides = array<i32>} : memref<256x128xf32, #tpu.memory_space<vmem>>, vector<256x128xf32>,
    %c14 = arith.constant 14 : index
    %c0_18 = arith.constant 0 : index
    %21 = vector.load %arg11[%c14, %c0_18] : memref<320x128xf32, #tpu.memory_space<vmem>>, vector<256x128xf32>
    %22 = arith.truncf %21 : vector<256x128xf32> to vector<256x128xbf16>
    %c1 = arith.constant 1 : index
    %c0_19 = arith.constant 0 : index
    %c0_20 = arith.constant 0 : index
    %23 = vector.load %arg5[%c1, %c0_19, %c0_20] : memref<9x128x128xbf16, #tpu.memory_space<vmem>>, vector<1x128x128xbf16>
    %24 = vector.shape_cast %23 : vector<1x128x128xbf16> to vector<128x128xbf16>
    %cst_21 = arith.constant dense<0.000000e+00> : vector<256x128xf32>
    %25 = tpu.matmul %22, %24, %cst_21 {dimension_numbers = #tpu.dot_dimension_numbers<[1], [0], [0], [1], [0, 0, 1, 1], [], []>} : vector<256x128xbf16>, vector<128x128xbf16>, vector<256x128xf32> -> vector<256x128xf32>
    %c0_22 = arith.constant 0 : index
    %c0_23 = arith.constant 0 : index
    %26 = vector.load %arg12[%c0_22, %c0_23] : memref<256x128xf32, #tpu.memory_space<vmem>>, vector<256x128xf32>
    %27 = arith.addf %26, %25 : vector<256x128xf32>
    %c0_24 = arith.constant 0 : index
    %c0_25 = arith.constant 0 : index
    %28 = vector.load %arg12[%c0_24, %c0_25] : memref<256x128xf32, #tpu.memory_space<vmem>>, vector<256x128xf32>
    tpu.vector_store %arg12[%c0_24, %c0_25], %27 {strides = array<i32>} : memref<256x128xf32, #tpu.memory_space<vmem>>, vector<256x128xf32>,
    %c15 = arith.constant 15 : index
    %c0_26 = arith.constant 0 : index
    %29 = vector.load %arg11[%c15, %c0_26] : memref<320x128xf32, #tpu.memory_space<vmem>>, vector<256x128xf32>
    %30 = arith.truncf %29 : vector<256x128xf32> to vector<256x128xbf16>
    %c2 = arith.constant 2 : index
    %c0_27 = arith.constant 0 : index
    %c0_28 = arith.constant 0 : index
    %31 = vector.load %arg5[%c2, %c0_27, %c0_28] : memref<9x128x128xbf16, #tpu.memory_space<vmem>>, vector<1x128x128xbf16>
    %32 = vector.shape_cast %31 : vector<1x128x128xbf16> to vector<128x128xbf16>
    %cst_29 = arith.constant dense<0.000000e+00> : vector<256x128xf32>
    %33 = tpu.matmul %30, %32, %cst_29 {dimension_numbers = #tpu.dot_dimension_numbers<[1], [0], [0], [1], [0, 0, 1, 1], [], []>} : vector<256x128xbf16>, vector<128x128xbf16>, vector<256x128xf32> -> vector<256x128xf32>
    %c0_30 = arith.constant 0 : index
    %c0_31 = arith.constant 0 : index
    %34 = vector.load %arg12[%c0_30, %c0_31] : memref<256x128xf32, #tpu.memory_space<vmem>>, vector<256x128xf32>
    %35 = arith.addf %34, %33 : vector<256x128xf32>
    %c0_32 = arith.constant 0 : index
    %c0_33 = arith.constant 0 : index
    %36 = vector.load %arg12[%c0_32, %c0_33] : memref<256x128xf32, #tpu.memory_space<vmem>>, vector<256x128xf32>
    tpu.vector_store %arg12[%c0_32, %c0_33], %35 {strides = array<i32>} : memref<256x128xf32, #tpu.memory_space<vmem>>, vector<256x128xf32>,
    %c31 = arith.constant 31 : index
    %c0_34 = arith.constant 0 : index
    %37 = vector.load %arg11[%c31, %c0_34] : memref<320x128xf32, #tpu.memory_space<vmem>>, vector<256x128xf32>
    %38 = arith.truncf %37 : vector<256x128xf32> to vector<256x128xbf16>
    %c3 = arith.constant 3 : index
    %c0_35 = arith.constant 0 : index
    %c0_36 = arith.constant 0 : index
    %39 = vector.load %arg5[%c3, %c0_35, %c0_36] : memref<9x128x128xbf16, #tpu.memory_space<vmem>>, vector<1x128x128xbf16>
    %40 = vector.shape_cast %39 : vector<1x128x128xbf16> to vector<128x128xbf16>
    %cst_37 = arith.constant dense<0.000000e+00> : vector<256x128xf32>
    %41 = tpu.matmul %38, %40, %cst_37 {dimension_numbers = #tpu.dot_dimension_numbers<[1], [0], [0], [1], [0, 0, 1, 1], [], []>} : vector<256x128xbf16>, vector<128x128xbf16>, vector<256x128xf32> -> vector<256x128xf32>
    %c0_38 = arith.constant 0 : index
    %c0_39 = arith.constant 0 : index
    %42 = vector.load %arg12[%c0_38, %c0_39] : memref<256x128xf32, #tpu.memory_space<vmem>>, vector<256x128xf32>
    %43 = arith.addf %42, %41 : vector<256x128xf32>
    %c0_40 = arith.constant 0 : index
    %c0_41 = arith.constant 0 : index
    %44 = vector.load %arg12[%c0_40, %c0_41] : memref<256x128xf32, #tpu.memory_space<vmem>>, vector<256x128xf32>
    tpu.vector_store %arg12[%c0_40, %c0_41], %43 {strides = array<i32>} : memref<256x128xf32, #tpu.memory_space<vmem>>, vector<256x128xf32>,
    %c32_42 = arith.constant 32 : index
    %c0_43 = arith.constant 0 : index
    %45 = vector.load %arg11[%c32_42, %c0_43] : memref<320x128xf32, #tpu.memory_space<vmem>>, vector<256x128xf32>
    %46 = arith.truncf %45 : vector<256x128xf32> to vector<256x128xbf16>
    %c4 = arith.constant 4 : index
    %c0_44 = arith.constant 0 : index
    %c0_45 = arith.constant 0 : index
    %47 = vector.load %arg5[%c4, %c0_44, %c0_45] : memref<9x128x128xbf16, #tpu.memory_space<vmem>>, vector<1x128x128xbf16>
    %48 = vector.shape_cast %47 : vector<1x128x128xbf16> to vector<128x128xbf16>
    %cst_46 = arith.constant dense<0.000000e+00> : vector<256x128xf32>
    %49 = tpu.matmul %46, %48, %cst_46 {dimension_numbers = #tpu.dot_dimension_numbers<[1], [0], [0], [1], [0, 0, 1, 1], [], []>} : vector<256x128xbf16>, vector<128x128xbf16>, vector<256x128xf32> -> vector<256x128xf32>
    %c0_47 = arith.constant 0 : index
    %c0_48 = arith.constant 0 : index
    %50 = vector.load %arg12[%c0_47, %c0_48] : memref<256x128xf32, #tpu.memory_space<vmem>>, vector<256x128xf32>
    %51 = arith.addf %50, %49 : vector<256x128xf32>
    %c0_49 = arith.constant 0 : index
    %c0_50 = arith.constant 0 : index
    %52 = vector.load %arg12[%c0_49, %c0_50] : memref<256x128xf32, #tpu.memory_space<vmem>>, vector<256x128xf32>
    tpu.vector_store %arg12[%c0_49, %c0_50], %51 {strides = array<i32>} : memref<256x128xf32, #tpu.memory_space<vmem>>, vector<256x128xf32>,
    %c33 = arith.constant 33 : index
    %c0_51 = arith.constant 0 : index
    %53 = vector.load %arg11[%c33, %c0_51] : memref<320x128xf32, #tpu.memory_space<vmem>>, vector<256x128xf32>
    %54 = arith.truncf %53 : vector<256x128xf32> to vector<256x128xbf16>
    %c5 = arith.constant 5 : index
    %c0_52 = arith.constant 0 : index
    %c0_53 = arith.constant 0 : index
    %55 = vector.load %arg5[%c5, %c0_52, %c0_53] : memref<9x128x128xbf16, #tpu.memory_space<vmem>>, vector<1x128x128xbf16>
    %56 = vector.shape_cast %55 : vector<1x128x128xbf16> to vector<128x128xbf16>
    %cst_54 = arith.constant dense<0.000000e+00> : vector<256x128xf32>
    %57 = tpu.matmul %54, %56, %cst_54 {dimension_numbers = #tpu.dot_dimension_numbers<[1], [0], [0], [1], [0, 0, 1, 1], [], []>} : vector<256x128xbf16>, vector<128x128xbf16>, vector<256x128xf32> -> vector<256x128xf32>
    %c0_55 = arith.constant 0 : index
    %c0_56 = arith.constant 0 : index
    %58 = vector.load %arg12[%c0_55, %c0_56] : memref<256x128xf32, #tpu.memory_space<vmem>>, vector<256x128xf32>
    %59 = arith.addf %58, %57 : vector<256x128xf32>
    %c0_57 = arith.constant 0 : index
    %c0_58 = arith.constant 0 : index
    %60 = vector.load %arg12[%c0_57, %c0_58] : memref<256x128xf32, #tpu.memory_space<vmem>>, vector<256x128xf32>
    tpu.vector_store %arg12[%c0_57, %c0_58], %59 {strides = array<i32>} : memref<256x128xf32, #tpu.memory_space<vmem>>, vector<256x128xf32>,
    %c49 = arith.constant 49 : index
    %c0_59 = arith.constant 0 : index
    %61 = vector.load %arg11[%c49, %c0_59] : memref<320x128xf32, #tpu.memory_space<vmem>>, vector<256x128xf32>
    %62 = arith.truncf %61 : vector<256x128xf32> to vector<256x128xbf16>
    %c6 = arith.constant 6 : index
    %c0_60 = arith.constant 0 : index
    %c0_61 = arith.constant 0 : index
    %63 = vector.load %arg5[%c6, %c0_60, %c0_61] : memref<9x128x128xbf16, #tpu.memory_space<vmem>>, vector<1x128x128xbf16>
    %64 = vector.shape_cast %63 : vector<1x128x128xbf16> to vector<128x128xbf16>
    %cst_62 = arith.constant dense<0.000000e+00> : vector<256x128xf32>
    %65 = tpu.matmul %62, %64, %cst_62 {dimension_numbers = #tpu.dot_dimension_numbers<[1], [0], [0], [1], [0, 0, 1, 1], [], []>} : vector<256x128xbf16>, vector<128x128xbf16>, vector<256x128xf32> -> vector<256x128xf32>
    %c0_63 = arith.constant 0 : index
    %c0_64 = arith.constant 0 : index
    %66 = vector.load %arg12[%c0_63, %c0_64] : memref<256x128xf32, #tpu.memory_space<vmem>>, vector<256x128xf32>
    %67 = arith.addf %66, %65 : vector<256x128xf32>
    %c0_65 = arith.constant 0 : index
    %c0_66 = arith.constant 0 : index
    %68 = vector.load %arg12[%c0_65, %c0_66] : memref<256x128xf32, #tpu.memory_space<vmem>>, vector<256x128xf32>
    tpu.vector_store %arg12[%c0_65, %c0_66], %67 {strides = array<i32>} : memref<256x128xf32, #tpu.memory_space<vmem>>, vector<256x128xf32>,
    %c50 = arith.constant 50 : index
    %c0_67 = arith.constant 0 : index
    %69 = vector.load %arg11[%c50, %c0_67] : memref<320x128xf32, #tpu.memory_space<vmem>>, vector<256x128xf32>
    %70 = arith.truncf %69 : vector<256x128xf32> to vector<256x128xbf16>
    %c7 = arith.constant 7 : index
    %c0_68 = arith.constant 0 : index
    %c0_69 = arith.constant 0 : index
    %71 = vector.load %arg5[%c7, %c0_68, %c0_69] : memref<9x128x128xbf16, #tpu.memory_space<vmem>>, vector<1x128x128xbf16>
    %72 = vector.shape_cast %71 : vector<1x128x128xbf16> to vector<128x128xbf16>
    %cst_70 = arith.constant dense<0.000000e+00> : vector<256x128xf32>
    %73 = tpu.matmul %70, %72, %cst_70 {dimension_numbers = #tpu.dot_dimension_numbers<[1], [0], [0], [1], [0, 0, 1, 1], [], []>} : vector<256x128xbf16>, vector<128x128xbf16>, vector<256x128xf32> -> vector<256x128xf32>
    %c0_71 = arith.constant 0 : index
    %c0_72 = arith.constant 0 : index
    %74 = vector.load %arg12[%c0_71, %c0_72] : memref<256x128xf32, #tpu.memory_space<vmem>>, vector<256x128xf32>
    %75 = arith.addf %74, %73 : vector<256x128xf32>
    %c0_73 = arith.constant 0 : index
    %c0_74 = arith.constant 0 : index
    %76 = vector.load %arg12[%c0_73, %c0_74] : memref<256x128xf32, #tpu.memory_space<vmem>>, vector<256x128xf32>
    tpu.vector_store %arg12[%c0_73, %c0_74], %75 {strides = array<i32>} : memref<256x128xf32, #tpu.memory_space<vmem>>, vector<256x128xf32>,
    %c51 = arith.constant 51 : index
    %c0_75 = arith.constant 0 : index
    %77 = vector.load %arg11[%c51, %c0_75] : memref<320x128xf32, #tpu.memory_space<vmem>>, vector<256x128xf32>
    %78 = arith.truncf %77 : vector<256x128xf32> to vector<256x128xbf16>
    %c8 = arith.constant 8 : index
    %c0_76 = arith.constant 0 : index
    %c0_77 = arith.constant 0 : index
    %79 = vector.load %arg5[%c8, %c0_76, %c0_77] : memref<9x128x128xbf16, #tpu.memory_space<vmem>>, vector<1x128x128xbf16>
    %80 = vector.shape_cast %79 : vector<1x128x128xbf16> to vector<128x128xbf16>
    %cst_78 = arith.constant dense<0.000000e+00> : vector<256x128xf32>
    %81 = tpu.matmul %78, %80, %cst_78 {dimension_numbers = #tpu.dot_dimension_numbers<[1], [0], [0], [1], [0, 0, 1, 1], [], []>} : vector<256x128xbf16>, vector<128x128xbf16>, vector<256x128xf32> -> vector<256x128xf32>
    %c0_79 = arith.constant 0 : index
    %c0_80 = arith.constant 0 : index
    %82 = vector.load %arg12[%c0_79, %c0_80] : memref<256x128xf32, #tpu.memory_space<vmem>>, vector<256x128xf32>
    %83 = arith.addf %82, %81 : vector<256x128xf32>
    %c0_81 = arith.constant 0 : index
    %c0_82 = arith.constant 0 : index
    %84 = vector.load %arg12[%c0_81, %c0_82] : memref<256x128xf32, #tpu.memory_space<vmem>>, vector<256x128xf32>
    tpu.vector_store %arg12[%c0_81, %c0_82], %83 {strides = array<i32>} : memref<256x128xf32, #tpu.memory_space<vmem>>, vector<256x128xf32>,
    %c0_83 = arith.constant 0 : index
    %c0_84 = arith.constant 0 : index
    %85 = vector.load %arg7[%c0_83, %c0_84] : memref<256x1xf32, #tpu.memory_space<vmem>>, vector<256x1xf32>
    %c0_85 = arith.constant 0 : index
    %c0_86 = arith.constant 0 : index
    %86 = vector.load %arg12[%c0_85, %c0_86] : memref<256x128xf32, #tpu.memory_space<vmem>>, vector<256x128xf32>
    %c0_87 = arith.constant 0 : index
    %c0_88 = arith.constant 0 : index
    %87 = vector.load %arg6[%c0_87, %c0_88] : memref<1x128xf32, #tpu.memory_space<vmem>>, vector<1x128xf32>
    %88 = vector.broadcast %87 : vector<1x128xf32> to vector<256x128xf32>
    %89 = arith.addf %86, %88 : vector<256x128xf32>
    %90 = arith.truncf %89 : vector<256x128xf32> to vector<256x128xbf16>
    %c0_89 = arith.constant 0 : index
    %c0_90 = arith.constant 0 : index
    %c0_91 = arith.constant 0 : index
    %91 = vector.load %arg8[%c0_89, %c0_90, %c0_91] : memref<1x256x128xbf16, #tpu.memory_space<vmem>>, vector<1x256x128xbf16>
    %92 = vector.shape_cast %91 : vector<1x256x128xbf16> to vector<256x128xbf16>
    %93 = vector.shape_cast %90 : vector<256x128xbf16> to vector<1x256x128xbf16>
    tpu.vector_store %arg8[%c0_89, %c0_90, %c0_91], %93 {strides = array<i32>} : memref<1x256x128xbf16, #tpu.memory_space<vmem>>, vector<1x256x128xbf16>,
    %94 = vector.broadcast %85 : vector<256x1xf32> to vector<256x128xf32>
    %95 = arith.mulf %89, %94 : vector<256x128xf32>
    %c0_92 = arith.constant 0 : index
    %c0_93 = arith.constant 0 : index
    %c0_94 = arith.constant 0 : index
    %96 = vector.load %arg9[%c0_92, %c0_93, %c0_94] : memref<1x1x128xf32, #tpu.memory_space<vmem>>, vector<1x1x128xf32>
    %97 = vector.shape_cast %96 : vector<1x1x128xf32> to vector<1x128xf32>
    %cst_95 = arith.constant dense<0.000000e+00> : vector<128xf32>
    %98 = vector.multi_reduction <add>, %95, %cst_95 [0] : vector<256x128xf32> to vector<128xf32>
    %99 = vector.shape_cast %98 : vector<128xf32> to vector<1x128xf32>
    %100 = arith.addf %97, %99 : vector<1x128xf32>
    %c0_96 = arith.constant 0 : index
    %c0_97 = arith.constant 0 : index
    %c0_98 = arith.constant 0 : index
    %101 = vector.load %arg9[%c0_96, %c0_97, %c0_98] : memref<1x1x128xf32, #tpu.memory_space<vmem>>, vector<1x1x128xf32>
    %102 = vector.shape_cast %101 : vector<1x1x128xf32> to vector<1x128xf32>
    %103 = vector.shape_cast %100 : vector<1x128xf32> to vector<1x1x128xf32>
    tpu.vector_store %arg9[%c0_96, %c0_97, %c0_98], %103 {strides = array<i32>} : memref<1x1x128xf32, #tpu.memory_space<vmem>>, vector<1x1x128xf32>,
    %c0_99 = arith.constant 0 : index
    %c0_100 = arith.constant 0 : index
    %c0_101 = arith.constant 0 : index
    %104 = vector.load %arg10[%c0_99, %c0_100, %c0_101] : memref<1x1x128xf32, #tpu.memory_space<vmem>>, vector<1x1x128xf32>
    %105 = vector.shape_cast %104 : vector<1x1x128xf32> to vector<1x128xf32>
    %106 = arith.mulf %95, %89 : vector<256x128xf32>
    %cst_102 = arith.constant dense<0.000000e+00> : vector<128xf32>
    %107 = vector.multi_reduction <add>, %106, %cst_102 [0] : vector<256x128xf32> to vector<128xf32>
    %108 = vector.shape_cast %107 : vector<128xf32> to vector<1x128xf32>
    %109 = arith.addf %105, %108 : vector<1x128xf32>
    %c0_103 = arith.constant 0 : index
    %c0_104 = arith.constant 0 : index
    %c0_105 = arith.constant 0 : index
    %110 = vector.load %arg10[%c0_103, %c0_104, %c0_105] : memref<1x1x128xf32, #tpu.memory_space<vmem>>, vector<1x1x128xf32>
    %111 = vector.shape_cast %110 : vector<1x1x128xf32> to vector<1x128xf32>
    %112 = vector.shape_cast %109 : vector<1x128xf32> to vector<1x1x128xf32>
    tpu.vector_store %arg10[%c0_103, %c0_104, %c0_105], %112 {strides = array<i32>} : memref<1x1x128xf32, #tpu.memory_space<vmem>>, vector<1x1x128xf32>,
    return
  }
  func.func @transform_0(%arg0: i32, %arg1: i32) -> (i32, i32, i32) {
    %c0_i32 = arith.constant 0 : i32
    %c0_i32_0 = arith.constant 0 : i32
    return %arg0, %arg1, %c0_i32 : i32, i32, i32
  }
  func.func @transform_1(%arg0: i32, %arg1: i32) -> (i32, i32, i32) {
    %c1_i32 = arith.constant 1 : i32
    %0 = arith.addi %arg1, %c1_i32 : i32
    %c0_i32 = arith.constant 0 : i32
    %c0_i32_0 = arith.constant 0 : i32
    return %arg0, %0, %c0_i32 : i32, i32, i32
  }
  func.func @transform_2(%arg0: i32, %arg1: i32) -> (i32, i32, i32) {
    %c2_i32 = arith.constant 2 : i32
    %0 = arith.addi %arg1, %c2_i32 : i32
    %c0_i32 = arith.constant 0 : i32
    %c0_i32_0 = arith.constant 0 : i32
    return %arg0, %0, %c0_i32 : i32, i32, i32
  }
  func.func @transform_3(%arg0: i32, %arg1: i32) -> (i32, i32, i32) {
    %c0_i32 = arith.constant 0 : i32
    %c0_i32_0 = arith.constant 0 : i32
    %c0_i32_1 = arith.constant 0 : i32
    %c0_i32_2 = arith.constant 0 : i32
    return %c0_i32, %c0_i32_0, %c0_i32_1 : i32, i32, i32
  }
  func.func @transform_4(%arg0: i32, %arg1: i32) -> (i32, i32) {
    %c0_i32 = arith.constant 0 : i32
    %c0_i32_0 = arith.constant 0 : i32
    %c0_i32_1 = arith.constant 0 : i32
    return %c0_i32, %c0_i32_0 : i32, i32
  }
  func.func @transform_5(%arg0: i32, %arg1: i32) -> (i32, i32) {
    %c1_i32 = arith.constant 1 : i32
    %0 = arith.addi %arg1, %c1_i32 : i32
    %c0_i32 = arith.constant 0 : i32
    %c0_i32_0 = arith.constant 0 : i32
    return %0, %c0_i32 : i32, i32
  }
  func.func @transform_6(%arg0: i32, %arg1: i32) -> (i32, i32, i32) {
    %c0_i32 = arith.constant 0 : i32
    %c0_i32_0 = arith.constant 0 : i32
    return %arg0, %arg1, %c0_i32 : i32, i32, i32
  }
  func.func @transform_7(%arg0: i32, %arg1: i32) -> (i32, i32, i32) {
    %c0_i32 = arith.constant 0 : i32
    %c0_i32_0 = arith.constant 0 : i32
    %c0_i32_1 = arith.constant 0 : i32
    return %arg0, %c0_i32, %c0_i32_0 : i32, i32, i32
  }
  func.func @transform_8(%arg0: i32, %arg1: i32) -> (i32, i32, i32) {
    %c0_i32 = arith.constant 0 : i32
    %c0_i32_0 = arith.constant 0 : i32
    %c0_i32_1 = arith.constant 0 : i32
    return %arg0, %c0_i32, %c0_i32_0 : i32, i32, i32
  }
}

module attributes {stable_mosaic.version = 11 : i64} {
  func.func @kernel(%arg0: i32, %arg1: i32, %arg2: memref<1x256x128xbf16, #tpu.memory_space<vmem>>, %arg3: memref<1x128xf32, #tpu.memory_space<vmem>>, %arg4: memref<1x128xf32, #tpu.memory_space<vmem>>, %arg5: memref<1x256x128xbf16, #tpu.memory_space<vmem>>, %arg6: memref<128x128xbf16, #tpu.memory_space<vmem>>, %arg7: memref<1x128xf32, #tpu.memory_space<vmem>>, %arg8: memref<1x128xf32, #tpu.memory_space<vmem>>, %arg9: memref<1x256x128xf32, #tpu.memory_space<vmem>>) attributes {dimension_semantics = [#tpu.dimension_semantics<parallel>, #tpu.dimension_semantics<parallel>], iteration_bounds = array<i64: 2, 2>, scalar_prefetch = 0 : i64, scratch_operands = 0 : i64, tpu.core_type = #tpu.core_type<tc>, window_params = [{transform_indices = @transform_0, window_bounds = array<i64: 1, 256, 128>}, {pipeline_mode = #tpu.pipeline_mode<synchronous>, transform_indices = @transform_1, window_bounds = array<i64: 1, 128>}, {pipeline_mode = #tpu.pipeline_mode<synchronous>, transform_indices = @transform_2, window_bounds = array<i64: 1, 128>}, {transform_indices = @transform_3, window_bounds = array<i64: 1, 256, 128>}, {pipeline_mode = #tpu.pipeline_mode<synchronous>, transform_indices = @transform_4, window_bounds = array<i64: 128, 128>}, {pipeline_mode = #tpu.pipeline_mode<synchronous>, transform_indices = @transform_5, window_bounds = array<i64: 1, 128>}, {pipeline_mode = #tpu.pipeline_mode<synchronous>, transform_indices = @transform_6, window_bounds = array<i64: 1, 128>}, {transform_indices = @transform_7, window_bounds = array<i64: 1, 256, 128>}]} {
    %c0 = arith.constant 0 : index
    %c0_0 = arith.constant 0 : index
    %c0_1 = arith.constant 0 : index
    %0 = vector.load %arg2[%c0, %c0_0, %c0_1] : memref<1x256x128xbf16, #tpu.memory_space<vmem>>, vector<1x256x128xbf16>
    %1 = vector.shape_cast %0 : vector<1x256x128xbf16> to vector<256x128xbf16>
    %2 = arith.extf %1 : vector<256x128xbf16> to vector<256x128xf32>
    %c0_2 = arith.constant 0 : index
    %c0_3 = arith.constant 0 : index
    %3 = vector.load %arg3[%c0_2, %c0_3] : memref<1x128xf32, #tpu.memory_space<vmem>>, vector<1x128xf32>
    %4 = vector.broadcast %3 : vector<1x128xf32> to vector<256x128xf32>
    %5 = arith.mulf %2, %4 : vector<256x128xf32>
    %c0_4 = arith.constant 0 : index
    %c0_5 = arith.constant 0 : index
    %6 = vector.load %arg4[%c0_4, %c0_5] : memref<1x128xf32, #tpu.memory_space<vmem>>, vector<1x128xf32>
    %7 = vector.broadcast %6 : vector<1x128xf32> to vector<256x128xf32>
    %8 = arith.addf %5, %7 : vector<256x128xf32>
    %c0_6 = arith.constant 0 : index
    %c0_7 = arith.constant 0 : index
    %c0_8 = arith.constant 0 : index
    %9 = vector.load %arg5[%c0_6, %c0_7, %c0_8] : memref<1x256x128xbf16, #tpu.memory_space<vmem>>, vector<1x256x128xbf16>
    %10 = vector.shape_cast %9 : vector<1x256x128xbf16> to vector<256x128xbf16>
    %c0_9 = arith.constant 0 : index
    %c0_10 = arith.constant 0 : index
    %11 = vector.load %arg6[%c0_9, %c0_10] : memref<128x128xbf16, #tpu.memory_space<vmem>>, vector<128x128xbf16>
    %cst = arith.constant dense<0.000000e+00> : vector<256x128xf32>
    %12 = tpu.matmul %10, %11, %cst {dimension_numbers = #tpu.dot_dimension_numbers<[1], [0], [0], [1], [0, 0, 1, 1], [], []>} : vector<256x128xbf16>, vector<128x128xbf16>, vector<256x128xf32> -> vector<256x128xf32>
    %c0_11 = arith.constant 0 : index
    %c0_12 = arith.constant 0 : index
    %13 = vector.load %arg7[%c0_11, %c0_12] : memref<1x128xf32, #tpu.memory_space<vmem>>, vector<1x128xf32>
    %14 = vector.broadcast %13 : vector<1x128xf32> to vector<256x128xf32>
    %15 = arith.mulf %12, %14 : vector<256x128xf32>
    %c0_13 = arith.constant 0 : index
    %c0_14 = arith.constant 0 : index
    %16 = vector.load %arg8[%c0_13, %c0_14] : memref<1x128xf32, #tpu.memory_space<vmem>>, vector<1x128xf32>
    %17 = vector.broadcast %16 : vector<1x128xf32> to vector<256x128xf32>
    %18 = arith.addf %15, %17 : vector<256x128xf32>
    %19 = arith.addf %8, %18 : vector<256x128xf32>
    %cst_15 = arith.constant 0.000000e+00 : f32
    %20 = vector.broadcast %cst_15 : f32 to vector<256x128xf32>
    %21 = arith.maximumf %19, %20 : vector<256x128xf32>
    %c0_16 = arith.constant 0 : index
    %c0_17 = arith.constant 0 : index
    %c0_18 = arith.constant 0 : index
    %22 = vector.load %arg9[%c0_16, %c0_17, %c0_18] : memref<1x256x128xf32, #tpu.memory_space<vmem>>, vector<1x256x128xf32>
    %23 = vector.shape_cast %22 : vector<1x256x128xf32> to vector<256x128xf32>
    %24 = vector.shape_cast %21 : vector<256x128xf32> to vector<1x256x128xf32>
    tpu.vector_store %arg9[%c0_16, %c0_17, %c0_18], %24 {strides = array<i32>} : memref<1x256x128xf32, #tpu.memory_space<vmem>>, vector<1x256x128xf32>,
    return
  }
  func.func @transform_0(%arg0: i32, %arg1: i32) -> (i32, i32, i32) {
    %c0_i32 = arith.constant 0 : i32
    %c0_i32_0 = arith.constant 0 : i32
    return %arg0, %arg1, %c0_i32 : i32, i32, i32
  }
  func.func @transform_1(%arg0: i32, %arg1: i32) -> (i32, i32) {
    %c0_i32 = arith.constant 0 : i32
    %c0_i32_0 = arith.constant 0 : i32
    %c0_i32_1 = arith.constant 0 : i32
    return %c0_i32, %c0_i32_0 : i32, i32
  }
  func.func @transform_2(%arg0: i32, %arg1: i32) -> (i32, i32) {
    %c0_i32 = arith.constant 0 : i32
    %c0_i32_0 = arith.constant 0 : i32
    %c0_i32_1 = arith.constant 0 : i32
    return %c0_i32, %c0_i32_0 : i32, i32
  }
  func.func @transform_3(%arg0: i32, %arg1: i32) -> (i32, i32, i32) {
    %c1_i32 = arith.constant 1 : i32
    %0 = arith.addi %arg1, %c1_i32 : i32
    %c0_i32 = arith.constant 0 : i32
    %c0_i32_0 = arith.constant 0 : i32
    return %arg0, %0, %c0_i32 : i32, i32, i32
  }
  func.func @transform_4(%arg0: i32, %arg1: i32) -> (i32, i32) {
    %c0_i32 = arith.constant 0 : i32
    %c0_i32_0 = arith.constant 0 : i32
    %c0_i32_1 = arith.constant 0 : i32
    return %c0_i32, %c0_i32_0 : i32, i32
  }
  func.func @transform_5(%arg0: i32, %arg1: i32) -> (i32, i32) {
    %c0_i32 = arith.constant 0 : i32
    %c0_i32_0 = arith.constant 0 : i32
    %c0_i32_1 = arith.constant 0 : i32
    return %c0_i32, %c0_i32_0 : i32, i32
  }
  func.func @transform_6(%arg0: i32, %arg1: i32) -> (i32, i32) {
    %c0_i32 = arith.constant 0 : i32
    %c0_i32_0 = arith.constant 0 : i32
    %c0_i32_1 = arith.constant 0 : i32
    return %c0_i32, %c0_i32_0 : i32, i32
  }
  func.func @transform_7(%arg0: i32, %arg1: i32) -> (i32, i32, i32) {
    %c0_i32 = arith.constant 0 : i32
    %c0_i32_0 = arith.constant 0 : i32
    return %arg0, %arg1, %c0_i32 : i32, i32, i32
  }
}

</mosaic_0001>

<bundles_post_ra>
// kernel: residual_block.5
= control target key start
LH: loop header
LB: loop body
LE: loop exit
PB: predicated region body
PF: predicated region fallthrough
CT: control target
= control target key end

     0   :  { %s1386_s15 = smov 0   ;;  %s1388_s16 = smov 0   ;;  %s1632_s0 = inlined_call_operand.vmem [shape: bf16[2,512,128], index: 0, kind: input, shape index: {}]   ;;  %s1633_s1 = inlined_call_operand.vmem [shape: f32[1,128], index: 1, kind: input, shape index: {}]   ;;  %s1634_s2 = inlined_call_operand.vmem [shape: f32[1,128], index: 2, kind: input, shape index: {}]   ;;  %s1635_s3 = inlined_call_operand.vmem [shape: f32[1024,1], index: 3, kind: input, shape index: {}]   ;;  %s1636_s4 = inlined_call_operand.vmem [shape: bf16[2,1024,128], index: 4, kind: output, shape index: {}]  }
   0x1   :  { %s1390_s17 = smov 0   ;;  %s1392_s18 = smov 0  }
   0x2   :  { %s1394_s19 = smov 0  }
   0x3 LB: > { %s23_s20 = sadd.s32 1, %s1349_s17  ;;  %s26_s21 = sadd.s32 1, %s1353_s18  ;;  %s1357_s19 = sphi %s1394_s19, %s14_s19   ;;  %s1353_s18 = sphi %s1392_s18, %s1641_s18   ;;  %s1349_s17 = sphi %s1390_s17, %s1640_s17   ;;  %s1345_s16 = sphi %s1388_s16, %s1639_s16   ;;  %s1341_s15 = sphi %s1386_s15, %s1638_s15  }
   0x4   : > { %p24_p0 = scmp.ge.s32.totalorder %s23_s20, 4  ;;  %p1012_p1 = scmp.ge.s32.totalorder %s1357_s19, 1 }
   0x5   : > { %p214_p2 = scmp.lt.s32.totalorder %s1357_s19, 9 }
   0x6   : > { %s1643_s20 = smov (%p24_p0, %s23_s20), 0  ;;  %s1645_s21 = smov (!%p24_p0, %s26_s21), %s1353_s18 }
   0x7   : > { %p215_p3 = pnand %p1012_p1, %p214_p2  ;;  %p28_p4 = scmp.ge.s32.totalorder %s1645_s21, 2 }
   0x8   : > { %s1013_s22 = sadd.s32 (!%p215_p3), 4294967295, %s1341_s15  ;;  %p264_p5 = scmp.lt.s32.totalorder (!%p215_p3), %s1345_s16, 1 }
   0x9   : > { %s1647_s21 = smov (%p28_p4, %s1645_s21), 0  ;;  %218 = sbr.rel (%p215_p3) target bundleno = 235 (0xeb), region = 36 }
   0xa   : > { %p259_p6 = scmp.gt.s32.totalorder (!%p215_p3), %s1013_s22, 0  ;;  %p1014_p7 = scmp.lt.s32.totalorder (!%p215_p3), %s1013_s22, 1 }
   0xb   : > { %s1022_s24 = sshll.u32 (!%p215_p3), %s1341_s15, 5  ;;  %p295_p9 = scmp.eq.s32.totalorder (!%p215_p3), %s1341_s15, 0 }
   0xc   : > { %p279_p8 = scmp.lt.s32.totalorder (!%p215_p3), %s1022_s24, 127  ;;  %p296_p11 = scmp.eq.s32.totalorder (!%p215_p3), %s1341_s15, 3 }
   0xe   : > { %p1439_p12 = por (!%p215_p3), %p296_p11, %p295_p9 }
  0x10   : > { %s1649_s16 = smov (!%p264_p5, %s1345_s16), 1  ;;  %s1651_s22 = smov (!%p259_p6, %s1013_s22), 0 }
  0x11   : > { %s1020_s23 = sshll.u32 %s1649_s16, 6  ;;  %s1653_s22 = smov (!%p1014_p7, %s1651_s22), 1  ;;  %v1359_v0 = vmov (%p1439_p12), 0  }
  0x12   : > { %s1025_s25 = sshll.u32 %s1649_s16, 7  ;;  %s1019_s26 = sshll.u32 %s1653_s22, 5 }
  0x13   : > { %p266_p10 = scmp.lt.s32.totalorder %s1019_s26, 63  ;;  %s1655_s24 = smov (!%p279_p8, %s1022_s24), 127 }
  0x14   : > { %s1023_s27 = sshll.u32 %s1655_s24, 3  ;;  %s290_s28 = sadd.s32 %s1025_s25, %s1655_s24 }
  0x15   : > { %s1657_s26 = smov (!%p266_p10, %s1019_s26), 63  ;;  %s1425_s6 = scalar_lea.vmem %s1635_s3, %s1023_s27 }
  0x16   : > { %s269_s29 = sadd.s32 %s1020_s23, %s1657_s26  ;;  %s1026_s8 = sshll.u32 %s290_s28, 2 }
  0x17   : > { %s1021_s7 = sshll.u32 %s269_s29, 2  ;;  %s1435_s14 = scalar_lea.vmem %s1636_s4, %s1026_s8 }
  0x18   : > { %s1430_s11 = scalar_lea.vmem %s1632_s0, %s1021_s7  ;;  %300 = sbr.rel (!%p1439_p12) target bundleno = 40 (0x28), region = 40  ;;  %301 = vst [vmem:[%s1435_s14] sm:$0xf] (%p1439_p12), %v1359_v0  ;;  %302 = vst [vmem:[%s1435_s14 + $0x4] sm:$0xf] (%p1439_p12), %v1359_v0 }
  0x19   : > { %303 = vst [vmem:[%s1435_s14 + $0x8] sm:$0xf] (%p1439_p12), %v1359_v0  ;;  %304 = vst [vmem:[%s1435_s14 + $0xc] sm:$0xf] (%p1439_p12), %v1359_v0 }
  0x1a   : > { %305 = vst [vmem:[%s1435_s14 + $0x10] sm:$0xf] (%p1439_p12), %v1359_v0  ;;  %306 = vst [vmem:[%s1435_s14 + $0x14] sm:$0xf] (%p1439_p12), %v1359_v0 }
  0x1b   : > { %307 = vst [vmem:[%s1435_s14 + $0x18] sm:$0xf] (%p1439_p12), %v1359_v0  ;;  %308 = vst [vmem:[%s1435_s14 + $0x1c] sm:$0xf] (%p1439_p12), %v1359_v0 }
  0x1c   : > { %309 = vst [vmem:[%s1435_s14 + $0x20] sm:$0xf] (%p1439_p12), %v1359_v0  ;;  %310 = vst [vmem:[%s1435_s14 + $0x24] sm:$0xf] (%p1439_p12), %v1359_v0 }
  0x1d   : > { %311 = vst [vmem:[%s1435_s14 + $0x28] sm:$0xf] (%p1439_p12), %v1359_v0  ;;  %312 = vst [vmem:[%s1435_s14 + $0x2c] sm:$0xf] (%p1439_p12), %v1359_v0 }
  0x1e   : > { %313 = vst [vmem:[%s1435_s14 + $0x30] sm:$0xf] (%p1439_p12), %v1359_v0  ;;  %314 = vst [vmem:[%s1435_s14 + $0x34] sm:$0xf] (%p1439_p12), %v1359_v0 }
  0x1f   : > { %315 = vst [vmem:[%s1435_s14 + $0x38] sm:$0xf] %v1359_v0  ;;  %316 = vst [vmem:[%s1435_s14 + $0x3c] sm:$0xf] %v1359_v0 }
  0x20   : > { %317 = vst [vmem:[%s1435_s14 + $0x40] sm:$0xf] %v1359_v0  ;;  %318 = vst [vmem:[%s1435_s14 + $0x44] sm:$0xf] %v1359_v0 }
  0x21   : > { %319 = vst [vmem:[%s1435_s14 + $0x48] sm:$0xf] %v1359_v0  ;;  %320 = vst [vmem:[%s1435_s14 + $0x4c] sm:$0xf] %v1359_v0 }
  0x22   : > { %321 = vst [vmem:[%s1435_s14 + $0x50] sm:$0xf] %v1359_v0  ;;  %322 = vst [vmem:[%s1435_s14 + $0x54] sm:$0xf] %v1359_v0 }
  0x23   : > { %323 = vst [vmem:[%s1435_s14 + $0x58] sm:$0xf] %v1359_v0  ;;  %324 = vst [vmem:[%s1435_s14 + $0x5c] sm:$0xf] %v1359_v0 }
  0x24   : > { %325 = vst [vmem:[%s1435_s14 + $0x60] sm:$0xf] %v1359_v0  ;;  %326 = vst [vmem:[%s1435_s14 + $0x64] sm:$0xf] %v1359_v0 }
  0x25   : > { %327 = vst [vmem:[%s1435_s14 + $0x68] sm:$0xf] %v1359_v0  ;;  %328 = vst [vmem:[%s1435_s14 + $0x6c] sm:$0xf] %v1359_v0 }
  0x26   : > { %329 = vst [vmem:[%s1435_s14 + $0x70] sm:$0xf] %v1359_v0  ;;  %330 = vst [vmem:[%s1435_s14 + $0x74] sm:$0xf] %v1359_v0 }
  0x27   : > { %331 = vst [vmem:[%s1435_s14 + $0x78] sm:$0xf] %v1359_v0  ;;  %332 = vst [vmem:[%s1435_s14 + $0x7c] sm:$0xf] %v1359_v0 }
  0x28 PF: > { %335 = sbr.rel (%p1439_p12) target bundleno = 235 (0xeb), region = 44  ;;  %v512_v1 = vld [vmem:[%s1425_s6 + $0x10] sm:$0xff] (!%p1439_p12)  ;;  %v510_v2 = vld [vmem:[%s1425_s6] sm:$0xff] (!%p1439_p12)  ;;  %v1360_v3 = vmov (!%p1439_p12), 0   ;;  %v513_v4 = vld [vmem:[%s1425_s6 + $0x18] sm:$0xff] (!%p1439_p12) }
  0x29   : > { %1318 = vset.pattern.permute.xlu1 (!%p1439_p12), %v1360_v3  ;;  %1317 = vset.pattern.permute.xlu0 (!%p1439_p12), %v1360_v3  ;;  %v511_v5 = vld [vmem:[%s1425_s6 + $0x8] sm:$0xff] (!%p1439_p12)  ;;  %v514_v7 = vld [vmem:[%s1425_s6 + $0x20] sm:$0xff] (!%p1439_p12)  ;;  %v517_v8 = vld [vmem:[%s1425_s6 + $0x38] sm:$0xff] (!%p1439_p12) }
  0x2a   : > { %554 = vperm.xlu1 (!%p1439_p12), %1318, %v512_v1   ;;  %544 = vperm.xlu0 (!%p1439_p12), %1317, %v510_v2   ;;  %v515_v6 = vld [vmem:[%s1425_s6 + $0x28] sm:$0xff] (!%p1439_p12)  ;;  %v516_v9 = vld [vmem:[%s1425_s6 + $0x30] sm:$0xff] (!%p1439_p12)  ;;  %v518_v11 = vld [vmem:[%s1425_s6 + $0x40] sm:$0xff] (!%p1439_p12) }
  0x2b   : > { %v519_v10 = vld [vmem:[%s1425_s6 + $0x48] sm:$0xff] (!%p1439_p12)  ;;  %v521_v12 = vld [vmem:[%s1425_s6 + $0x58] sm:$0xff] (!%p1439_p12)  ;;  %v520_v13 = vld [vmem:[%s1425_s6 + $0x50] sm:$0xff] (!%p1439_p12) }
  0x2c   : > { %v523_v14 = vld [vmem:[%s1425_s6 + $0x68] sm:$0xff] (!%p1439_p12)  ;;  %v522_v15 = vld [vmem:[%s1425_s6 + $0x60] sm:$0xff] (!%p1439_p12)  ;;  %v525_v16 = vld [vmem:[%s1425_s6 + $0x78] sm:$0xff] (!%p1439_p12) }
  0x2d   : > { %v524_v17 = vld [vmem:[%s1425_s6 + $0x70] sm:$0xff] (!%p1439_p12)  ;;  %v527_v18 = vld [vmem:[%s1425_s6 + $0x88] sm:$0xff] (!%p1439_p12)  ;;  %v526_v19 = vld [vmem:[%s1425_s6 + $0x80] sm:$0xff] (!%p1439_p12) }
  0x2e   : > { %559 = vperm.xlu1 (!%p1439_p12), %1318, %v513_v4   ;;  %549 = vperm.xlu0 (!%p1439_p12), %1317, %v511_v5   ;;  %v529_v20 = vld [vmem:[%s1425_s6 + $0x98] sm:$0xff] (!%p1439_p12)  ;;  %v528_v21 = vld [vmem:[%s1425_s6 + $0x90] sm:$0xff] (!%p1439_p12)  ;;  %v531_v22 = vld [vmem:[%s1425_s6 + $0xa8] sm:$0xff] (!%p1439_p12) }
  0x2f   : > { %v530_v23 = vld [vmem:[%s1425_s6 + $0xa0] sm:$0xff]  ;;  %v533_v24 = vld [vmem:[%s1425_s6 + $0xb8] sm:$0xff]  ;;  %v532_v25 = vld [vmem:[%s1425_s6 + $0xb0] sm:$0xff] }
  0x30   : > { %v535_v26 = vld [vmem:[%s1425_s6 + $0xc8] sm:$0xff]  ;;  %v534_v27 = vld [vmem:[%s1425_s6 + $0xc0] sm:$0xff]  ;;  %v537_v28 = vld [vmem:[%s1425_s6 + $0xd8] sm:$0xff] }
  0x31   : > { %v536_v29 = vld [vmem:[%s1425_s6 + $0xd0] sm:$0xff]  ;;  %v539_v30 = vld [vmem:[%s1425_s6 + $0xe8] sm:$0xff]  ;;  %v538_v31 = vld [vmem:[%s1425_s6 + $0xe0] sm:$0xff] }
  0x32   : > { %569 = vperm.xlu1 %1318, %v515_v6   ;;  %564 = vperm.xlu0 %1317, %v514_v7   ;;  %v541_v32 = vld [vmem:[%s1425_s6 + $0xf8] sm:$0xff]  ;;  %v540_v33 = vld [vmem:[%s1425_s6 + $0xf0] sm:$0xff]  ;;  %v1245_v34 = vld [vmem:[%s1430_s11 + $0x8] sm:$0xff]  }
  0x33   : > { %v1102_v35 = vld [vmem:[%s1430_s11] sm:$0xff]   ;;  %v1246_v36 = vld [vmem:[%s1430_s11 + $0x10] sm:$0xff]   ;;  %v1107_v37 = vunpack.c.l.bf16 %v1245_v34  ;;  %v1108_v39 = vunpack.c.h.bf16 %v1245_v34  ;;  %v1247_v44 = vld [vmem:[%s1430_s11 + $0x18] sm:$0xff]  }
  0x34   : > { %v1103_v38 = vunpack.c.l.bf16 %v1102_v35  ;;  %v1104_v40 = vunpack.c.h.bf16 %v1102_v35  ;;  %v1517_v41 = vld [vmem:[%s1633_s1] ss:$0 sm:$0xff]  ;;  %v1112_v42 = vunpack.c.h.bf16 %v1246_v36  ;;  %v1111_v43 = vunpack.c.l.bf16 %v1246_v36  ;;  %v1249_v7 = vld [vmem:[%s1430_s11 + $0x28] sm:$0xff]  }
  0x35   : > { %v409_v45 = vmul.f32 %v1107_v37, %v1517_v41  ;;  %v410_v47 = vmul.f32 %v1108_v39, %v1517_v41  ;;  %v1527_v49 = vld [vmem:[%s1634_s2] ss:$0 sm:$0xff]  ;;  %v1116_v52 = vunpack.c.h.bf16 %v1247_v44  ;;  %v1115_v53 = vunpack.c.l.bf16 %v1247_v44 }
  0x36   : > { %579 = vperm.xlu1 %1318, %v517_v8   ;;  %574 = vperm.xlu0 %1317, %v516_v9   ;;  %v407_v46 = vmul.f32 %v1103_v38, %v1517_v41  ;;  %v408_v48 = vmul.f32 %v1104_v40, %v1517_v41  ;;  %v412_v50 = vmul.f32 %v1112_v42, %v1517_v41  ;;  %v1248_v58 = vld [vmem:[%s1430_s11 + $0x20] sm:$0xff]  }
  0x37   : > { %v411_v51 = vmul.f32 %v1111_v43, %v1517_v41  ;;  %v448_v54 = vadd.f32 %v1527_v49, %v409_v45  ;;  %v449_v56 = vadd.f32 %v1527_v49, %v410_v47  ;;  %v414_v61 = vmul.f32 %v1116_v52, %v1517_v41 }
  0x38   : > { %v446_v55 = vadd.f32 %v1527_v49, %v407_v46  ;;  %v447_v57 = vadd.f32 %v1527_v49, %v408_v48  ;;  %v451_v59 = vadd.f32 %v1527_v49, %v412_v50  ;;  %v413_v62 = vmul.f32 %v1115_v53, %v1517_v41  ;;  %v1252_v48 = vld [vmem:[%s1430_s11 + $0x40] sm:$0xff]  }
  0x39   : > { %v450_v60 = vadd.f32 %v1527_v49, %v411_v51  ;;  %v1120_v1 = vunpack.c.h.bf16 %v1248_v58  ;;  %v1119_v2 = vunpack.c.l.bf16 %v1248_v58  ;;  %v480_v3 = vmax.f32 %v448_v54, 0.0 }
  0x3a   : > { %589 = vperm.xlu1 %1318, %v519_v10   ;;  %584 = vperm.xlu0 %1317, %v518_v11   ;;  %v478_v4 = vmax.f32 %v446_v55, 0.0  ;;  %v481_v5 = vmax.f32 %v449_v56, 0.0  ;;  %v479_v6 = vmax.f32 %v447_v57, 0.0  ;;  %v483_v8 = vmax.f32 %v451_v59, 0.0 }
  0x3b   : > { %v482_v9 = vmax.f32 %v450_v60, 0.0  ;;  %v453_v10 = vadd.f32 %v1527_v49, %v414_v61  ;;  %v452_v11 = vadd.f32 %v1527_v49, %v413_v62  ;;  %v1136_v55 = vunpack.c.h.bf16 %v1252_v48 }
  0x3c   : > { %v1135_v56 = vunpack.c.l.bf16 %v1252_v48 }
  0x3e   : > { %599 = vperm.xlu1 %1318, %v521_v12   ;;  %594 = vperm.xlu0 %1317, %v520_v13  }
  0x42   : > { %609 = vperm.xlu1 %1318, %v523_v14   ;;  %604 = vperm.xlu0 %1317, %v522_v15   ;;  %v416_v14 = vmul.f32 %v1120_v1, %v1517_v41  ;;  %v415_v15 = vmul.f32 %v1119_v2, %v1517_v41 }
  0x44   : > { %v455_v36 = vadd.f32 %v1527_v49, %v416_v14  ;;  %v454_v37 = vadd.f32 %v1527_v49, %v415_v15 }
  0x46   : > { %619 = vperm.xlu1 %1318, %v525_v16   ;;  %614 = vperm.xlu0 %1317, %v524_v17   ;;  %v1124_v16 = vunpack.c.h.bf16 %v1249_v7  ;;  %v1123_v17 = vunpack.c.l.bf16 %v1249_v7  ;;  %v487_v52 = vmax.f32 %v455_v36, 0.0  ;;  %v486_v53 = vmax.f32 %v454_v37, 0.0 }
  0x4a   : > { %629 = vperm.xlu1 %1318, %v527_v18   ;;  %624 = vperm.xlu0 %1317, %v526_v19  }
  0x4e   : > { %639 = vperm.xlu1 %1318, %v529_v20   ;;  %634 = vperm.xlu0 %1317, %v528_v21  }
  0x52   : > { %649 = vperm.xlu1 %1318, %v531_v22   ;;  %644 = vperm.xlu0 %1317, %v530_v23   ;;  %v1250_v22 = vld [vmem:[%s1430_s11 + $0x30] sm:$0xff]  }
  0x56   : > { %659 = vperm.xlu1 %1318, %v533_v24   ;;  %654 = vperm.xlu0 %1317, %v532_v25   ;;  %v485_v25 = vmax.f32 %v453_v10, 0.0 }
  0x5a   : > { %669 = vperm.xlu1 %1318, %v535_v26   ;;  %664 = vperm.xlu0 %1317, %v534_v27   ;;  %v484_v26 = vmax.f32 %v452_v11, 0.0 }
  0x5e   : > { %679 = vperm.xlu1 %1318, %v537_v28   ;;  %674 = vperm.xlu0 %1317, %v536_v29   ;;  %v418_v29 = vmul.f32 %v1124_v16, %v1517_v41 }
  0x60   : > { %v457_v44 = vadd.f32 %v1527_v49, %v418_v29 }
  0x62   : > { %689 = vperm.xlu1 %1318, %v539_v30   ;;  %684 = vperm.xlu0 %1317, %v538_v31   ;;  %v417_v30 = vmul.f32 %v1123_v17, %v1517_v41  ;;  %v1128_v31 = vunpack.c.h.bf16 %v1250_v22  ;;  %v489_v1 = vmax.f32 %v457_v44, 0.0  ;;  %v1254_v17 = vld [vmem:[%s1430_s11 + $0x50] sm:$0xff]  }
  0x64   : > { %v456_v45 = vadd.f32 %v1527_v49, %v417_v30  ;;  %v420_v46 = vmul.f32 %v1128_v31, %v1517_v41  ;;  %v1255_v31 = vld [vmem:[%s1430_s11 + $0x58] sm:$0xff]  }
  0x66   : > { %699 = vperm.xlu1 %1318, %v541_v32   ;;  %694 = vperm.xlu0 %1317, %v540_v33   ;;  %v1127_v32 = vunpack.c.l.bf16 %v1250_v22  ;;  %v1251_v33 = vld [vmem:[%s1430_s11 + $0x38] sm:$0xff]   ;;  %v459_v59 = vadd.f32 %v1527_v49, %v420_v46  ;;  %v488_v2 = vmax.f32 %v456_v45, 0.0  ;;  %v1148_v45 = vunpack.c.h.bf16 %v1255_v31 }
  0x67   : > { %v1132_v39 = vunpack.c.h.bf16 %v1251_v33  ;;  %v1131_v40 = vunpack.c.l.bf16 %v1251_v33  ;;  %v1147_v46 = vunpack.c.l.bf16 %v1255_v31 }
  0x68   : > { %v419_v47 = vmul.f32 %v1127_v32, %v1517_v41  ;;  %v491_v15 = vmax.f32 %v459_v59, 0.0  ;;  %v430_v59 = vmul.f32 %v1148_v45, %v1517_v41 }
  0x69   : > { %v422_v61 = vmul.f32 %v1132_v39, %v1517_v41  ;;  %v421_v62 = vmul.f32 %v1131_v40, %v1517_v41 }
  0x6a   : > { %v458_v60 = vadd.f32 %v1527_v49, %v419_v47 }
  0x6b   : > { %v460_v10 = vadd.f32 %v1527_v49, %v421_v62 }
  0x6c   : > { %v490_v16 = vmax.f32 %v458_v60, 0.0  ;;  %v429_v60 = vmul.f32 %v1147_v46, %v1517_v41 }
  0x6d   : > { %v492_v30 = vmax.f32 %v460_v10, 0.0 }
  0x6e   : > { %v468_v10 = vadd.f32 %v1527_v49, %v429_v60 }
  0xa9   : > { %v555_v63 = vpop.permute.xlu1 %554  ;;  %v545_v0 = vpop.permute.xlu0 %544 }
  0xaa   : > { %v704_v18 = vmul.f32 %v555_v63, %v480_v3  ;;  %v702_v19 = vmul.f32 %v545_v0, %v478_v4  ;;  %v1253_v3 = vld [vmem:[%s1430_s11 + $0x48] sm:$0xff]  }
  0xab   : > { %v1140_v11 = vunpack.c.h.bf16 %v1253_v3 }
  0xad   : > { %v560_v12 = vpop.permute.xlu1 %559  ;;  %v550_v13 = vpop.permute.xlu0 %549 }
  0xae   : > { %v705_v20 = vmul.f32 %v560_v12, %v481_v5  ;;  %v703_v21 = vmul.f32 %v550_v13, %v479_v6  ;;  %v424_v5 = vmul.f32 %v1136_v55, %v1517_v41  ;;  %v423_v6 = vmul.f32 %v1135_v56, %v1517_v41 }
  0xaf   : > { %v1139_v12 = vunpack.c.l.bf16 %v1253_v3 }
  0xb0   : > { %v1173_v23 = vpack.c.bf16 %v705_v20, %v704_v18  ;;  %v1168_v24 = vpack.c.bf16 %v703_v21, %v702_v19  ;;  %v463_v19 = vadd.f32 %v1527_v49, %v424_v5  ;;  %v462_v20 = vadd.f32 %v1527_v49, %v423_v6 }
  0xb1   : > { %v570_v27 = vpop.permute.xlu1 %569  ;;  %v565_v28 = vpop.permute.xlu0 %564 }
  0xb2   : > { %1260 = vst [vmem:[%s1435_s14 + $0x8] sm:$0xff] %v1173_v23   ;;  %1169 = vst [vmem:[%s1435_s14] sm:$0xff] %v1168_v24   ;;  %v707_v34 = vmul.f32 %v570_v27, %v483_v8  ;;  %v706_v35 = vmul.f32 %v565_v28, %v482_v9  ;;  %v461_v9 = vadd.f32 %v1527_v49, %v422_v61  ;;  %v495_v33 = vmax.f32 %v463_v19, 0.0  ;;  %v1257_v61 = vld [vmem:[%s1430_s11 + $0x68] sm:$0xff]  }
  0xb3   : > { %v426_v23 = vmul.f32 %v1140_v11, %v1517_v41  ;;  %v425_v24 = vmul.f32 %v1139_v12, %v1517_v41  ;;  %v1156_v5 = vunpack.c.h.bf16 %v1257_v61  ;;  %v1155_v6 = vunpack.c.l.bf16 %v1257_v61  ;;  %v1258_v11 = vld [vmem:[%s1430_s11 + $0x70] sm:$0xff]  }
  0xb4   : > { %v1178_v38 = vpack.c.bf16 %v707_v34, %v706_v35  ;;  %v493_v29 = vmax.f32 %v461_v9, 0.0  ;;  %v494_v34 = vmax.f32 %v462_v20, 0.0  ;;  %v469_v9 = vadd.f32 %v1527_v49, %v430_v59 }
  0xb5   : > { %v580_v42 = vpop.permute.xlu1 %579  ;;  %v575_v43 = vpop.permute.xlu0 %574  ;;  %v465_v37 = vadd.f32 %v1527_v49, %v426_v23  ;;  %v1160_v19 = vunpack.c.h.bf16 %v1258_v11  ;;  %v1159_v20 = vunpack.c.l.bf16 %v1258_v11 }
  0xb6   : > { %1261 = vst [vmem:[%s1435_s14 + $0x10] sm:$0xff] %v1178_v38   ;;  %v709_v50 = vmul.f32 %v580_v42, %v485_v25  ;;  %v708_v51 = vmul.f32 %v575_v43, %v484_v26  ;;  %v1144_v25 = vunpack.c.h.bf16 %v1254_v17  ;;  %v1143_v26 = vunpack.c.l.bf16 %v1254_v17  ;;  %v1256_v42 = vld [vmem:[%s1430_s11 + $0x60] sm:$0xff]  }
  0xb7   : > { %v464_v38 = vadd.f32 %v1527_v49, %v425_v24  ;;  %v1152_v48 = vunpack.c.h.bf16 %v1256_v42  ;;  %v434_v17 = vmul.f32 %v1156_v5, %v1517_v41  ;;  %v501_v23 = vmax.f32 %v469_v9, 0.0 }
  0xb8   : > { %v1183_v54 = vpack.c.bf16 %v709_v50, %v708_v51  ;;  %v428_v39 = vmul.f32 %v1144_v25, %v1517_v41  ;;  %v427_v40 = vmul.f32 %v1143_v26, %v1517_v41  ;;  %v1151_v50 = vunpack.c.l.bf16 %v1256_v42  ;;  %v1259_v25 = vld [vmem:[%s1430_s11 + $0x78] sm:$0xff]  }
  0xb9   : > { %v590_v57 = vpop.permute.xlu1 %589  ;;  %v585_v58 = vpop.permute.xlu0 %584  ;;  %v500_v24 = vmax.f32 %v468_v10, 0.0  ;;  %v473_v31 = vadd.f32 %v1527_v49, %v434_v17 }
  0xba   : > { %1262 = vst [vmem:[%s1435_s14 + $0x18] sm:$0xff] %v1183_v54   ;;  %v711_v63 = vmul.f32 %v590_v57, %v487_v52  ;;  %v710_v0 = vmul.f32 %v585_v58, %v486_v53  ;;  %v497_v53 = vmax.f32 %v465_v37, 0.0  ;;  %v496_v54 = vmax.f32 %v464_v38, 0.0 }
  0xbb   : > { %v467_v55 = vadd.f32 %v1527_v49, %v428_v39  ;;  %v466_v56 = vadd.f32 %v1527_v49, %v427_v40  ;;  %v1164_v37 = vunpack.c.h.bf16 %v1259_v25  ;;  %v1163_v38 = vunpack.c.l.bf16 %v1259_v25 }
  0xbc   : > { %v1188_v4 = vpack.c.bf16 %v711_v63, %v710_v0  ;;  %v432_v63 = vmul.f32 %v1152_v48, %v1517_v41  ;;  %v431_v0 = vmul.f32 %v1151_v50, %v1517_v41 }
  0xbd   : > { %v600_v7 = vpop.permute.xlu1 %599  ;;  %v595_v8 = vpop.permute.xlu0 %594  ;;  %v499_v3 = vmax.f32 %v467_v55, 0.0  ;;  %v438_v50 = vmul.f32 %v1164_v37, %v1517_v41 }
  0xbe   : > { %1263 = vst [vmem:[%s1435_s14 + $0x20] sm:$0xff] %v1188_v4   ;;  %v713_v13 = vmul.f32 %v600_v7, %v489_v1  ;;  %v712_v14 = vmul.f32 %v595_v8, %v488_v2  ;;  %v498_v4 = vmax.f32 %v466_v56, 0.0 }
  0xbf   : > { %v477_v59 = vadd.f32 %v1527_v49, %v438_v50 }
  0xc0   : > { %v1193_v18 = vpack.c.bf16 %v713_v13, %v712_v14  ;;  %v471_v13 = vadd.f32 %v1527_v49, %v432_v63  ;;  %v470_v14 = vadd.f32 %v1527_v49, %v431_v0 }
  0xc1   : > { %v610_v21 = vpop.permute.xlu1 %609  ;;  %v605_v22 = vpop.permute.xlu0 %604 }
  0xc2   : > { %1264 = vst [vmem:[%s1435_s14 + $0x28] sm:$0xff] %v1193_v18   ;;  %v715_v27 = vmul.f32 %v610_v21, %v491_v15  ;;  %v714_v28 = vmul.f32 %v605_v22, %v490_v16  ;;  %v433_v18 = vmul.f32 %v1155_v6, %v1517_v41 }
  0xc4   : > { %v1198_v32 = vpack.c.bf16 %v715_v27, %v714_v28  ;;  %v503_v27 = vmax.f32 %v471_v13, 0.0  ;;  %v502_v28 = vmax.f32 %v470_v14, 0.0 }
  0xc5   : > { %v620_v35 = vpop.permute.xlu1 %619  ;;  %v615_v36 = vpop.permute.xlu0 %614 }
  0xc6   : > { %1265 = vst [vmem:[%s1435_s14 + $0x30] sm:$0xff] %v1198_v32   ;;  %v717_v43 = vmul.f32 %v620_v35, %v493_v29  ;;  %v716_v44 = vmul.f32 %v615_v36, %v492_v30  ;;  %v472_v32 = vadd.f32 %v1527_v49, %v433_v18 }
  0xc8   : > { %v1203_v47 = vpack.c.bf16 %v717_v43, %v716_v44  ;;  %v505_v43 = vmax.f32 %v473_v31, 0.0  ;;  %v504_v44 = vmax.f32 %v472_v32, 0.0 }
  0xc9   : > { %v630_v51 = vpop.permute.xlu1 %629  ;;  %v625_v52 = vpop.permute.xlu0 %624 }
  0xca   : > { %1266 = vst [vmem:[%s1435_s14 + $0x38] sm:$0xff] %v1203_v47   ;;  %v719_v57 = vmul.f32 %v630_v51, %v495_v33  ;;  %v718_v58 = vmul.f32 %v625_v52, %v494_v34  ;;  %v436_v33 = vmul.f32 %v1160_v19, %v1517_v41  ;;  %v435_v34 = vmul.f32 %v1159_v20, %v1517_v41 }
  0xcb   : > { %v437_v51 = vmul.f32 %v1163_v38, %v1517_v41 }
  0xcc   : > { %v1208_v62 = vpack.c.bf16 %v719_v57, %v718_v58  ;;  %v475_v45 = vadd.f32 %v1527_v49, %v436_v33  ;;  %v474_v46 = vadd.f32 %v1527_v49, %v435_v34 }
  0xcd   : > { %v640_v1 = vpop.permute.xlu1 %639  ;;  %v635_v2 = vpop.permute.xlu0 %634  ;;  %v476_v60 = vadd.f32 %v1527_v49, %v437_v51 }
  0xce   : > { %1267 = vst [vmem:[%s1435_s14 + $0x40] sm:$0xff] %v1208_v62   ;;  %v721_v7 = vmul.f32 %v640_v1, %v497_v53  ;;  %v720_v8 = vmul.f32 %v635_v2, %v496_v54  ;;  %v507_v55 = vmax.f32 %v475_v45, 0.0  ;;  %v506_v56 = vmax.f32 %v474_v46, 0.0 }
  0xcf   : > { %v509_v1 = vmax.f32 %v477_v59, 0.0  ;;  %v508_v2 = vmax.f32 %v476_v60, 0.0 }
  0xd0   : > { %v1213_v12 = vpack.c.bf16 %v721_v7, %v720_v8 }
  0xd1   : > { %v650_v15 = vpop.permute.xlu1 %649  ;;  %v645_v16 = vpop.permute.xlu0 %644 }
  0xd2   : > { %1268 = vst [vmem:[%s1435_s14 + $0x48] sm:$0xff] %v1213_v12   ;;  %v723_v21 = vmul.f32 %v650_v15, %v499_v3  ;;  %v722_v22 = vmul.f32 %v645_v16, %v498_v4 }
  0xd4   : > { %v1218_v26 = vpack.c.bf16 %v723_v21, %v722_v22 }
  0xd5   : > { %v660_v29 = vpop.permute.xlu1 %659  ;;  %v655_v30 = vpop.permute.xlu0 %654 }
  0xd6   : > { %1269 = vst [vmem:[%s1435_s14 + $0x50] sm:$0xff] %v1218_v26   ;;  %v725_v35 = vmul.f32 %v660_v29, %v501_v23  ;;  %v724_v36 = vmul.f32 %v655_v30, %v500_v24 }
  0xd8   : > { %v1223_v39 = vpack.c.bf16 %v725_v35, %v724_v36 }
  0xd9   : > { %v670_v40 = vpop.permute.xlu1 %669  ;;  %v665_v42 = vpop.permute.xlu0 %664 }
  0xda   : > { %1270 = vst [vmem:[%s1435_s14 + $0x58] sm:$0xff] %v1223_v39   ;;  %v727_v47 = vmul.f32 %v670_v40, %v503_v27  ;;  %v726_v48 = vmul.f32 %v665_v42, %v502_v28 }
  0xdc   : > { %v1228_v52 = vpack.c.bf16 %v727_v47, %v726_v48 }
  0xdd   : > { %v680_v53 = vpop.permute.xlu1 %679  ;;  %v675_v54 = vpop.permute.xlu0 %674 }
  0xde   : > { %1271 = vst [vmem:[%s1435_s14 + $0x60] sm:$0xff] %v1228_v52   ;;  %v729_v57 = vmul.f32 %v680_v53, %v505_v43  ;;  %v728_v58 = vmul.f32 %v675_v54, %v504_v44 }
  0xe0   : > { %v1233_v61 = vpack.c.bf16 %v729_v57, %v728_v58 }
  0xe1   : > { %v690_v62 = vpop.permute.xlu1 %689  ;;  %v685_v63 = vpop.permute.xlu0 %684 }
  0xe2   : > { %1272 = vst [vmem:[%s1435_s14 + $0x68] sm:$0xff] %v1233_v61   ;;  %v731_v0 = vmul.f32 %v690_v62, %v507_v55  ;;  %v730_v41 = vmul.f32 %v685_v63, %v506_v56 }
  0xe4   : > { %v1238_v3 = vpack.c.bf16 %v731_v0, %v730_v41 }
  0xe5   : > { %v700_v4 = vpop.permute.xlu1 %699  ;;  %v695_v5 = vpop.permute.xlu0 %694 }
  0xe6   : > { %1273 = vst [vmem:[%s1435_s14 + $0x70] sm:$0xff] %v1238_v3   ;;  %v733_v6 = vmul.f32 %v700_v4, %v509_v1  ;;  %v732_v7 = vmul.f32 %v695_v5, %v508_v2 }
  0xe8   : > { %v1243_v8 = vpack.c.bf16 %v733_v6, %v732_v7 }
  0xea   : > { %1274 = vst [vmem:[%s1435_s14 + $0x78] sm:$0xff] %v1243_v8  }
  0xeb PF: > { %s14_s19 = sadd.s32 1, %s1357_s19   ;;  %s1638_s15 = smov %s1349_s17 }
  0xec   : > { %p11_p13 = scmp.ge.s32.totalorder %s14_s19, 10   ;;  %s1639_s16 = smov %s1353_s18 }
  0xed   : > { %s1640_s17 = smov %s1643_s20  ;;  %s1641_s18 = smov %s1647_s21 }
  0xee   :  { %13 = sbr.rel (!%p11_p13) target bundleno = 3 (0x3), region = 77 }

// kernel: residual_block.7
= control target key start
LH: loop header
LB: loop body
LE: loop exit
PB: predicated region body
PF: predicated region fallthrough
CT: control target
= control target key end

     0   :  { %s1496_s24 = smov 0   ;;  %s1498_s25 = smov 0   ;;  %s1892_s0 = inlined_call_operand.vmem [shape: bf16[2,512,128], index: 0, kind: input, shape index: {}]   ;;  %s1893_s1 = inlined_call_operand.vmem [shape: f32[1,128], index: 1, kind: input, shape index: {}]   ;;  %s1894_s2 = inlined_call_operand.vmem [shape: f32[1,128], index: 2, kind: input, shape index: {}]   ;;  %s1895_s3 = inlined_call_operand.vmem [shape: bf16[2,1024,128], index: 3, kind: input, shape index: {}]   ;;  %s1896_s4 = inlined_call_operand.vmem [shape: bf16[128,128], index: 4, kind: input, shape index: {}]   ;;  %s1897_s5 = inlined_call_operand.vmem [shape: f32[1,128], index: 5, kind: input, shape index: {}]   ;;  %s1898_s6 = inlined_call_operand.vmem [shape: f32[1,128], index: 6, kind: input, shape index: {}]   ;;  %s1899_s7 = inlined_call_operand.vmem [shape: f32[2,512,128], index: 7, kind: output, shape index: {}]  }
   0x1   :  { %s1500_s26 = smov 0   ;;  %s1502_s27 = smov 0  }
   0x2   :  { %s1504_s28 = smov 0  }
   0x3 LB: > { %s26_s29 = sadd.s32 1, %s1446_s26  ;;  %s29_s30 = sadd.s32 1, %s1450_s27  ;;  %s1454_s28 = sphi %s1504_s28, %s17_s28   ;;  %s1450_s27 = sphi %s1502_s27, %s1903_s27   ;;  %s1446_s26 = sphi %s1500_s26, %s1902_s26   ;;  %s1442_s25 = sphi %s1498_s25, %s1901_s25   ;;  %s1438_s24 = sphi %s1496_s24, %s1900_s24  }
   0x4   : > { %p27_p0 = scmp.ge.s32.totalorder %s26_s29, 2  ;;  %p1143_p1 = scmp.ge.s32.totalorder %s1454_s28, 1 }
   0x5   : > { %p279_p2 = scmp.lt.s32.totalorder %s1454_s28, 5 }
   0x6   : > { %s1905_s29 = smov (%p27_p0, %s26_s29), 0  ;;  %s1907_s30 = smov (!%p27_p0, %s29_s30), %s1450_s27 }
   0x7   : > { %p280_p3 = pnand %p1143_p1, %p279_p2  ;;  %p31_p4 = scmp.ge.s32.totalorder %s1907_s30, 2 }
   0x8   : > { %v1392_v0 = vld [vmem:[%s1896_s4] sm:$0xff] (!%p280_p3)   ;;  %s1144_s10 = sshll.u32 (!%p280_p3), %s1438_s24, 5  ;;  %v1393_v1 = vld [vmem:[%s1896_s4 + $0x8] sm:$0xff] (!%p280_p3)   ;;  %p330_p5 = scmp.lt.s32.totalorder (!%p280_p3), %s1442_s25, 1  ;;  %v1394_v2 = vld [vmem:[%s1896_s4 + $0x10] sm:$0xff] (!%p280_p3)  }
   0x9   : > { %s1909_s30 = smov (%p31_p4, %s1907_s30), 0  ;;  %283 = sbr.rel (%p280_p3) target bundleno = 292 (0x124), region = 48 }
   0xa   : > { %1288 = vmatprep.subr.bf16.mxu0 (!%p280_p3), %v1392_v0  ;;  %1336 = vmatprep.subr.bf16.mxu1 (!%p280_p3), %v1392_v0  ;;  %s1184_s13 = sadd.s32 (!%p280_p3), 32, %s1144_s10  ;;  %p332_p7 = scmp.lt.s32.totalorder (!%p280_p3), %s1144_s10, 63  ;;  %v1395_v3 = vld [vmem:[%s1896_s4 + $0x18] sm:$0xff] (!%p280_p3)   ;;  %v1396_v4 = vld [vmem:[%s1896_s4 + $0x20] sm:$0xff] (!%p280_p3)   ;;  %v1397_v7 = vld [vmem:[%s1896_s4 + $0x28] sm:$0xff] (!%p280_p3)  }
   0xb   : > { %1289 = vmatpush3.bf16.msra.mxu0 (!%p280_p3), %v1392_v0  ;;  %1344 = vmatpush3.bf16.msra.mxu1 (!%p280_p3), %v1392_v0  ;;  %p343_p6 = scmp.lt.s32.totalorder (!%p280_p3), %s1184_s13, 127  ;;  %v1398_v8 = vld [vmem:[%s1896_s4 + $0x30] sm:$0xff] (!%p280_p3)   ;;  %v1399_v9 = vld [vmem:[%s1896_s4 + $0x38] sm:$0xff] (!%p280_p3)   ;;  %v1590_v34 = vld [vmem:[%s1893_s1] ss:$0 sm:$0xff] (!%p280_p3) }
   0xc   : > { %1290 = vmatprep.subr.bf16.mxu0 (!%p280_p3), %v1393_v1  ;;  %1337 = vmatprep.subr.bf16.mxu1 (!%p280_p3), %v1393_v1  ;;  %v1597_v49 = vld [vmem:[%s1894_s2] ss:$0 sm:$0xff] (!%p280_p3) }
   0xf   : > { %1291 = vmatpush3.bf16.msra.mxu0 (!%p280_p3), %v1393_v1  ;;  %1345 = vmatpush3.bf16.msra.mxu1 (!%p280_p3), %v1393_v1 }
  0x10   : > { %s1911_s25 = smov (!%p330_p5, %s1442_s25), 1  ;;  %s1913_s13 = smov (!%p343_p6, %s1184_s13), 127  ;;  %1292 = vmatprep.subr.bf16.mxu0 %v1394_v2  ;;  %1338 = vmatprep.subr.bf16.mxu1 %v1394_v2 }
  0x11   : > { %s1148_s16 = sshll.u32 %s1911_s25, 7  ;;  %s1145_s9 = sshll.u32 %s1911_s25, 6 }
  0x12   : > { %s346_s19 = sadd.s32 %s1148_s16, %s1913_s13  ;;  %s1915_s10 = smov (!%p332_p7, %s1144_s10), 63 }
  0x13   : > { %s1149_s20 = sshll.u32 %s346_s19, 2  ;;  %1293 = vmatpush3.bf16.msra.mxu0 %v1394_v2  ;;  %1346 = vmatpush3.bf16.msra.mxu1 %v1394_v2  ;;  %s1548_s11 = sadd.s32 %s1145_s9, %s1915_s10 }
  0x14   : > { %s1544_s8 = scalar_lea.vmem %s1895_s3, %s1149_s20  ;;  %1294 = vmatprep.subr.bf16.mxu0 %v1395_v3  ;;  %1339 = vmatprep.subr.bf16.mxu1 %v1395_v3  ;;  %s1146_s16 = sshll.u32 %s1548_s11, 2 }
  0x15   : > { %v1400_v5 = vld [vmem:[%s1544_s8] sm:$0xff]   ;;  %v1402_v10 = vld [vmem:[%s1544_s8 + $0x8] sm:$0xff]   ;;  %v1404_v12 = vld [vmem:[%s1544_s8 + $0x10] sm:$0xff]   ;;  %s1577_s19 = scalar_lea.vmem %s1892_s0, %s1146_s16  ;;  %s1152_s13 = sshll.u32 %s1548_s11, 3 }
  0x16   : > { %v1401_v6 = vld [vmem:[%s1544_s8 + $0x40] sm:$0xff]   ;;  %1304 = vmatprep.mubr.bf16.mxu0 %v1400_v5  ;;  %v1403_v11 = vld [vmem:[%s1544_s8 + $0x48] sm:$0xff]   ;;  %v1405_v13 = vld [vmem:[%s1544_s8 + $0x50] sm:$0xff]   ;;  %s1763_s14 = scalar_lea.vmem %s1899_s7, %s1152_s13 }
  0x17   : > { %1320 = vmatprep.mubr.bf16.mxu1 %v1401_v6  ;;  %1295 = vmatpush3.bf16.msra.mxu0 %v1395_v3  ;;  %v1406_v14 = vld [vmem:[%s1544_s8 + $0x18] sm:$0xff]   ;;  %v1408_v16 = vld [vmem:[%s1544_s8 + $0x20] sm:$0xff]   ;;  %v1410_v18 = vld [vmem:[%s1544_s8 + $0x28] sm:$0xff]  }
  0x18   : > { %1347 = vmatpush3.bf16.msra.mxu1 %v1395_v3  ;;  %1296 = vmatprep.subr.bf16.mxu0 %v1396_v4  ;;  %v1407_v15 = vld [vmem:[%s1544_s8 + $0x58] sm:$0xff]   ;;  %v1409_v17 = vld [vmem:[%s1544_s8 + $0x60] sm:$0xff]   ;;  %v1411_v19 = vld [vmem:[%s1544_s8 + $0x68] sm:$0xff]  }
  0x19   : > { %1340 = vmatprep.subr.bf16.mxu1 %v1396_v4  ;;  %v1412_v20 = vld [vmem:[%s1544_s8 + $0x30] sm:$0xff]   ;;  %v1414_v22 = vld [vmem:[%s1544_s8 + $0x38] sm:$0xff]   ;;  %v1249_v24 = vld [vmem:[%s1577_s19 + $0x8] sm:$0xff]  }
  0x1a   : > { %v1413_v21 = vld [vmem:[%s1544_s8 + $0x70] sm:$0xff]   ;;  %v1415_v23 = vld [vmem:[%s1544_s8 + $0x78] sm:$0xff]   ;;  %v1257_v25 = vld [vmem:[%s1577_s19 + $0x48] sm:$0xff]   ;;  %v1191_v29 = vunpack.c.l.bf16 %v1249_v24  ;;  %v1192_v37 = vunpack.c.h.bf16 %v1249_v24 }
  0x1b   : > { %1297 = vmatpush3.bf16.msra.mxu0 %v1396_v4  ;;  %v1186_v26 = vld [vmem:[%s1577_s19] sm:$0xff]   ;;  %v1251_v28 = vld [vmem:[%s1577_s19 + $0x18] sm:$0xff]   ;;  %v1223_v30 = vunpack.c.l.bf16 %v1257_v25  ;;  %v1250_v32 = vld [vmem:[%s1577_s19 + $0x10] sm:$0xff]   ;;  %v1224_v38 = vunpack.c.h.bf16 %v1257_v25 }
  0x1c   : > { %1348 = vmatpush3.bf16.msra.mxu1 %v1396_v4  ;;  %1298 = vmatprep.subr.bf16.mxu0 %v1397_v7  ;;  %v1256_v27 = vld [vmem:[%s1577_s19 + $0x40] sm:$0xff]   ;;  %v1259_v31 = vld [vmem:[%s1577_s19 + $0x58] sm:$0xff]   ;;  %v1258_v33 = vld [vmem:[%s1577_s19 + $0x50] sm:$0xff]   ;;  %v1187_v35 = vunpack.c.l.bf16 %v1186_v26  ;;  %v1188_v39 = vunpack.c.h.bf16 %v1186_v26  ;;  %v1199_v41 = vunpack.c.l.bf16 %v1251_v28  ;;  %v1195_v43 = vunpack.c.l.bf16 %v1250_v32 }
  0x1d   : > { %1341 = vmatprep.subr.bf16.mxu1 %v1397_v7  ;;  %v1219_v36 = vunpack.c.l.bf16 %v1256_v27  ;;  %v1220_v40 = vunpack.c.h.bf16 %v1256_v27  ;;  %v1231_v42 = vunpack.c.l.bf16 %v1259_v31  ;;  %v1227_v44 = vunpack.c.l.bf16 %v1258_v33  ;;  %v1253_v6 = vld [vmem:[%s1577_s19 + $0x28] sm:$0xff]   ;;  %v1254_v24 = vld [vmem:[%s1577_s19 + $0x30] sm:$0xff]  }
  0x1e   : > { %v435_v45 = vmul.f32 %v1191_v29, %v1590_v34  ;;  %v451_v46 = vmul.f32 %v1223_v30, %v1590_v34  ;;  %v1200_v47 = vunpack.c.h.bf16 %v1251_v28  ;;  %v1232_v48 = vunpack.c.h.bf16 %v1259_v31  ;;  %v1262_v25 = vld [vmem:[%s1577_s19 + $0x70] sm:$0xff]  }
  0x1f   : > { %1299 = vmatpush3.bf16.msra.mxu0 %v1397_v7  ;;  %v433_v50 = vmul.f32 %v1187_v35, %v1590_v34  ;;  %v449_v51 = vmul.f32 %v1219_v36, %v1590_v34  ;;  %v1196_v52 = vunpack.c.h.bf16 %v1250_v32  ;;  %v1228_v53 = vunpack.c.h.bf16 %v1258_v33 }
  0x20   : > { %1349 = vmatpush3.bf16.msra.mxu1 %v1397_v7  ;;  %1300 = vmatprep.subr.bf16.mxu0 %v1398_v8  ;;  %v436_v54 = vmul.f32 %v1192_v37, %v1590_v34  ;;  %v452_v55 = vmul.f32 %v1224_v38, %v1590_v34  ;;  %v434_v56 = vmul.f32 %v1188_v39, %v1590_v34  ;;  %v1261_v7 = vld [vmem:[%s1577_s19 + $0x68] sm:$0xff]   ;;  %v1208_v30 = vunpack.c.h.bf16 %v1253_v6 }
  0x21   : > { %1342 = vmatprep.subr.bf16.mxu1 %v1398_v8  ;;  %v450_v57 = vmul.f32 %v1220_v40, %v1590_v34  ;;  %v439_v58 = vmul.f32 %v1199_v41, %v1590_v34  ;;  %v455_v59 = vmul.f32 %v1231_v42, %v1590_v34  ;;  %v437_v60 = vmul.f32 %v1195_v43, %v1590_v34 }
  0x22   : > { %v453_v61 = vmul.f32 %v1227_v44, %v1590_v34  ;;  %v1610_v62 = vadd.f32 %v1597_v49, %v435_v45  ;;  %v1613_v63 = vadd.f32 %v1597_v49, %v451_v46  ;;  %v440_v0 = vmul.f32 %v1200_v47, %v1590_v34 }
  0x23   : > { %1301 = vmatpush3.bf16.msra.mxu0 %v1398_v8  ;;  %v456_v1 = vmul.f32 %v1232_v48, %v1590_v34  ;;  %v1618_v2 = vadd.f32 %v1597_v49, %v433_v50  ;;  %v1621_v3 = vadd.f32 %v1597_v49, %v449_v51  ;;  %v438_v4 = vmul.f32 %v1196_v52, %v1590_v34 }
  0x24   : > { %1350 = vmatpush3.bf16.msra.mxu1 %v1398_v8  ;;  %1302 = vmatprep.subr.bf16.mxu0 %v1399_v9  ;;  %v454_v5 = vmul.f32 %v1228_v53, %v1590_v34  ;;  %v1628_v8 = vadd.f32 %v1597_v49, %v436_v54  ;;  %v1240_v31 = vunpack.c.h.bf16 %v1261_v7  ;;  %v1211_v37 = vunpack.c.l.bf16 %v1254_v24 }
  0x25   : > { %1343 = vmatprep.subr.bf16.mxu1 %v1399_v9  ;;  %v1664_v26 = vadd.f32 %v1597_v49, %v438_v4  ;;  %v1243_v38 = vunpack.c.l.bf16 %v1262_v25  ;;  %v1212_v45 = vunpack.c.h.bf16 %v1254_v24  ;;  %v1244_v46 = vunpack.c.h.bf16 %v1262_v25 }
  0x26   : > { %v1667_v27 = vadd.f32 %v1597_v49, %v454_v5  ;;  %v444_v47 = vmul.f32 %v1208_v30, %v1590_v34  ;;  %v460_v48 = vmul.f32 %v1240_v31, %v1590_v34  ;;  %v445_v54 = vmul.f32 %v1211_v37, %v1590_v34 }
  0x27   : > { %1303 = vmatpush3.bf16.msra.mxu0 %v1399_v9  ;;  %v462_v4 = vmul.f32 %v1244_v46, %v1590_v34 }
  0x28   : > { %1351 = vmatpush3.bf16.msra.mxu1 %v1399_v9  ;;  %v1631_v9 = vadd.f32 %v1597_v49, %v452_v55  ;;  %v461_v55 = vmul.f32 %v1243_v38, %v1590_v34  ;;  %v1703_v5 = vadd.f32 %v1597_v49, %v444_v47 }
  0x2a   : > { %1305 = vmatmul.mubr.bf16.vlgmr.msra.gmra.mrb[0].mxu0 %v1402_v10  ;;  %v1634_v10 = vadd.f32 %v1597_v49, %v434_v56  ;;  %v1729_v24 = vadd.f32 %v1597_v49, %v461_v55 }
  0x2b   : > { %1321 = vmatmul.mubr.bf16.vlgmr.msra.gmra.mrb[0].mxu1 %v1403_v11  ;;  %1308 = vmatprep.mubr.bf16.mxu0 %v1404_v12  ;;  %v1637_v11 = vadd.f32 %v1597_v49, %v450_v57  ;;  %v1252_v12 = vld [vmem:[%s1577_s19 + $0x20] sm:$0xff]  }
  0x2c   : > { %1324 = vmatprep.mubr.bf16.mxu1 %v1405_v13  ;;  %v1260_v13 = vld [vmem:[%s1577_s19 + $0x60] sm:$0xff]   ;;  %v1203_v28 = vunpack.c.l.bf16 %v1252_v12  ;;  %v1204_v32 = vunpack.c.h.bf16 %v1252_v12 }
  0x2d   : > { %v1235_v29 = vunpack.c.l.bf16 %v1260_v13  ;;  %v1236_v33 = vunpack.c.h.bf16 %v1260_v13 }
  0x2e   : > { %v441_v43 = vmul.f32 %v1203_v28, %v1590_v34  ;;  %v442_v50 = vmul.f32 %v1204_v32, %v1590_v34 }
  0x2f   : > { %v457_v44 = vmul.f32 %v1235_v29, %v1590_v34  ;;  %v458_v51 = vmul.f32 %v1236_v33, %v1590_v34 }
  0x31   : > { %v1712_v12 = vadd.f32 %v1597_v49, %v458_v51 }
  0x32   : > { %1309 = vmatmul.mubr.bf16.gmra.mrb[4].mxu0 %v1406_v14  ;;  %v1642_v14 = vadd.f32 %v1597_v49, %v439_v58 }
  0x33   : > { %1325 = vmatmul.mubr.bf16.gmra.mrb[4].mxu1 %v1407_v15  ;;  %1312 = vmatprep.mubr.bf16.mxu0 %v1408_v16  ;;  %v1645_v15 = vadd.f32 %v1597_v49, %v455_v59  ;;  %v1648_v16 = vadd.f32 %v1597_v49, %v437_v60  ;;  %v1692_v60 = vld [vmem:[%s1897_s5] ss:$0 sm:$0xff] }
  0x34   : > { %1328 = vmatprep.mubr.bf16.mxu1 %v1409_v17  ;;  %v1651_v17 = vadd.f32 %v1597_v49, %v453_v61  ;;  %v1695_v61 = vadd.f32 %v1597_v49, %v441_v43 }
  0x3a   : > { %1313 = vmatmul.mubr.bf16.gmra.mrb[8].mxu0 %v1410_v18  ;;  %v1255_v18 = vld [vmem:[%s1577_s19 + $0x38] sm:$0xff]  }
  0x3b   : > { %1329 = vmatmul.mubr.bf16.gmra.mrb[8].mxu1 %v1411_v19  ;;  %1316 = vmatprep.mubr.bf16.mxu0 %v1412_v20  ;;  %v1655_v19 = vadd.f32 %v1597_v49, %v440_v0  ;;  %v1658_v20 = vadd.f32 %v1597_v49, %v456_v1  ;;  %v1215_v35 = vunpack.c.l.bf16 %v1255_v18  ;;  %v1216_v41 = vunpack.c.h.bf16 %v1255_v18  ;;  %v1717_v18 = vld [vmem:[%s1898_s6] ss:$0 sm:$0xff] }
  0x3c   : > { %1332 = vmatprep.mubr.bf16.mxu1 %v1413_v21  ;;  %v1207_v21 = vunpack.c.l.bf16 %v1253_v6  ;;  %v1698_v0 = vadd.f32 %v1597_v49, %v457_v44  ;;  %v446_v1 = vmul.f32 %v1212_v45, %v1590_v34  ;;  %v1706_v6 = vadd.f32 %v1597_v49, %v460_v48 }
  0x3d   : > { %v447_v52 = vmul.f32 %v1215_v35, %v1590_v34  ;;  %v448_v58 = vmul.f32 %v1216_v41, %v1590_v34 }
  0x3e   : > { %v443_v39 = vmul.f32 %v1207_v21, %v1590_v34  ;;  %v1742_v38 = vadd.f32 %v1597_v49, %v446_v1 }
  0x3f   : > { %v1734_v31 = vadd.f32 %v1597_v49, %v448_v58 }
  0x40   : > { %v1682_v56 = vadd.f32 %v1597_v49, %v443_v39  ;;  %v1745_v39 = vadd.f32 %v1597_v49, %v462_v4 }
  0x42   : > { %1317 = vmatmul.mubr.bf16.gmra.mrb[12].mxu0 %v1414_v22  ;;  %v1239_v22 = vunpack.c.l.bf16 %v1261_v7  ;;  %v1709_v7 = vadd.f32 %v1597_v49, %v442_v50 }
  0x43   : > { %1333 = vmatmul.mubr.bf16.gmra.mrb[12].mxu1 %v1415_v23  ;;  %v1263_v23 = vld [vmem:[%s1577_s19 + $0x78] sm:$0xff]  }
  0x44   : > { %v1247_v36 = vunpack.c.l.bf16 %v1263_v23  ;;  %v459_v40 = vmul.f32 %v1239_v22, %v1590_v34  ;;  %v1248_v42 = vunpack.c.h.bf16 %v1263_v23  ;;  %v1726_v23 = vadd.f32 %v1597_v49, %v445_v54 }
  0x46   : > { %v463_v53 = vmul.f32 %v1247_v36, %v1590_v34  ;;  %v1685_v57 = vadd.f32 %v1597_v49, %v459_v40  ;;  %v464_v59 = vmul.f32 %v1248_v42, %v1590_v34  ;;  %v1720_v34 = vadd.f32 %v1597_v49, %v447_v52 }
  0x48   : > { %v1723_v22 = vadd.f32 %v1597_v49, %v463_v53  ;;  %v1737_v32 = vadd.f32 %v1597_v49, %v464_v59 }
  0xfd   : > { %v1306_v13 = vpop.f32.mrb[0].mxu0 }
  0xfe   : > { %v1322_v21 = vpop.f32.mrb[0].mxu1  ;;  %v866_v25 = vmul.f32 %v1306_v13, %v1692_v60  ;;  %v730_v29 = vpop.f32.mrb[1].mxu0 }
  0xff   : > { %v882_v28 = vmul.f32 %v1322_v21, %v1692_v60  ;;  %v794_v30 = vpop.f32.mrb[1].mxu1  ;;  %v864_v33 = vmul.f32 %v1692_v60, %v730_v29  ;;  %v1307_v36 = vpop.f32.mrb[2].mxu0 }
 0x100   : > { %v880_v35 = vmul.f32 %v1692_v60, %v794_v30  ;;  %v1323_v37 = vpop.f32.mrb[2].mxu1  ;;  %v905_v40 = vadd.f32 %v1717_v18, %v866_v25  ;;  %v867_v42 = vmul.f32 %v1307_v36, %v1692_v60  ;;  %v733_v44 = vpop.f32.mrb[3].mxu0 }
 0x101   : > { %v921_v41 = vadd.f32 %v1717_v18, %v882_v28  ;;  %v883_v43 = vmul.f32 %v1323_v37, %v1692_v60  ;;  %v797_v45 = vpop.f32.mrb[3].mxu1  ;;  %v903_v46 = vadd.f32 %v1717_v18, %v864_v33  ;;  %v865_v48 = vmul.f32 %v1692_v60, %v733_v44 }
 0x102   : > { %v919_v47 = vadd.f32 %v1717_v18, %v880_v35  ;;  %v881_v49 = vmul.f32 %v1692_v60, %v797_v45  ;;  %v937_v50 = vadd.f32 %v905_v40, %v1610_v62  ;;  %v906_v52 = vadd.f32 %v1717_v18, %v867_v42 }
 0x103   : > { %v953_v51 = vadd.f32 %v921_v41, %v1613_v63  ;;  %v922_v53 = vadd.f32 %v1717_v18, %v883_v43  ;;  %v935_v54 = vadd.f32 %v903_v46, %v1618_v2  ;;  %v904_v58 = vadd.f32 %v1717_v18, %v865_v48 }
 0x104   : > { %v951_v55 = vadd.f32 %v919_v47, %v1621_v3  ;;  %v920_v62 = vadd.f32 %v1717_v18, %v881_v49  ;;  %v969_v63 = vmax.f32 %v937_v50, 0.0  ;;  %v938_v1 = vadd.f32 %v906_v52, %v1628_v8 }
 0x105   : > { %v985_v59 = vmax.f32 %v953_v51, 0.0  ;;  %v954_v4 = vadd.f32 %v922_v53, %v1631_v9  ;;  %v967_v13 = vmax.f32 %v935_v54, 0.0  ;;  %v936_v25 = vadd.f32 %v904_v58, %v1634_v10  ;;  %v1310_v28 = vpop.f32.mrb[4].mxu0 }
 0x106   : > { %v983_v21 = vmax.f32 %v951_v55, 0.0  ;;  %v952_v2 = vadd.f32 %v920_v62, %v1637_v11  ;;  %v1326_v3 = vpop.f32.mrb[4].mxu1  ;;  %1001 = vst [vmem:[%s1763_s14 + $0x10] sm:$0xff] %v969_v63  ;;  %v970_v29 = vmax.f32 %v938_v1, 0.0  ;;  %v870_v8 = vmul.f32 %v1310_v28, %v1692_v60  ;;  %v746_v9 = vpop.f32.mrb[5].mxu0 }
 0x107   : > { %1017 = vst [vmem:[%s1763_s14 + $0x90] sm:$0xff] %v985_v59  ;;  %v986_v30 = vmax.f32 %v954_v4, 0.0  ;;  %v886_v33 = vmul.f32 %v1326_v3, %v1692_v60  ;;  %v810_v35 = vpop.f32.mrb[5].mxu1  ;;  %999 = vst [vmem:[%s1763_s14] sm:$0xff] %v967_v13  ;;  %v968_v10 = vmax.f32 %v936_v25, 0.0  ;;  %v868_v36 = vmul.f32 %v1692_v60, %v746_v9  ;;  %v1311_v40 = vpop.f32.mrb[6].mxu0 }
 0x108   : > { %1015 = vst [vmem:[%s1763_s14 + $0x80] sm:$0xff] %v983_v21  ;;  %v984_v11 = vmax.f32 %v952_v2, 0.0  ;;  %v884_v37 = vmul.f32 %v1692_v60, %v810_v35  ;;  %v1327_v41 = vpop.f32.mrb[6].mxu1  ;;  %1002 = vst [vmem:[%s1763_s14 + $0x18] sm:$0xff] %v970_v29  ;;  %v909_v42 = vadd.f32 %v1717_v18, %v870_v8  ;;  %v871_v44 = vmul.f32 %v1311_v40, %v1692_v60  ;;  %v749_v46 = vpop.f32.mrb[7].mxu0 }
 0x109   : > { %1018 = vst [vmem:[%s1763_s14 + $0x98] sm:$0xff] %v986_v30  ;;  %v925_v43 = vadd.f32 %v1717_v18, %v886_v33  ;;  %v887_v45 = vmul.f32 %v1327_v41, %v1692_v60  ;;  %v813_v47 = vpop.f32.mrb[7].mxu1  ;;  %1000 = vst [vmem:[%s1763_s14 + $0x8] sm:$0xff] %v968_v10  ;;  %v907_v48 = vadd.f32 %v1717_v18, %v868_v36 }
 0x10a   : > { %1016 = vst [vmem:[%s1763_s14 + $0x88] sm:$0xff] %v984_v11  ;;  %v923_v49 = vadd.f32 %v1717_v18, %v884_v37  ;;  %v869_v50 = vmul.f32 %v1692_v60, %v749_v46  ;;  %v885_v51 = vmul.f32 %v1692_v60, %v813_v47  ;;  %v941_v52 = vadd.f32 %v909_v42, %v1642_v14 }
 0x10b   : > { %v957_v53 = vadd.f32 %v925_v43, %v1645_v15  ;;  %v910_v54 = vadd.f32 %v1717_v18, %v871_v44  ;;  %v926_v55 = vadd.f32 %v1717_v18, %v887_v45  ;;  %v939_v58 = vadd.f32 %v907_v48, %v1648_v16 }
 0x10c   : > { %v955_v62 = vadd.f32 %v923_v49, %v1651_v17  ;;  %v908_v63 = vadd.f32 %v1717_v18, %v869_v50  ;;  %v924_v59 = vadd.f32 %v1717_v18, %v885_v51  ;;  %v973_v1 = vmax.f32 %v941_v52, 0.0 }
 0x10d   : > { %v989_v4 = vmax.f32 %v957_v53, 0.0  ;;  %v942_v14 = vadd.f32 %v910_v54, %v1655_v19  ;;  %v958_v15 = vadd.f32 %v926_v55, %v1658_v20  ;;  %v971_v13 = vmax.f32 %v939_v58, 0.0  ;;  %v1314_v2 = vpop.f32.mrb[8].mxu0 }
 0x10e   : > { %v987_v21 = vmax.f32 %v955_v62, 0.0  ;;  %v940_v25 = vadd.f32 %v908_v63, %v1664_v26  ;;  %v956_v16 = vadd.f32 %v924_v59, %v1667_v27  ;;  %v1330_v17 = vpop.f32.mrb[8].mxu1  ;;  %1005 = vst [vmem:[%s1763_s14 + $0x30] sm:$0xff] %v973_v1  ;;  %v874_v19 = vmul.f32 %v1314_v2, %v1692_v60  ;;  %v762_v20 = vpop.f32.mrb[9].mxu0 }
 0x10f   : > { %1021 = vst [vmem:[%s1763_s14 + $0xb0] sm:$0xff] %v989_v4  ;;  %v974_v28 = vmax.f32 %v942_v14, 0.0  ;;  %v990_v3 = vmax.f32 %v958_v15, 0.0  ;;  %v890_v29 = vmul.f32 %v1330_v17, %v1692_v60  ;;  %v826_v30 = vpop.f32.mrb[9].mxu1  ;;  %1003 = vst [vmem:[%s1763_s14 + $0x20] sm:$0xff] %v971_v13  ;;  %v872_v8 = vmul.f32 %v1692_v60, %v762_v20  ;;  %v1315_v9 = vpop.f32.mrb[10].mxu0 }
 0x110   : > { %1019 = vst [vmem:[%s1763_s14 + $0xa0] sm:$0xff] %v987_v21  ;;  %v972_v26 = vmax.f32 %v940_v25, 0.0  ;;  %v988_v27 = vmax.f32 %v956_v16, 0.0  ;;  %v888_v33 = vmul.f32 %v1692_v60, %v826_v30  ;;  %v1331_v35 = vpop.f32.mrb[10].mxu1  ;;  %v913_v10 = vadd.f32 %v1717_v18, %v874_v19  ;;  %v765_v40 = vpop.f32.mrb[11].mxu0 }
 0x111   : > { %1006 = vst [vmem:[%s1763_s14 + $0x38] sm:$0xff] %v974_v28  ;;  %1022 = vst [vmem:[%s1763_s14 + $0xb8] sm:$0xff] %v990_v3  ;;  %v929_v11 = vadd.f32 %v1717_v18, %v890_v29  ;;  %v875_v36 = vmul.f32 %v1315_v9, %v1692_v60  ;;  %v891_v37 = vmul.f32 %v1331_v35, %v1692_v60  ;;  %v829_v41 = vpop.f32.mrb[11].mxu1 }
 0x112   : > { %1004 = vst [vmem:[%s1763_s14 + $0x28] sm:$0xff] %v972_v26  ;;  %1020 = vst [vmem:[%s1763_s14 + $0xa8] sm:$0xff] %v988_v27  ;;  %v911_v42 = vadd.f32 %v1717_v18, %v872_v8  ;;  %v927_v43 = vadd.f32 %v1717_v18, %v888_v33  ;;  %v873_v44 = vmul.f32 %v1692_v60, %v765_v40 }
 0x113   : > { %v889_v45 = vmul.f32 %v1692_v60, %v829_v41  ;;  %v945_v46 = vadd.f32 %v913_v10, %v1682_v56  ;;  %v961_v47 = vadd.f32 %v929_v11, %v1685_v57  ;;  %v914_v48 = vadd.f32 %v1717_v18, %v875_v36 }
 0x114   : > { %v930_v49 = vadd.f32 %v1717_v18, %v891_v37  ;;  %v943_v50 = vadd.f32 %v911_v42, %v1695_v61  ;;  %v959_v51 = vadd.f32 %v927_v43, %v1698_v0  ;;  %v912_v52 = vadd.f32 %v1717_v18, %v873_v44 }
 0x115   : > { %v928_v53 = vadd.f32 %v1717_v18, %v889_v45  ;;  %v977_v54 = vmax.f32 %v945_v46, 0.0  ;;  %v993_v55 = vmax.f32 %v961_v47, 0.0  ;;  %v946_v56 = vadd.f32 %v914_v48, %v1703_v5  ;;  %v1318_v59 = vpop.f32.mrb[12].mxu0 }
 0x116   : > { %v962_v57 = vadd.f32 %v930_v49, %v1706_v6  ;;  %v975_v58 = vmax.f32 %v943_v50, 0.0  ;;  %v991_v62 = vmax.f32 %v959_v51, 0.0  ;;  %v944_v63 = vadd.f32 %v912_v52, %v1709_v7  ;;  %v1334_v0 = vpop.f32.mrb[12].mxu1  ;;  %v778_v6 = vpop.f32.mrb[13].mxu0 }
 0x117   : > { %v960_v61 = vadd.f32 %v928_v53, %v1712_v12  ;;  %1009 = vst [vmem:[%s1763_s14 + $0x50] sm:$0xff] %v977_v54  ;;  %1025 = vst [vmem:[%s1763_s14 + $0xd0] sm:$0xff] %v993_v55  ;;  %v978_v1 = vmax.f32 %v946_v56, 0.0  ;;  %v878_v5 = vmul.f32 %v1318_v59, %v1692_v60  ;;  %v894_v14 = vmul.f32 %v1334_v0, %v1692_v60  ;;  %v842_v15 = vpop.f32.mrb[13].mxu1  ;;  %v1319_v25 = vpop.f32.mrb[14].mxu0 }
 0x118   : > { %v994_v4 = vmax.f32 %v962_v57, 0.0  ;;  %1007 = vst [vmem:[%s1763_s14 + $0x40] sm:$0xff] %v975_v58  ;;  %1023 = vst [vmem:[%s1763_s14 + $0xc0] sm:$0xff] %v991_v62  ;;  %v976_v7 = vmax.f32 %v944_v63, 0.0  ;;  %v876_v13 = vmul.f32 %v1692_v60, %v778_v6  ;;  %v892_v21 = vmul.f32 %v1692_v60, %v842_v15  ;;  %v1335_v16 = vpop.f32.mrb[14].mxu1  ;;  %v781_v19 = vpop.f32.mrb[15].mxu0 }
 0x119   : > { %v992_v12 = vmax.f32 %v960_v61, 0.0  ;;  %1010 = vst [vmem:[%s1763_s14 + $0x58] sm:$0xff] %v978_v1  ;;  %v917_v2 = vadd.f32 %v1717_v18, %v878_v5  ;;  %v933_v17 = vadd.f32 %v1717_v18, %v894_v14  ;;  %v879_v28 = vmul.f32 %v1319_v25, %v1692_v60  ;;  %v845_v29 = vpop.f32.mrb[15].mxu1 }
 0x11a   : > { %1026 = vst [vmem:[%s1763_s14 + $0xd8] sm:$0xff] %v994_v4  ;;  %v895_v3 = vmul.f32 %v1335_v16, %v1692_v60  ;;  %1008 = vst [vmem:[%s1763_s14 + $0x48] sm:$0xff] %v976_v7  ;;  %v915_v20 = vadd.f32 %v1717_v18, %v876_v13  ;;  %v931_v30 = vadd.f32 %v1717_v18, %v892_v21 }
 0x11b   : > { %1024 = vst [vmem:[%s1763_s14 + $0xc8] sm:$0xff] %v992_v12  ;;  %v877_v26 = vmul.f32 %v1692_v60, %v781_v19  ;;  %v893_v27 = vmul.f32 %v1692_v60, %v845_v29  ;;  %v949_v8 = vadd.f32 %v917_v2, %v1720_v34  ;;  %v965_v33 = vadd.f32 %v933_v17, %v1723_v22 }
 0x11c   : > { %v918_v9 = vadd.f32 %v1717_v18, %v879_v28  ;;  %v934_v35 = vadd.f32 %v1717_v18, %v895_v3  ;;  %v947_v10 = vadd.f32 %v915_v20, %v1726_v23  ;;  %v963_v11 = vadd.f32 %v931_v30, %v1729_v24 }
 0x11d   : > { %v916_v36 = vadd.f32 %v1717_v18, %v877_v26  ;;  %v932_v60 = vadd.f32 %v1717_v18, %v893_v27  ;;  %v981_v37 = vmax.f32 %v949_v8, 0.0  ;;  %v997_v34 = vmax.f32 %v965_v33, 0.0 }
 0x11e   : > { %v950_v22 = vadd.f32 %v918_v9, %v1734_v31  ;;  %v966_v40 = vadd.f32 %v934_v35, %v1737_v32  ;;  %v979_v41 = vmax.f32 %v947_v10, 0.0  ;;  %v995_v23 = vmax.f32 %v963_v11, 0.0 }
 0x11f   : > { %v948_v42 = vadd.f32 %v916_v36, %v1742_v38  ;;  %v964_v24 = vadd.f32 %v932_v60, %v1745_v39  ;;  %1013 = vst [vmem:[%s1763_s14 + $0x70] sm:$0xff] %v981_v37  ;;  %1029 = vst [vmem:[%s1763_s14 + $0xf0] sm:$0xff] %v997_v34 }
 0x120   : > { %v982_v43 = vmax.f32 %v950_v22, 0.0  ;;  %v998_v18 = vmax.f32 %v966_v40, 0.0  ;;  %1011 = vst [vmem:[%s1763_s14 + $0x60] sm:$0xff] %v979_v41  ;;  %1027 = vst [vmem:[%s1763_s14 + $0xe0] sm:$0xff] %v995_v23 }
 0x121   : > { %v980_v44 = vmax.f32 %v948_v42, 0.0  ;;  %v996_v45 = vmax.f32 %v964_v24, 0.0 }
 0x122   : > { %1014 = vst [vmem:[%s1763_s14 + $0x78] sm:$0xff] %v982_v43  ;;  %1030 = vst [vmem:[%s1763_s14 + $0xf8] sm:$0xff] %v998_v18 }
 0x123   : > { %1012 = vst [vmem:[%s1763_s14 + $0x68] sm:$0xff] %v980_v44  ;;  %1028 = vst [vmem:[%s1763_s14 + $0xe8] sm:$0xff] %v996_v45 }
 0x124 PF: > { %s17_s28 = sadd.s32 1, %s1454_s28   ;;  %s1900_s24 = smov %s1446_s26 }
 0x125   : > { %p14_p8 = scmp.ge.s32.totalorder %s17_s28, 6   ;;  %s1901_s25 = smov %s1450_s27 }
 0x126   : > { %s1902_s26 = smov %s1905_s29  ;;  %s1903_s27 = smov %s1909_s30 }
 0x127   :  { %16 = sbr.rel (!%p14_p8) target bundleno = 3 (0x3), region = 81 }

// kernel: residual_block.6
= control target key start
LH: loop header
LB: loop body
LE: loop exit
PB: predicated region body
PF: predicated region fallthrough
CT: control target
= control target key end

     0   :  { %s6249_s27 = smov 0   ;;  %s6251_s28 = smov 0   ;;  %s6919_s0 = inlined_call_operand.vmem [shape: bf16[2,1024,128], index: 0, kind: input, shape index: {}, may-alias: {0,1,2}]   ;;  %s6920_s1 = inlined_call_operand.vmem [shape: bf16[2,1024,128], index: 1, kind: input, shape index: {}, may-alias: {0,1,2}]   ;;  %s6921_s2 = inlined_call_operand.vmem [shape: bf16[2,1024,128], index: 2, kind: input, shape index: {}, may-alias: {0,1,2}]   ;;  %s6922_s3 = inlined_call_operand.vmem [shape: bf16[9,128,128], index: 3, kind: input, shape index: {}]   ;;  %s6923_s4 = inlined_call_operand.vmem [shape: f32[1,128], index: 4, kind: input, shape index: {}]   ;;  %s6924_s5 = inlined_call_operand.vmem [shape: f32[1024,1], index: 5, kind: input, shape index: {}]   ;;  %s6925_s6 = inlined_call_operand.vmem [shape: bf16[2,512,128], index: 6, kind: output, shape index: {0}]   ;;  %s6926_s7 = inlined_call_operand.vmem [shape: f32[2,1,128], index: 7, kind: output, shape index: {1}]   ;;  %s6927_s8 = inlined_call_operand.vmem [shape: f32[2,1,128], index: 8, kind: output, shape index: {2}]  }
   0x1   :  { %s6253_s29 = smov 0   ;;  %s6255_s30 = smov 0  }
   0x2   :  { %s6257_s9 = smov 0  }
   0x3 LB: > { %6930 = sst [smem:[#allocation4_spill]] %s6192_s29  ;;  %s28_s10 = sadd.s32 1, %s6192_s29  ;;  %s6200_s9 = sphi %s6257_s9, %s19_s9   ;;  %s6196_s30 = sphi %s6255_s30, %s6937_s30   ;;  %s6192_s29 = sphi %s6253_s29, %s6936_s29   ;;  %s6188_s28 = sphi %s6251_s28, %s6935_s28   ;;  %s6184_s27 = sphi %s6249_s27, %s6934_s27  }
   0x4   : > { %6931 = sst [smem:[#allocation5_spill]] %s6196_s30  ;;  %s31_s11 = sadd.s32 1, %s6196_s30 }
   0x5   : > { %p29_p0 = scmp.ge.s32.totalorder %s28_s10, 2  ;;  %p4628_p1 = scmp.ge.s32.totalorder %s6200_s9, 1 }
   0x6   : > { %p345_p2 = scmp.lt.s32.totalorder %s6200_s9, 5 }
   0x7   : > { %s6939_s10 = smov (%p29_p0, %s28_s10), 0  ;;  %s6941_s11 = smov (!%p29_p0, %s31_s11), %s6196_s30 }
   0x8   : > { %6932 = sst [smem:[#allocation6_spill]] %s6939_s10  ;;  %p346_p3 = pnand %p4628_p1, %p345_p2 }
   0x9   : > { %p33_p4 = scmp.ge.s32.totalorder %s6941_s11, 2  ;;  %s4629_s12 = sshll.u32 (!%p346_p3), %s6184_s27, 5 }
   0xa   : > { %349 = sbr.rel (%p346_p3) target bundleno = 594 (0x252), region = 44  ;;  %p420_p5 = scmp.lt.s32.totalorder (!%p346_p3), %s6188_s28, 1 }
   0xb   : > { %s6943_s11 = smov (%p33_p4, %s6941_s11), 0  ;;  %p422_p6 = scmp.lt.s32.totalorder (!%p346_p3), %s4629_s12, 127 }
   0xc   : > { %6933 = sst [smem:[#allocation7_spill]] %s6943_s11  ;;  %s4880_s13 = sadd.s32 (!%p346_p3), 32, %s4629_s12 }
   0xd   : > { %p433_p7 = scmp.lt.s32.totalorder (!%p346_p3), %s4880_s13, 127  ;;  %s4882_s17 = sadd.s32 (!%p346_p3), 64, %s4629_s12 }
   0xe   : > { %p445_p8 = scmp.lt.s32.totalorder (!%p346_p3), %s4882_s17, 127  ;;  %p464_p9 = scmp.lt.s32.totalorder (!%p346_p3), %s4629_s12, 63 }
   0xf   : > { %p4643_p10 = scmp.ne.s32.totalorder (!%p346_p3), %s6184_s27, 0 }
  0x11   : > { %s6945_s28 = smov (!%p420_p5, %s6188_s28), 1  ;;  %s6947_s13 = smov (!%p433_p7, %s4880_s13), 127 }
  0x12   : > { %s423_s14 = scalar_select %p422_p6, %s4629_s12, 127 }
  0x13   : > { %s4630_s15 = sshll.u32 %s6945_s28, 7  ;;  %s6949_s17 = smov (!%p445_p8, %s4882_s17), 127  ;;  %v6202_v0 = vmov (!%p4643_p10), 0.0  }
  0x14   : > { %s425_s16 = sadd.s32 %s4630_s15, %s423_s14  ;;  %s436_s22 = sadd.s32 %s4630_s15, %s6947_s13 }
  0x15   : > { %s4631_s18 = sshll.u32 %s425_s16, 2  ;;  %s4639_s23 = sshll.u32 %s6947_s13, 3 }
  0x16   : > { %s6285_s21 = scalar_lea.vmem %s6919_s0, %s4631_s18  ;;  %s4634_s24 = sshll.u32 %s436_s22, 2 }
  0x17   : > { %s448_s25 = sadd.s32 %s4630_s15, %s6949_s17  ;;  %s6290_s10 = scalar_lea.vmem %s6920_s1, %s4634_s24 }
  0x18   : > { %s4637_s14 = sshll.u32 %s448_s25, 2  ;;  %s6300_s20 = scalar_lea.vmem %s6924_s5, %s4639_s23 }
  0x19   : > { %s6295_s29 = scalar_lea.vmem %s6921_s2, %s4637_s14  ;;  %s6951_s12 = smov (!%p464_p9, %s4629_s12), 63 }
  0x1a   : > { %s4641_s13 = sshll.u32 %s6945_s28, 6  ;;  %s6305_s17 = scalar_lea.vmem %s6926_s7, %s6945_s28 }
  0x1b   : > { %s467_s11 = sadd.s32 %s4641_s13, %s6951_s12  ;;  %s6310_s26 = scalar_lea.vmem %s6927_s8, %s6945_s28  ;;  %482 = vst [vmem:[%s6305_s17] sm:$0x1] (!%p4643_p10), %v6202_v0 }
  0x1c   : > { %s4642_s30 = sshll.u32 %s467_s11, 2  ;;  %481 = sbr.rel (%p4643_p10) target bundleno = 35 (0x23), region = 48  ;;  %483 = vst [vmem:[%s6310_s26] sm:$0x1] (!%p4643_p10), %v6202_v0 }
  0x1d   : > { %s6315_s18 = scalar_lea.vmem %s6925_s6, %s4642_s30 }
  0x23 PF: > { %v6074_v1 = vld [vmem:[%s6922_s3] sm:$0xff]   ;;  %v6076_v3 = vld [vmem:[%s6922_s3 + $0x8] sm:$0xff]   ;;  %v6078_v5 = vld [vmem:[%s6922_s3 + $0x10] sm:$0xff]  }
  0x24   : > { %v6075_v2 = vld [vmem:[%s6922_s3 + $0x100] sm:$0xff]   ;;  %5326 = vmatprep.subr.bf16.mxu1 %v6074_v1  ;;  %v6077_v4 = vld [vmem:[%s6922_s3 + $0x108] sm:$0xff]   ;;  %v6079_v6 = vld [vmem:[%s6922_s3 + $0x110] sm:$0xff]  }
  0x25   : > { %5518 = vmatprep.subr.bf16.mxu0 %v6075_v2  ;;  %5327 = vmatpush3.bf16.msra.mxu1 %v6074_v1  ;;  %v6080_v7 = vld [vmem:[%s6922_s3 + $0x18] sm:$0xff]   ;;  %v6082_v9 = vld [vmem:[%s6922_s3 + $0x20] sm:$0xff]   ;;  %v6084_v11 = vld [vmem:[%s6922_s3 + $0x28] sm:$0xff]  }
  0x26   : > { %5519 = vmatpush3.bf16.msra.mxu0 %v6075_v2  ;;  %5328 = vmatprep.subr.bf16.mxu1 %v6076_v3  ;;  %v6081_v8 = vld [vmem:[%s6922_s3 + $0x118] sm:$0xff]   ;;  %v6083_v10 = vld [vmem:[%s6922_s3 + $0x120] sm:$0xff]   ;;  %v6085_v12 = vld [vmem:[%s6922_s3 + $0x128] sm:$0xff]  }
  0x27   : > { %5520 = vmatprep.subr.bf16.mxu0 %v6077_v4  ;;  %v5077_v13 = vld [vmem:[%s6285_s21 + $0x70] sm:$0xff]   ;;  %v5078_v14 = vld [vmem:[%s6285_s21 + $0x78] sm:$0xff]   ;;  %v4926_v15 = vld [vmem:[%s6290_s10] sm:$0xff]  }
  0x28   : > { %v4920_v16 = vunpack.c.h.bf16 %v5077_v13  ;;  %v4923_v17 = vunpack.c.l.bf16 %v5078_v14  ;;  %v4924_v18 = vunpack.c.h.bf16 %v5078_v14  ;;  %v6090_v19 = vld [vmem:[%s6290_s10] sm:$0xff]  ;;  %v4927_v20 = vunpack.c.l.bf16 %v4926_v15  ;;  %v5079_v22 = vld [vmem:[%s6290_s10 + $0x8] sm:$0xff]   ;;  %v6086_v25 = vld [vmem:[%s6922_s3 + $0x30] sm:$0xff]  }
  0x29   : > { %5329 = vmatpush3.bf16.msra.mxu1 %v6076_v3  ;;  %v4928_v21 = vunpack.c.h.bf16 %v4926_v15  ;;  %5534 = vmatprep.mubr.bf16.mxu0 %v6090_v19  ;;  %v4931_v23 = vunpack.c.l.bf16 %v5079_v22  ;;  %v4932_v24 = vunpack.c.h.bf16 %v5079_v22  ;;  %v6087_v26 = vld [vmem:[%s6922_s3 + $0x130] sm:$0xff]   ;;  %v5081_v30 = vld [vmem:[%s6290_s10 + $0x18] sm:$0xff]   ;;  %v5082_v35 = vld [vmem:[%s6290_s10 + $0x20] sm:$0xff]  }
  0x2a   : > { %5521 = vmatpush3.bf16.msra.mxu0 %v6077_v4  ;;  %5330 = vmatprep.subr.bf16.mxu1 %v6078_v5  ;;  %493 = vst [vmem:[#allocation2 + $0x8] sm:$0xff] %v4920_v16  ;;  %494 = vst [vmem:[#allocation2 + $0x10] sm:$0xff] %v4923_v17  ;;  %v5080_v27 = vld [vmem:[%s6290_s10 + $0x10] sm:$0xff]   ;;  %v4939_v31 = vunpack.c.l.bf16 %v5081_v30  ;;  %v4940_v32 = vunpack.c.h.bf16 %v5081_v30  ;;  %v6088_v33 = vld [vmem:[%s6922_s3 + $0x38] sm:$0xff]   ;;  %v4943_v38 = vunpack.c.l.bf16 %v5082_v35  ;;  %v4944_v39 = vunpack.c.h.bf16 %v5082_v35 }
  0x2b   : > { %5522 = vmatprep.subr.bf16.mxu0 %v6079_v6  ;;  %495 = vst [vmem:[#allocation2 + $0x18] sm:$0xff] %v4924_v18  ;;  %560 = vst [vmem:[#allocation2 + $0x20] sm:$0xff] %v4927_v20  ;;  %v4935_v28 = vunpack.c.l.bf16 %v5080_v27  ;;  %v4936_v29 = vunpack.c.h.bf16 %v5080_v27  ;;  %v6089_v34 = vld [vmem:[%s6922_s3 + $0x138] sm:$0xff]   ;;  %v6091_v43 = vld [vmem:[%s6922_s3 + $0x40] sm:$0xff]  }
  0x2c   : > { %561 = vst [vmem:[#allocation2 + $0x28] sm:$0xff] %v4928_v21  ;;  %562 = vst [vmem:[#allocation2 + $0x30] sm:$0xff] %v4931_v23  ;;  %v6093_v44 = vld [vmem:[%s6922_s3 + $0x140] sm:$0xff]   ;;  %v5083_v47 = vld [vmem:[%s6290_s10 + $0x28] sm:$0xff]  }
  0x2d   : > { %5331 = vmatpush3.bf16.msra.mxu1 %v6078_v5  ;;  %563 = vst [vmem:[#allocation2 + $0x38] sm:$0xff] %v4932_v24  ;;  %564 = vst [vmem:[#allocation2 + $0x40] sm:$0xff] %v4935_v28  ;;  %v4947_v49 = vunpack.c.l.bf16 %v5083_v47  ;;  %v4948_v50 = vunpack.c.h.bf16 %v5083_v47  ;;  %v6092_v51 = vld [vmem:[%s6290_s10 + $0x8] sm:$0xff]  ;;  %v6095_v54 = vld [vmem:[%s6290_s10 + $0x10] sm:$0xff] }
  0x2e   : > { %5523 = vmatpush3.bf16.msra.mxu0 %v6079_v6  ;;  %5332 = vmatprep.subr.bf16.mxu1 %v6080_v7  ;;  %565 = vst [vmem:[#allocation2 + $0x48] sm:$0xff] %v4936_v29  ;;  %566 = vst [vmem:[#allocation2 + $0x50] sm:$0xff] %v4939_v31  ;;  %v6094_v52 = vld [vmem:[%s6922_s3 + $0x148] sm:$0xff]   ;;  %v5084_v56 = vld [vmem:[%s6290_s10 + $0x30] sm:$0xff]  }
  0x2f   : > { %5524 = vmatprep.subr.bf16.mxu0 %v6081_v8  ;;  %567 = vst [vmem:[#allocation2 + $0x58] sm:$0xff] %v4940_v32  ;;  %568 = vst [vmem:[#allocation2 + $0x60] sm:$0xff] %v4943_v38  ;;  %v6096_v55 = vld [vmem:[%s6922_s3 + $0x48] sm:$0xff]   ;;  %v6101_v57 = vld [vmem:[%s6922_s3 + $0x50] sm:$0xff]   ;;  %v4951_v58 = vunpack.c.l.bf16 %v5084_v56  ;;  %v4952_v59 = vunpack.c.h.bf16 %v5084_v56 }
  0x30   : > { %569 = vst [vmem:[#allocation2 + $0x68] sm:$0xff] %v4944_v39  ;;  %570 = vst [vmem:[#allocation2 + $0x70] sm:$0xff] %v4947_v49  ;;  %v5085_v60 = vld [vmem:[%s6290_s10 + $0x38] sm:$0xff]   ;;  %v6098_v3 = vld [vmem:[%s6922_s3 + $0x150] sm:$0xff]  }
  0x31   : > { %5333 = vmatpush3.bf16.msra.mxu1 %v6080_v7  ;;  %v604_v36 = vld [vmem:[#allocation2 + $0xd] sm:$0xff]  ;;  %571 = vst [vmem:[#allocation2 + $0x78] sm:$0xff] %v4948_v50  ;;  %v4955_v0 = vunpack.c.l.bf16 %v5085_v60  ;;  %v4956_v1 = vunpack.c.h.bf16 %v5085_v60  ;;  %572 = vst [vmem:[#allocation2 + $0x80] sm:$0xff] %v4951_v58  ;;  %v5086_v5 = vld [vmem:[%s6290_s10 + $0x40] sm:$0xff]  }
  0x32   : > { %5525 = vmatpush3.bf16.msra.mxu0 %v6081_v8  ;;  %5334 = vmatprep.subr.bf16.mxu1 %v6082_v9  ;;  %v605_v37 = vld [vmem:[#allocation2 + $0x15] sm:$0xff]  ;;  %v606_v41 = vld [vmem:[#allocation2 + $0x1d] sm:$0xff]  ;;  %573 = vst [vmem:[#allocation2 + $0x88] sm:$0xff] %v4952_v59  ;;  %v4959_v8 = vunpack.c.l.bf16 %v5086_v5  ;;  %v5087_v13 = vld [vmem:[%s6290_s10 + $0x48] sm:$0xff]  }
  0x33   : > { %5526 = vmatprep.subr.bf16.mxu0 %v6083_v10  ;;  %v636_v40 = vpack.c.bf16 %v605_v37, %v604_v36  ;;  %v607_v42 = vld [vmem:[#allocation2 + $0x25] sm:$0xff]  ;;  %v608_v45 = vld [vmem:[#allocation2 + $0x2d] sm:$0xff]  ;;  %574 = vst [vmem:[#allocation2 + $0x90] sm:$0xff] %v4955_v0  ;;  %575 = vst [vmem:[#allocation2 + $0x98] sm:$0xff] %v4956_v1  ;;  %v4963_v16 = vunpack.c.l.bf16 %v5087_v13  ;;  %v4964_v17 = vunpack.c.h.bf16 %v5087_v13 }
  0x34   : > { %v609_v46 = vld [vmem:[#allocation2 + $0x35] sm:$0xff]  ;;  %v637_v48 = vpack.c.bf16 %v607_v42, %v606_v41  ;;  %v610_v61 = vld [vmem:[#allocation2 + $0x3d] sm:$0xff]  ;;  %576 = vst [vmem:[#allocation2 + $0xa0] sm:$0xff] %v4959_v8  ;;  %v6104_v32 = vld [vmem:[%s6922_s3 + $0x168] sm:$0xff]  }
  0x35   : > { %5335 = vmatpush3.bf16.msra.mxu1 %v6082_v9  ;;  %5342 = vmatprep.mubr.bf16.mxu1 %v636_v40  ;;  %v638_v53 = vpack.c.bf16 %v609_v46, %v608_v45  ;;  %v611_v62 = vld [vmem:[#allocation2 + $0x45] sm:$0xff]  ;;  %v612_v63 = vld [vmem:[#allocation2 + $0x4d] sm:$0xff]  ;;  %v6097_v6 = vld [vmem:[%s6290_s10 + $0x18] sm:$0xff]  ;;  %v4960_v9 = vunpack.c.h.bf16 %v5086_v5  ;;  %578 = vst [vmem:[#allocation2 + $0xb0] sm:$0xff] %v4963_v16 }
  0x36   : > { %5527 = vmatpush3.bf16.msra.mxu0 %v6083_v10  ;;  %5336 = vmatprep.subr.bf16.mxu1 %v6084_v11  ;;  %v613_v2 = vld [vmem:[#allocation2 + $0x55] sm:$0xff]  ;;  %v639_v4 = vpack.c.bf16 %v611_v62, %v610_v61  ;;  %v6100_v10 = vld [vmem:[%s6290_s10 + $0x20] sm:$0xff]  ;;  %579 = vst [vmem:[#allocation2 + $0xb8] sm:$0xff] %v4964_v17  ;;  %v6112_v35 = vld [vmem:[%s6922_s3 + $0x68] sm:$0xff]  }
  0x37   : > { %5528 = vmatprep.subr.bf16.mxu0 %v6085_v12  ;;  %v640_v7 = vpack.c.bf16 %v613_v2, %v612_v63  ;;  %577 = vst [vmem:[#allocation2 + $0xa8] sm:$0xff] %v4960_v9  ;;  %v614_v14 = vld [vmem:[#allocation2 + $0x5d] sm:$0xff]  ;;  %v615_v15 = vld [vmem:[#allocation2 + $0x65] sm:$0xff]  ;;  %v616_v18 = vld [vmem:[#allocation2 + $0x6d] sm:$0xff] }
  0x38   : > { %v617_v19 = vld [vmem:[#allocation2 + $0x75] sm:$0xff]  ;;  %v6103_v21 = vld [vmem:[%s6922_s3 + $0x160] sm:$0xff]   ;;  %v641_v24 = vpack.c.bf16 %v615_v15, %v614_v14  ;;  %v2394_v1 = vld [vmem:[#allocation2 + $0x49] sm:$0xff] }
  0x39   : > { %5337 = vmatpush3.bf16.msra.mxu1 %v6084_v11  ;;  %v6099_v11 = vld [vmem:[%s6922_s3 + $0x158] sm:$0xff]   ;;  %v5088_v20 = vld [vmem:[%s6290_s10 + $0x50] sm:$0xff]   ;;  %v642_v27 = vpack.c.bf16 %v617_v19, %v616_v18  ;;  %v619_v38 = vld [vmem:[#allocation2 + $0x85] sm:$0xff] }
  0x3a   : > { %5529 = vmatpush3.bf16.msra.mxu0 %v6085_v12  ;;  %5338 = vmatprep.subr.bf16.mxu1 %v6086_v25  ;;  %v6106_v12 = vld [vmem:[%s6922_s3 + $0x58] sm:$0xff]   ;;  %v4967_v22 = vunpack.c.l.bf16 %v5088_v20  ;;  %v4968_v23 = vunpack.c.h.bf16 %v5088_v20  ;;  %v6105_v29 = vld [vmem:[%s6290_s10 + $0x30] sm:$0xff]  ;;  %v2389_v42 = vld [vmem:[#allocation2 + $0x21] sm:$0xff] }
  0x3b   : > { %5530 = vmatprep.subr.bf16.mxu0 %v6087_v26  ;;  %v5089_v28 = vld [vmem:[%s6290_s10 + $0x58] sm:$0xff]   ;;  %v6108_v39 = vld [vmem:[%s6922_s3 + $0x170] sm:$0xff]   ;;  %v6111_v61 = vld [vmem:[%s6922_s3 + $0x180] sm:$0xff]  }
  0x3c   : > { %580 = vst [vmem:[#allocation2 + $0xc0] sm:$0xff] %v4967_v22  ;;  %581 = vst [vmem:[#allocation2 + $0xc8] sm:$0xff] %v4968_v23  ;;  %v4971_v30 = vunpack.c.l.bf16 %v5089_v28  ;;  %v4972_v31 = vunpack.c.h.bf16 %v5089_v28  ;;  %v620_v40 = vld [vmem:[#allocation2 + $0x8d] sm:$0xff]  ;;  %v621_v41 = vld [vmem:[#allocation2 + $0x95] sm:$0xff] }
  0x3d   : > { %5339 = vmatpush3.bf16.msra.mxu1 %v6086_v25  ;;  %v6110_v25 = vld [vmem:[%s6922_s3 + $0x60] sm:$0xff]   ;;  %v6114_v46 = vld [vmem:[%s6922_s3 + $0x70] sm:$0xff]   ;;  %v6107_v50 = vld [vmem:[%s6290_s10 + $0x38] sm:$0xff] }
  0x3e   : > { %5531 = vmatpush3.bf16.msra.mxu0 %v6087_v26  ;;  %5340 = vmatprep.subr.bf16.mxu1 %v6088_v33  ;;  %v6102_v26 = vld [vmem:[%s6290_s10 + $0x28] sm:$0xff]  ;;  %582 = vst [vmem:[#allocation2 + $0xd0] sm:$0xff] %v4971_v30  ;;  %583 = vst [vmem:[#allocation2 + $0xd8] sm:$0xff] %v4972_v31  ;;  %v5092_v49 = vld [vmem:[%s6290_s10 + $0x70] sm:$0xff]  }
  0x3f   : > { %5532 = vmatprep.subr.bf16.mxu0 %v6089_v34  ;;  %v2391_v56 = vld [vmem:[#allocation2 + $0x31] sm:$0xff]  ;;  %v622_v59 = vld [vmem:[#allocation2 + $0x9d] sm:$0xff]  ;;  %v623_v60 = vld [vmem:[#allocation2 + $0xa5] sm:$0xff] }
  0x40   : > { %v6116_v58 = vld [vmem:[%s6922_s3 + $0x78] sm:$0xff]   ;;  %v624_v62 = vld [vmem:[#allocation2 + $0xad] sm:$0xff]  ;;  %v2393_v0 = vld [vmem:[#allocation2 + $0x41] sm:$0xff]  ;;  %v645_v2 = vpack.c.bf16 %v623_v60, %v622_v59 }
  0x41   : > { %5341 = vmatpush3.bf16.msra.mxu1 %v6088_v33  ;;  %v5090_v33 = vld [vmem:[%s6290_s10 + $0x60] sm:$0xff]   ;;  %v625_v63 = vld [vmem:[#allocation2 + $0xb5] sm:$0xff]  ;;  %v2398_v15 = vld [vmem:[#allocation2 + $0x69] sm:$0xff] }
  0x42   : > { %5533 = vmatpush3.bf16.msra.mxu0 %v6089_v34  ;;  %5374 = vmatprep.subr.bf16.mxu1 %v6091_v43  ;;  %v618_v34 = vld [vmem:[#allocation2 + $0x7d] sm:$0xff]  ;;  %v4975_v36 = vunpack.c.l.bf16 %v5090_v33  ;;  %v4976_v37 = vunpack.c.h.bf16 %v5090_v33  ;;  %v646_v5 = vpack.c.bf16 %v625_v63, %v624_v62  ;;  %v2395_v9 = vld [vmem:[#allocation2 + $0x51] sm:$0xff]  ;;  %v2402_v28 = vld [vmem:[#allocation2 + $0x89] sm:$0xff] }
  0x43   : > { %5566 = vmatprep.subr.bf16.mxu0 %v6093_v44  ;;  %v643_v45 = vpack.c.bf16 %v619_v38, %v618_v34  ;;  %v626_v8 = vld [vmem:[#allocation2 + $0xbd] sm:$0xff]  ;;  %v6115_v16 = vld [vmem:[%s6922_s3 + $0x190] sm:$0xff]  }
  0x44   : > { %5343 = vmatmul.mubr.bf16.vlgmr.msra.gmra.mrb[0].mxu1 %v637_v48  ;;  %584 = vst [vmem:[#allocation2 + $0xe0] sm:$0xff] %v4975_v36  ;;  %585 = vst [vmem:[#allocation2 + $0xe8] sm:$0xff] %v4976_v37  ;;  %v2399_v23 = vld [vmem:[#allocation2 + $0x71] sm:$0xff]  ;;  %v6119_v33 = vld [vmem:[%s6922_s3 + $0x1a0] sm:$0xff]  }
  0x45   : > { %5535 = vmatmul.mubr.bf16.vlgmr.msra.gmra.mrb[0].mxu0 %v6092_v51  ;;  %5375 = vmatpush3.bf16.msra.mxu1 %v6091_v43  ;;  %v2390_v43 = vld [vmem:[#allocation2 + $0x29] sm:$0xff]  ;;  %v644_v51 = vpack.c.bf16 %v621_v41, %v620_v40  ;;  %v629_v14 = vld [vmem:[#allocation2 + $0xd5] sm:$0xff]  ;;  %v4990_v34 = vld [vmem:[%s6295_s29] sm:$0xff]  }
  0x46   : > { %5567 = vmatpush3.bf16.msra.mxu0 %v6093_v44  ;;  %5346 = vmatprep.mubr.bf16.mxu1 %v638_v53  ;;  %v5091_v44 = vld [vmem:[%s6290_s10 + $0x68] sm:$0xff]   ;;  %v4984_v53 = vunpack.c.h.bf16 %v5092_v49  ;;  %v4991_v36 = vunpack.c.l.bf16 %v4990_v34  ;;  %v4992_v37 = vunpack.c.h.bf16 %v4990_v34  ;;  %v2408_v59 = vld [vmem:[#allocation2 + $0xb9] sm:$0xff] }
  0x47   : > { %5568 = vmatprep.subr.bf16.mxu0 %v6094_v52  ;;  %5538 = vmatprep.mubr.bf16.mxu0 %v6095_v54  ;;  %v4979_v47 = vunpack.c.l.bf16 %v5091_v44  ;;  %v4980_v48 = vunpack.c.h.bf16 %v5091_v44  ;;  %v2421_v54 = vpack.c.bf16 %v2390_v43, %v2389_v42  ;;  %v628_v13 = vld [vmem:[#allocation2 + $0xcd] sm:$0xff]  ;;  %v2404_v44 = vld [vmem:[#allocation2 + $0x99] sm:$0xff]  ;;  %v2409_v62 = vld [vmem:[#allocation2 + $0xc1] sm:$0xff] }
  0x48   : > { %5376 = vmatprep.subr.bf16.mxu1 %v6096_v55  ;;  %589 = vst [vmem:[#allocation2 + $0x108] sm:$0xff] %v4984_v53  ;;  %v648_v19 = vpack.c.bf16 %v629_v14, %v628_v13  ;;  %600 = vst [vmem:[#allocation2 + $0x120] sm:$0xff] %v4991_v36  ;;  %v6121_v41 = vld [vmem:[%s6922_s3 + $0x1a8] sm:$0xff]   ;;  %v2403_v43 = vld [vmem:[#allocation2 + $0x91] sm:$0xff] }
  0x49   : > { %5377 = vmatpush3.bf16.msra.mxu1 %v6096_v55  ;;  %586 = vst [vmem:[#allocation2 + $0xf0] sm:$0xff] %v4979_v47  ;;  %587 = vst [vmem:[#allocation2 + $0xf8] sm:$0xff] %v4980_v48  ;;  %v6109_v55 = vld [vmem:[%s6922_s3 + $0x178] sm:$0xff]   ;;  %v2405_v48 = vld [vmem:[#allocation2 + $0xa1] sm:$0xff] }
  0x4a   : > { %5569 = vmatpush3.bf16.msra.mxu0 %v6094_v52  ;;  %5378 = vmatprep.subr.bf16.mxu1 %v6101_v57  ;;  %v4983_v52 = vunpack.c.l.bf16 %v5092_v49  ;;  %601 = vst [vmem:[#allocation2 + $0x128] sm:$0xff] %v4992_v37  ;;  %v910_v47 = vld [vmem:[#allocation2 + $0x16] sm:$0xff]  ;;  %v2406_v49 = vld [vmem:[#allocation2 + $0xa9] sm:$0xff] }
  0x4b   : > { %5570 = vmatprep.subr.bf16.mxu0 %v6098_v3  ;;  %v630_v22 = vld [vmem:[#allocation2 + $0xdd] sm:$0xff]  ;;  %v913_v60 = vld [vmem:[#allocation2 + $0x2e] sm:$0xff] }
  0x4c   : > { %5347 = vmatmul.mubr.bf16.gmra.mrb[4].mxu1 %v639_v4  ;;  %588 = vst [vmem:[#allocation2 + $0x100] sm:$0xff] %v4983_v52  ;;  %v6488_v52 = vpack.c.bf16 %v2404_v44, %v2403_v43  ;;  %v2410_v63 = vld [vmem:[#allocation2 + $0xc9] sm:$0xff]  ;;  %v918_v14 = vld [vmem:[#allocation2 + $0x56] sm:$0xff] }
  0x4d   : > { %5539 = vmatmul.mubr.bf16.gmra.mrb[4].mxu0 %v6097_v6  ;;  %5350 = vmatprep.mubr.bf16.mxu1 %v640_v7  ;;  %v6451_v6 = vpack.c.bf16 %v2394_v1, %v2393_v0  ;;  %v6113_v7 = vld [vmem:[%s6922_s3 + $0x188] sm:$0xff]   ;;  %v6500_v0 = vld [vmem:[%s6922_s3 + $0x1c0] sm:$0xff]  }
  0x4e   : > { %5571 = vmatpush3.bf16.msra.mxu0 %v6098_v3  ;;  %5542 = vmatprep.mubr.bf16.mxu0 %v6100_v10  ;;  %v6447_v3 = vld [vmem:[%s6922_s3 + $0x80] sm:$0xff]   ;;  %v917_v13 = vld [vmem:[#allocation2 + $0x4e] sm:$0xff] }
  0x4f   : > { %5572 = vmatprep.subr.bf16.mxu0 %v6099_v11  ;;  %5379 = vmatpush3.bf16.msra.mxu1 %v6101_v57  ;;  %v2392_v57 = vld [vmem:[#allocation2 + $0x39] sm:$0xff]  ;;  %v924_v43 = vld [vmem:[#allocation2 + $0x86] sm:$0xff]  ;;  %v925_v44 = vld [vmem:[#allocation2 + $0x8e] sm:$0xff] }
  0x50   : > { %5380 = vmatprep.subr.bf16.mxu1 %v6106_v12  ;;  %v6449_v4 = vpack.c.bf16 %v2392_v57, %v2391_v56  ;;  %v2396_v10 = vld [vmem:[#allocation2 + $0x59] sm:$0xff]  ;;  %v912_v57 = vld [vmem:[#allocation2 + $0x26] sm:$0xff] }
  0x51   : > { %v6462_v18 = vpack.c.bf16 %v2396_v10, %v2395_v9  ;;  %v633_v30 = vld [vmem:[#allocation2 + $0xf5] sm:$0xff]  ;;  %v916_v9 = vld [vmem:[#allocation2 + $0x46] sm:$0xff] }
  0x52   : > { %5573 = vmatpush3.bf16.msra.mxu0 %v6099_v11  ;;  %v627_v11 = vld [vmem:[#allocation2 + $0xc5] sm:$0xff]  ;;  %v6125_v56 = vld [vmem:[%s6922_s3 + $0x1b8] sm:$0xff]  }
  0x53   : > { %5574 = vmatprep.subr.bf16.mxu0 %v6103_v21  ;;  %5381 = vmatpush3.bf16.msra.mxu1 %v6106_v12  ;;  %v2397_v12 = vld [vmem:[#allocation2 + $0x61] sm:$0xff]  ;;  %v647_v17 = vpack.c.bf16 %v627_v11, %v626_v8  ;;  %v2411_v11 = vld [vmem:[#allocation2 + $0xd1] sm:$0xff] }
  0x54   : > { %5351 = vmatmul.mubr.bf16.gmra.mrb[8].mxu1 %v641_v24  ;;  %5382 = vmatprep.subr.bf16.mxu1 %v6110_v25  ;;  %v6464_v20 = vpack.c.bf16 %v2398_v15, %v2397_v12  ;;  %v2400_v24 = vld [vmem:[#allocation2 + $0x79] sm:$0xff]  ;;  %v6120_v10 = vld [vmem:[%s6922_s3 + $0x88] sm:$0xff]  }
  0x55   : > { %5543 = vmatmul.mubr.bf16.gmra.mrb[8].mxu0 %v6102_v26  ;;  %5354 = vmatprep.mubr.bf16.mxu1 %v642_v27  ;;  %v632_v26 = vld [vmem:[#allocation2 + $0xed] sm:$0xff]  ;;  %v2401_v27 = vld [vmem:[#allocation2 + $0x81] sm:$0xff]  ;;  %v6476_v38 = vpack.c.bf16 %v2400_v24, %v2399_v23  ;;  %v2412_v12 = vld [vmem:[#allocation2 + $0xd9] sm:$0xff] }
  0x56   : > { %5575 = vmatpush3.bf16.msra.mxu0 %v6103_v21  ;;  %5546 = vmatprep.mubr.bf16.mxu0 %v6105_v29  ;;  %v6117_v21 = vld [vmem:[%s6922_s3 + $0x198] sm:$0xff]   ;;  %v6478_v40 = vpack.c.bf16 %v2402_v28, %v2401_v27  ;;  %v2413_v15 = vld [vmem:[#allocation2 + $0xe1] sm:$0xff] }
  0x57   : > { %5576 = vmatprep.subr.bf16.mxu0 %v6104_v32  ;;  %5383 = vmatpush3.bf16.msra.mxu1 %v6110_v25  ;;  %v631_v25 = vld [vmem:[#allocation2 + $0xe5] sm:$0xff]  ;;  %v5093_v29 = vld [vmem:[%s6290_s10 + $0x78] sm:$0xff]  }
  0x58   : > { %5384 = vmatprep.subr.bf16.mxu1 %v6112_v35  ;;  %v4987_v31 = vunpack.c.l.bf16 %v5093_v29  ;;  %v634_v42 = vld [vmem:[#allocation2 + $0xfd] sm:$0xff]  ;;  %v2415_v28 = vld [vmem:[#allocation2 + $0xf1] sm:$0xff] }
  0x59   : > { %v915_v8 = vld [vmem:[#allocation2 + $0x3e] sm:$0xff] }
  0x5a   : > { %5577 = vmatpush3.bf16.msra.mxu0 %v6104_v32  ;;  %v4988_v32 = vunpack.c.h.bf16 %v5093_v29  ;;  %590 = vst [vmem:[#allocation2 + $0x110] sm:$0xff] %v4987_v31  ;;  %v919_v23 = vld [vmem:[#allocation2 + $0x5e] sm:$0xff]  ;;  %v922_v31 = vld [vmem:[#allocation2 + $0x76] sm:$0xff] }
  0x5b   : > { %5578 = vmatprep.subr.bf16.mxu0 %v6108_v39  ;;  %5385 = vmatpush3.bf16.msra.mxu1 %v6112_v35  ;;  %v649_v35 = vpack.c.bf16 %v631_v25, %v630_v22  ;;  %v945_v22 = vpack.c.bf16 %v918_v14, %v917_v13  ;;  %v6124_v24 = vld [vmem:[%s6922_s3 + $0x98] sm:$0xff]   ;;  %v5094_v25 = vld [vmem:[%s6295_s29 + $0x8] sm:$0xff]   ;;  %v6135_v13 = vld [vmem:[%s6922_s3 + $0x1e0] sm:$0xff]  }
  0x5c   : > { %5355 = vmatmul.mubr.bf16.gmra.mrb[12].mxu1 %v643_v45  ;;  %5386 = vmatprep.subr.bf16.mxu1 %v6114_v46  ;;  %591 = vst [vmem:[#allocation2 + $0x118] sm:$0xff] %v4988_v32  ;;  %v909_v45 = vld [vmem:[#allocation2 + $0xe] sm:$0xff]  ;;  %v4995_v27 = vunpack.c.l.bf16 %v5094_v25  ;;  %v2416_v29 = vld [vmem:[#allocation2 + $0xf9] sm:$0xff]  ;;  %v2417_v32 = vld [vmem:[#allocation2 + $0x101] sm:$0xff] }
  0x5d   : > { %5547 = vmatmul.mubr.bf16.gmra.mrb[12].mxu0 %v6107_v50  ;;  %5358 = vmatprep.mubr.bf16.mxu1 %v644_v51  ;;  %v6123_v50 = vld [vmem:[%s6922_s3 + $0x1b0] sm:$0xff]   ;;  %v941_v53 = vpack.c.bf16 %v910_v47, %v909_v45  ;;  %v6529_v36 = vpack.c.bf16 %v2416_v29, %v2415_v28  ;;  %v1282_v25 = vld [vmem:[#allocation2 + $0x27] sm:$0xff] }
  0x5e   : > { %5579 = vmatpush3.bf16.msra.mxu0 %v6108_v39  ;;  %5582 = vmatprep.mubr.bf16.mxu0 %v2421_v54  ;;  %v650_v39 = vpack.c.bf16 %v633_v30, %v632_v26  ;;  %v6490_v54 = vpack.c.bf16 %v2406_v49, %v2405_v48  ;;  %v920_v26 = vld [vmem:[#allocation2 + $0x66] sm:$0xff]  ;;  %v921_v30 = vld [vmem:[#allocation2 + $0x6e] sm:$0xff]  ;;  %602 = vst [vmem:[#allocation2 + $0x130] sm:$0xff] %v4995_v27  ;;  %v926_v45 = vld [vmem:[#allocation2 + $0x96] sm:$0xff] }
  0x5f   : > { %5580 = vmatprep.subr.bf16.mxu0 %v6109_v55  ;;  %5387 = vmatpush3.bf16.msra.mxu1 %v6114_v46  ;;  %v635_v46 = vld [vmem:[#allocation2 + $0x105] sm:$0xff]  ;;  %v947_v37 = vpack.c.bf16 %v922_v31, %v921_v30  ;;  %v6130_v48 = vld [vmem:[%s6922_s3 + $0xb0] sm:$0xff]   ;;  %v6203_v31 = vmov 0  }
  0x60   : > { %5388 = vmatprep.subr.bf16.mxu1 %v6116_v58  ;;  %v651_v51 = vpack.c.bf16 %v635_v46, %v634_v42  ;;  %v923_v42 = vld [vmem:[#allocation2 + $0x7e] sm:$0xff]  ;;  %v3871_v27 = vld [vmem:[%s6300_s20 + $0x10] sm:$0xff]  ;;  %6072 = vset.pattern.permute.xlu0 %v6203_v31 }
  0x61   : > { %v2418_v34 = vld [vmem:[#allocation2 + $0x109] sm:$0xff]  ;;  %v948_v49 = vpack.c.bf16 %v924_v43, %v923_v42  ;;  %v1284_v29 = vld [vmem:[#allocation2 + $0x37] sm:$0xff]  ;;  %v6589_v30 = vld [vmem:[%s6922_s3 + $0x200] sm:$0xff]   ;;  %6073 = vset.pattern.permute.xlu1 %v6203_v31 }
  0x62   : > { %5581 = vmatpush3.bf16.msra.mxu0 %v6109_v55  ;;  %v911_v55 = vld [vmem:[#allocation2 + $0x1e] sm:$0xff]  ;;  %v1283_v28 = vld [vmem:[#allocation2 + $0x2f] sm:$0xff]  ;;  %4144 = vperm.xlu1 %6073, %v3871_v27  }
  0x63   : > { %5614 = vmatprep.subr.bf16.mxu0 %v6111_v61  ;;  %5389 = vmatpush3.bf16.msra.mxu1 %v6116_v58  ;;  %v2407_v58 = vld [vmem:[#allocation2 + $0xb1] sm:$0xff]  ;;  %v942_v1 = vpack.c.bf16 %v912_v57, %v911_v55  ;;  %v2420_v47 = vld [vmem:[#allocation2 + $0x119] sm:$0xff]  ;;  %v6145_v31 = vld [vmem:[%s6922_s3 + $0x208] sm:$0xff]  }
  0x64   : > { %5359 = vmatmul.mubr.bf16.gmra.mrb[16].mxu1 %v645_v2  ;;  %5422 = vmatprep.subr.bf16.mxu1 %v6447_v3  ;;  %v6502_v2 = vpack.c.bf16 %v2408_v59, %v2407_v58  ;;  %v2419_v46 = vld [vmem:[#allocation2 + $0x111] sm:$0xff]  ;;  %v927_v55 = vld [vmem:[#allocation2 + $0x9e] sm:$0xff] }
  0x65   : > { %5583 = vmatmul.mubr.bf16.vlgmr.msra.gmra.mrb[0].mxu0 %v6449_v4  ;;  %5362 = vmatprep.mubr.bf16.mxu1 %v646_v5  ;;  %v929_v57 = vld [vmem:[#allocation2 + $0xae] sm:$0xff]  ;;  %v930_v58 = vld [vmem:[#allocation2 + $0xb6] sm:$0xff]  ;;  %v6551_v59 = vld [vmem:[%s6922_s3 + $0xc0] sm:$0xff]  }
  0x66   : > { %5615 = vmatpush3.bf16.msra.mxu0 %v6111_v61  ;;  %5586 = vmatprep.mubr.bf16.mxu0 %v6451_v6  ;;  %v914_v61 = vld [vmem:[#allocation2 + $0x36] sm:$0xff] }
  0x67   : > { %5616 = vmatprep.subr.bf16.mxu0 %v6113_v7  ;;  %v943_v5 = vpack.c.bf16 %v914_v61, %v913_v60  ;;  %v951_v61 = vpack.c.bf16 %v930_v58, %v929_v57  ;;  %v1287_v42 = vld [vmem:[#allocation2 + $0x4f] sm:$0xff]  ;;  %v1288_v43 = vld [vmem:[#allocation2 + $0x57] sm:$0xff]  ;;  %v6142_v57 = vld [vmem:[%s6922_s3 + $0xe0] sm:$0xff]  }
  0x6a   : > { %5617 = vmatpush3.bf16.msra.mxu0 %v6113_v7  ;;  %v6504_v7 = vpack.c.bf16 %v2410_v63, %v2409_v62  ;;  %v6129_v62 = vld [vmem:[%s6922_s3 + $0x1c8] sm:$0xff]  }
  0x6b   : > { %5618 = vmatprep.subr.bf16.mxu0 %v6115_v16  ;;  %v932_v63 = vld [vmem:[#allocation2 + $0xc6] sm:$0xff] }
  0x6c   : > { %5363 = vmatmul.mubr.bf16.gmra.mrb[20].mxu1 %v647_v17  ;;  %v2414_v17 = vld [vmem:[#allocation2 + $0xe9] sm:$0xff] }
  0x6d   : > { %5587 = vmatmul.mubr.bf16.gmra.mrb[4].mxu0 %v6462_v18  ;;  %5366 = vmatprep.mubr.bf16.mxu1 %v648_v19  ;;  %v944_v19 = vpack.c.bf16 %v916_v9, %v915_v8  ;;  %v6131_v8 = vld [vmem:[%s6922_s3 + $0x1d0] sm:$0xff]  }
  0x6e   : > { %5590 = vmatprep.mubr.bf16.mxu0 %v6464_v20  ;;  %5619 = vmatpush3.bf16.msra.mxu0 %v6115_v16  ;;  %v6122_v16 = vld [vmem:[%s6922_s3 + $0x90] sm:$0xff]  }
  0x6f   : > { %5620 = vmatprep.subr.bf16.mxu0 %v6117_v21 }
  0x72   : > { %5621 = vmatpush3.bf16.msra.mxu0 %v6117_v21  ;;  %v6516_v21 = vpack.c.bf16 %v2412_v12, %v2411_v11  ;;  %v937_v11 = vld [vmem:[#allocation2 + $0xee] sm:$0xff]  ;;  %v938_v12 = vld [vmem:[#allocation2 + $0xf6] sm:$0xff] }
  0x73   : > { %5622 = vmatprep.subr.bf16.mxu0 %v6119_v33 }
  0x74   : > { %5367 = vmatmul.mubr.bf16.gmra.mrb[24].mxu1 %v649_v35  ;;  %v946_v35 = vpack.c.bf16 %v920_v26, %v919_v23  ;;  %v3869_v26 = vld [vmem:[%s6300_s20] sm:$0xff] }
  0x75   : > { %5591 = vmatmul.mubr.bf16.gmra.mrb[8].mxu0 %v6476_v38  ;;  %5370 = vmatprep.mubr.bf16.mxu1 %v650_v39  ;;  %v6531_v39 = vpack.c.bf16 %v2418_v34, %v2417_v32  ;;  %v6594_v32 = vpack.c.bf16 %v1284_v29, %v1283_v28  ;;  %v1285_v34 = vld [vmem:[#allocation2 + $0x3f] sm:$0xff]  ;;  %v3887_v28 = vld [vmem:[%s6300_s20 + $0x90] sm:$0xff] }
  0x76   : > { %5594 = vmatprep.mubr.bf16.mxu0 %v6478_v40  ;;  %5623 = vmatpush3.bf16.msra.mxu0 %v6119_v33  ;;  %v6126_v33 = vld [vmem:[%s6922_s3 + $0xa0] sm:$0xff]  }
  0x77   : > { %5624 = vmatprep.subr.bf16.mxu0 %v6121_v41  ;;  %4134 = vperm.xlu0 %6072, %v3869_v26  }
  0x7a   : > { %5625 = vmatpush3.bf16.msra.mxu0 %v6121_v41  ;;  %v6128_v41 = vld [vmem:[%s6922_s3 + $0xa8] sm:$0xff]  }
  0x7b   : > { %5626 = vmatprep.subr.bf16.mxu0 %v6123_v50 }
  0x7c   : > { %5371 = vmatmul.mubr.bf16.gmra.mrb[28].mxu1 %v651_v51  ;;  %v949_v51 = vpack.c.bf16 %v926_v45, %v925_v44  ;;  %v6138_v44 = vld [vmem:[%s6922_s3 + $0xd0] sm:$0xff]   ;;  %v3874_v45 = vld [vmem:[%s6300_s20 + $0x28] sm:$0xff] }
  0x7d   : > { %5595 = vmatmul.mubr.bf16.gmra.mrb[12].mxu0 %v6488_v52  ;;  %5390 = vmatprep.mubr.bf16.mxu1 %v941_v53  ;;  %v6132_v53 = vld [vmem:[%s6922_s3 + $0xb8] sm:$0xff]  }
  0x7e   : > { %5598 = vmatprep.mubr.bf16.mxu0 %v6490_v54  ;;  %5627 = vmatpush3.bf16.msra.mxu0 %v6123_v50  ;;  %v6541_v50 = vpack.c.bf16 %v2420_v47, %v2419_v46  ;;  %v6613_v46 = vpack.c.bf16 %v1288_v43, %v1287_v42  ;;  %v3875_v47 = vld [vmem:[%s6300_s20 + $0x30] sm:$0xff] }
  0x7f   : > { %5628 = vmatprep.subr.bf16.mxu0 %v6125_v56  ;;  %v3136_v42 = vld [vmem:[#allocation2 + $0x6a] sm:$0xff] }
  0x80   : > { %v1303_v43 = vld [vmem:[#allocation2 + $0xcf] sm:$0xff] }
  0x82   : > { %5629 = vmatpush3.bf16.msra.mxu0 %v6125_v56  ;;  %v928_v56 = vld [vmem:[#allocation2 + $0xa6] sm:$0xff] }
  0x83   : > { %5662 = vmatprep.subr.bf16.mxu0 %v6500_v0  ;;  %v950_v60 = vpack.c.bf16 %v928_v56, %v927_v55  ;;  %v1291_v55 = vld [vmem:[#allocation2 + $0x6f] sm:$0xff]  ;;  %v1292_v56 = vld [vmem:[#allocation2 + $0x77] sm:$0xff] }
  0x84   : > { %5391 = vmatmul.mubr.bf16.vlgmr.msra.gmra.mrb[0].mxu1 %v942_v1  ;;  %v933_v1 = vld [vmem:[#allocation2 + $0xce] sm:$0xff] }
  0x85   : > { %5599 = vmatmul.mubr.bf16.gmra.mrb[16].mxu0 %v6502_v2  ;;  %5423 = vmatpush3.bf16.msra.mxu1 %v6447_v3  ;;  %v6518_v3 = vpack.c.bf16 %v2414_v17, %v2413_v15  ;;  %v955_v15 = vpack.c.bf16 %v938_v12, %v937_v11  ;;  %v1279_v17 = vld [vmem:[#allocation2 + $0xf] sm:$0xff] }
  0x86   : > { %5394 = vmatprep.mubr.bf16.mxu1 %v943_v5  ;;  %5602 = vmatprep.mubr.bf16.mxu0 %v6504_v7  ;;  %v934_v5 = vld [vmem:[#allocation2 + $0xd6] sm:$0xff] }
  0x87   : > { %5424 = vmatprep.subr.bf16.mxu1 %v6120_v10  ;;  %v3883_v12 = vld [vmem:[%s6300_s20 + $0x70] sm:$0xff] }
  0x89   : > { %5425 = vmatpush3.bf16.msra.mxu1 %v6120_v10  ;;  %v953_v10 = vpack.c.bf16 %v934_v5, %v933_v1  ;;  %v3881_v1 = vld [vmem:[%s6300_s20 + $0x60] sm:$0xff]  ;;  %v2790_v5 = vld [vmem:[#allocation2 + $0x129] sm:$0xff] }
  0x8a   : > { %5426 = vmatprep.subr.bf16.mxu1 %v6122_v16 }
  0x8c   : > { %5395 = vmatmul.mubr.bf16.gmra.mrb[4].mxu1 %v944_v19  ;;  %v1280_v19 = vld [vmem:[#allocation2 + $0x17] sm:$0xff] }
  0x8d   : > { %5603 = vmatmul.mubr.bf16.gmra.mrb[20].mxu0 %v6516_v21  ;;  %5398 = vmatprep.mubr.bf16.mxu1 %v945_v22  ;;  %v6139_v22 = vld [vmem:[%s6922_s3 + $0x1f0] sm:$0xff]  }
  0x8e   : > { %5606 = vmatprep.mubr.bf16.mxu0 %v6518_v3  ;;  %5427 = vmatpush3.bf16.msra.mxu1 %v6122_v16  ;;  %v940_v16 = vld [vmem:[#allocation2 + $0x106] sm:$0xff] }
  0x8f   : > { %5428 = vmatprep.subr.bf16.mxu1 %v6124_v24 }
  0x92   : > { %5429 = vmatpush3.bf16.msra.mxu1 %v6124_v24  ;;  %v1311_v24 = vpack.c.bf16 %v1280_v19, %v1279_v17  ;;  %v3885_v17 = vld [vmem:[%s6300_s20 + $0x80] sm:$0xff]  ;;  %v3132_v19 = vld [vmem:[#allocation2 + $0x4a] sm:$0xff] }
  0x93   : > { %5430 = vmatprep.subr.bf16.mxu1 %v6126_v33 }
  0x94   : > { %5399 = vmatmul.mubr.bf16.gmra.mrb[8].mxu1 %v946_v35  ;;  %v1286_v35 = vld [vmem:[#allocation2 + $0x47] sm:$0xff] }
  0x95   : > { %5607 = vmatmul.mubr.bf16.gmra.mrb[24].mxu0 %v6529_v36  ;;  %5402 = vmatprep.mubr.bf16.mxu1 %v947_v37  ;;  %v3872_v37 = vld [vmem:[%s6300_s20 + $0x18] sm:$0xff] }
  0x96   : > { %5610 = vmatprep.mubr.bf16.mxu0 %v6531_v39  ;;  %5431 = vmatpush3.bf16.msra.mxu1 %v6126_v33  ;;  %v6136_v33 = vld [vmem:[%s6922_s3 + $0xc8] sm:$0xff]  }
  0x97   : > { %5432 = vmatprep.subr.bf16.mxu1 %v6128_v41  ;;  %4149 = vperm.xlu1 %6073, %v3872_v37   ;;  %v3135_v37 = vld [vmem:[#allocation2 + $0x62] sm:$0xff] }
  0x9a   : > { %5433 = vmatpush3.bf16.msra.mxu1 %v6128_v41  ;;  %v3873_v41 = vld [vmem:[%s6300_s20 + $0x20] sm:$0xff] }
  0x9b   : > { %5434 = vmatprep.subr.bf16.mxu1 %v6130_v48  ;;  %4159 = vperm.xlu1 %6073, %v3874_v45   ;;  %v3137_v45 = vld [vmem:[#allocation2 + $0x72] sm:$0xff] }
  0x9c   : > { %5403 = vmatmul.mubr.bf16.gmra.mrb[12].mxu1 %v948_v49  ;;  %v1290_v49 = vld [vmem:[#allocation2 + $0x67] sm:$0xff] }
  0x9d   : > { %5611 = vmatmul.mubr.bf16.gmra.mrb[28].mxu0 %v6541_v50  ;;  %5406 = vmatprep.mubr.bf16.mxu1 %v949_v51  ;;  %v3876_v51 = vld [vmem:[%s6300_s20 + $0x38] sm:$0xff] }
  0x9e   : > { %5630 = vmatprep.mubr.bf16.mxu0 %v6449_v4  ;;  %5435 = vmatpush3.bf16.msra.mxu1 %v6130_v48  ;;  %v931_v4 = vld [vmem:[#allocation2 + $0xbe] sm:$0xff] }
  0x9f   : > { %5436 = vmatprep.subr.bf16.mxu1 %v6132_v53  ;;  %v952_v9 = vpack.c.bf16 %v932_v63, %v931_v4  ;;  %v1289_v48 = vld [vmem:[#allocation2 + $0x5f] sm:$0xff]  ;;  %4169 = vperm.xlu1 %6073, %v3876_v51   ;;  %v3164_v51 = vpack.c.bf16 %v3136_v42, %v3135_v37  ;;  %v3152_v42 = vld [vmem:[#allocation2 + $0xea] sm:$0xff] }
  0xa0   : > { %v6628_v58 = vpack.c.bf16 %v1290_v49, %v1289_v48  ;;  %v2789_v4 = vld [vmem:[#allocation2 + $0x121] sm:$0xff]  ;;  %v3880_v63 = vld [vmem:[%s6300_s20 + $0x58] sm:$0xff] }
  0xa1   : > { %v2806_v11 = vpack.c.bf16 %v2790_v5, %v2789_v4  ;;  %v3890_v49 = vld [vmem:[%s6300_s20 + $0xa8] sm:$0xff]  ;;  %v3142_v5 = vld [vmem:[#allocation2 + $0x9a] sm:$0xff] }
  0xa2   : > { %5437 = vmatpush3.bf16.msra.mxu1 %v6132_v53  ;;  %v3877_v53 = vld [vmem:[%s6300_s20 + $0x40] sm:$0xff]  ;;  %v1307_v4 = vld [vmem:[#allocation2 + $0xef] sm:$0xff] }
  0xa3   : > { %5470 = vmatprep.subr.bf16.mxu1 %v6551_v59 }
  0xa4   : > { %5407 = vmatmul.mubr.bf16.gmra.mrb[16].mxu1 %v950_v60  ;;  %v3879_v60 = vld [vmem:[%s6300_s20 + $0x50] sm:$0xff] }
  0xa5   : > { %5631 = vmatmul.mubr.bf16.vlgmr.msra.gmra.mrb[0].mxu0 %v6451_v6  ;;  %5410 = vmatprep.mubr.bf16.mxu1 %v951_v61  ;;  %v6133_v6 = vld [vmem:[%s6922_s3 + $0x1d8] sm:$0xff]  }
  0xa6   : > { %5663 = vmatpush3.bf16.msra.mxu0 %v6500_v0  ;;  %5634 = vmatprep.mubr.bf16.mxu0 %v6462_v18  ;;  %v935_v0 = vld [vmem:[#allocation2 + $0xde] sm:$0xff]  ;;  %v936_v18 = vld [vmem:[#allocation2 + $0xe6] sm:$0xff] }
  0xa7   : > { %5664 = vmatprep.subr.bf16.mxu0 %v6129_v62  ;;  %v954_v14 = vpack.c.bf16 %v936_v18, %v935_v0  ;;  %v1293_v61 = vld [vmem:[#allocation2 + $0x7f] sm:$0xff]  ;;  %v3882_v18 = vld [vmem:[%s6300_s20 + $0x68] sm:$0xff] }
  0xaa   : > { %5665 = vmatpush3.bf16.msra.mxu0 %v6129_v62  ;;  %v1294_v62 = vld [vmem:[#allocation2 + $0x87] sm:$0xff] }
  0xab   : > { %5666 = vmatprep.subr.bf16.mxu0 %v6131_v8  ;;  %v6646_v0 = vpack.c.bf16 %v1294_v62, %v1293_v61  ;;  %v3893_v61 = vld [vmem:[%s6300_s20 + $0xc0] sm:$0xff]  ;;  %v3140_v62 = vld [vmem:[#allocation2 + $0x8a] sm:$0xff] }
  0xac   : > { %5411 = vmatmul.mubr.bf16.gmra.mrb[20].mxu1 %v952_v9  ;;  %v1296_v9 = vld [vmem:[#allocation2 + $0x97] sm:$0xff] }
  0xad   : > { %5635 = vmatmul.mubr.bf16.gmra.mrb[4].mxu0 %v6464_v20  ;;  %5414 = vmatprep.mubr.bf16.mxu1 %v953_v10  ;;  %v6137_v20 = vld [vmem:[%s6922_s3 + $0x1e8] sm:$0xff]   ;;  %v3129_v10 = vld [vmem:[#allocation2 + $0x32] sm:$0xff] }
  0xae   : > { %5638 = vmatprep.mubr.bf16.mxu0 %v6476_v38  ;;  %5667 = vmatpush3.bf16.msra.mxu0 %v6131_v8  ;;  %v939_v38 = vld [vmem:[#allocation2 + $0xfe] sm:$0xff]  ;;  %v1295_v8 = vld [vmem:[#allocation2 + $0x8f] sm:$0xff] }
  0xaf   : > { %5668 = vmatprep.subr.bf16.mxu0 %v6133_v6  ;;  %v956_v23 = vpack.c.bf16 %v940_v16, %v939_v38  ;;  %v3131_v38 = vld [vmem:[#allocation2 + $0x42] sm:$0xff]  ;;  %v3884_v16 = vld [vmem:[%s6300_s20 + $0x78] sm:$0xff] }
  0xb0   : > { %v3162_v26 = vpack.c.bf16 %v3132_v19, %v3131_v38  ;;  %v3143_v38 = vld [vmem:[#allocation2 + $0xa2] sm:$0xff]  ;;  %v3146_v19 = vld [vmem:[#allocation2 + $0xba] sm:$0xff] }
  0xb2   : > { %5669 = vmatpush3.bf16.msra.mxu0 %v6133_v6  ;;  %v3130_v6 = vld [vmem:[#allocation2 + $0x3a] sm:$0xff] }
  0xb3   : > { %5670 = vmatprep.subr.bf16.mxu0 %v6135_v13 }
  0xb4   : > { %5415 = vmatmul.mubr.bf16.gmra.mrb[24].mxu1 %v954_v14  ;;  %v6148_v14 = vld [vmem:[%s6922_s3 + $0xf8] sm:$0xff]  }
  0xb5   : > { %5639 = vmatmul.mubr.bf16.gmra.mrb[8].mxu0 %v6478_v40  ;;  %5418 = vmatprep.mubr.bf16.mxu1 %v955_v15  ;;  %v6141_v40 = vld [vmem:[%s6922_s3 + $0x1f8] sm:$0xff]  }
  0xb6   : > { %5642 = vmatprep.mubr.bf16.mxu0 %v6488_v52  ;;  %5671 = vmatpush3.bf16.msra.mxu0 %v6135_v13  ;;  %v1281_v52 = vld [vmem:[#allocation2 + $0x1f] sm:$0xff]  ;;  %v3161_v13 = vpack.c.bf16 %v3130_v6, %v3129_v10  ;;  %v3894_v10 = vld [vmem:[%s6300_s20 + $0xc8] sm:$0xff] }
  0xb7   : > { %5672 = vmatprep.subr.bf16.mxu0 %v6137_v20  ;;  %v1297_v15 = vld [vmem:[#allocation2 + $0x9f] sm:$0xff] }
  0xba   : > { %5673 = vmatpush3.bf16.msra.mxu0 %v6137_v20  ;;  %v1298_v20 = vld [vmem:[#allocation2 + $0xa7] sm:$0xff] }
  0xbb   : > { %5674 = vmatprep.subr.bf16.mxu0 %v6139_v22 }
  0xbc   : > { %5419 = vmatmul.mubr.bf16.gmra.mrb[28].mxu1 %v956_v23  ;;  %v1300_v23 = vld [vmem:[#allocation2 + $0xb7] sm:$0xff] }
  0xbd   : > { %5643 = vmatmul.mubr.bf16.gmra.mrb[12].mxu0 %v6490_v54  ;;  %5438 = vmatprep.mubr.bf16.mxu1 %v1311_v24  ;;  %v6591_v54 = vpack.c.bf16 %v1282_v25, %v1281_v52  ;;  %v3133_v24 = vld [vmem:[#allocation2 + $0x52] sm:$0xff]  ;;  %v6659_v52 = vpack.c.bf16 %v1298_v20, %v1297_v15  ;;  %v3886_v25 = vld [vmem:[%s6300_s20 + $0x88] sm:$0xff]  ;;  %v3897_v20 = vld [vmem:[%s6300_s20 + $0xe0] sm:$0xff] }
  0xbe   : > { %5646 = vmatprep.mubr.bf16.mxu0 %v6502_v2  ;;  %5675 = vmatpush3.bf16.msra.mxu0 %v6139_v22  ;;  %v3870_v2 = vld [vmem:[%s6300_s20 + $0x8] sm:$0xff] }
  0xbf   : > { %5676 = vmatprep.subr.bf16.mxu0 %v6141_v40  ;;  %4139 = vperm.xlu0 %6072, %v3870_v2   ;;  %v1299_v22 = vld [vmem:[#allocation2 + $0xaf] sm:$0xff]  ;;  %v6671_v2 = vld [vmem:[%s6922_s3 + $0x100] sm:$0xff]  }
  0xc0   : > { %v6662_v27 = vpack.c.bf16 %v1300_v23, %v1299_v22  ;;  %v1310_v15 = vld [vmem:[#allocation2 + $0x107] sm:$0xff]  ;;  %v6152_v22 = vld [vmem:[%s6922_s3 + $0x230] sm:$0xff]  }
  0xc2   : > { %5677 = vmatpush3.bf16.msra.mxu0 %v6141_v40  ;;  %v3134_v40 = vld [vmem:[#allocation2 + $0x5a] sm:$0xff] }
  0xc3   : > { %5710 = vmatprep.subr.bf16.mxu0 %v6589_v30  ;;  %4154 = vperm.xlu0 %6072, %v3873_v41   ;;  %v3163_v29 = vpack.c.bf16 %v3134_v40, %v3133_v24  ;;  %v3889_v41 = vld [vmem:[%s6300_s20 + $0xa0] sm:$0xff]  ;;  %v3898_v24 = vld [vmem:[%s6300_s20 + $0xe8] sm:$0xff] }
  0xc4   : > { %5439 = vmatmul.mubr.bf16.vlgmr.msra.gmra.mrb[0].mxu1 %v6591_v54 }
  0xc5   : > { %5647 = vmatmul.mubr.bf16.gmra.mrb[16].mxu0 %v6504_v7  ;;  %5471 = vmatpush3.bf16.msra.mxu1 %v6551_v59  ;;  %v6610_v7 = vpack.c.bf16 %v1286_v35, %v1285_v34  ;;  %v6631_v59 = vpack.c.bf16 %v1292_v56, %v1291_v55  ;;  %v3888_v34 = vld [vmem:[%s6300_s20 + $0x98] sm:$0xff]  ;;  %v1302_v35 = vld [vmem:[#allocation2 + $0xc7] sm:$0xff] }
  0xc6   : > { %5442 = vmatprep.mubr.bf16.mxu1 %v6594_v32  ;;  %5650 = vmatprep.mubr.bf16.mxu0 %v6516_v21  ;;  %v6140_v21 = vld [vmem:[%s6922_s3 + $0xd8] sm:$0xff]  }
  0xc7   : > { %5472 = vmatprep.subr.bf16.mxu1 %v6136_v33  ;;  %4164 = vperm.xlu0 %6072, %v3875_v47   ;;  %v3138_v47 = vld [vmem:[#allocation2 + $0x7a] sm:$0xff] }
  0xc8   : > { %v3165_v55 = vpack.c.bf16 %v3138_v47, %v3137_v45  ;;  %v6149_v56 = vld [vmem:[%s6922_s3 + $0x218] sm:$0xff]  }
  0xc9   : > { %5473 = vmatpush3.bf16.msra.mxu1 %v6136_v33  ;;  %v1301_v33 = vld [vmem:[#allocation2 + $0xbf] sm:$0xff] }
  0xca   : > { %5474 = vmatprep.subr.bf16.mxu1 %v6138_v44  ;;  %v6682_v48 = vpack.c.bf16 %v1302_v35, %v1301_v33  ;;  %v3148_v33 = vld [vmem:[#allocation2 + $0xca] sm:$0xff]  ;;  %v3150_v35 = vld [vmem:[#allocation2 + $0xda] sm:$0xff] }
  0xcb   : > { %4174 = vperm.xlu0 %6072, %v3877_v53   ;;  %v3891_v53 = vld [vmem:[%s6300_s20 + $0xb0] sm:$0xff]  ;;  %v3154_v45 = vld [vmem:[#allocation2 + $0xfa] sm:$0xff] }
  0xcc   : > { %5443 = vmatmul.mubr.bf16.gmra.mrb[4].mxu1 %v6610_v7 }
  0xcd   : > { %5651 = vmatmul.mubr.bf16.gmra.mrb[20].mxu0 %v6518_v3  ;;  %5446 = vmatprep.mubr.bf16.mxu1 %v6613_v46  ;;  %v3878_v3 = vld [vmem:[%s6300_s20 + $0x48] sm:$0xff] }
  0xce   : > { %5654 = vmatprep.mubr.bf16.mxu0 %v6529_v36  ;;  %5475 = vmatpush3.bf16.msra.mxu1 %v6138_v44  ;;  %v6144_v36 = vld [vmem:[%s6922_s3 + $0xe8] sm:$0xff]   ;;  %v1304_v44 = vld [vmem:[#allocation2 + $0xd7] sm:$0xff] }
  0xcf   : > { %5476 = vmatprep.subr.bf16.mxu1 %v6140_v21  ;;  %4179 = vperm.xlu1 %6073, %v3878_v3   ;;  %v3892_v3 = vld [vmem:[%s6300_s20 + $0xb8] sm:$0xff] }
  0xd0   : > { %4184 = vperm.xlu0 %6072, %v3879_v60   ;;  %v1306_v60 = vld [vmem:[#allocation2 + $0xe7] sm:$0xff] }
  0xd2   : > { %5477 = vmatpush3.bf16.msra.mxu1 %v6140_v21  ;;  %v6147_v21 = vld [vmem:[%s6922_s3 + $0x210] sm:$0xff]  }
  0xd3   : > { %5478 = vmatprep.subr.bf16.mxu1 %v6142_v57  ;;  %4189 = vperm.xlu1 %6073, %v3880_v63   ;;  %v1308_v63 = vld [vmem:[#allocation2 + $0xf7] sm:$0xff] }
  0xd4   : > { %5447 = vmatmul.mubr.bf16.gmra.mrb[8].mxu1 %v6628_v58  ;;  %4194 = vperm.xlu0 %6072, %v3881_v1   ;;  %v3141_v1 = vld [vmem:[#allocation2 + $0x92] sm:$0xff] }
  0xd5   : > { %5655 = vmatmul.mubr.bf16.gmra.mrb[24].mxu0 %v6531_v39  ;;  %5450 = vmatprep.mubr.bf16.mxu1 %v6631_v59  ;;  %v6146_v39 = vld [vmem:[%s6922_s3 + $0xf0] sm:$0xff]  }
  0xd6   : > { %5658 = vmatprep.mubr.bf16.mxu0 %v6541_v50  ;;  %5479 = vmatpush3.bf16.msra.mxu1 %v6142_v57  ;;  %v6649_v50 = vpack.c.bf16 %v1296_v9, %v1295_v8  ;;  %v1305_v57 = vld [vmem:[#allocation2 + $0xdf] sm:$0xff] }
  0xd7   : > { %5480 = vmatprep.subr.bf16.mxu1 %v6144_v36  ;;  %4199 = vperm.xlu1 %6073, %v3882_v18   ;;  %v6150_v8 = vld [vmem:[%s6922_s3 + $0x220] sm:$0xff]   ;;  %v6698_v9 = vpack.c.bf16 %v1306_v60, %v1305_v57  ;;  %v3895_v18 = vld [vmem:[%s6300_s20 + $0xd0] sm:$0xff] }
  0xd8   : > { %4204 = vperm.xlu0 %6072, %v3883_v12   ;;  %v6151_v12 = vld [vmem:[%s6922_s3 + $0x228] sm:$0xff]   ;;  %v3500_v60 = vld [vmem:[#allocation2 + $0x3b] sm:$0xff] }
  0xd9   : > { %v3160_v57 = vld [vmem:[#allocation2 + $0x12a] sm:$0xff] }
  0xda   : > { %5481 = vmatpush3.bf16.msra.mxu1 %v6144_v36  ;;  %v3139_v36 = vld [vmem:[#allocation2 + $0x82] sm:$0xff] }
  0xdb   : > { %5482 = vmatprep.subr.bf16.mxu1 %v6146_v39  ;;  %4209 = vperm.xlu1 %6073, %v3884_v16   ;;  %v3166_v6 = vpack.c.bf16 %v3140_v62, %v3139_v36  ;;  %v3144_v16 = vld [vmem:[#allocation2 + $0xaa] sm:$0xff] }
  0xdc   : > { %5451 = vmatmul.mubr.bf16.gmra.mrb[12].mxu1 %v6646_v0  ;;  %4214 = vperm.xlu0 %6072, %v3885_v17   ;;  %v3145_v17 = vld [vmem:[#allocation2 + $0xb2] sm:$0xff]  ;;  %v3168_v40 = vpack.c.bf16 %v3144_v16, %v3143_v38  ;;  %v6159_v36 = vld [vmem:[%s6922_s3 + $0x128] sm:$0xff]  }
  0xdd   : > { %5659 = vmatmul.mubr.bf16.gmra.mrb[28].mxu0 %v2806_v11  ;;  %5454 = vmatprep.mubr.bf16.mxu1 %v6649_v50  ;;  %v3167_v11 = vpack.c.bf16 %v3142_v5, %v3141_v1  ;;  %v3504_v1 = vld [vmem:[#allocation2 + $0x5b] sm:$0xff] }
  0xde   : > { %5678 = vmatprep.mubr.bf16.mxu0 %v3161_v13  ;;  %5483 = vmatpush3.bf16.msra.mxu1 %v6146_v39  ;;  %v6701_v39 = vpack.c.bf16 %v1308_v63, %v1307_v4  ;;  %v3896_v13 = vld [vmem:[%s6300_s20 + $0xd8] sm:$0xff]  ;;  %v3502_v4 = vld [vmem:[#allocation2 + $0x4b] sm:$0xff] }
  0xdf   : > { %5484 = vmatprep.subr.bf16.mxu1 %v6148_v14  ;;  %4219 = vperm.xlu1 %6073, %v3886_v25   ;;  %v3899_v25 = vld [vmem:[%s6300_s20 + $0xf0] sm:$0xff]  ;;  %v6161_v5 = vld [vmem:[%s6922_s3 + $0x138] sm:$0xff]  }
  0xe0   : > { %4224 = vperm.xlu0 %6072, %v3887_v28   ;;  %v6153_v28 = vld [vmem:[%s6922_s3 + $0x238] sm:$0xff]  }
  0xe1   : > { %v3503_v63 = vld [vmem:[#allocation2 + $0x53] sm:$0xff] }
  0xe2   : > { %5485 = vmatpush3.bf16.msra.mxu1 %v6148_v14  ;;  %v1309_v14 = vld [vmem:[#allocation2 + $0xff] sm:$0xff]  ;;  %v1680_v16 = vld [vmem:[#allocation2 + $0x117] sm:$0xff] }
  0xe3   : > { %5758 = vmatprep.subr.bf16.mxu1 %v6671_v2  ;;  %4229 = vperm.xlu1 %6073, %v3888_v34   ;;  %v6714_v23 = vpack.c.bf16 %v1310_v15, %v1309_v14  ;;  %v3149_v34 = vld [vmem:[#allocation2 + $0xd2] sm:$0xff] }
  0xe4   : > { %5455 = vmatmul.mubr.bf16.gmra.mrb[16].mxu1 %v6659_v52  ;;  %4234 = vperm.xlu0 %6072, %v3889_v41   ;;  %v3171_v41 = vpack.c.bf16 %v3150_v35, %v3149_v34  ;;  %v3510_v14 = vld [vmem:[#allocation2 + $0x8b] sm:$0xff]  ;;  %v3511_v15 = vld [vmem:[#allocation2 + $0x93] sm:$0xff] }
  0xe5   : > { %5679 = vmatmul.mubr.bf16.vlgmr.msra.gmra.mrb[0].mxu0 %v3162_v26  ;;  %5458 = vmatprep.mubr.bf16.mxu1 %v6662_v27  ;;  %v3169_v26 = vpack.c.bf16 %v3146_v19, %v3145_v17  ;;  %v3513_v17 = vld [vmem:[#allocation2 + $0xa3] sm:$0xff]  ;;  %v3519_v35 = vld [vmem:[#allocation2 + $0xd3] sm:$0xff] }
  0xe6   : > { %5711 = vmatpush3.bf16.msra.mxu0 %v6589_v30  ;;  %5682 = vmatprep.mubr.bf16.mxu0 %v3163_v29  ;;  %v6685_v30 = vpack.c.bf16 %v1304_v44, %v1303_v43  ;;  %v3900_v29 = vld [vmem:[%s6300_s20 + $0xf8] sm:$0xff]  ;;  %v6155_v43 = vld [vmem:[%s6922_s3 + $0x108] sm:$0xff]   ;;  %v2035_v19 = vld [vmem:[#allocation2 + $0xa0] sm:$0xff] }
  0xe7   : > { %5712 = vmatprep.subr.bf16.mxu0 %v6145_v31  ;;  %4239 = vperm.xlu1 %6073, %v3890_v49   ;;  %v3153_v44 = vld [vmem:[#allocation2 + $0xf2] sm:$0xff]  ;;  %v2040_v34 = vld [vmem:[#allocation2 + $0xc8] sm:$0xff] }
  0xe8   : > { %4244 = vperm.xlu0 %6072, %v3891_v53   ;;  %v3157_v49 = vld [vmem:[#allocation2 + $0x112] sm:$0xff] }
  0xe9   : > { %v6157_v53 = vld [vmem:[%s6922_s3 + $0x118] sm:$0xff]  }
  0xea   : > { %5713 = vmatpush3.bf16.msra.mxu0 %v6145_v31  ;;  %v3147_v31 = vld [vmem:[#allocation2 + $0xc2] sm:$0xff] }
  0xeb   : > { %5714 = vmatprep.subr.bf16.mxu0 %v6147_v21  ;;  %4249 = vperm.xlu1 %6073, %v3892_v3   ;;  %v3170_v37 = vpack.c.bf16 %v3148_v33, %v3147_v31  ;;  %v3499_v3 = vld [vmem:[#allocation2 + $0x33] sm:$0xff]  ;;  %v3517_v31 = vld [vmem:[#allocation2 + $0xc3] sm:$0xff] }
  0xec   : > { %5459 = vmatmul.mubr.bf16.gmra.mrb[20].mxu1 %v6682_v48  ;;  %4254 = vperm.xlu0 %6072, %v3893_v61   ;;  %v3531_v62 = vpack.c.bf16 %v3500_v60, %v3499_v3  ;;  %v2039_v33 = vld [vmem:[#allocation2 + $0xc0] sm:$0xff]  ;;  %v3526_v3 = vld [vmem:[#allocation2 + $0x10b] sm:$0xff] }
  0xed   : > { %5683 = vmatmul.mubr.bf16.gmra.mrb[4].mxu0 %v3164_v51  ;;  %5462 = vmatprep.mubr.bf16.mxu1 %v6685_v30  ;;  %v3158_v51 = vld [vmem:[#allocation2 + $0x11a] sm:$0xff] }
  0xee   : > { %5686 = vmatprep.mubr.bf16.mxu0 %v3165_v55  ;;  %5715 = vmatpush3.bf16.msra.mxu0 %v6147_v21  ;;  %v3173_v21 = vpack.c.bf16 %v3154_v45, %v3153_v44  ;;  %v2041_v44 = vld [vmem:[#allocation2 + $0xd0] sm:$0xff]  ;;  %v2042_v45 = vld [vmem:[#allocation2 + $0xd8] sm:$0xff]  ;;  %v2047_v60 = vld [vmem:[#allocation2 + $0x100] sm:$0xff] }
  0xef   : > { %5716 = vmatprep.subr.bf16.mxu0 %v6149_v56  ;;  %4259 = vperm.xlu1 %6073, %v3894_v10   ;;  %v3533_v10 = vpack.c.bf16 %v3504_v1, %v3503_v63  ;;  %v2049_v1 = vld [vmem:[#allocation2 + $0x110] sm:$0xff] }
  0xf0   : > { %4264 = vperm.xlu0 %6072, %v3895_v18   ;;  %v3508_v18 = vld [vmem:[#allocation2 + $0x7b] sm:$0xff] }
  0xf2   : > { %5717 = vmatpush3.bf16.msra.mxu0 %v6149_v56  ;;  %v3175_v56 = vpack.c.bf16 %v3158_v51, %v3157_v49  ;;  %v3524_v49 = vld [vmem:[#allocation2 + $0xfb] sm:$0xff]  ;;  %v2062_v51 = vpack.c.bf16 %v2042_v45, %v2041_v44 }
  0xf3   : > { %5718 = vmatprep.subr.bf16.mxu0 %v6150_v8  ;;  %4269 = vperm.xlu1 %6073, %v3896_v13   ;;  %v3509_v13 = vld [vmem:[#allocation2 + $0x83] sm:$0xff] }
  0xf4   : > { %5463 = vmatmul.mubr.bf16.gmra.mrb[24].mxu1 %v6698_v9  ;;  %4274 = vperm.xlu0 %6072, %v3897_v20   ;;  %v3536_v20 = vpack.c.bf16 %v3510_v14, %v3509_v13  ;;  %v4145_v13 = vpop.permute.xlu1 %4144 }
  0xf5   : > { %5687 = vmatmul.mubr.bf16.gmra.mrb[8].mxu0 %v3166_v6  ;;  %5466 = vmatprep.mubr.bf16.mxu1 %v6701_v39  ;;  %v3507_v6 = vld [vmem:[#allocation2 + $0x73] sm:$0xff] }
  0xf6   : > { %5690 = vmatprep.mubr.bf16.mxu0 %v3167_v11  ;;  %5719 = vmatpush3.bf16.msra.mxu0 %v6150_v8 }
  0xf7   : > { %5720 = vmatprep.subr.bf16.mxu0 %v6151_v12  ;;  %4279 = vperm.xlu1 %6073, %v3898_v24   ;;  %v3516_v24 = vld [vmem:[#allocation2 + $0xbb] sm:$0xff] }
  0xf8   : > { %4284 = vperm.xlu0 %6072, %v3899_v25  }
  0xfa   : > { %5721 = vmatpush3.bf16.msra.mxu0 %v6151_v12  ;;  %v3535_v12 = vpack.c.bf16 %v3508_v18, %v3507_v6  ;;  %v4135_v6 = vpop.permute.xlu0 %4134 }
  0xfb   : > { %5722 = vmatprep.subr.bf16.mxu0 %v6152_v22  ;;  %4289 = vperm.xlu1 %6073, %v3900_v29   ;;  %v2038_v29 = vld [vmem:[#allocation2 + $0xb8] sm:$0xff] }
  0xfc   : > { %5467 = vmatmul.mubr.bf16.gmra.mrb[28].mxu1 %v6714_v23 }
  0xfd   : > { %5691 = vmatmul.mubr.bf16.gmra.mrb[12].mxu0 %v3168_v40  ;;  %5486 = vmatprep.mubr.bf16.mxu1 %v6591_v54  ;;  %v3151_v54 = vld [vmem:[#allocation2 + $0xe2] sm:$0xff] }
  0xfe   : > { %5694 = vmatprep.mubr.bf16.mxu0 %v3169_v26  ;;  %5723 = vmatpush3.bf16.msra.mxu0 %v6152_v22  ;;  %v3172_v47 = vpack.c.bf16 %v3152_v42, %v3151_v54  ;;  %v2036_v22 = vld [vmem:[#allocation2 + $0xa8] sm:$0xff]  ;;  %v2061_v42 = vpack.c.bf16 %v2040_v34, %v2039_v33 }
  0xff   : > { %5724 = vmatprep.subr.bf16.mxu0 %v6153_v28  ;;  %v2059_v26 = vpack.c.bf16 %v2036_v22, %v2035_v19 }
 0x102   : > { %5725 = vmatpush3.bf16.msra.mxu0 %v6153_v28 }
 0x104   : > { %5487 = vmatmul.mubr.bf16.vlgmr.msra.gmra.mrb[0].mxu1 %v6594_v32  ;;  %v6156_v32 = vld [vmem:[%s6922_s3 + $0x110] sm:$0xff]  }
 0x105   : > { %5695 = vmatmul.mubr.bf16.gmra.mrb[16].mxu0 %v3170_v37  ;;  %5766 = vmatpush3.bf16.msra.mxu1 %v6671_v2  ;;  %v3156_v2 = vld [vmem:[#allocation2 + $0x10a] sm:$0xff]  ;;  %v3520_v37 = vld [vmem:[#allocation2 + $0xdb] sm:$0xff] }
 0x106   : > { %5490 = vmatprep.mubr.bf16.mxu1 %v6610_v7  ;;  %5698 = vmatprep.mubr.bf16.mxu0 %v3171_v41  ;;  %v3155_v7 = vld [vmem:[#allocation2 + $0x102] sm:$0xff] }
 0x107   : > { %5759 = vmatprep.subr.bf16.mxu1 %v6155_v43  ;;  %v3174_v55 = vpack.c.bf16 %v3156_v2, %v3155_v7  ;;  %v2044_v7 = vld [vmem:[#allocation2 + $0xe8] sm:$0xff]  ;;  %v3523_v2 = vld [vmem:[#allocation2 + $0xf3] sm:$0xff] }
 0x109   : > { %5767 = vmatpush3.bf16.msra.mxu1 %v6155_v43  ;;  %v3541_v43 = vpack.c.bf16 %v3520_v37, %v3519_v35  ;;  %v6795_v37 = vld [vmem:[%s6923_s4] ss:$0 sm:$0xff] }
 0x10a   : > { %5760 = vmatprep.subr.bf16.mxu1 %v6156_v32 }
 0x10c   : > { %5491 = vmatmul.mubr.bf16.gmra.mrb[4].mxu1 %v6613_v46  ;;  %v6158_v46 = vld [vmem:[%s6922_s3 + $0x120] sm:$0xff]  }
 0x10d   : > { %5699 = vmatmul.mubr.bf16.gmra.mrb[20].mxu0 %v3172_v47  ;;  %5494 = vmatprep.mubr.bf16.mxu1 %v6628_v58  ;;  %v3159_v58 = vld [vmem:[#allocation2 + $0x122] sm:$0xff] }
 0x10e   : > { %5702 = vmatprep.mubr.bf16.mxu0 %v3173_v21  ;;  %5768 = vmatpush3.bf16.msra.mxu1 %v6156_v32  ;;  %v3176_v61 = vpack.c.bf16 %v3160_v57, %v3159_v58  ;;  %v3521_v47 = vld [vmem:[#allocation2 + $0xe3] sm:$0xff]  ;;  %v3522_v21 = vld [vmem:[#allocation2 + $0xeb] sm:$0xff]  ;;  %v2046_v58 = vld [vmem:[#allocation2 + $0xf8] sm:$0xff] }
 0x10f   : > { %5761 = vmatprep.subr.bf16.mxu1 %v6157_v53  ;;  %v2043_v32 = vld [vmem:[#allocation2 + $0xe0] sm:$0xff] }
 0x110   : > { %v3525_v57 = vld [vmem:[#allocation2 + $0x103] sm:$0xff] }
 0x112   : > { %5769 = vmatpush3.bf16.msra.mxu1 %v6157_v53  ;;  %v3542_v53 = vpack.c.bf16 %v3522_v21, %v3521_v47 }
 0x113   : > { %5762 = vmatprep.subr.bf16.mxu1 %v6158_v46 }
 0x114   : > { %5495 = vmatmul.mubr.bf16.gmra.mrb[8].mxu1 %v6631_v59  ;;  %v6160_v59 = vld [vmem:[%s6922_s3 + $0x130] sm:$0xff]  }
 0x115   : > { %5703 = vmatmul.mubr.bf16.gmra.mrb[24].mxu0 %v3174_v55  ;;  %5498 = vmatprep.mubr.bf16.mxu1 %v6646_v0  ;;  %v3501_v0 = vld [vmem:[#allocation2 + $0x43] sm:$0xff]  ;;  %v2063_v55 = vpack.c.bf16 %v2044_v7, %v2043_v32 }
 0x116   : > { %5706 = vmatprep.mubr.bf16.mxu0 %v3175_v56  ;;  %5770 = vmatpush3.bf16.msra.mxu1 %v6158_v46  ;;  %v3532_v8 = vpack.c.bf16 %v3502_v4, %v3501_v0  ;;  %v3543_v56 = vpack.c.bf16 %v3524_v49, %v3523_v2  ;;  %v2045_v46 = vld [vmem:[#allocation2 + $0xf0] sm:$0xff]  ;;  %v3544_v0 = vpack.c.bf16 %v3526_v3, %v3525_v57 }
 0x117   : > { %5763 = vmatprep.subr.bf16.mxu1 %v6159_v36 }
 0x11a   : > { %5771 = vmatpush3.bf16.msra.mxu1 %v6159_v36  ;;  %v2048_v36 = vld [vmem:[#allocation2 + $0x108] sm:$0xff] }
 0x11b   : > { %5764 = vmatprep.subr.bf16.mxu1 %v6160_v59  ;;  %v2065_v4 = vpack.c.bf16 %v2048_v36, %v2047_v60 }
 0x11c   : > { %5499 = vmatmul.mubr.bf16.gmra.mrb[12].mxu1 %v6649_v50  ;;  %v3505_v50 = vld [vmem:[#allocation2 + $0x63] sm:$0xff] }
 0x11d   : > { %5707 = vmatmul.mubr.bf16.gmra.mrb[28].mxu0 %v3176_v61  ;;  %5502 = vmatprep.mubr.bf16.mxu1 %v6659_v52  ;;  %v3506_v52 = vld [vmem:[#allocation2 + $0x6b] sm:$0xff]  ;;  %v3527_v61 = vld [vmem:[#allocation2 + $0x113] sm:$0xff] }
 0x11e   : > { %5726 = vmatprep.mubr.bf16.mxu0 %v3531_v62  ;;  %5772 = vmatpush3.bf16.msra.mxu1 %v6160_v59  ;;  %v3534_v11 = vpack.c.bf16 %v3506_v52, %v3505_v50  ;;  %v3528_v62 = vld [vmem:[#allocation2 + $0x11b] sm:$0xff]  ;;  %v2064_v59 = vpack.c.bf16 %v2046_v58, %v2045_v46 }
 0x11f   : > { %5765 = vmatprep.subr.bf16.mxu1 %v6161_v5  ;;  %v3545_v63 = vpack.c.bf16 %v3528_v62, %v3527_v61 }
 0x122   : > { %5773 = vmatpush3.bf16.msra.mxu1 %v6161_v5  ;;  %v2050_v5 = vld [vmem:[#allocation2 + $0x118] sm:$0xff] }
 0x123   : > { %v2066_v50 = vpack.c.bf16 %v2050_v5, %v2049_v1 }
 0x124   : > { %5503 = vmatmul.mubr.bf16.gmra.mrb[16].mxu1 %v6662_v27  ;;  %v3512_v27 = vld [vmem:[#allocation2 + $0x9b] sm:$0xff] }
 0x125   : > { %5727 = vmatmul.mubr.bf16.vlgmr.msra.gmra.mrb[0].mxu0 %v3532_v8  ;;  %5506 = vmatprep.mubr.bf16.mxu1 %v6682_v48  ;;  %v3537_v38 = vpack.c.bf16 %v3512_v27, %v3511_v15  ;;  %v1679_v48 = vld [vmem:[#allocation2 + $0x10f] sm:$0xff]  ;;  %v3529_v8 = vld [vmem:[#allocation2 + $0x123] sm:$0xff] }
 0x126   : > { %5730 = vmatprep.mubr.bf16.mxu0 %v3533_v10  ;;  %v1696_v40 = vpack.c.bf16 %v1680_v16, %v1679_v48  ;;  %v3530_v10 = vld [vmem:[#allocation2 + $0x12b] sm:$0xff] }
 0x127   : > { %v3546_v52 = vpack.c.bf16 %v3530_v10, %v3529_v8 }
 0x12c   : > { %5507 = vmatmul.mubr.bf16.gmra.mrb[20].mxu1 %v6685_v30  ;;  %v3514_v30 = vld [vmem:[#allocation2 + $0xab] sm:$0xff] }
 0x12d   : > { %5731 = vmatmul.mubr.bf16.gmra.mrb[4].mxu0 %v3534_v11  ;;  %5510 = vmatprep.mubr.bf16.mxu1 %v6698_v9  ;;  %v3515_v9 = vld [vmem:[#allocation2 + $0xb3] sm:$0xff]  ;;  %v3538_v25 = vpack.c.bf16 %v3514_v30, %v3513_v17 }
 0x12e   : > { %5734 = vmatprep.mubr.bf16.mxu0 %v3535_v12  ;;  %v3539_v28 = vpack.c.bf16 %v3516_v24, %v3515_v9 }
 0x134   : > { %5511 = vmatmul.mubr.bf16.gmra.mrb[24].mxu1 %v6701_v39  ;;  %v2037_v39 = vld [vmem:[#allocation2 + $0xb0] sm:$0xff] }
 0x135   : > { %5735 = vmatmul.mubr.bf16.gmra.mrb[8].mxu0 %v3536_v20  ;;  %5514 = vmatprep.mubr.bf16.mxu1 %v6714_v23  ;;  %v3518_v23 = vld [vmem:[#allocation2 + $0xcb] sm:$0xff]  ;;  %v2060_v41 = vpack.c.bf16 %v2038_v29, %v2037_v39  ;;  %v4150_v20 = vpop.permute.xlu1 %4149 }
 0x136   : > { %5738 = vmatprep.mubr.bf16.mxu0 %v3537_v38  ;;  %v3540_v54 = vpack.c.bf16 %v3518_v23, %v3517_v31 }
 0x139   : > { %v6762_v30 = vpop.permute.xlu1 %4159 }
 0x13c   : > { %5515 = vmatmul.mubr.bf16.gmra.mrb[28].mxu1 %v1696_v40 }
 0x13d   : > { %5739 = vmatmul.mubr.bf16.gmra.mrb[12].mxu0 %v3538_v25  ;;  %5550 = vmatprep.mubr.bf16.mxu1 %v2059_v26  ;;  %v6774_v25 = vpop.permute.xlu1 %4169 }
 0x13e   : > { %5742 = vmatprep.mubr.bf16.mxu0 %v3539_v28  ;;  %v4140_v15 = vpop.permute.xlu0 %4139 }
 0x142   : > { %v6760_v48 = vpop.permute.xlu0 %4154 }
 0x144   : > { %5551 = vmatmul.mubr.bf16.vlgmr.msra.gmra.mrb[16].mxu1 %v2060_v41 }
 0x145   : > { %5743 = vmatmul.mubr.bf16.gmra.mrb[16].mxu0 %v3540_v54  ;;  %5554 = vmatprep.mubr.bf16.mxu1 %v2061_v42 }
 0x146   : > { %5746 = vmatprep.mubr.bf16.mxu0 %v3541_v43  ;;  %v6764_v19 = vpop.permute.xlu0 %4164 }
 0x14a   : > { %v6776_v26 = vpop.permute.xlu0 %4174 }
 0x14c   : > { %5555 = vmatmul.mubr.bf16.gmra.mrb[20].mxu1 %v2062_v51 }
 0x14d   : > { %5747 = vmatmul.mubr.bf16.gmra.mrb[20].mxu0 %v3542_v53  ;;  %5558 = vmatprep.mubr.bf16.mxu1 %v2063_v55 }
 0x14e   : > { %5750 = vmatprep.mubr.bf16.mxu0 %v3543_v56  ;;  %v6784_v31 = vpop.permute.xlu1 %4179 }
 0x14f   : > { %v6788_v33 = vpop.permute.xlu0 %4184 }
 0x152   : > { %v6790_v34 = vpop.permute.xlu1 %4189 }
 0x153   : > { %v6797_v41 = vpop.permute.xlu0 %4194 }
 0x154   : > { %5559 = vmatmul.mubr.bf16.gmra.mrb[24].mxu1 %v2064_v59 }
 0x155   : > { %5751 = vmatmul.mubr.bf16.gmra.mrb[24].mxu0 %v3544_v0  ;;  %5562 = vmatprep.mubr.bf16.mxu1 %v2065_v4 }
 0x156   : > { %5754 = vmatprep.mubr.bf16.mxu0 %v3545_v63  ;;  %v6802_v49 = vpop.permute.xlu1 %4199 }
 0x157   : > { %v6805_v55 = vpop.permute.xlu0 %4204 }
 0x15a   : > { %v6809_v10 = vpop.permute.xlu1 %4209 }
 0x15c   : > { %5563 = vmatmul.mubr.bf16.gmra.mrb[28].mxu1 %v2066_v50 }
 0x15d   : > { %5755 = vmatmul.mubr.bf16.gmra.mrb[28].mxu0 %v3546_v52 }
 0x1d7   : > { %v5488_v18 = vpop.f32.mrb[0].mxu1 }
 0x1d8   : > { %v1796_v11 = vpop.f32.mrb[1].mxu1 }
 0x1d9   : > { %v5489_v12 = vpop.f32.mrb[2].mxu1 }
 0x1da   : > { %v1799_v14 = vpop.f32.mrb[3].mxu1 }
 0x1df   : > { %v5492_v27 = vpop.f32.mrb[4].mxu1 }
 0x1e0   : > { %v1812_v38 = vpop.f32.mrb[5].mxu1 }
 0x1e1   : > { %v5493_v16 = vpop.f32.mrb[6].mxu1 }
 0x1e2   : > { %v1815_v17 = vpop.f32.mrb[7].mxu1 }
 0x1e7   : > { %v6766_v22 = vpop.f32.mrb[8].mxu1 }
 0x1e8   : > { %v6768_v9 = vpop.f32.mrb[9].mxu1 }
 0x1e9   : > { %v6770_v24 = vpop.f32.mrb[10].mxu1 }
 0x1ea   : > { %v6772_v40 = vpop.f32.mrb[11].mxu1 }
 0x1ef   : > { %v6778_v28 = vpop.f32.mrb[12].mxu1 }
 0x1f0   : > { %v6780_v39 = vpop.f32.mrb[13].mxu1 }
 0x1f1   : > { %v6782_v29 = vpop.f32.mrb[14].mxu1 }
 0x1f2   : > { %v6786_v23 = vpop.f32.mrb[15].mxu1 }
 0x1f8   : > { %v5728_v35 = vpop.f32.mrb[0].mxu0 }
 0x1f9   : > { %v5774_v54 = vadd.f32 %v5728_v35, %v5488_v18  ;;  %v3646_v42 = vpop.f32.mrb[1].mxu0 }
 0x1fa   : > { %v5775_v43 = vadd.f32 %v3646_v42, %v1796_v11  ;;  %v5729_v44 = vpop.f32.mrb[2].mxu0  ;;  %v6812_v11 = vpop.permute.xlu0 %4214 }
 0x1fb   : > { %v3942_v45 = vadd.f32 %v5774_v54, %v6795_v37  ;;  %v5776_v47 = vadd.f32 %v5729_v44, %v5489_v12  ;;  %v3649_v21 = vpop.f32.mrb[3].mxu0 }
 0x1fc   : > { %v3940_v32 = vadd.f32 %v5775_v43, %v6795_v37  ;;  %v5777_v7 = vadd.f32 %v3649_v21, %v1799_v14 }
 0x1fd   : > { %v3943_v2 = vadd.f32 %v5776_v47, %v6795_v37  ;;  %v4294_v56 = vmul.f32 %v4145_v13, %v3942_v45 }
 0x1fe   : > { %v4292_v51 = vmul.f32 %v4135_v6, %v3940_v32  ;;  %v3941_v53 = vadd.f32 %v5777_v7, %v6795_v37 }
 0x1ff   : > { %v5005_v46 = vpack.c.bf16 %v3943_v2, %v3942_v45  ;;  %v4295_v60 = vmul.f32 %v4150_v20, %v3943_v2  ;;  %v4367_v1 = vmul.f32 %v4294_v56, %v3942_v45 }
 0x200   : > { %v5000_v58 = vpack.c.bf16 %v3941_v53, %v3940_v32  ;;  %v4293_v57 = vmul.f32 %v4140_v15, %v3941_v53  ;;  %v5732_v3 = vpop.f32.mrb[4].mxu0  ;;  %v4365_v62 = vmul.f32 %v4292_v51, %v3940_v32  ;;  %v6822_v32 = vpop.permute.xlu1 %4219 }
 0x201   : > { %5095 = vst [vmem:[%s6315_s18 + $0x8] sm:$0xff] %v5005_v46   ;;  %v5778_v36 = vadd.f32 %v5732_v3, %v5492_v27  ;;  %v3662_v61 = vpop.f32.mrb[5].mxu0  ;;  %v4368_v12 = vmul.f32 %v4295_v60, %v3943_v2 }
 0x202   : > { %5001 = vst [vmem:[%s6315_s18] sm:$0xff] %v5000_v58   ;;  %v4325_v59 = vadd.f32 %v4293_v57, %v4292_v51  ;;  %v4366_v0 = vmul.f32 %v4293_v57, %v3941_v53  ;;  %v5779_v4 = vadd.f32 %v3662_v61, %v1812_v38  ;;  %v5733_v63 = vpop.f32.mrb[6].mxu0  ;;  %v6826_v51 = vpop.permute.xlu0 %4224 }
 0x203   : > { %v5780_v5 = vadd.f32 %v5733_v63, %v5493_v16  ;;  %v3665_v8 = vpop.f32.mrb[7].mxu0  ;;  %v3946_v13 = vadd.f32 %v5778_v36, %v6795_v37 }
 0x204   : > { %v4326_v50 = vadd.f32 %v4325_v59, %v4294_v56  ;;  %v4397_v52 = vadd.f32 %v4366_v0, %v4365_v62  ;;  %v3944_v6 = vadd.f32 %v5779_v4, %v6795_v37  ;;  %v5781_v18 = vadd.f32 %v3665_v8, %v1815_v17  ;;  %v6836_v4 = vpop.permute.xlu1 %4229 }
 0x205   : > { %v3947_v14 = vadd.f32 %v5780_v5, %v6795_v37  ;;  %v4298_v44 = vmul.f32 %v6764_v19, %v3946_v13 }
 0x206   : > { %v4398_v15 = vadd.f32 %v4397_v52, %v4367_v1  ;;  %v4296_v27 = vmul.f32 %v6760_v48, %v3944_v6  ;;  %v4327_v20 = vadd.f32 %v4326_v50, %v4295_v60  ;;  %v3945_v38 = vadd.f32 %v5781_v18, %v6795_v37  ;;  %v6840_v50 = vpop.permute.xlu0 %4234 }
 0x207   : > { %v5015_v16 = vpack.c.bf16 %v3947_v14, %v3946_v13  ;;  %v4299_v53 = vmul.f32 %v6774_v25, %v3947_v14  ;;  %v4371_v3 = vmul.f32 %v4298_v44, %v3946_v13 }
 0x208   : > { %v4328_v35 = vadd.f32 %v4327_v20, %v4296_v27  ;;  %v4369_v54 = vmul.f32 %v4296_v27, %v3944_v6  ;;  %v4399_v42 = vadd.f32 %v4398_v15, %v4368_v12  ;;  %v5010_v17 = vpack.c.bf16 %v3945_v38, %v3944_v6  ;;  %v5736_v43 = vpop.f32.mrb[8].mxu0 }
 0x209   : > { %5097 = vst [vmem:[%s6315_s18 + $0x18] sm:$0xff] %v5015_v16   ;;  %v4297_v45 = vmul.f32 %v6762_v30, %v3945_v38  ;;  %v5782_v47 = vadd.f32 %v5736_v43, %v6766_v22  ;;  %v3678_v21 = vpop.f32.mrb[9].mxu0  ;;  %v4372_v62 = vmul.f32 %v4299_v53, %v3947_v14 }
 0x20a   : > { %v4400_v48 = vadd.f32 %v4399_v42, %v4369_v54  ;;  %5096 = vst [vmem:[%s6315_s18 + $0x10] sm:$0xff] %v5010_v17   ;;  %v5783_v7 = vadd.f32 %v3678_v21, %v6768_v9  ;;  %v5737_v2 = vpop.f32.mrb[10].mxu0 }
 0x20b   : > { %v4329_v56 = vadd.f32 %v4328_v35, %v4297_v45  ;;  %v4370_v46 = vmul.f32 %v4297_v45, %v3945_v38  ;;  %v5784_v19 = vadd.f32 %v5737_v2, %v6770_v24  ;;  %v3681_v58 = vpop.f32.mrb[11].mxu0  ;;  %v3950_v30 = vadd.f32 %v5782_v47, %v6795_v37 }
 0x20c   : > { %v3948_v22 = vadd.f32 %v5783_v7, %v6795_v37  ;;  %v5785_v57 = vadd.f32 %v3681_v58, %v6772_v40 }
 0x20d   : > { %v4330_v60 = vadd.f32 %v4329_v56, %v4298_v44  ;;  %v4401_v36 = vadd.f32 %v4400_v48, %v4370_v46  ;;  %v3951_v9 = vadd.f32 %v5784_v19, %v6795_v37  ;;  %v4302_v63 = vmul.f32 %v6788_v33, %v3950_v30 }
 0x20e   : > { %v4300_v61 = vmul.f32 %v6776_v26, %v3948_v22  ;;  %v3949_v25 = vadd.f32 %v5785_v57, %v6795_v37 }
 0x20f   : > { %v4402_v24 = vadd.f32 %v4401_v36, %v4371_v3  ;;  %v4331_v59 = vadd.f32 %v4330_v60, %v4299_v53  ;;  %v5025_v0 = vpack.c.bf16 %v3951_v9, %v3950_v30  ;;  %v4303_v33 = vmul.f32 %v6790_v34, %v3951_v9 }
 0x210   : > { %v4373_v40 = vmul.f32 %v4300_v61, %v3948_v22  ;;  %v5020_v1 = vpack.c.bf16 %v3949_v25, %v3948_v22  ;;  %v4301_v5 = vmul.f32 %v6784_v31, %v3949_v25  ;;  %v5740_v8 = vpop.f32.mrb[12].mxu0  ;;  %v4375_v38 = vmul.f32 %v4302_v63, %v3950_v30 }
 0x211   : > { %v4332_v52 = vadd.f32 %v4331_v59, %v4300_v61  ;;  %v4403_v26 = vadd.f32 %v4402_v24, %v4372_v62  ;;  %5099 = vst [vmem:[%s6315_s18 + $0x28] sm:$0xff] %v5025_v0   ;;  %v5786_v6 = vadd.f32 %v5740_v8, %v6778_v28  ;;  %v3694_v18 = vpop.f32.mrb[13].mxu0  ;;  %v4376_v44 = vmul.f32 %v4303_v33, %v3951_v9 }
 0x212   : > { %5098 = vst [vmem:[%s6315_s18 + $0x20] sm:$0xff] %v5020_v1   ;;  %v4374_v12 = vmul.f32 %v4301_v5, %v3949_v25  ;;  %v5787_v13 = vadd.f32 %v3694_v18, %v6780_v39  ;;  %v5741_v14 = vpop.f32.mrb[14].mxu0  ;;  %v6852_v39 = vpop.permute.xlu1 %4239 }
 0x213   : > { %v4404_v15 = vadd.f32 %v4403_v26, %v4373_v40  ;;  %v4333_v27 = vadd.f32 %v4332_v52, %v4301_v5  ;;  %v5788_v31 = vadd.f32 %v5741_v14, %v6782_v29  ;;  %v3697_v20 = vpop.f32.mrb[15].mxu0  ;;  %v3954_v42 = vadd.f32 %v5786_v6, %v6795_v37  ;;  %v6856_v29 = vpop.permute.xlu0 %4244 }
 0x214   : > { %v3952_v16 = vadd.f32 %v5787_v13, %v6795_v37  ;;  %v5789_v35 = vadd.f32 %v3697_v20, %v6786_v23 }
 0x215   : > { %v4334_v54 = vadd.f32 %v4333_v27, %v4302_v63  ;;  %v4405_v28 = vadd.f32 %v4404_v15, %v4374_v12  ;;  %v3955_v17 = vadd.f32 %v5788_v31, %v6795_v37  ;;  %v4306_v46 = vmul.f32 %v6805_v55, %v3954_v42 }
 0x216   : > { %v4304_v43 = vmul.f32 %v6797_v41, %v3952_v16  ;;  %v3953_v34 = vadd.f32 %v5789_v35, %v6795_v37  ;;  %v6866_v5 = vpop.permute.xlu1 %4249 }
 0x217   : > { %v4406_v45 = vadd.f32 %v4405_v28, %v4375_v38  ;;  %v4335_v47 = vadd.f32 %v4334_v54, %v4303_v33  ;;  %v5035_v23 = vpack.c.bf16 %v3955_v17, %v3954_v42  ;;  %v5552_v21 = vpop.f32.mrb[16].mxu1  ;;  %v4307_v61 = vmul.f32 %v6809_v10, %v3955_v17  ;;  %v6870_v52 = vpop.permute.xlu0 %4254 }
 0x218   : > { %v4377_v48 = vmul.f32 %v4304_v43, %v3952_v16  ;;  %v5030_v7 = vpack.c.bf16 %v3953_v34, %v3952_v16  ;;  %v4305_v2 = vmul.f32 %v6802_v49, %v3953_v34  ;;  %v5744_v53 = vpop.f32.mrb[16].mxu0  ;;  %v2230_v56 = vpop.f32.mrb[17].mxu1  ;;  %v4379_v0 = vmul.f32 %v4306_v46, %v3954_v42 }
 0x219   : > { %v4336_v41 = vadd.f32 %v4335_v47, %v4304_v43  ;;  %v4407_v19 = vadd.f32 %v4406_v45, %v4376_v44  ;;  %5101 = vst [vmem:[%s6315_s18 + $0x38] sm:$0xff] %v5035_v23   ;;  %v5790_v58 = vadd.f32 %v5744_v53, %v5552_v21  ;;  %v3710_v30 = vpop.f32.mrb[17].mxu0  ;;  %v5553_v22 = vpop.f32.mrb[18].mxu1  ;;  %v4380_v26 = vmul.f32 %v4307_v61, %v3955_v17 }
 0x21a   : > { %5100 = vst [vmem:[%s6315_s18 + $0x30] sm:$0xff] %v5030_v7   ;;  %v4378_v57 = vmul.f32 %v4305_v2, %v3953_v34  ;;  %v5791_v3 = vadd.f32 %v3710_v30, %v2230_v56  ;;  %v5745_v60 = vpop.f32.mrb[18].mxu0  ;;  %v2233_v36 = vpop.f32.mrb[19].mxu1 }
 0x21b   : > { %v4408_v9 = vadd.f32 %v4407_v19, %v4377_v48  ;;  %v4337_v25 = vadd.f32 %v4336_v41, %v4305_v2  ;;  %v5792_v49 = vadd.f32 %v5745_v60, %v5553_v22  ;;  %v3713_v62 = vpop.f32.mrb[19].mxu0  ;;  %v3958_v24 = vadd.f32 %v5790_v58, %v6795_v37  ;;  %v4260_v56 = vpop.permute.xlu1 %4259 }
 0x21c   : > { %v3956_v55 = vadd.f32 %v5791_v3, %v6795_v37  ;;  %v5793_v59 = vadd.f32 %v3713_v62, %v2233_v36 }
 0x21d   : > { %v4338_v63 = vadd.f32 %v4337_v25, %v4306_v46  ;;  %v4409_v40 = vadd.f32 %v4408_v9, %v4378_v57  ;;  %v3959_v1 = vadd.f32 %v5792_v49, %v6795_v37  ;;  %v4310_v14 = vmul.f32 %v6826_v51, %v3958_v24 }
 0x21e   : > { %v4308_v8 = vmul.f32 %v6812_v11, %v3956_v55  ;;  %v3957_v10 = vadd.f32 %v5793_v59, %v6795_v37 }
 0x21f   : > { %v4410_v6 = vadd.f32 %v4409_v40, %v4379_v0  ;;  %v4339_v18 = vadd.f32 %v4338_v63, %v4307_v61  ;;  %v5045_v12 = vpack.c.bf16 %v3959_v1, %v3958_v24  ;;  %v5556_v13 = vpop.f32.mrb[20].mxu1  ;;  %v4311_v51 = vmul.f32 %v6836_v4, %v3959_v1  ;;  %v4265_v4 = vpop.permute.xlu0 %4264 }
 0x220   : > { %v4381_v15 = vmul.f32 %v4308_v8, %v3956_v55  ;;  %v5040_v33 = vpack.c.bf16 %v3957_v10, %v3956_v55  ;;  %v4309_v27 = vmul.f32 %v6822_v32, %v3957_v10  ;;  %v5748_v31 = vpop.f32.mrb[20].mxu0  ;;  %v2246_v20 = vpop.f32.mrb[21].mxu1  ;;  %v4383_v32 = vmul.f32 %v4310_v14, %v3958_v24 }
 0x221   : > { %v4340_v11 = vadd.f32 %v4339_v18, %v4308_v8  ;;  %v4411_v38 = vadd.f32 %v4410_v6, %v4380_v26  ;;  %5103 = vst [vmem:[%s6315_s18 + $0x48] sm:$0xff] %v5045_v12   ;;  %v5794_v16 = vadd.f32 %v5748_v31, %v5556_v13  ;;  %v3726_v35 = vpop.f32.mrb[21].mxu0  ;;  %v5557_v54 = vpop.f32.mrb[22].mxu1  ;;  %v4384_v19 = vmul.f32 %v4311_v51, %v3959_v1 }
 0x222   : > { %5102 = vst [vmem:[%s6315_s18 + $0x40] sm:$0xff] %v5040_v33   ;;  %v4382_v28 = vmul.f32 %v4309_v27, %v3957_v10  ;;  %v5795_v42 = vadd.f32 %v3726_v35, %v2246_v20  ;;  %v5749_v17 = vpop.f32.mrb[22].mxu0  ;;  %v2249_v43 = vpop.f32.mrb[23].mxu1 }
 0x223   : > { %v4412_v34 = vadd.f32 %v4411_v38, %v4381_v15  ;;  %v4341_v44 = vadd.f32 %v4340_v11, %v4309_v27  ;;  %v5796_v45 = vadd.f32 %v5749_v17, %v5557_v54  ;;  %v3729_v47 = vpop.f32.mrb[23].mxu0  ;;  %v3962_v2 = vadd.f32 %v5794_v16, %v6795_v37  ;;  %v4270_v33 = vpop.permute.xlu1 %4269 }
 0x224   : > { %v3960_v23 = vadd.f32 %v5795_v42, %v6795_v37  ;;  %v5797_v21 = vadd.f32 %v3729_v47, %v2249_v43 }
 0x225   : > { %v4342_v48 = vadd.f32 %v4341_v44, %v4310_v14  ;;  %v4413_v7 = vadd.f32 %v4412_v34, %v4382_v28  ;;  %v3963_v53 = vadd.f32 %v5796_v45, %v6795_v37  ;;  %v4314_v25 = vmul.f32 %v6856_v29, %v3962_v2 }
 0x226   : > { %v4312_v46 = vmul.f32 %v6840_v50, %v3960_v23  ;;  %v3961_v41 = vadd.f32 %v5797_v21, %v6795_v37 }
 0x227   : > { %v4414_v58 = vadd.f32 %v4413_v7, %v4383_v32  ;;  %v4343_v30 = vadd.f32 %v4342_v48, %v4311_v51  ;;  %v5055_v22 = vpack.c.bf16 %v3963_v53, %v3962_v2  ;;  %v5560_v57 = vpop.f32.mrb[24].mxu1  ;;  %v4315_v8 = vmul.f32 %v6866_v5, %v3963_v53  ;;  %v4275_v5 = vpop.permute.xlu0 %4274 }
 0x228   : > { %v4385_v3 = vmul.f32 %v4312_v46, %v3960_v23  ;;  %v5050_v60 = vpack.c.bf16 %v3961_v41, %v3960_v23  ;;  %v4313_v36 = vmul.f32 %v6852_v39, %v3961_v41  ;;  %v5752_v9 = vpop.f32.mrb[24].mxu0  ;;  %v2262_v61 = vpop.f32.mrb[25].mxu1  ;;  %v4387_v12 = vmul.f32 %v4314_v25, %v3962_v2 }
 0x229   : > { %v4344_v49 = vadd.f32 %v4343_v30, %v4312_v46  ;;  %v4415_v50 = vadd.f32 %v4414_v58, %v4384_v19  ;;  %5105 = vst [vmem:[%s6315_s18 + $0x58] sm:$0xff] %v5055_v22   ;;  %v5798_v62 = vadd.f32 %v5752_v9, %v5560_v57  ;;  %v3742_v24 = vpop.f32.mrb[25].mxu0  ;;  %v5561_v55 = vpop.f32.mrb[26].mxu1  ;;  %v4388_v20 = vmul.f32 %v4315_v8, %v3963_v53 }
 0x22a   : > { %5104 = vst [vmem:[%s6315_s18 + $0x50] sm:$0xff] %v5050_v60   ;;  %v4386_v59 = vmul.f32 %v4313_v36, %v3961_v41  ;;  %v5799_v0 = vadd.f32 %v3742_v24, %v2262_v61  ;;  %v5753_v63 = vpop.f32.mrb[26].mxu0  ;;  %v2265_v40 = vpop.f32.mrb[27].mxu1 }
 0x22b   : > { %v4416_v1 = vadd.f32 %v4415_v50, %v4385_v3  ;;  %v4345_v10 = vadd.f32 %v4344_v49, %v4313_v36  ;;  %v5800_v39 = vadd.f32 %v5753_v63, %v5561_v55  ;;  %v3745_v26 = vpop.f32.mrb[27].mxu0  ;;  %v3966_v6 = vadd.f32 %v5798_v62, %v6795_v37  ;;  %v4285_v50 = vpop.permute.xlu0 %4284 }
 0x22c   : > { %v3964_v29 = vadd.f32 %v5799_v0, %v6795_v37  ;;  %v5801_v18 = vadd.f32 %v3745_v26, %v2265_v40 }
 0x22d   : > { %v4346_v13 = vadd.f32 %v4345_v10, %v4314_v25  ;;  %v4417_v14 = vadd.f32 %v4416_v1, %v4386_v59  ;;  %v3967_v15 = vadd.f32 %v5800_v39, %v6795_v37  ;;  %v4318_v54 = vmul.f32 %v4265_v4, %v3966_v6  ;;  %v4280_v4 = vpop.permute.xlu1 %4279 }
 0x22e   : > { %v4316_v27 = vmul.f32 %v6870_v52, %v3964_v29  ;;  %v3965_v31 = vadd.f32 %v5801_v18, %v6795_v37 }
 0x22f   : > { %v4418_v11 = vadd.f32 %v4417_v14, %v4387_v12  ;;  %v4347_v38 = vadd.f32 %v4346_v13, %v4315_v8  ;;  %v5065_v16 = vpack.c.bf16 %v3967_v15, %v3966_v6  ;;  %v5564_v35 = vpop.f32.mrb[28].mxu1  ;;  %v4319_v2 = vmul.f32 %v4270_v33, %v3967_v15 }
 0x230   : > { %v4389_v28 = vmul.f32 %v4316_v27, %v3964_v29  ;;  %v5060_v42 = vpack.c.bf16 %v3965_v31, %v3964_v29  ;;  %v4317_v17 = vmul.f32 %v4260_v56, %v3965_v31  ;;  %v5756_v43 = vpop.f32.mrb[28].mxu0  ;;  %v2278_v34 = vpop.f32.mrb[29].mxu1  ;;  %v4391_v56 = vmul.f32 %v4318_v54, %v3966_v6 }
 0x231   : > { %v4348_v51 = vadd.f32 %v4347_v38, %v4316_v27  ;;  %v4419_v44 = vadd.f32 %v4418_v11, %v4388_v20  ;;  %5107 = vst [vmem:[%s6315_s18 + $0x68] sm:$0xff] %v5065_v16   ;;  %v5802_v52 = vadd.f32 %v5756_v43, %v5564_v35  ;;  %v3758_v45 = vpop.f32.mrb[29].mxu0  ;;  %v5565_v47 = vpop.f32.mrb[30].mxu1  ;;  %v4392_v9 = vmul.f32 %v4319_v2, %v3967_v15  ;;  %v4324_v16 = vld [vmem:[%s6305_s17] sm:$0x1] }
 0x232   : > { %5106 = vst [vmem:[%s6315_s18 + $0x60] sm:$0xff] %v5060_v42   ;;  %v4390_v32 = vmul.f32 %v4317_v17, %v3965_v31  ;;  %v5803_v23 = vadd.f32 %v3758_v45, %v2278_v34  ;;  %v5757_v21 = vpop.f32.mrb[30].mxu0  ;;  %v2281_v48 = vpop.f32.mrb[31].mxu1 }
 0x233   : > { %v4420_v7 = vadd.f32 %v4419_v44, %v4389_v28  ;;  %v4349_v53 = vadd.f32 %v4348_v51, %v4317_v17  ;;  %v5804_v46 = vadd.f32 %v5757_v21, %v5565_v47  ;;  %v3761_v41 = vpop.f32.mrb[31].mxu0  ;;  %v3970_v57 = vadd.f32 %v5802_v52, %v6795_v37  ;;  %v4290_v40 = vpop.permute.xlu1 %4289  ;;  %v4364_v28 = vld [vmem:[%s6310_s26] sm:$0x1] }
 0x234   : > { %v3968_v19 = vadd.f32 %v5803_v23, %v6795_v37  ;;  %v5805_v58 = vadd.f32 %v3761_v41, %v2281_v48 }
 0x235   : > { %v4350_v30 = vadd.f32 %v4349_v53, %v4318_v54  ;;  %v4421_v22 = vadd.f32 %v4420_v7, %v4390_v32  ;;  %v3971_v3 = vadd.f32 %v5804_v46, %v6795_v37  ;;  %v4322_v59 = vmul.f32 %v4285_v50, %v3970_v57 }
 0x236   : > { %v4320_v60 = vmul.f32 %v4275_v5, %v3968_v19  ;;  %v3969_v36 = vadd.f32 %v5805_v58, %v6795_v37 }
 0x237   : > { %v4422_v61 = vadd.f32 %v4421_v22, %v4391_v56  ;;  %v4351_v25 = vadd.f32 %v4350_v30, %v4319_v2  ;;  %v5075_v49 = vpack.c.bf16 %v3971_v3, %v3970_v57  ;;  %v4323_v10 = vmul.f32 %v4290_v40, %v3971_v3 }
 0x238   : > { %v4393_v62 = vmul.f32 %v4320_v60, %v3968_v19  ;;  %v5070_v24 = vpack.c.bf16 %v3969_v36, %v3968_v19  ;;  %v4321_v55 = vmul.f32 %v4280_v4, %v3969_v36  ;;  %v4395_v26 = vmul.f32 %v4322_v59, %v3970_v57 }
 0x239   : > { %v4352_v0 = vadd.f32 %v4351_v25, %v4320_v60  ;;  %v4423_v63 = vadd.f32 %v4422_v61, %v4392_v9  ;;  %5109 = vst [vmem:[%s6315_s18 + $0x78] sm:$0xff] %v5075_v49   ;;  %v4396_v29 = vmul.f32 %v4323_v10, %v3971_v3 }
 0x23a   : > { %5108 = vst [vmem:[%s6315_s18 + $0x70] sm:$0xff] %v5070_v24   ;;  %v4394_v1 = vmul.f32 %v4321_v55, %v3969_v36 }
 0x23b   : > { %v4424_v8 = vadd.f32 %v4423_v63, %v4393_v62  ;;  %v4353_v39 = vadd.f32 %v4352_v0, %v4321_v55 }
 0x23d   : > { %v4354_v37 = vadd.f32 %v4353_v39, %v4322_v59  ;;  %v4425_v6 = vadd.f32 %v4424_v8, %v4394_v1 }
 0x23f   : > { %v4355_v18 = vadd.f32 %v4354_v37, %v4323_v10  ;;  %v4426_v12 = vadd.f32 %v4425_v6, %v4395_v26 }
 0x241   : > { %v4356_v13 = vrot.slane %v4355_v18, 4  ;;  %v4427_v14 = vadd.f32 %v4426_v12, %v4396_v29 }
 0x243   : > { %v4357_v15 = vadd.f32 %v4356_v13, %v4355_v18  ;;  %v4428_v33 = vrot.slane %v4427_v14, 4 }
 0x245   : > { %v4358_v27 = vrot.slane %v4357_v15, 2  ;;  %v4429_v31 = vadd.f32 %v4428_v33, %v4427_v14 }
 0x247   : > { %v4359_v5 = vadd.f32 %v4358_v27, %v4357_v15  ;;  %v4430_v20 = vrot.slane %v4429_v31, 2 }
 0x249   : > { %v4360_v11 = vrot.slane %v4359_v5, 1  ;;  %v4431_v38 = vadd.f32 %v4430_v20, %v4429_v31 }
 0x24b   : > { %v4361_v35 = vadd.f32 %v4360_v11, %v4359_v5  ;;  %v4432_v54 = vrot.slane %v4431_v38, 1 }
 0x24d   : > { %v4362_v42 = vadd.f32 %v4361_v35, %v4324_v16  ;;  %v4433_v17 = vadd.f32 %v4432_v54, %v4431_v38 }
 0x24f   : > { %4363 = vst [vmem:[%s6305_s17] sm:$0x1] %v4362_v42  ;;  %v4434_v43 = vadd.f32 %v4433_v17, %v4364_v28 }
 0x251   : > { %4435 = vst [vmem:[%s6310_s26] sm:$0x1] %v4434_v43 }
 0x252 PF: > { %s19_s9 = sadd.s32 1, %s6200_s9   ;;  %s6934_s27 = sld [smem:[#allocation4_spill]] }
 0x253   : > { %p16_p11 = scmp.ge.s32.totalorder %s19_s9, 6   ;;  %s6935_s28 = sld [smem:[#allocation5_spill]] }
 0x254   : > { %s6936_s29 = sld [smem:[#allocation6_spill]]  ;;  %s6937_s30 = sld [smem:[#allocation7_spill]] }
 0x255   :  { %18 = sbr.rel (!%p16_p11) target bundleno = 3 (0x3), region = 119 }

// kernel: residual_block.4
= control target key start
LH: loop header
LB: loop body
LE: loop exit
PB: predicated region body
PF: predicated region fallthrough
CT: control target
= control target key end

     0   :  { %s7054_s21 = smov 0   ;;  %s7056_s22 = smov 0   ;;  %s7982_s0 = inlined_call_operand.vmem [shape: bf16[2,1024,128], index: 0, kind: input, shape index: {}, may-alias: {0,1,2}]   ;;  %s7983_s1 = inlined_call_operand.vmem [shape: bf16[2,1024,128], index: 1, kind: input, shape index: {}, may-alias: {0,1,2}]   ;;  %s7984_s2 = inlined_call_operand.vmem [shape: bf16[2,1024,128], index: 2, kind: input, shape index: {}, may-alias: {0,1,2}]   ;;  %s7985_s3 = inlined_call_operand.vmem [shape: bf16[9,128,128], index: 3, kind: input, shape index: {}]   ;;  %s7986_s4 = inlined_call_operand.vmem [shape: f32[1,128], index: 4, kind: input, shape index: {}]   ;;  %s7987_s5 = inlined_call_operand.vmem [shape: f32[1024,1], index: 5, kind: input, shape index: {}]   ;;  %s7988_s6 = inlined_call_operand.vmem [shape: bf16[128,128], index: 6, kind: input, shape index: {}]   ;;  %s7989_s7 = inlined_call_operand.vmem [shape: f32[1,128], index: 7, kind: input, shape index: {}]   ;;  %s7990_s8 = inlined_call_operand.vmem [shape: bf16[2,512,128], index: 8, kind: output, shape index: {0}]   ;;  %s7991_s9 = inlined_call_operand.vmem [shape: f32[2,1,128], index: 9, kind: output, shape index: {1}]   ;;  %s7992_s10 = inlined_call_operand.vmem [shape: f32[2,1,128], index: 10, kind: output, shape index: {2}]   ;;  %s7993_s11 = inlined_call_operand.vmem [shape: f32[2,1,128], index: 11, kind: output, shape index: {3}]   ;;  %s7994_s12 = inlined_call_operand.vmem [shape: f32[2,1,128], index: 12, kind: output, shape index: {4}]  }
   0x1   :  { %7999 = sst [smem:[#allocation16_spill]] %s7982_s0  ;;  %s7058_s23 = smov 0  }
   0x2   :  { %8000 = sst [smem:[#allocation17_spill]] %s7986_s4  ;;  %s7060_s24 = smov 0  }
   0x3   :  { %8001 = sst [smem:[#allocation18_spill]] %s7988_s6  ;;  %s7062_s25 = smov 0  }
   0x4   :  { %8002 = sst [smem:[#allocation19_spill]] %s7989_s7 }
   0x5 LB: > { %8003 = sst [smem:[#allocation4_spill]] %s6977_s23  ;;  %s32_s26 = sadd.s32 1, %s6977_s23  ;;  %s6985_s25 = sphi %s7062_s25, %s23_s25   ;;  %s6981_s24 = sphi %s7060_s24, %s8031_s24   ;;  %s6977_s23 = sphi %s7058_s23, %s8030_s23   ;;  %s6973_s22 = sphi %s7056_s22, %s8029_s22   ;;  %s6969_s21 = sphi %s7054_s21, %s8028_s21  }
   0x6   : > { %8004 = sst [smem:[#allocation5_spill]] %s6981_s24  ;;  %s35_s27 = sadd.s32 1, %s6981_s24 }
   0x7   : > { %8005 = sst [smem:[#allocation6_spill]] %s6985_s25  ;;  %p33_p0 = scmp.ge.s32.totalorder %s32_s26, 2 }
   0x8   : > { %p5308_p1 = scmp.ge.s32.totalorder %s6985_s25, 1  ;;  %p449_p2 = scmp.lt.s32.totalorder %s6985_s25, 5 }
   0x9   : > { %s8033_s26 = smov (%p33_p0, %s32_s26), 0  ;;  %s8035_s27 = smov (!%p33_p0, %s35_s27), %s6981_s24 }
   0xa   : > { %8006 = sst [smem:[#allocation7_spill]] %s8033_s26  ;;  %p450_p3 = pnand %p5308_p1, %p449_p2 }
   0xb   : > { %p37_p4 = scmp.ge.s32.totalorder %s8035_s27, 2 }
   0xc   : > { %453 = sbr.rel (%p450_p3) target bundleno = 659 (0x293), region = 52 }
   0xd   : > { %s8037_s27 = smov (%p37_p4, %s8035_s27), 0 }
   0xe   : > { %8007 = sst [smem:[#allocation8_spill]] %s8037_s27 }
  0x13   : > { %s5309_s28 = sshll.u32 %s6969_s21, 5  ;;  %p538_p5 = scmp.lt.s32.totalorder %s6973_s22, 1 }
  0x14   : > { %p540_p6 = scmp.lt.s32.totalorder %s5309_s28, 127  ;;  %s5585_s29 = sadd.s32 32, %s5309_s28 }
  0x15   : > { %s8039_s22 = smov (!%p538_p5, %s6973_s22), 1  ;;  %p551_p7 = scmp.lt.s32.totalorder %s5585_s29, 127 }
  0x16   : > { %s541_s30 = scalar_select %p540_p6, %s5309_s28, 127 }
  0x17   : > { %s5310_s13 = sshll.u32 %s8039_s22, 7  ;;  %s5587_s15 = sadd.s32 64, %s5309_s28 }
  0x18   : > { %s543_s14 = sadd.s32 %s5310_s13, %s541_s30  ;;  %p563_p8 = scmp.lt.s32.totalorder %s5587_s15, 127 }
  0x19   : > { %s5311_s16 = sshll.u32 %s543_s14, 2  ;;  %s8008_s0 = sld [smem:[#allocation16_spill]] }
  0x1a   : > { %p582_p9 = scmp.lt.s32.totalorder %s5309_s28, 63  ;;  %s8041_s29 = smov (!%p551_p7, %s5585_s29), 127 }
  0x1b   : > { %s8043_s15 = smov (!%p563_p8, %s5587_s15), 127  ;;  %s554_s20 = sadd.s32 %s5310_s13, %s8041_s29 }
  0x1c   : > { %s5319_s27 = sshll.u32 %s8041_s29, 3  ;;  %s5314_s26 = sshll.u32 %s554_s20, 2 }
  0x1d   : > { %s566_s24 = sadd.s32 %s5310_s13, %s8043_s15  ;;  %s7095_s4 = scalar_lea.vmem %s7983_s1, %s5314_s26 }
  0x1e   : > { %s5317_s30 = sshll.u32 %s566_s24, 2  ;;  %s7105_s18 = scalar_lea.vmem %s7987_s5, %s5319_s27 }
  0x1f   : > { %s7090_s19 = scalar_lea.vmem %s8008_s0, %s5311_s16  ;;  %s7100_s6 = scalar_lea.vmem %s7984_s2, %s5317_s30 }
  0x20   : > { %s8045_s28 = smov (!%p582_p9, %s5309_s28), 63  ;;  %s5321_s29 = sshll.u32 %s8039_s22, 6 }
  0x21   : > { %s7110_s15 = scalar_lea.vmem %s7991_s9, %s8039_s22  ;;  %s585_s23 = sadd.s32 %s5321_s29, %s8045_s28 }
  0x22   : > { %s7115_s26 = scalar_lea.vmem %s7992_s10, %s8039_s22  ;;  %s5322_s7 = sshll.u32 %s585_s23, 2 }
  0x23   : > { %s7120_s16 = scalar_lea.vmem %s7993_s11, %s8039_s22  ;;  %s7125_s0 = scalar_lea.vmem %s7990_s8, %s5322_s7 }
  0x24   : > { %s7130_s28 = scalar_lea.vmem %s7994_s12, %s8039_s22  ;;  %p5323_p10 = scmp.ne.s32.totalorder %s6969_s21, 0 }
  0x25   : > { %v6987_v0 = vmov (!%p5323_p10), 0.0  }
  0x26   : > { %605 = sbr.rel (%p5323_p10) target bundleno = 45 (0x2d), region = 56  ;;  %606 = vst [vmem:[%s7110_s15] sm:$0x1] (!%p5323_p10), %v6987_v0  ;;  %607 = vst [vmem:[%s7115_s26] sm:$0x1] (!%p5323_p10), %v6987_v0 }
  0x27   : > { %608 = vst [vmem:[%s7120_s16] sm:$0x1] (!%p5323_p10), %v6987_v0  ;;  %609 = vst [vmem:[%s7130_s28] sm:$0x1] (!%p5323_p10), %v6987_v0 }
  0x2d PF: > { %v6835_v1 = vld [vmem:[%s7985_s3] sm:$0xff]   ;;  %v6837_v3 = vld [vmem:[%s7985_s3 + $0x8] sm:$0xff]   ;;  %v6839_v5 = vld [vmem:[%s7985_s3 + $0x10] sm:$0xff]   ;;  %s8009_s21 = sld [smem:[#allocation18_spill]]  ;;  %s8018_s24 = sld [smem:[#allocation19_spill]] }
  0x2e   : > { %v6836_v2 = vld [vmem:[%s7985_s3 + $0x100] sm:$0xff]   ;;  %6055 = vmatprep.subr.bf16.mxu1 %v6835_v1  ;;  %v6838_v4 = vld [vmem:[%s7985_s3 + $0x108] sm:$0xff]   ;;  %v6840_v6 = vld [vmem:[%s7985_s3 + $0x110] sm:$0xff]  }
  0x2f   : > { %6247 = vmatprep.subr.bf16.mxu0 %v6836_v2  ;;  %6056 = vmatpush3.bf16.msra.mxu1 %v6835_v1  ;;  %v6841_v7 = vld [vmem:[%s7985_s3 + $0x18] sm:$0xff]   ;;  %v6843_v9 = vld [vmem:[%s7985_s3 + $0x20] sm:$0xff]   ;;  %v6845_v11 = vld [vmem:[%s7985_s3 + $0x28] sm:$0xff]  }
  0x30   : > { %6248 = vmatpush3.bf16.msra.mxu0 %v6836_v2  ;;  %6057 = vmatprep.subr.bf16.mxu1 %v6837_v3  ;;  %v6842_v8 = vld [vmem:[%s7985_s3 + $0x118] sm:$0xff]   ;;  %v6844_v10 = vld [vmem:[%s7985_s3 + $0x120] sm:$0xff]   ;;  %v5782_v12 = vld [vmem:[%s7090_s19 + $0x70] sm:$0xff]  }
  0x31   : > { %6249 = vmatprep.subr.bf16.mxu0 %v6838_v4  ;;  %v5783_v13 = vld [vmem:[%s7090_s19 + $0x78] sm:$0xff]   ;;  %v5631_v14 = vld [vmem:[%s7095_s4] sm:$0xff]   ;;  %v6846_v15 = vld [vmem:[%s7985_s3 + $0x128] sm:$0xff]   ;;  %v5625_v16 = vunpack.c.h.bf16 %v5782_v12 }
  0x32   : > { %v5628_v17 = vunpack.c.l.bf16 %v5783_v13  ;;  %v5629_v18 = vunpack.c.h.bf16 %v5783_v13  ;;  %v6851_v19 = vld [vmem:[%s7095_s4] sm:$0xff]  ;;  %v5784_v20 = vld [vmem:[%s7095_s4 + $0x8] sm:$0xff]   ;;  %v5632_v21 = vunpack.c.l.bf16 %v5631_v14  ;;  %v5633_v22 = vunpack.c.h.bf16 %v5631_v14  ;;  %v6847_v25 = vld [vmem:[%s7985_s3 + $0x30] sm:$0xff]  }
  0x33   : > { %6058 = vmatpush3.bf16.msra.mxu1 %v6837_v3  ;;  %v5636_v23 = vunpack.c.l.bf16 %v5784_v20  ;;  %v5637_v24 = vunpack.c.h.bf16 %v5784_v20  ;;  %619 = vst [vmem:[#allocation2 + $0x8] sm:$0xff] %v5625_v16  ;;  %6263 = vmatprep.mubr.bf16.mxu0 %v6851_v19  ;;  %v5785_v26 = vld [vmem:[%s7095_s4 + $0x10] sm:$0xff]   ;;  %v5786_v27 = vld [vmem:[%s7095_s4 + $0x18] sm:$0xff]   ;;  %v5787_v33 = vld [vmem:[%s7095_s4 + $0x20] sm:$0xff]   ;;  %s8010_s7 = smov %s8009_s21 }
  0x34   : > { %6250 = vmatpush3.bf16.msra.mxu0 %v6838_v4  ;;  %6059 = vmatprep.subr.bf16.mxu1 %v6839_v5  ;;  %620 = vst [vmem:[#allocation2 + $0x10] sm:$0xff] %v5628_v17  ;;  %621 = vst [vmem:[#allocation2 + $0x18] sm:$0xff] %v5629_v18  ;;  %v6848_v28 = vld [vmem:[%s7985_s3 + $0x130] sm:$0xff]   ;;  %v5640_v29 = vunpack.c.l.bf16 %v5785_v26  ;;  %v5641_v30 = vunpack.c.h.bf16 %v5785_v26  ;;  %v5644_v31 = vunpack.c.l.bf16 %v5786_v27  ;;  %v5645_v32 = vunpack.c.h.bf16 %v5786_v27  ;;  %v6849_v34 = vld [vmem:[%s7985_s3 + $0x38] sm:$0xff]  }
  0x35   : > { %6251 = vmatprep.subr.bf16.mxu0 %v6840_v6  ;;  %686 = vst [vmem:[#allocation2 + $0x20] sm:$0xff] %v5632_v21  ;;  %687 = vst [vmem:[#allocation2 + $0x28] sm:$0xff] %v5633_v22  ;;  %v5648_v35 = vunpack.c.l.bf16 %v5787_v33  ;;  %v5649_v36 = vunpack.c.h.bf16 %v5787_v33  ;;  %v5788_v37 = vld [vmem:[%s7095_s4 + $0x28] sm:$0xff]   ;;  %v6850_v38 = vld [vmem:[%s7985_s3 + $0x138] sm:$0xff]  }
  0x36   : > { %688 = vst [vmem:[#allocation2 + $0x30] sm:$0xff] %v5636_v23  ;;  %689 = vst [vmem:[#allocation2 + $0x38] sm:$0xff] %v5637_v24  ;;  %v5652_v39 = vunpack.c.l.bf16 %v5788_v37  ;;  %v5653_v40 = vunpack.c.h.bf16 %v5788_v37  ;;  %v6853_v46 = vld [vmem:[%s7985_s3 + $0x140] sm:$0xff]   ;;  %v5789_v48 = vld [vmem:[%s7095_s4 + $0x30] sm:$0xff]  }
  0x37   : > { %6060 = vmatpush3.bf16.msra.mxu1 %v6839_v5  ;;  %690 = vst [vmem:[#allocation2 + $0x40] sm:$0xff] %v5640_v29  ;;  %691 = vst [vmem:[#allocation2 + $0x48] sm:$0xff] %v5641_v30  ;;  %v6854_v47 = vld [vmem:[%s7985_s3 + $0x40] sm:$0xff]   ;;  %v5656_v51 = vunpack.c.l.bf16 %v5789_v48  ;;  %v5657_v52 = vunpack.c.h.bf16 %v5789_v48  ;;  %v5790_v53 = vld [vmem:[%s7095_s4 + $0x38] sm:$0xff]  }
  0x38   : > { %6252 = vmatpush3.bf16.msra.mxu0 %v6840_v6  ;;  %6061 = vmatprep.subr.bf16.mxu1 %v6841_v7  ;;  %692 = vst [vmem:[#allocation2 + $0x50] sm:$0xff] %v5644_v31  ;;  %693 = vst [vmem:[#allocation2 + $0x58] sm:$0xff] %v5645_v32  ;;  %v5660_v55 = vunpack.c.l.bf16 %v5790_v53  ;;  %v5661_v56 = vunpack.c.h.bf16 %v5790_v53  ;;  %v6852_v57 = vld [vmem:[%s7095_s4 + $0x8] sm:$0xff]  ;;  %v6855_v59 = vld [vmem:[%s7095_s4 + $0x10] sm:$0xff] }
  0x39   : > { %6253 = vmatprep.subr.bf16.mxu0 %v6842_v8  ;;  %694 = vst [vmem:[#allocation2 + $0x60] sm:$0xff] %v5648_v35  ;;  %695 = vst [vmem:[#allocation2 + $0x68] sm:$0xff] %v5649_v36  ;;  %v6857_v60 = vld [vmem:[%s7985_s3 + $0x148] sm:$0xff]   ;;  %v6862_v63 = vld [vmem:[%s7985_s3 + $0x50] sm:$0xff]  }
  0x3a   : > { %696 = vst [vmem:[#allocation2 + $0x70] sm:$0xff] %v5652_v39  ;;  %697 = vst [vmem:[#allocation2 + $0x78] sm:$0xff] %v5653_v40  ;;  %v6858_v61 = vld [vmem:[%s7985_s3 + $0x48] sm:$0xff]   ;;  %v5791_v0 = vld [vmem:[%s7095_s4 + $0x40] sm:$0xff]  }
  0x3b   : > { %6062 = vmatpush3.bf16.msra.mxu1 %v6841_v7  ;;  %v730_v41 = vld [vmem:[#allocation2 + $0xd] sm:$0xff]  ;;  %v731_v42 = vld [vmem:[#allocation2 + $0x15] sm:$0xff]  ;;  %698 = vst [vmem:[#allocation2 + $0x80] sm:$0xff] %v5656_v51  ;;  %699 = vst [vmem:[#allocation2 + $0x88] sm:$0xff] %v5657_v52  ;;  %v5664_v3 = vunpack.c.l.bf16 %v5791_v0  ;;  %v5665_v4 = vunpack.c.h.bf16 %v5791_v0 }
  0x3c   : > { %6254 = vmatpush3.bf16.msra.mxu0 %v6842_v8  ;;  %6063 = vmatprep.subr.bf16.mxu1 %v6843_v9  ;;  %v762_v43 = vpack.c.bf16 %v731_v42, %v730_v41  ;;  %v732_v44 = vld [vmem:[#allocation2 + $0x1d] sm:$0xff]  ;;  %v733_v45 = vld [vmem:[#allocation2 + $0x25] sm:$0xff]  ;;  %700 = vst [vmem:[#allocation2 + $0x90] sm:$0xff] %v5660_v55  ;;  %701 = vst [vmem:[#allocation2 + $0x98] sm:$0xff] %v5661_v56 }
  0x3d   : > { %6255 = vmatprep.subr.bf16.mxu0 %v6844_v10  ;;  %v734_v49 = vld [vmem:[#allocation2 + $0x2d] sm:$0xff]  ;;  %v735_v50 = vld [vmem:[#allocation2 + $0x35] sm:$0xff]  ;;  %v763_v54 = vpack.c.bf16 %v733_v45, %v732_v44  ;;  %702 = vst [vmem:[#allocation2 + $0xa0] sm:$0xff] %v5664_v3  ;;  %703 = vst [vmem:[#allocation2 + $0xa8] sm:$0xff] %v5665_v4 }
  0x3e   : > { %6071 = vmatprep.mubr.bf16.mxu1 %v762_v43  ;;  %v764_v58 = vpack.c.bf16 %v735_v50, %v734_v49  ;;  %v736_v62 = vld [vmem:[#allocation2 + $0x3d] sm:$0xff]  ;;  %v737_v1 = vld [vmem:[#allocation2 + $0x45] sm:$0xff]  ;;  %v5797_v37 = vld [vmem:[%s7095_s4 + $0x70] sm:$0xff]  }
  0x3f   : > { %6064 = vmatpush3.bf16.msra.mxu1 %v6843_v9  ;;  %v738_v2 = vld [vmem:[#allocation2 + $0x4d] sm:$0xff]  ;;  %v739_v6 = vld [vmem:[#allocation2 + $0x55] sm:$0xff]  ;;  %v6859_v16 = vld [vmem:[%s7095_s4 + $0x20] sm:$0xff]  ;;  %v5688_v39 = vunpack.c.l.bf16 %v5797_v37  ;;  %v5689_v40 = vunpack.c.h.bf16 %v5797_v37 }
  0x40   : > { %6256 = vmatpush3.bf16.msra.mxu0 %v6844_v10  ;;  %6065 = vmatprep.subr.bf16.mxu1 %v6845_v11  ;;  %v5792_v5 = vld [vmem:[%s7095_s4 + $0x48] sm:$0xff]   ;;  %v6861_v9 = vld [vmem:[%s7985_s3 + $0x150] sm:$0xff]   ;;  %v765_v10 = vpack.c.bf16 %v737_v1, %v736_v62  ;;  %v6856_v12 = vld [vmem:[%s7095_s4 + $0x18] sm:$0xff]  ;;  %v766_v13 = vpack.c.bf16 %v739_v6, %v738_v2 }
  0x41   : > { %6257 = vmatprep.subr.bf16.mxu0 %v6846_v15  ;;  %v5668_v7 = vunpack.c.l.bf16 %v5792_v5  ;;  %v5669_v8 = vunpack.c.h.bf16 %v5792_v5  ;;  %v5794_v17 = vld [vmem:[%s7095_s4 + $0x58] sm:$0xff]   ;;  %v5795_v22 = vld [vmem:[%s7095_s4 + $0x60] sm:$0xff]   ;;  %v5796_v27 = vld [vmem:[%s7095_s4 + $0x68] sm:$0xff]   ;;  %714 = vst [vmem:[#allocation2 + $0x100] sm:$0xff] %v5688_v39 }
  0x42   : > { %v6865_v18 = vld [vmem:[%s7985_s3 + $0x158] sm:$0xff]   ;;  %v5676_v19 = vunpack.c.l.bf16 %v5794_v17  ;;  %v5677_v20 = vunpack.c.h.bf16 %v5794_v17  ;;  %v741_v24 = vld [vmem:[#allocation2 + $0x65] sm:$0xff]  ;;  %v5681_v26 = vunpack.c.h.bf16 %v5795_v22  ;;  %v5684_v30 = vunpack.c.l.bf16 %v5796_v27  ;;  %715 = vst [vmem:[#allocation2 + $0x108] sm:$0xff] %v5689_v40  ;;  %v6877_v50 = vld [vmem:[%s7985_s3 + $0x170] sm:$0xff]  }
  0x43   : > { %6066 = vmatpush3.bf16.msra.mxu1 %v6845_v11  ;;  %704 = vst [vmem:[#allocation2 + $0xb0] sm:$0xff] %v5668_v7  ;;  %705 = vst [vmem:[#allocation2 + $0xb8] sm:$0xff] %v5669_v8  ;;  %v5793_v11 = vld [vmem:[%s7095_s4 + $0x50] sm:$0xff]   ;;  %v6866_v21 = vld [vmem:[%s7985_s3 + $0x58] sm:$0xff]   ;;  %v5685_v31 = vunpack.c.h.bf16 %v5796_v27 }
  0x44   : > { %6258 = vmatpush3.bf16.msra.mxu0 %v6846_v15  ;;  %6067 = vmatprep.subr.bf16.mxu1 %v6847_v25  ;;  %v5672_v14 = vunpack.c.l.bf16 %v5793_v11  ;;  %v5673_v15 = vunpack.c.h.bf16 %v5793_v11  ;;  %v740_v23 = vld [vmem:[#allocation2 + $0x5d] sm:$0xff]  ;;  %708 = vst [vmem:[#allocation2 + $0xd0] sm:$0xff] %v5676_v19  ;;  %709 = vst [vmem:[#allocation2 + $0xd8] sm:$0xff] %v5677_v20  ;;  %v743_v29 = vld [vmem:[#allocation2 + $0x75] sm:$0xff] }
  0x45   : > { %6259 = vmatprep.subr.bf16.mxu0 %v6848_v28  ;;  %v6869_v32 = vld [vmem:[%s7985_s3 + $0x160] sm:$0xff]   ;;  %711 = vst [vmem:[#allocation2 + $0xe8] sm:$0xff] %v5681_v26  ;;  %v767_v33 = vpack.c.bf16 %v741_v24, %v740_v23  ;;  %712 = vst [vmem:[#allocation2 + $0xf0] sm:$0xff] %v5684_v30  ;;  %v6860_v35 = vld [vmem:[%s7095_s4 + $0x28] sm:$0xff] }
  0x46   : > { %706 = vst [vmem:[#allocation2 + $0xc0] sm:$0xff] %v5672_v14  ;;  %707 = vst [vmem:[#allocation2 + $0xc8] sm:$0xff] %v5673_v15  ;;  %v5798_v41 = vld [vmem:[%s7095_s4 + $0x78] sm:$0xff]   ;;  %v6873_v42 = vld [vmem:[%s7985_s3 + $0x168] sm:$0xff]  }
  0x47   : > { %6068 = vmatpush3.bf16.msra.mxu1 %v6847_v25  ;;  %v5680_v25 = vunpack.c.l.bf16 %v5795_v22  ;;  %713 = vst [vmem:[#allocation2 + $0xf8] sm:$0xff] %v5685_v31  ;;  %v5692_v43 = vunpack.c.l.bf16 %v5798_v41  ;;  %v5693_v44 = vunpack.c.h.bf16 %v5798_v41  ;;  %v744_v45 = vld [vmem:[#allocation2 + $0x7d] sm:$0xff]  ;;  %v746_v48 = vld [vmem:[#allocation2 + $0x8d] sm:$0xff]  ;;  %v747_v49 = vld [vmem:[#allocation2 + $0x95] sm:$0xff] }
  0x48   : > { %6260 = vmatpush3.bf16.msra.mxu0 %v6848_v28  ;;  %6069 = vmatprep.subr.bf16.mxu1 %v6849_v34  ;;  %v742_v28 = vld [vmem:[#allocation2 + $0x6d] sm:$0xff]  ;;  %v6864_v53 = vld [vmem:[%s7095_s4 + $0x38] sm:$0xff]  ;;  %v6867_v55 = vld [vmem:[%s7095_s4 + $0x40] sm:$0xff] }
  0x49   : > { %6261 = vmatprep.subr.bf16.mxu0 %v6850_v38  ;;  %710 = vst [vmem:[#allocation2 + $0xe0] sm:$0xff] %v5680_v25  ;;  %v768_v36 = vpack.c.bf16 %v743_v29, %v742_v28  ;;  %716 = vst [vmem:[#allocation2 + $0x110] sm:$0xff] %v5692_v43  ;;  %v6878_v52 = vld [vmem:[%s7985_s3 + $0x70] sm:$0xff]   ;;  %v6881_v56 = vld [vmem:[%s7985_s3 + $0x178] sm:$0xff]  }
  0x4a   : > { %717 = vst [vmem:[#allocation2 + $0x118] sm:$0xff] %v5693_v44  ;;  %v7263_v62 = vld [vmem:[%s7985_s3 + $0x180] sm:$0xff]   ;;  %v6868_v1 = vld [vmem:[%s7095_s4 + $0x48] sm:$0xff]  ;;  %v6871_v3 = vld [vmem:[%s7095_s4 + $0x50] sm:$0xff] }
  0x4b   : > { %6070 = vmatpush3.bf16.msra.mxu1 %v6849_v34  ;;  %v6870_v34 = vld [vmem:[%s7985_s3 + $0x60] sm:$0xff]   ;;  %v755_v7 = vld [vmem:[#allocation2 + $0xd5] sm:$0xff]  ;;  %v6876_v17 = vld [vmem:[%s7095_s4 + $0x68] sm:$0xff] }
  0x4c   : > { %6262 = vmatpush3.bf16.msra.mxu0 %v6850_v38  ;;  %6103 = vmatprep.subr.bf16.mxu1 %v6854_v47  ;;  %v6863_v38 = vld [vmem:[%s7095_s4 + $0x30] sm:$0xff]  ;;  %v7268_v0 = vld [vmem:[%s7985_s3 + $0x80] sm:$0xff]   ;;  %v6880_v27 = vld [vmem:[%s7095_s4 + $0x78] sm:$0xff] }
  0x4d   : > { %6295 = vmatprep.subr.bf16.mxu0 %v6853_v46  ;;  %v752_v4 = vld [vmem:[#allocation2 + $0xbd] sm:$0xff]  ;;  %v753_v5 = vld [vmem:[#allocation2 + $0xc5] sm:$0xff]  ;;  %v754_v6 = vld [vmem:[#allocation2 + $0xcd] sm:$0xff] }
  0x4e   : > { %6072 = vmatmul.mubr.bf16.vlgmr.msra.gmra.mrb[0].mxu1 %v763_v54  ;;  %v770_v54 = vpack.c.bf16 %v747_v49, %v746_v48  ;;  %v773_v8 = vpack.c.bf16 %v753_v5, %v752_v4  ;;  %v6875_v11 = vld [vmem:[%s7095_s4 + $0x60] sm:$0xff]  ;;  %v758_v14 = vld [vmem:[#allocation2 + $0xed] sm:$0xff]  ;;  %v759_v15 = vld [vmem:[#allocation2 + $0xf5] sm:$0xff] }
  0x4f   : > { %6264 = vmatmul.mubr.bf16.vlgmr.msra.gmra.mrb[0].mxu0 %v6852_v57  ;;  %6104 = vmatpush3.bf16.msra.mxu1 %v6854_v47  ;;  %v745_v47 = vld [vmem:[#allocation2 + $0x85] sm:$0xff]  ;;  %v6882_v57 = vld [vmem:[%s7985_s3 + $0x78] sm:$0xff]   ;;  %v6879_v19 = vld [vmem:[%s7095_s4 + $0x70] sm:$0xff] }
  0x50   : > { %6296 = vmatpush3.bf16.msra.mxu0 %v6853_v46  ;;  %6075 = vmatprep.mubr.bf16.mxu1 %v764_v58  ;;  %v6874_v46 = vld [vmem:[%s7985_s3 + $0x68] sm:$0xff]   ;;  %v769_v51 = vpack.c.bf16 %v745_v47, %v744_v45  ;;  %v748_v58 = vld [vmem:[#allocation2 + $0x9d] sm:$0xff]  ;;  %v2521_v48 = vld [vmem:[#allocation2 + $0x51] sm:$0xff] }
  0x51   : > { %6267 = vmatprep.mubr.bf16.mxu0 %v6855_v59  ;;  %6297 = vmatprep.subr.bf16.mxu0 %v6857_v60  ;;  %v749_v59 = vld [vmem:[#allocation2 + $0xa5] sm:$0xff]  ;;  %v760_v20 = vld [vmem:[#allocation2 + $0xfd] sm:$0xff]  ;;  %v1035_v22 = vld [vmem:[#allocation2 + $0xe] sm:$0xff] }
  0x52   : > { %6105 = vmatprep.subr.bf16.mxu1 %v6858_v61  ;;  %v1036_v23 = vld [vmem:[#allocation2 + $0x16] sm:$0xff]  ;;  %v2515_v24 = vld [vmem:[#allocation2 + $0x21] sm:$0xff]  ;;  %v2516_v25 = vld [vmem:[#allocation2 + $0x29] sm:$0xff] }
  0x53   : > { %6106 = vmatpush3.bf16.msra.mxu1 %v6858_v61  ;;  %v751_v61 = vld [vmem:[#allocation2 + $0xb5] sm:$0xff]  ;;  %v1067_v28 = vpack.c.bf16 %v1036_v23, %v1035_v22  ;;  %v2547_v29 = vpack.c.bf16 %v2516_v25, %v2515_v24  ;;  %v5695_v30 = vld [vmem:[%s7100_s6] sm:$0xff]   ;;  %v2520_v41 = vld [vmem:[#allocation2 + $0x49] sm:$0xff] }
  0x54   : > { %6298 = vmatpush3.bf16.msra.mxu0 %v6857_v60  ;;  %6107 = vmatprep.subr.bf16.mxu1 %v6862_v63  ;;  %v750_v60 = vld [vmem:[#allocation2 + $0xad] sm:$0xff]  ;;  %v5696_v31 = vunpack.c.l.bf16 %v5695_v30  ;;  %v2519_v40 = vld [vmem:[#allocation2 + $0x41] sm:$0xff]  ;;  %v2522_v49 = vld [vmem:[#allocation2 + $0x59] sm:$0xff] }
  0x55   : > { %6299 = vmatprep.subr.bf16.mxu0 %v6861_v9  ;;  %v772_v2 = vpack.c.bf16 %v751_v61, %v750_v60  ;;  %v1039_v37 = vld [vmem:[#allocation2 + $0x2e] sm:$0xff]  ;;  %v7282_v44 = vpack.c.bf16 %v2520_v41, %v2519_v40  ;;  %v1041_v45 = vld [vmem:[#allocation2 + $0x3e] sm:$0xff]  ;;  %v1048_v4 = vld [vmem:[#allocation2 + $0x76] sm:$0xff] }
  0x56   : > { %6076 = vmatmul.mubr.bf16.gmra.mrb[4].mxu1 %v765_v10  ;;  %v774_v10 = vpack.c.bf16 %v755_v7, %v754_v6  ;;  %726 = vst [vmem:[#allocation2 + $0x120] sm:$0xff] %v5696_v31  ;;  %v6885_v47 = vld [vmem:[%s7985_s3 + $0x188] sm:$0xff]   ;;  %v1045_v61 = vld [vmem:[#allocation2 + $0x5e] sm:$0xff]  ;;  %v6895_v24 = vld [vmem:[%s7985_s3 + $0x1b0] sm:$0xff]  }
  0x57   : > { %6268 = vmatmul.mubr.bf16.gmra.mrb[4].mxu0 %v6856_v12  ;;  %6079 = vmatprep.mubr.bf16.mxu1 %v766_v13  ;;  %v756_v12 = vld [vmem:[#allocation2 + $0xdd] sm:$0xff]  ;;  %v757_v13 = vld [vmem:[#allocation2 + $0xe5] sm:$0xff] }
  0x58   : > { %6271 = vmatprep.mubr.bf16.mxu0 %v6859_v16  ;;  %6300 = vmatpush3.bf16.msra.mxu0 %v6861_v9  ;;  %v6872_v9 = vld [vmem:[%s7095_s4 + $0x58] sm:$0xff]  ;;  %v775_v16 = vpack.c.bf16 %v757_v13, %v756_v12  ;;  %v2527_v5 = vld [vmem:[#allocation2 + $0x81] sm:$0xff]  ;;  %v2528_v6 = vld [vmem:[#allocation2 + $0x89] sm:$0xff] }
  0x59   : > { %6108 = vmatpush3.bf16.msra.mxu1 %v6862_v63  ;;  %6301 = vmatprep.subr.bf16.mxu0 %v6865_v18  ;;  %v771_v63 = vpack.c.bf16 %v749_v59, %v748_v58  ;;  %v7300_v58 = vpack.c.bf16 %v2522_v49, %v2521_v48  ;;  %v6891_v7 = vld [vmem:[%s7985_s3 + $0x1a0] sm:$0xff]   ;;  %v7320_v12 = vpack.c.bf16 %v2528_v6, %v2527_v5  ;;  %v2532_v22 = vld [vmem:[#allocation2 + $0xa9] sm:$0xff] }
  0x5a   : > { %6109 = vmatprep.subr.bf16.mxu1 %v6866_v21  ;;  %v1049_v13 = vld [vmem:[#allocation2 + $0x7e] sm:$0xff]  ;;  %v5799_v23 = vld [vmem:[%s7100_s6 + $0x8] sm:$0xff]   ;;  %s8019_s6 = sld [smem:[#allocation17_spill]] }
  0x5b   : > { %v5700_v25 = vunpack.c.l.bf16 %v5799_v23  ;;  %v1053_v31 = vld [vmem:[#allocation2 + $0x9e] sm:$0xff]  ;;  %v2536_v40 = vld [vmem:[#allocation2 + $0xc9] sm:$0xff] }
  0x5c   : > { %6302 = vmatpush3.bf16.msra.mxu0 %v6865_v18  ;;  %v776_v18 = vpack.c.bf16 %v759_v15, %v758_v14  ;;  %v1050_v14 = vld [vmem:[#allocation2 + $0x86] sm:$0xff]  ;;  %v1057_v49 = vld [vmem:[#allocation2 + $0xbe] sm:$0xff] }
  0x5d   : > { %6110 = vmatpush3.bf16.msra.mxu1 %v6866_v21  ;;  %6303 = vmatprep.subr.bf16.mxu0 %v6869_v32  ;;  %v761_v21 = vld [vmem:[#allocation2 + $0x105] sm:$0xff]  ;;  %728 = vst [vmem:[#allocation2 + $0x130] sm:$0xff] %v5700_v25  ;;  %v1410_v25 = vld [vmem:[#allocation2 + $0x37] sm:$0xff] }
  0x5e   : > { %6080 = vmatmul.mubr.bf16.gmra.mrb[8].mxu1 %v767_v33  ;;  %6111 = vmatprep.subr.bf16.mxu1 %v6870_v34  ;;  %v777_v26 = vpack.c.bf16 %v761_v21, %v760_v20  ;;  %v1037_v33 = vld [vmem:[#allocation2 + $0x1e] sm:$0xff]  ;;  %v6893_v15 = vld [vmem:[%s7985_s3 + $0x1a8] sm:$0xff]   ;;  %v1052_v20 = vld [vmem:[#allocation2 + $0x96] sm:$0xff] }
  0x5f   : > { %6272 = vmatmul.mubr.bf16.gmra.mrb[8].mxu0 %v6860_v35  ;;  %6083 = vmatprep.mubr.bf16.mxu1 %v768_v36  ;;  %v2517_v35 = vld [vmem:[#allocation2 + $0x31] sm:$0xff]  ;;  %v2518_v36 = vld [vmem:[#allocation2 + $0x39] sm:$0xff]  ;;  %v2531_v21 = vld [vmem:[#allocation2 + $0xa1] sm:$0xff] }
  0x60   : > { %6275 = vmatprep.mubr.bf16.mxu0 %v6863_v38  ;;  %6304 = vmatpush3.bf16.msra.mxu0 %v6869_v32  ;;  %v5697_v32 = vunpack.c.h.bf16 %v5695_v30  ;;  %v1040_v38 = vld [vmem:[#allocation2 + $0x36] sm:$0xff]  ;;  %v7339_v30 = vpack.c.bf16 %v2532_v22, %v2531_v21  ;;  %v7352_v41 = vld [vmem:[%s7985_s3 + $0x1c0] sm:$0xff]   ;;  %v2544_v6 = vld [vmem:[#allocation2 + $0x109] sm:$0xff] }
  0x61   : > { %6112 = vmatpush3.bf16.msra.mxu1 %v6870_v34  ;;  %6305 = vmatprep.subr.bf16.mxu0 %v6873_v42  ;;  %v1038_v34 = vld [vmem:[#allocation2 + $0x26] sm:$0xff]  ;;  %v1069_v43 = vpack.c.bf16 %v1040_v38, %v1039_v37  ;;  %v1055_v37 = vld [vmem:[#allocation2 + $0xae] sm:$0xff]  ;;  %v1056_v38 = vld [vmem:[#allocation2 + $0xb6] sm:$0xff] }
  0x62   : > { %6113 = vmatprep.subr.bf16.mxu1 %v6874_v46  ;;  %727 = vst [vmem:[#allocation2 + $0x128] sm:$0xff] %v5697_v32  ;;  %v1068_v39 = vpack.c.bf16 %v1038_v34, %v1037_v33  ;;  %v1054_v32 = vld [vmem:[#allocation2 + $0xa6] sm:$0xff]  ;;  %v6897_v33 = vld [vmem:[%s7985_s3 + $0x1b8] sm:$0xff]  }
  0x63   : > { %v2533_v34 = vld [vmem:[#allocation2 + $0xb1] sm:$0xff]  ;;  %v2543_v5 = vld [vmem:[#allocation2 + $0x101] sm:$0xff] }
  0x64   : > { %6306 = vmatpush3.bf16.msra.mxu0 %v6873_v42  ;;  %v7280_v42 = vpack.c.bf16 %v2518_v36, %v2517_v35  ;;  %v2534_v35 = vld [vmem:[#allocation2 + $0xb9] sm:$0xff]  ;;  %v1408_v23 = vld [vmem:[#allocation2 + $0x27] sm:$0xff] }
  0x65   : > { %6114 = vmatpush3.bf16.msra.mxu1 %v6874_v46  ;;  %6307 = vmatprep.subr.bf16.mxu0 %v6877_v50  ;;  %v1042_v46 = vld [vmem:[#allocation2 + $0x46] sm:$0xff]  ;;  %v6898_v36 = vld [vmem:[%s7985_s3 + $0xb8] sm:$0xff]  }
  0x66   : > { %6084 = vmatmul.mubr.bf16.gmra.mrb[12].mxu1 %v769_v51  ;;  %6115 = vmatprep.subr.bf16.mxu1 %v6878_v52  ;;  %v1043_v51 = vld [vmem:[#allocation2 + $0x4e] sm:$0xff]  ;;  %v1407_v22 = vld [vmem:[#allocation2 + $0x1f] sm:$0xff] }
  0x67   : > { %6276 = vmatmul.mubr.bf16.gmra.mrb[12].mxu0 %v6864_v53  ;;  %6087 = vmatprep.mubr.bf16.mxu1 %v770_v54  ;;  %v2523_v53 = vld [vmem:[#allocation2 + $0x61] sm:$0xff]  ;;  %v6888_v54 = vld [vmem:[%s7985_s3 + $0x90] sm:$0xff]  }
  0x68   : > { %6279 = vmatprep.mubr.bf16.mxu0 %v6867_v55  ;;  %6308 = vmatpush3.bf16.msra.mxu0 %v6877_v50  ;;  %v6886_v50 = vld [vmem:[%s7985_s3 + $0x88] sm:$0xff]  }
  0x69   : > { %6116 = vmatpush3.bf16.msra.mxu1 %v6878_v52  ;;  %6309 = vmatprep.subr.bf16.mxu0 %v6881_v56  ;;  %v1044_v52 = vld [vmem:[#allocation2 + $0x56] sm:$0xff]  ;;  %v2524_v55 = vld [vmem:[#allocation2 + $0x69] sm:$0xff] }
  0x6a   : > { %6117 = vmatprep.subr.bf16.mxu1 %v6882_v57  ;;  %v1071_v59 = vpack.c.bf16 %v1044_v52, %v1043_v51  ;;  %v7302_v60 = vpack.c.bf16 %v2524_v55, %v2523_v53  ;;  %v2537_v51 = vld [vmem:[#allocation2 + $0xd1] sm:$0xff]  ;;  %v2538_v52 = vld [vmem:[#allocation2 + $0xd9] sm:$0xff]  ;;  %v2539_v55 = vld [vmem:[#allocation2 + $0xe1] sm:$0xff] }
  0x6b   : > { %v1059_v53 = vld [vmem:[#allocation2 + $0xce] sm:$0xff] }
  0x6c   : > { %6310 = vmatpush3.bf16.msra.mxu0 %v6881_v56  ;;  %v6887_v56 = vld [vmem:[%s7985_s3 + $0x190] sm:$0xff]  }
  0x6d   : > { %6118 = vmatpush3.bf16.msra.mxu1 %v6882_v57  ;;  %6343 = vmatprep.subr.bf16.mxu0 %v7263_v62  ;;  %v1070_v57 = vpack.c.bf16 %v1042_v46, %v1041_v45  ;;  %v7357_v45 = vld [vmem:[%s7985_s3 + $0xc0] sm:$0xff]   ;;  %v7359_v46 = vpack.c.bf16 %v2534_v35, %v2533_v34  ;;  %v1414_v34 = vld [vmem:[#allocation2 + $0x57] sm:$0xff] }
  0x6e   : > { %6088 = vmatmul.mubr.bf16.gmra.mrb[16].mxu1 %v771_v63  ;;  %6151 = vmatprep.subr.bf16.mxu1 %v7268_v0  ;;  %v6889_v63 = vld [vmem:[%s7985_s3 + $0x198] sm:$0xff]   ;;  %v6904_v35 = vld [vmem:[%s7985_s3 + $0xd0] sm:$0xff]  }
  0x6f   : > { %6280 = vmatmul.mubr.bf16.gmra.mrb[16].mxu0 %v6868_v1  ;;  %6091 = vmatprep.mubr.bf16.mxu1 %v772_v2  ;;  %v6890_v1 = vld [vmem:[%s7985_s3 + $0x98] sm:$0xff]  }
  0x70   : > { %6283 = vmatprep.mubr.bf16.mxu0 %v6871_v3  ;;  %v2526_v2 = vld [vmem:[#allocation2 + $0x79] sm:$0xff]  ;;  %v1047_v3 = vld [vmem:[#allocation2 + $0x6e] sm:$0xff] }
  0x76   : > { %6092 = vmatmul.mubr.bf16.gmra.mrb[20].mxu1 %v773_v8 }
  0x77   : > { %6284 = vmatmul.mubr.bf16.gmra.mrb[20].mxu0 %v6872_v9  ;;  %6095 = vmatprep.mubr.bf16.mxu1 %v774_v10  ;;  %v6892_v9 = vld [vmem:[%s7985_s3 + $0xa0] sm:$0xff]  }
  0x78   : > { %6287 = vmatprep.mubr.bf16.mxu0 %v6875_v11  ;;  %v1073_v11 = vpack.c.bf16 %v1048_v4, %v1047_v3  ;;  %v1063_v3 = vld [vmem:[#allocation2 + $0xee] sm:$0xff]  ;;  %v1064_v4 = vld [vmem:[#allocation2 + $0xf6] sm:$0xff] }
  0x7e   : > { %6096 = vmatmul.mubr.bf16.gmra.mrb[24].mxu1 %v775_v16  ;;  %v2529_v16 = vld [vmem:[#allocation2 + $0x91] sm:$0xff] }
  0x7f   : > { %6288 = vmatmul.mubr.bf16.gmra.mrb[24].mxu0 %v6876_v17  ;;  %6099 = vmatprep.mubr.bf16.mxu1 %v776_v18  ;;  %v6894_v17 = vld [vmem:[%s7985_s3 + $0xa8] sm:$0xff]   ;;  %v2530_v18 = vld [vmem:[#allocation2 + $0x99] sm:$0xff] }
  0x80   : > { %6291 = vmatprep.mubr.bf16.mxu0 %v6879_v19  ;;  %v1051_v19 = vld [vmem:[#allocation2 + $0x8e] sm:$0xff] }
  0x86   : > { %6100 = vmatmul.mubr.bf16.gmra.mrb[28].mxu1 %v777_v26  ;;  %v1074_v26 = vpack.c.bf16 %v1050_v14, %v1049_v13  ;;  %v1065_v13 = vld [vmem:[#allocation2 + $0xfe] sm:$0xff]  ;;  %v1066_v14 = vld [vmem:[#allocation2 + $0x106] sm:$0xff] }
  0x87   : > { %6292 = vmatmul.mubr.bf16.gmra.mrb[28].mxu0 %v6880_v27  ;;  %6119 = vmatprep.mubr.bf16.mxu1 %v1067_v28  ;;  %v6896_v27 = vld [vmem:[%s7985_s3 + $0xb0] sm:$0xff]   ;;  %v7337_v28 = vpack.c.bf16 %v2530_v18, %v2529_v16  ;;  %v2546_v16 = vld [vmem:[#allocation2 + $0x119] sm:$0xff] }
  0x88   : > { %6311 = vmatprep.mubr.bf16.mxu0 %v2547_v29  ;;  %v1075_v29 = vpack.c.bf16 %v1052_v20, %v1051_v19  ;;  %v1406_v18 = vld [vmem:[#allocation2 + $0x17] sm:$0xff]  ;;  %v1082_v19 = vpack.c.bf16 %v1066_v14, %v1065_v13  ;;  %v1427_v13 = vld [vmem:[#allocation2 + $0xbf] sm:$0xff]  ;;  %v1428_v14 = vld [vmem:[#allocation2 + $0xc7] sm:$0xff] }
  0x8e   : > { %6120 = vmatmul.mubr.bf16.vlgmr.msra.gmra.mrb[0].mxu1 %v1068_v39  ;;  %v2535_v39 = vld [vmem:[#allocation2 + $0xc1] sm:$0xff] }
  0x8f   : > { %6312 = vmatmul.mubr.bf16.vlgmr.msra.gmra.mrb[0].mxu0 %v7280_v42  ;;  %6152 = vmatpush3.bf16.msra.mxu1 %v7268_v0  ;;  %v2525_v0 = vld [vmem:[#allocation2 + $0x71] sm:$0xff]  ;;  %v7361_v48 = vpack.c.bf16 %v2536_v40, %v2535_v39  ;;  %v1415_v39 = vld [vmem:[#allocation2 + $0x5f] sm:$0xff]  ;;  %v1416_v40 = vld [vmem:[#allocation2 + $0x67] sm:$0xff] }
  0x90   : > { %6344 = vmatpush3.bf16.msra.mxu0 %v7263_v62  ;;  %6123 = vmatprep.mubr.bf16.mxu1 %v1069_v43  ;;  %v1046_v62 = vld [vmem:[#allocation2 + $0x66] sm:$0xff]  ;;  %v7318_v10 = vpack.c.bf16 %v2526_v2, %v2525_v0  ;;  %v1076_v43 = vpack.c.bf16 %v1054_v32, %v1053_v31  ;;  %v2542_v2 = vld [vmem:[#allocation2 + $0xf9] sm:$0xff] }
  0x91   : > { %6315 = vmatprep.mubr.bf16.mxu0 %v7282_v44  ;;  %6345 = vmatprep.subr.bf16.mxu0 %v6885_v47  ;;  %v1072_v8 = vpack.c.bf16 %v1046_v62, %v1045_v61  ;;  %v1062_v0 = vld [vmem:[#allocation2 + $0xe6] sm:$0xff] }
  0x92   : > { %6153 = vmatprep.subr.bf16.mxu1 %v6886_v50  ;;  %v6902_v31 = vld [vmem:[%s7985_s3 + $0xc8] sm:$0xff]  }
  0x93   : > { %6154 = vmatpush3.bf16.msra.mxu1 %v6886_v50  ;;  %v1058_v50 = vld [vmem:[#allocation2 + $0xc6] sm:$0xff] }
  0x94   : > { %6346 = vmatpush3.bf16.msra.mxu0 %v6885_v47  ;;  %6155 = vmatprep.subr.bf16.mxu1 %v6888_v54  ;;  %v1077_v47 = vpack.c.bf16 %v1056_v38, %v1055_v37  ;;  %v1412_v32 = vld [vmem:[#allocation2 + $0x47] sm:$0xff]  ;;  %v6905_v38 = vld [vmem:[%s7985_s3 + $0x1d8] sm:$0xff]  }
  0x95   : > { %6347 = vmatprep.subr.bf16.mxu0 %v6887_v56 }
  0x96   : > { %6124 = vmatmul.mubr.bf16.gmra.mrb[4].mxu1 %v1070_v57  ;;  %v1078_v57 = vpack.c.bf16 %v1058_v50, %v1057_v49  ;;  %v6910_v50 = vld [vmem:[%s7985_s3 + $0xe8] sm:$0xff]  }
  0x97   : > { %6316 = vmatmul.mubr.bf16.gmra.mrb[4].mxu0 %v7300_v58  ;;  %6127 = vmatprep.mubr.bf16.mxu1 %v1071_v59  ;;  %v7367_v59 = vpack.c.bf16 %v2538_v52, %v2537_v51  ;;  %v1419_v51 = vld [vmem:[#allocation2 + $0x7f] sm:$0xff]  ;;  %v1420_v52 = vld [vmem:[#allocation2 + $0x87] sm:$0xff] }
  0x98   : > { %6319 = vmatprep.mubr.bf16.mxu0 %v7302_v60  ;;  %6348 = vmatpush3.bf16.msra.mxu0 %v6887_v56  ;;  %v2540_v56 = vld [vmem:[#allocation2 + $0xe9] sm:$0xff] }
  0x99   : > { %6156 = vmatpush3.bf16.msra.mxu1 %v6888_v54  ;;  %6349 = vmatprep.subr.bf16.mxu0 %v6889_v63  ;;  %v1060_v54 = vld [vmem:[#allocation2 + $0xd6] sm:$0xff]  ;;  %v7369_v62 = vpack.c.bf16 %v2540_v56, %v2539_v55  ;;  %v7442_v56 = vpack.c.bf16 %v1420_v52, %v1419_v51  ;;  %v4011_v51 = vld [vmem:[%s7105_s18 + $0x80] sm:$0xff] }
  0x9a   : > { %6157 = vmatprep.subr.bf16.mxu1 %v6890_v1  ;;  %v1079_v61 = vpack.c.bf16 %v1060_v54, %v1059_v53  ;;  %v1421_v53 = vld [vmem:[#allocation2 + $0x8f] sm:$0xff]  ;;  %v1422_v54 = vld [vmem:[#allocation2 + $0x97] sm:$0xff] }
  0x9b   : > { %v6911_v55 = vld [vmem:[%s7985_s3 + $0x1f0] sm:$0xff]  }
  0x9c   : > { %6350 = vmatpush3.bf16.msra.mxu0 %v6889_v63  ;;  %v1061_v63 = vld [vmem:[#allocation2 + $0xde] sm:$0xff]  ;;  %v3259_v52 = vld [vmem:[#allocation2 + $0x52] sm:$0xff] }
  0x9d   : > { %6158 = vmatpush3.bf16.msra.mxu1 %v6890_v1  ;;  %6351 = vmatprep.subr.bf16.mxu0 %v6891_v7  ;;  %v2541_v1 = vld [vmem:[#allocation2 + $0xf1] sm:$0xff] }
  0x9e   : > { %6128 = vmatmul.mubr.bf16.gmra.mrb[8].mxu1 %v1072_v8  ;;  %6159 = vmatprep.subr.bf16.mxu1 %v6892_v9  ;;  %v7373_v8 = vpack.c.bf16 %v2542_v2, %v2541_v1  ;;  %v1425_v1 = vld [vmem:[#allocation2 + $0xaf] sm:$0xff]  ;;  %v1426_v2 = vld [vmem:[#allocation2 + $0xb7] sm:$0xff] }
  0x9f   : > { %6320 = vmatmul.mubr.bf16.gmra.mrb[8].mxu0 %v7318_v10  ;;  %6131 = vmatprep.mubr.bf16.mxu1 %v1073_v11  ;;  %v7375_v11 = vpack.c.bf16 %v2544_v6, %v2543_v5  ;;  %v3997_v5 = vld [vmem:[%s7105_s18 + $0x10] sm:$0xff]  ;;  %v6988_v6 = vmov 0  }
  0xa0   : > { %6323 = vmatprep.mubr.bf16.mxu0 %v7320_v12  ;;  %6352 = vmatpush3.bf16.msra.mxu0 %v6891_v7  ;;  %v1080_v7 = vpack.c.bf16 %v1062_v0, %v1061_v63  ;;  %v1423_v63 = vld [vmem:[#allocation2 + $0x9f] sm:$0xff]  ;;  %v1424_v0 = vld [vmem:[#allocation2 + $0xa7] sm:$0xff] }
  0xa1   : > { %6160 = vmatpush3.bf16.msra.mxu1 %v6892_v9  ;;  %6353 = vmatprep.subr.bf16.mxu0 %v6893_v15  ;;  %v1081_v9 = vpack.c.bf16 %v1064_v4, %v1063_v3  ;;  %v3995_v3 = vld [vmem:[%s7105_s18] sm:$0xff] }
  0xa2   : > { %6161 = vmatprep.subr.bf16.mxu1 %v6894_v17  ;;  %v7463_v4 = vld [vmem:[%s7985_s3 + $0x200] sm:$0xff]   ;;  %6833 = vset.pattern.permute.xlu0 %v6988_v6 }
  0xa3   : > { %4260 = vperm.xlu0 %6833, %v3995_v3   ;;  %6834 = vset.pattern.permute.xlu1 %v6988_v6  ;;  %v3264_v3 = vld [vmem:[#allocation2 + $0x7a] sm:$0xff] }
  0xa4   : > { %6354 = vmatpush3.bf16.msra.mxu0 %v6893_v15  ;;  %v2545_v15 = vld [vmem:[#allocation2 + $0x111] sm:$0xff]  ;;  %4270 = vperm.xlu1 %6834, %v3997_v5  }
  0xa5   : > { %6162 = vmatpush3.bf16.msra.mxu1 %v6894_v17  ;;  %6355 = vmatprep.subr.bf16.mxu0 %v6895_v24  ;;  %v1405_v17 = vld [vmem:[#allocation2 + $0xf] sm:$0xff]  ;;  %v7379_v20 = vpack.c.bf16 %v2546_v16, %v2545_v15  ;;  %v3998_v15 = vld [vmem:[%s7105_s18 + $0x18] sm:$0xff] }
  0xa6   : > { %6132 = vmatmul.mubr.bf16.gmra.mrb[12].mxu1 %v1074_v26  ;;  %6163 = vmatprep.subr.bf16.mxu1 %v6896_v27  ;;  %v1437_v21 = vpack.c.bf16 %v1406_v18, %v1405_v17  ;;  %v7383_v26 = vpack.c.bf16 %v1408_v23, %v1407_v22  ;;  %v1429_v16 = vld [vmem:[#allocation2 + $0xcf] sm:$0xff]  ;;  %v1430_v17 = vld [vmem:[#allocation2 + $0xd7] sm:$0xff]  ;;  %v3999_v18 = vld [vmem:[%s7105_s18 + $0x20] sm:$0xff] }
  0xa7   : > { %6324 = vmatmul.mubr.bf16.gmra.mrb[12].mxu0 %v7337_v28  ;;  %6135 = vmatprep.mubr.bf16.mxu1 %v1075_v29  ;;  %v6901_v29 = vld [vmem:[%s7985_s3 + $0x1c8] sm:$0xff]   ;;  %v7487_v22 = vpack.c.bf16 %v1430_v17, %v1429_v16  ;;  %v6919_v5 = vld [vmem:[%s7985_s3 + $0x210] sm:$0xff]   ;;  %v6921_v6 = vld [vmem:[%s7985_s3 + $0x218] sm:$0xff]  }
  0xa8   : > { %6327 = vmatprep.mubr.bf16.mxu0 %v7339_v30  ;;  %6356 = vmatpush3.bf16.msra.mxu0 %v6895_v24  ;;  %v1409_v24 = vld [vmem:[#allocation2 + $0x2f] sm:$0xff]  ;;  %v1432_v23 = vld [vmem:[#allocation2 + $0xe7] sm:$0xff] }
  0xa9   : > { %6164 = vmatpush3.bf16.msra.mxu1 %v6896_v27  ;;  %6357 = vmatprep.subr.bf16.mxu0 %v6897_v33  ;;  %v7385_v27 = vpack.c.bf16 %v1410_v25, %v1409_v24  ;;  %v4002_v24 = vld [vmem:[%s7105_s18 + $0x38] sm:$0xff]  ;;  %v1433_v25 = vld [vmem:[#allocation2 + $0xef] sm:$0xff] }
  0xaa   : > { %6165 = vmatprep.subr.bf16.mxu1 %v6898_v36  ;;  %4275 = vperm.xlu1 %6834, %v3998_v15   ;;  %v3266_v15 = vld [vmem:[#allocation2 + $0x8a] sm:$0xff]  ;;  %v3267_v17 = vld [vmem:[#allocation2 + $0x92] sm:$0xff] }
  0xab   : > { %v4017_v16 = vld [vmem:[%s7105_s18 + $0xb0] sm:$0xff] }
  0xac   : > { %6358 = vmatpush3.bf16.msra.mxu0 %v6897_v33  ;;  %v1413_v33 = vld [vmem:[#allocation2 + $0x4f] sm:$0xff] }
  0xad   : > { %6166 = vmatpush3.bf16.msra.mxu1 %v6898_v36  ;;  %6391 = vmatprep.subr.bf16.mxu0 %v7352_v41  ;;  %v7407_v37 = vpack.c.bf16 %v1414_v34, %v1413_v33  ;;  %v1436_v34 = vld [vmem:[#allocation2 + $0x107] sm:$0xff] }
  0xae   : > { %6136 = vmatmul.mubr.bf16.gmra.mrb[16].mxu1 %v1076_v43  ;;  %6199 = vmatprep.subr.bf16.mxu1 %v7357_v45  ;;  %v1418_v43 = vld [vmem:[#allocation2 + $0x77] sm:$0xff] }
  0xaf   : > { %6328 = vmatmul.mubr.bf16.gmra.mrb[16].mxu0 %v7359_v46  ;;  %6139 = vmatprep.mubr.bf16.mxu1 %v1077_v47  ;;  %v7422_v47 = vpack.c.bf16 %v1416_v40, %v1415_v39  ;;  %v3256_v39 = vld [vmem:[#allocation2 + $0x3a] sm:$0xff] }
  0xb0   : > { %6331 = vmatprep.mubr.bf16.mxu0 %v7361_v48  ;;  %v4007_v40 = vld [vmem:[%s7105_s18 + $0x60] sm:$0xff] }
  0xb6   : > { %6140 = vmatmul.mubr.bf16.gmra.mrb[20].mxu1 %v1078_v57  ;;  %v7447_v57 = vpack.c.bf16 %v1422_v54, %v1421_v53  ;;  %v3260_v53 = vld [vmem:[#allocation2 + $0x5a] sm:$0xff]  ;;  %v4012_v54 = vld [vmem:[%s7105_s18 + $0x88] sm:$0xff] }
  0xb7   : > { %6332 = vmatmul.mubr.bf16.gmra.mrb[20].mxu0 %v7367_v59  ;;  %6143 = vmatprep.mubr.bf16.mxu1 %v1079_v61  ;;  %v6914_v61 = vld [vmem:[%s7985_s3 + $0xf8] sm:$0xff]  }
  0xb8   : > { %6335 = vmatprep.mubr.bf16.mxu0 %v7369_v62 }
  0xbe   : > { %6144 = vmatmul.mubr.bf16.gmra.mrb[24].mxu1 %v1080_v7  ;;  %v7473_v7 = vpack.c.bf16 %v1426_v2, %v1425_v1  ;;  %v6920_v1 = vld [vmem:[%s8010_s7 + $0x10] sm:$0xff]  }
  0xbf   : > { %6336 = vmatmul.mubr.bf16.gmra.mrb[24].mxu0 %v7373_v8  ;;  %6147 = vmatprep.mubr.bf16.mxu1 %v1081_v9  ;;  %v3996_v9 = vld [vmem:[%s7105_s18 + $0x8] sm:$0xff]  ;;  %v3263_v2 = vld [vmem:[#allocation2 + $0x72] sm:$0xff] }
  0xc0   : > { %6339 = vmatprep.mubr.bf16.mxu0 %v7375_v11  ;;  %4265 = vperm.xlu0 %6833, %v3996_v9   ;;  %v6922_v9 = vld [vmem:[%s8010_s7 + $0x18] sm:$0xff]  }
  0xc4   : > { %4280 = vperm.xlu0 %6833, %v3999_v18   ;;  %v3268_v18 = vld [vmem:[#allocation2 + $0x9a] sm:$0xff] }
  0xc6   : > { %6148 = vmatmul.mubr.bf16.gmra.mrb[28].mxu1 %v1082_v19  ;;  %v7484_v19 = vpack.c.bf16 %v1428_v14, %v1427_v13  ;;  %v4016_v13 = vld [vmem:[%s7105_s18 + $0xa8] sm:$0xff] }
  0xc7   : > { %6340 = vmatmul.mubr.bf16.gmra.mrb[28].mxu0 %v7379_v20  ;;  %6167 = vmatprep.mubr.bf16.mxu1 %v1437_v21  ;;  %v4000_v21 = vld [vmem:[%s7105_s18 + $0x28] sm:$0xff] }
  0xc8   : > { %6359 = vmatprep.mubr.bf16.mxu0 %v7280_v42  ;;  %v1411_v42 = vld [vmem:[#allocation2 + $0x3f] sm:$0xff]  ;;  %4285 = vperm.xlu1 %6834, %v4000_v21  }
  0xc9   : > { %v7405_v36 = vpack.c.bf16 %v1412_v32, %v1411_v42  ;;  %v4004_v32 = vld [vmem:[%s7105_s18 + $0x48] sm:$0xff] }
  0xca   : > { %v3265_v14 = vld [vmem:[#allocation2 + $0x82] sm:$0xff] }
  0xcb   : > { %v3292_v21 = vpack.c.bf16 %v3266_v15, %v3265_v14  ;;  %v6933_v14 = vld [vmem:[%s7095_s4 + $0x10] sm:$0xff]  }
  0xcc   : > { %4295 = vperm.xlu1 %6834, %v4002_v24   ;;  %v4018_v24 = vld [vmem:[%s7105_s18 + $0xb8] sm:$0xff] }
  0xce   : > { %6168 = vmatmul.mubr.bf16.vlgmr.msra.gmra.mrb[0].mxu1 %v7383_v26 }
  0xcf   : > { %6360 = vmatmul.mubr.bf16.vlgmr.msra.gmra.mrb[0].mxu0 %v7282_v44  ;;  %6200 = vmatpush3.bf16.msra.mxu1 %v7357_v45  ;;  %v6903_v44 = vld [vmem:[%s7985_s3 + $0x1d0] sm:$0xff]   ;;  %v6907_v45 = vld [vmem:[%s7985_s3 + $0x1e0] sm:$0xff]  }
  0xd0   : > { %6392 = vmatpush3.bf16.msra.mxu0 %v7352_v41  ;;  %6171 = vmatprep.mubr.bf16.mxu1 %v7385_v27  ;;  %v1417_v41 = vld [vmem:[#allocation2 + $0x6f] sm:$0xff] }
  0xd1   : > { %6363 = vmatprep.mubr.bf16.mxu0 %v7300_v58  ;;  %6393 = vmatprep.subr.bf16.mxu0 %v6901_v29  ;;  %v6906_v58 = vld [vmem:[%s7985_s3 + $0xd8] sm:$0xff]   ;;  %v7427_v49 = vpack.c.bf16 %v1418_v43, %v1417_v41 }
  0xd2   : > { %6201 = vmatprep.subr.bf16.mxu1 %v6902_v31  ;;  %4305 = vperm.xlu1 %6834, %v4004_v32   ;;  %v3271_v32 = vld [vmem:[#allocation2 + $0xb2] sm:$0xff] }
  0xd3   : > { %6202 = vmatpush3.bf16.msra.mxu1 %v6902_v31  ;;  %v4003_v31 = vld [vmem:[%s7105_s18 + $0x40] sm:$0xff] }
  0xd4   : > { %6394 = vmatpush3.bf16.msra.mxu0 %v6901_v29  ;;  %6203 = vmatprep.subr.bf16.mxu1 %v6904_v35  ;;  %v1434_v29 = vld [vmem:[#allocation2 + $0xf7] sm:$0xff] }
  0xd5   : > { %6395 = vmatprep.subr.bf16.mxu0 %v6903_v44  ;;  %v7499_v33 = vpack.c.bf16 %v1434_v29, %v1433_v25  ;;  %v3269_v25 = vld [vmem:[#allocation2 + $0xa2] sm:$0xff]  ;;  %v3270_v29 = vld [vmem:[#allocation2 + $0xaa] sm:$0xff] }
  0xd6   : > { %6172 = vmatmul.mubr.bf16.gmra.mrb[4].mxu1 %v7405_v36 }
  0xd7   : > { %6364 = vmatmul.mubr.bf16.gmra.mrb[4].mxu0 %v7302_v60  ;;  %6175 = vmatprep.mubr.bf16.mxu1 %v7407_v37  ;;  %v6908_v60 = vld [vmem:[%s7985_s3 + $0xe0] sm:$0xff]  }
  0xd8   : > { %6367 = vmatprep.mubr.bf16.mxu0 %v7318_v10  ;;  %6396 = vmatpush3.bf16.msra.mxu0 %v6903_v44  ;;  %v6909_v10 = vld [vmem:[%s7985_s3 + $0x1e8] sm:$0xff]  }
  0xd9   : > { %6204 = vmatpush3.bf16.msra.mxu1 %v6904_v35  ;;  %6397 = vmatprep.subr.bf16.mxu0 %v6905_v38  ;;  %v4006_v35 = vld [vmem:[%s7105_s18 + $0x58] sm:$0xff]  ;;  %v2915_v44 = vld [vmem:[#allocation2 + $0x121] sm:$0xff] }
  0xda   : > { %6205 = vmatprep.subr.bf16.mxu1 %v6906_v58  ;;  %4315 = vperm.xlu1 %6834, %v4006_v35   ;;  %v6929_v35 = vld [vmem:[%s7985_s3 + $0x238] sm:$0xff]  }
  0xdc   : > { %6398 = vmatpush3.bf16.msra.mxu0 %v6905_v38  ;;  %v2916_v38 = vld [vmem:[#allocation2 + $0x129] sm:$0xff] }
  0xdd   : > { %6206 = vmatpush3.bf16.msra.mxu1 %v6906_v58  ;;  %6399 = vmatprep.subr.bf16.mxu0 %v6907_v45  ;;  %v3255_v58 = vld [vmem:[#allocation2 + $0x32] sm:$0xff]  ;;  %v2932_v43 = vpack.c.bf16 %v2916_v38, %v2915_v44  ;;  %v4020_v38 = vld [vmem:[%s7105_s18 + $0xc8] sm:$0xff] }
  0xde   : > { %6176 = vmatmul.mubr.bf16.gmra.mrb[8].mxu1 %v7422_v47  ;;  %6207 = vmatprep.subr.bf16.mxu1 %v6908_v60  ;;  %v6930_v44 = vld [vmem:[%s8010_s7 + $0x38] sm:$0xff]  }
  0xdf   : > { %6368 = vmatmul.mubr.bf16.gmra.mrb[8].mxu0 %v7320_v12  ;;  %6179 = vmatprep.mubr.bf16.mxu1 %v7427_v49  ;;  %v6912_v12 = vld [vmem:[%s7985_s3 + $0xf0] sm:$0xff]  }
  0xe0   : > { %6371 = vmatprep.mubr.bf16.mxu0 %v7337_v28  ;;  %6400 = vmatpush3.bf16.msra.mxu0 %v6907_v45  ;;  %v6913_v28 = vld [vmem:[%s7985_s3 + $0x1f8] sm:$0xff]   ;;  %v3287_v45 = vpack.c.bf16 %v3256_v39, %v3255_v58  ;;  %v3273_v58 = vld [vmem:[#allocation2 + $0xc2] sm:$0xff]  ;;  %v3274_v39 = vld [vmem:[#allocation2 + $0xca] sm:$0xff] }
  0xe1   : > { %6208 = vmatpush3.bf16.msra.mxu1 %v6908_v60  ;;  %6401 = vmatprep.subr.bf16.mxu0 %v6909_v10  ;;  %v4009_v60 = vld [vmem:[%s7105_s18 + $0x70] sm:$0xff] }
  0xe2   : > { %6209 = vmatprep.subr.bf16.mxu1 %v6910_v50 }
  0xe4   : > { %6402 = vmatpush3.bf16.msra.mxu0 %v6909_v10  ;;  %v3257_v10 = vld [vmem:[#allocation2 + $0x42] sm:$0xff] }
  0xe5   : > { %6210 = vmatpush3.bf16.msra.mxu1 %v6910_v50  ;;  %6403 = vmatprep.subr.bf16.mxu0 %v6911_v55  ;;  %v3258_v50 = vld [vmem:[#allocation2 + $0x4a] sm:$0xff] }
  0xe6   : > { %6180 = vmatmul.mubr.bf16.gmra.mrb[12].mxu1 %v7442_v56  ;;  %6211 = vmatprep.subr.bf16.mxu1 %v6912_v12 }
  0xe7   : > { %6372 = vmatmul.mubr.bf16.gmra.mrb[12].mxu0 %v7339_v30  ;;  %6183 = vmatprep.mubr.bf16.mxu1 %v7447_v57  ;;  %v7466_v30 = vpack.c.bf16 %v1424_v0, %v1423_v63  ;;  %v4013_v63 = vld [vmem:[%s7105_s18 + $0x90] sm:$0xff] }
  0xe8   : > { %6375 = vmatprep.mubr.bf16.mxu0 %v7359_v46  ;;  %6404 = vmatpush3.bf16.msra.mxu0 %v6911_v55  ;;  %v7471_v46 = vld [vmem:[%s8009_s21] sm:$0xff]   ;;  %v3288_v55 = vpack.c.bf16 %v3258_v50, %v3257_v10  ;;  %v3262_v0 = vld [vmem:[#allocation2 + $0x6a] sm:$0xff] }
  0xe9   : > { %6212 = vmatpush3.bf16.msra.mxu1 %v6912_v12  ;;  %6405 = vmatprep.subr.bf16.mxu0 %v6913_v28  ;;  %v3289_v12 = vpack.c.bf16 %v3260_v53, %v3259_v52  ;;  %v3277_v10 = vld [vmem:[#allocation2 + $0xe2] sm:$0xff]  ;;  %v3278_v50 = vld [vmem:[#allocation2 + $0xea] sm:$0xff]  ;;  %v3280_v52 = vld [vmem:[#allocation2 + $0xfa] sm:$0xff] }
  0xea   : > { %6213 = vmatprep.subr.bf16.mxu1 %v6914_v61  ;;  %v4025_v53 = vld [vmem:[%s7105_s18 + $0xf0] sm:$0xff] }
  0xec   : > { %6406 = vmatpush3.bf16.msra.mxu0 %v6913_v28  ;;  %v6917_v28 = vld [vmem:[%s7985_s3 + $0x208] sm:$0xff]  }
  0xed   : > { %6214 = vmatpush3.bf16.msra.mxu1 %v6914_v61  ;;  %6439 = vmatprep.subr.bf16.mxu0 %v7463_v4  ;;  %v3261_v61 = vld [vmem:[#allocation2 + $0x62] sm:$0xff] }
  0xee   : > { %6184 = vmatmul.mubr.bf16.gmra.mrb[16].mxu1 %v7466_v30  ;;  %6487 = vmatprep.subr.bf16.mxu1 %v7471_v46 }
  0xef   : > { %6376 = vmatmul.mubr.bf16.gmra.mrb[16].mxu0 %v7361_v48  ;;  %6187 = vmatprep.mubr.bf16.mxu1 %v7473_v7  ;;  %v4001_v48 = vld [vmem:[%s7105_s18 + $0x30] sm:$0xff] }
  0xf0   : > { %6379 = vmatprep.mubr.bf16.mxu0 %v7367_v59  ;;  %v1431_v59 = vld [vmem:[#allocation2 + $0xdf] sm:$0xff]  ;;  %4290 = vperm.xlu0 %6833, %v4001_v48   ;;  %v3293_v48 = vpack.c.bf16 %v3268_v18, %v3267_v17  ;;  %v3632_v17 = vld [vmem:[#allocation2 + $0x6b] sm:$0xff]  ;;  %v3633_v18 = vld [vmem:[#allocation2 + $0x73] sm:$0xff] }
  0xf1   : > { %v7496_v42 = vpack.c.bf16 %v1432_v23, %v1431_v59  ;;  %v6925_v59 = vld [vmem:[%s7985_s3 + $0x228] sm:$0xff]  }
  0xf2   : > { %v6926_v23 = vld [vmem:[%s8010_s7 + $0x28] sm:$0xff]  }
  0xf4   : > { %4300 = vperm.xlu0 %6833, %v4003_v31   ;;  %v4019_v31 = vld [vmem:[%s7105_s18 + $0xc0] sm:$0xff] }
  0xf6   : > { %6188 = vmatmul.mubr.bf16.gmra.mrb[20].mxu1 %v7484_v19 }
  0xf7   : > { %6380 = vmatmul.mubr.bf16.gmra.mrb[20].mxu0 %v7369_v62  ;;  %6191 = vmatprep.mubr.bf16.mxu1 %v7487_v22  ;;  %v4005_v62 = vld [vmem:[%s7105_s18 + $0x50] sm:$0xff] }
  0xf8   : > { %6383 = vmatprep.mubr.bf16.mxu0 %v7373_v8  ;;  %v1435_v8 = vld [vmem:[#allocation2 + $0xff] sm:$0xff]  ;;  %4310 = vperm.xlu0 %6833, %v4005_v62  }
  0xf9   : > { %v7508_v41 = vpack.c.bf16 %v1436_v34, %v1435_v8  ;;  %v3272_v62 = vld [vmem:[#allocation2 + $0xba] sm:$0xff]  ;;  %v3294_v8 = vpack.c.bf16 %v3270_v29, %v3269_v25 }
  0xfa   : > { %v3295_v34 = vpack.c.bf16 %v3272_v62, %v3271_v32  ;;  %v3637_v25 = vld [vmem:[#allocation2 + $0x93] sm:$0xff]  ;;  %v3638_v29 = vld [vmem:[#allocation2 + $0x9b] sm:$0xff] }
  0xfb   : > { %v6937_v62 = vld [vmem:[%s7095_s4 + $0x30] sm:$0xff]  }
  0xfc   : > { %4320 = vperm.xlu0 %6833, %v4007_v40   ;;  %v4021_v40 = vld [vmem:[%s7105_s18 + $0xd0] sm:$0xff] }
  0xfe   : > { %6192 = vmatmul.mubr.bf16.gmra.mrb[24].mxu1 %v7496_v42 }
  0xff   : > { %6384 = vmatmul.mubr.bf16.gmra.mrb[24].mxu0 %v7375_v11  ;;  %6195 = vmatprep.mubr.bf16.mxu1 %v7499_v33  ;;  %v4008_v11 = vld [vmem:[%s7105_s18 + $0x68] sm:$0xff] }
 0x100   : > { %6387 = vmatprep.mubr.bf16.mxu0 %v7379_v20  ;;  %4325 = vperm.xlu1 %6834, %v4008_v11   ;;  %v4010_v20 = vld [vmem:[%s7105_s18 + $0x78] sm:$0xff] }
 0x101   : > { %4330 = vperm.xlu0 %6833, %v4009_v60   ;;  %v3275_v11 = vld [vmem:[#allocation2 + $0xd2] sm:$0xff] }
 0x104   : > { %4335 = vperm.xlu1 %6834, %v4010_v20   ;;  %v4024_v20 = vld [vmem:[%s7105_s18 + $0xe8] sm:$0xff] }
 0x105   : > { %4340 = vperm.xlu0 %6833, %v4011_v51   ;;  %v3279_v51 = vld [vmem:[#allocation2 + $0xf2] sm:$0xff] }
 0x106   : > { %6196 = vmatmul.mubr.bf16.gmra.mrb[28].mxu1 %v7508_v41 }
 0x107   : > { %6388 = vmatmul.mubr.bf16.gmra.mrb[28].mxu0 %v2932_v43  ;;  %6215 = vmatprep.mubr.bf16.mxu1 %v7383_v26  ;;  %v6918_v26 = vld [vmem:[%s8010_s7 + $0x8] sm:$0xff]   ;;  %v3276_v43 = vld [vmem:[#allocation2 + $0xda] sm:$0xff] }
 0x108   : > { %6407 = vmatprep.mubr.bf16.mxu0 %v3287_v45  ;;  %4345 = vperm.xlu1 %6834, %v4012_v54   ;;  %v4022_v45 = vld [vmem:[%s7105_s18 + $0xd8] sm:$0xff]  ;;  %v3297_v60 = vpack.c.bf16 %v3276_v43, %v3275_v11  ;;  %v3298_v54 = vpack.c.bf16 %v3278_v50, %v3277_v10  ;;  %v3644_v11 = vld [vmem:[#allocation2 + $0xcb] sm:$0xff]  ;;  %v3647_v10 = vld [vmem:[#allocation2 + $0xe3] sm:$0xff] }
 0x109   : > { %4350 = vperm.xlu0 %6833, %v4013_v63   ;;  %v3645_v43 = vld [vmem:[#allocation2 + $0xd3] sm:$0xff]  ;;  %v3648_v50 = vld [vmem:[#allocation2 + $0xeb] sm:$0xff] }
 0x10e   : > { %6216 = vmatmul.mubr.bf16.vlgmr.msra.gmra.mrb[0].mxu1 %v7385_v27  ;;  %v4014_v27 = vld [vmem:[%s7105_s18 + $0x98] sm:$0xff] }
 0x10f   : > { %6408 = vmatmul.mubr.bf16.vlgmr.msra.gmra.mrb[0].mxu0 %v3288_v55  ;;  %6488 = vmatpush3.bf16.msra.mxu1 %v7471_v46  ;;  %v3291_v46 = vpack.c.bf16 %v3264_v3, %v3263_v2  ;;  %v4026_v55 = vld [vmem:[%s7105_s18 + $0xf8] sm:$0xff] }
 0x110   : > { %6440 = vmatpush3.bf16.msra.mxu0 %v7463_v4  ;;  %6219 = vmatprep.mubr.bf16.mxu1 %v7405_v36  ;;  %v3290_v4 = vpack.c.bf16 %v3262_v0, %v3261_v61  ;;  %v4015_v36 = vld [vmem:[%s7105_s18 + $0xa0] sm:$0xff]  ;;  %v1805_v0 = vld [vmem:[#allocation2 + $0x10f] sm:$0xff] }
 0x111   : > { %6411 = vmatprep.mubr.bf16.mxu0 %v3289_v12  ;;  %6441 = vmatprep.subr.bf16.mxu0 %v6917_v28  ;;  %v3299_v12 = vpack.c.bf16 %v3280_v52, %v3279_v51  ;;  %v3626_v2 = vld [vmem:[#allocation2 + $0x3b] sm:$0xff]  ;;  %v3649_v51 = vld [vmem:[#allocation2 + $0xf3] sm:$0xff] }
 0x112   : > { %6489 = vmatprep.subr.bf16.mxu1 %v6918_v26  ;;  %4355 = vperm.xlu1 %6834, %v4014_v27   ;;  %v3286_v27 = vld [vmem:[#allocation2 + $0x12a] sm:$0xff]  ;;  %v3650_v52 = vld [vmem:[#allocation2 + $0xfb] sm:$0xff] }
 0x113   : > { %6490 = vmatpush3.bf16.msra.mxu1 %v6918_v26  ;;  %4360 = vperm.xlu0 %6833, %v4015_v36   ;;  %v3284_v26 = vld [vmem:[#allocation2 + $0x11a] sm:$0xff] }
 0x114   : > { %6442 = vmatpush3.bf16.msra.mxu0 %v6917_v28  ;;  %6491 = vmatprep.subr.bf16.mxu1 %v6920_v1  ;;  %v3283_v28 = vld [vmem:[#allocation2 + $0x112] sm:$0xff] }
 0x115   : > { %6443 = vmatprep.subr.bf16.mxu0 %v6919_v5  ;;  %v3301_v63 = vpack.c.bf16 %v3284_v26, %v3283_v28  ;;  %v3653_v28 = vld [vmem:[#allocation2 + $0x113] sm:$0xff]  ;;  %v3654_v26 = vld [vmem:[#allocation2 + $0x11b] sm:$0xff] }
 0x116   : > { %6220 = vmatmul.mubr.bf16.gmra.mrb[4].mxu1 %v7407_v37  ;;  %v6923_v37 = vld [vmem:[%s7985_s3 + $0x220] sm:$0xff]   ;;  %4365 = vperm.xlu1 %6834, %v4016_v13  }
 0x117   : > { %6412 = vmatmul.mubr.bf16.gmra.mrb[4].mxu0 %v3290_v4  ;;  %6223 = vmatprep.mubr.bf16.mxu1 %v7422_v47  ;;  %v6924_v47 = vld [vmem:[%s8010_s7 + $0x20] sm:$0xff]  }
 0x118   : > { %6415 = vmatprep.mubr.bf16.mxu0 %v3291_v46  ;;  %6444 = vmatpush3.bf16.msra.mxu0 %v6919_v5  ;;  %v6931_v4 = vld [vmem:[%s7095_s4] sm:$0xff]   ;;  %v3629_v46 = vld [vmem:[#allocation2 + $0x53] sm:$0xff] }
 0x119   : > { %6492 = vmatpush3.bf16.msra.mxu1 %v6920_v1  ;;  %6445 = vmatprep.subr.bf16.mxu0 %v6921_v6  ;;  %v1806_v1 = vld [vmem:[#allocation2 + $0x117] sm:$0xff] }
 0x11a   : > { %6493 = vmatprep.subr.bf16.mxu1 %v6922_v9  ;;  %4370 = vperm.xlu0 %6833, %v4017_v16   ;;  %v1822_v3 = vpack.c.bf16 %v1806_v1, %v1805_v0  ;;  %v3631_v16 = vld [vmem:[#allocation2 + $0x63] sm:$0xff]  ;;  %v6945_v0 = vld [vmem:[%s7095_s4 + $0x70] sm:$0xff]   ;;  %v3671_v1 = vpack.c.bf16 %v3654_v26, %v3653_v28 }
 0x11b   : > { %4375 = vperm.xlu1 %6834, %v4018_v24   ;;  %v3636_v24 = vld [vmem:[#allocation2 + $0x8b] sm:$0xff] }
 0x11c   : > { %6446 = vmatpush3.bf16.msra.mxu0 %v6921_v6  ;;  %v3630_v6 = vld [vmem:[#allocation2 + $0x5b] sm:$0xff] }
 0x11d   : > { %6494 = vmatpush3.bf16.msra.mxu1 %v6922_v9  ;;  %6447 = vmatprep.subr.bf16.mxu0 %v6923_v37  ;;  %v6932_v9 = vld [vmem:[%s7095_s4 + $0x8] sm:$0xff]   ;;  %v3659_v15 = vpack.c.bf16 %v3630_v6, %v3629_v46 }
 0x11e   : > { %6224 = vmatmul.mubr.bf16.gmra.mrb[8].mxu1 %v7427_v49  ;;  %6495 = vmatprep.subr.bf16.mxu1 %v6924_v47  ;;  %v6927_v49 = vld [vmem:[%s7985_s3 + $0x230] sm:$0xff]  }
 0x11f   : > { %6416 = vmatmul.mubr.bf16.gmra.mrb[8].mxu0 %v3292_v21  ;;  %6227 = vmatprep.mubr.bf16.mxu1 %v7442_v56  ;;  %v6928_v56 = vld [vmem:[%s8010_s7 + $0x30] sm:$0xff]   ;;  %v3660_v21 = vpack.c.bf16 %v3632_v17, %v3631_v16 }
 0x120   : > { %6419 = vmatprep.mubr.bf16.mxu0 %v3293_v48  ;;  %6448 = vmatpush3.bf16.msra.mxu0 %v6923_v37  ;;  %v3634_v37 = vld [vmem:[#allocation2 + $0x7b] sm:$0xff] }
 0x121   : > { %6496 = vmatpush3.bf16.msra.mxu1 %v6924_v47  ;;  %6449 = vmatprep.subr.bf16.mxu0 %v6925_v59  ;;  %v6934_v47 = vld [vmem:[%s7095_s4 + $0x18] sm:$0xff]   ;;  %v6935_v48 = vld [vmem:[%s7095_s4 + $0x20] sm:$0xff]  }
 0x122   : > { %6497 = vmatprep.subr.bf16.mxu1 %v6926_v23  ;;  %4380 = vperm.xlu0 %6833, %v4019_v31   ;;  %v6936_v31 = vld [vmem:[%s7095_s4 + $0x28] sm:$0xff]  }
 0x123   : > { %4385 = vperm.xlu1 %6834, %v4020_v38  }
 0x124   : > { %6450 = vmatpush3.bf16.msra.mxu0 %v6925_v59  ;;  %v3661_v59 = vpack.c.bf16 %v3634_v37, %v3633_v18 }
 0x125   : > { %6498 = vmatpush3.bf16.msra.mxu1 %v6926_v23  ;;  %6451 = vmatprep.subr.bf16.mxu0 %v6927_v49  ;;  %v3635_v23 = vld [vmem:[#allocation2 + $0x83] sm:$0xff] }
 0x126   : > { %6228 = vmatmul.mubr.bf16.gmra.mrb[12].mxu1 %v7447_v57  ;;  %6499 = vmatprep.subr.bf16.mxu1 %v6928_v56  ;;  %v3296_v57 = vpack.c.bf16 %v3274_v39, %v3273_v58  ;;  %v3662_v32 = vpack.c.bf16 %v3636_v24, %v3635_v23  ;;  %v6939_v58 = vld [vmem:[%s7095_s4 + $0x40] sm:$0xff]   ;;  %v4261_v23 = vpop.permute.xlu0 %4260 }
 0x127   : > { %6420 = vmatmul.mubr.bf16.gmra.mrb[12].mxu0 %v3294_v8  ;;  %6231 = vmatprep.mubr.bf16.mxu1 %v7466_v30  ;;  %v4023_v30 = vld [vmem:[%s7105_s18 + $0xe0] sm:$0xff]  ;;  %v3640_v8 = vld [vmem:[#allocation2 + $0xab] sm:$0xff] }
 0x128   : > { %6423 = vmatprep.mubr.bf16.mxu0 %v3295_v34  ;;  %6452 = vmatpush3.bf16.msra.mxu0 %v6927_v49  ;;  %v3663_v49 = vpack.c.bf16 %v3638_v29, %v3637_v25  ;;  %v3641_v34 = vld [vmem:[#allocation2 + $0xb3] sm:$0xff] }
 0x129   : > { %6500 = vmatpush3.bf16.msra.mxu1 %v6928_v56  ;;  %6453 = vmatprep.subr.bf16.mxu0 %v6929_v35  ;;  %v3639_v56 = vld [vmem:[#allocation2 + $0xa3] sm:$0xff] }
 0x12a   : > { %6501 = vmatprep.subr.bf16.mxu1 %v6930_v44  ;;  %4390 = vperm.xlu0 %6833, %v4021_v40   ;;  %v3664_v38 = vpack.c.bf16 %v3640_v8, %v3639_v56  ;;  %v3643_v40 = vld [vmem:[#allocation2 + $0xc3] sm:$0xff] }
 0x12b   : > { %4395 = vperm.xlu1 %6834, %v4022_v45   ;;  %v6940_v45 = vld [vmem:[%s7095_s4 + $0x48] sm:$0xff]  }
 0x12c   : > { %6454 = vmatpush3.bf16.msra.mxu0 %v6929_v35  ;;  %v3642_v35 = vld [vmem:[#allocation2 + $0xbb] sm:$0xff] }
 0x12d   : > { %6502 = vmatpush3.bf16.msra.mxu1 %v6930_v44  ;;  %v6938_v44 = vld [vmem:[%s7095_s4 + $0x38] sm:$0xff]   ;;  %v3665_v39 = vpack.c.bf16 %v3642_v35, %v3641_v34 }
 0x12e   : > { %6232 = vmatmul.mubr.bf16.gmra.mrb[16].mxu1 %v7473_v7  ;;  %4400 = vperm.xlu0 %6833, %v4023_v30   ;;  %v3281_v7 = vld [vmem:[#allocation2 + $0x102] sm:$0xff]  ;;  %v6941_v30 = vld [vmem:[%s7095_s4 + $0x50] sm:$0xff]  }
 0x12f   : > { %6424 = vmatmul.mubr.bf16.gmra.mrb[16].mxu0 %v3296_v57  ;;  %6235 = vmatprep.mubr.bf16.mxu1 %v7484_v19  ;;  %v3282_v19 = vld [vmem:[#allocation2 + $0x10a] sm:$0xff]  ;;  %v3646_v57 = vld [vmem:[#allocation2 + $0xdb] sm:$0xff] }
 0x130   : > { %6427 = vmatprep.mubr.bf16.mxu0 %v3297_v60  ;;  %4405 = vperm.xlu1 %6834, %v4024_v20   ;;  %v3300_v61 = vpack.c.bf16 %v3282_v19, %v3281_v7  ;;  %v3666_v60 = vpack.c.bf16 %v3644_v11, %v3643_v40  ;;  %v3667_v20 = vpack.c.bf16 %v3646_v57, %v3645_v43  ;;  %v3651_v7 = vld [vmem:[#allocation2 + $0x103] sm:$0xff]  ;;  %v3652_v19 = vld [vmem:[#allocation2 + $0x10b] sm:$0xff]  ;;  %v7670_v57 = vld [vmem:[%s8018_s24] ss:$0 sm:$0xff] }
 0x132   : > { %4410 = vperm.xlu0 %6833, %v4025_v53   ;;  %v6942_v53 = vld [vmem:[%s7095_s4 + $0x58] sm:$0xff]  }
 0x134   : > { %4415 = vperm.xlu1 %6834, %v4026_v55   ;;  %v6943_v55 = vld [vmem:[%s7095_s4 + $0x60] sm:$0xff]  }
 0x136   : > { %6236 = vmatmul.mubr.bf16.gmra.mrb[20].mxu1 %v7487_v22  ;;  %v3285_v22 = vld [vmem:[#allocation2 + $0x122] sm:$0xff] }
 0x137   : > { %6428 = vmatmul.mubr.bf16.gmra.mrb[20].mxu0 %v3298_v54  ;;  %6239 = vmatprep.mubr.bf16.mxu1 %v7496_v42  ;;  %v3625_v42 = vld [vmem:[#allocation2 + $0x33] sm:$0xff]  ;;  %v3302_v5 = vpack.c.bf16 %v3286_v27, %v3285_v22  ;;  %v3668_v54 = vpack.c.bf16 %v3648_v50, %v3647_v10  ;;  %v3655_v22 = vld [vmem:[#allocation2 + $0x123] sm:$0xff]  ;;  %v3656_v27 = vld [vmem:[#allocation2 + $0x12b] sm:$0xff] }
 0x138   : > { %6431 = vmatprep.mubr.bf16.mxu0 %v3299_v12  ;;  %v3657_v36 = vpack.c.bf16 %v3626_v2, %v3625_v42  ;;  %v3669_v12 = vpack.c.bf16 %v3650_v52, %v3649_v51  ;;  %v6946_v42 = vld [vmem:[%s7095_s4 + $0x78] sm:$0xff]   ;;  %v3672_v2 = vpack.c.bf16 %v3656_v27, %v3655_v22  ;;  %v7679_v10 = vld [vmem:[%s8019_s6] ss:$0 sm:$0xff] }
 0x13e   : > { %6240 = vmatmul.mubr.bf16.gmra.mrb[24].mxu1 %v7499_v33  ;;  %v3627_v33 = vld [vmem:[#allocation2 + $0x43] sm:$0xff] }
 0x13f   : > { %6432 = vmatmul.mubr.bf16.gmra.mrb[24].mxu0 %v3300_v61  ;;  %6243 = vmatprep.mubr.bf16.mxu1 %v7508_v41  ;;  %v3628_v41 = vld [vmem:[#allocation2 + $0x4b] sm:$0xff] }
 0x140   : > { %6435 = vmatprep.mubr.bf16.mxu0 %v3301_v63  ;;  %v3658_v13 = vpack.c.bf16 %v3628_v41, %v3627_v33  ;;  %v6944_v61 = vld [vmem:[%s7095_s4 + $0x68] sm:$0xff]   ;;  %v3670_v63 = vpack.c.bf16 %v3652_v19, %v3651_v7 }
 0x146   : > { %6244 = vmatmul.mubr.bf16.gmra.mrb[28].mxu1 %v1822_v3 }
 0x147   : > { %6436 = vmatmul.mubr.bf16.gmra.mrb[28].mxu0 %v3302_v5  ;;  %6503 = vmatprep.mubr.bf16.mxu1 %v6931_v4 }
 0x148   : > { %6455 = vmatprep.mubr.bf16.mxu0 %v3657_v36 }
 0x14e   : > { %6504 = vmatmul.mubr.bf16.vlgmr.msra.gmra.mrb[32].mxu1 %v6932_v9 }
 0x14f   : > { %6456 = vmatmul.mubr.bf16.vlgmr.msra.gmra.mrb[0].mxu0 %v3658_v13  ;;  %6507 = vmatprep.mubr.bf16.mxu1 %v6933_v14 }
 0x150   : > { %6459 = vmatprep.mubr.bf16.mxu0 %v3659_v15 }
 0x156   : > { %6508 = vmatmul.mubr.bf16.gmra.mrb[36].mxu1 %v6934_v47 }
 0x157   : > { %6460 = vmatmul.mubr.bf16.gmra.mrb[4].mxu0 %v3660_v21  ;;  %6511 = vmatprep.mubr.bf16.mxu1 %v6935_v48 }
 0x158   : > { %6463 = vmatprep.mubr.bf16.mxu0 %v3661_v59 }
 0x15e   : > { %6512 = vmatmul.mubr.bf16.gmra.mrb[40].mxu1 %v6936_v31 }
 0x15f   : > { %6464 = vmatmul.mubr.bf16.gmra.mrb[8].mxu0 %v3662_v32  ;;  %6515 = vmatprep.mubr.bf16.mxu1 %v6937_v62  ;;  %v4271_v32 = vpop.permute.xlu1 %4270  ;;  %v4266_v62 = vpop.permute.xlu0 %4265 }
 0x160   : > { %6467 = vmatprep.mubr.bf16.mxu0 %v3663_v49 }
 0x163   : > { %v4276_v34 = vpop.permute.xlu1 %4275 }
 0x166   : > { %6516 = vmatmul.mubr.bf16.gmra.mrb[44].mxu1 %v6938_v44  ;;  %v7653_v44 = vpop.permute.xlu0 %4280 }
 0x167   : > { %6468 = vmatmul.mubr.bf16.gmra.mrb[12].mxu0 %v3664_v38  ;;  %6519 = vmatprep.mubr.bf16.mxu1 %v6939_v58  ;;  %v7657_v58 = vpop.permute.xlu1 %4285 }
 0x168   : > { %6471 = vmatprep.mubr.bf16.mxu0 %v3665_v39 }
 0x16e   : > { %6520 = vmatmul.mubr.bf16.gmra.mrb[48].mxu1 %v6940_v45  ;;  %v7672_v45 = vpop.permute.xlu1 %4295 }
 0x16f   : > { %6472 = vmatmul.mubr.bf16.gmra.mrb[16].mxu0 %v3666_v60  ;;  %6523 = vmatprep.mubr.bf16.mxu1 %v6941_v30  ;;  %v7661_v40 = vpop.permute.xlu0 %4290 }
 0x170   : > { %6475 = vmatprep.mubr.bf16.mxu0 %v3667_v20 }
 0x173   : > { %v7674_v60 = vpop.permute.xlu0 %4300 }
 0x176   : > { %6524 = vmatmul.mubr.bf16.gmra.mrb[52].mxu1 %v6942_v53 }
 0x177   : > { %6476 = vmatmul.mubr.bf16.gmra.mrb[20].mxu0 %v3668_v54  ;;  %6527 = vmatprep.mubr.bf16.mxu1 %v6943_v55 }
 0x178   : > { %6479 = vmatprep.mubr.bf16.mxu0 %v3669_v12 }
 0x17e   : > { %6528 = vmatmul.mubr.bf16.gmra.mrb[56].mxu1 %v6944_v61 }
 0x17f   : > { %6480 = vmatmul.mubr.bf16.gmra.mrb[24].mxu0 %v3670_v63  ;;  %6531 = vmatprep.mubr.bf16.mxu1 %v6945_v0 }
 0x180   : > { %6483 = vmatprep.mubr.bf16.mxu0 %v3671_v1 }
 0x186   : > { %6532 = vmatmul.mubr.bf16.gmra.mrb[60].mxu1 %v6946_v42 }
 0x187   : > { %6484 = vmatmul.mubr.bf16.gmra.mrb[28].mxu0 %v3672_v2 }
 0x1e1   : > { %v6217_v3 = vpop.f32.mrb[0].mxu1 }
 0x1e2   : > { %v1922_v5 = vpop.f32.mrb[1].mxu1 }
 0x1e3   : > { %v6218_v4 = vpop.f32.mrb[2].mxu1 }
 0x1e4   : > { %v1925_v36 = vpop.f32.mrb[3].mxu1 }
 0x1e9   : > { %v7605_v33 = vpop.f32.mrb[4].mxu1 }
 0x1ea   : > { %v7607_v41 = vpop.f32.mrb[5].mxu1 }
 0x1eb   : > { %v7609_v46 = vpop.f32.mrb[6].mxu1 }
 0x1ec   : > { %v7611_v6 = vpop.f32.mrb[7].mxu1 }
 0x1f1   : > { %v7613_v9 = vpop.f32.mrb[8].mxu1 }
 0x1f2   : > { %v7615_v13 = vpop.f32.mrb[9].mxu1 }
 0x1f3   : > { %v7617_v14 = vpop.f32.mrb[10].mxu1 }
 0x1f4   : > { %v7619_v15 = vpop.f32.mrb[11].mxu1 }
 0x1f9   : > { %v7621_v16 = vpop.f32.mrb[12].mxu1 }
 0x1fa   : > { %v7623_v17 = vpop.f32.mrb[13].mxu1 }
 0x1fb   : > { %v7625_v18 = vpop.f32.mrb[14].mxu1 }
 0x1fc   : > { %v7627_v37 = vpop.f32.mrb[15].mxu1 }
 0x201   : > { %v7629_v47 = vpop.f32.mrb[16].mxu1 }
 0x202   : > { %v7631_v21 = vpop.f32.mrb[17].mxu1 }
 0x203   : > { %v7633_v48 = vpop.f32.mrb[18].mxu1 }
 0x204   : > { %v7635_v59 = vpop.f32.mrb[19].mxu1 }
 0x209   : > { %v7637_v24 = vpop.f32.mrb[20].mxu1 }
 0x20a   : > { %v7639_v25 = vpop.f32.mrb[21].mxu1 }
 0x20b   : > { %v7641_v29 = vpop.f32.mrb[22].mxu1 }
 0x20c   : > { %v7643_v31 = vpop.f32.mrb[23].mxu1 }
 0x211   : > { %v7645_v49 = vpop.f32.mrb[24].mxu1 }
 0x212   : > { %v7647_v56 = vpop.f32.mrb[25].mxu1 }
 0x213   : > { %8011 = vst [vmem:[#allocation9_spill] sm:$0xff] %v7647_v56  ;;  %v7649_v8 = vpop.f32.mrb[26].mxu1 }
 0x214   : > { %8012 = vst [vmem:[#allocation10_spill] sm:$0xff] %v7649_v8  ;;  %v7651_v35 = vpop.f32.mrb[27].mxu1 }
 0x215   : > { %8013 = vst [vmem:[#allocation11_spill] sm:$0xff] %v7651_v35 }
 0x219   : > { %v7655_v38 = vpop.f32.mrb[28].mxu1 }
 0x21a   : > { %8014 = vst [vmem:[#allocation12_spill] sm:$0xff] %v7655_v38  ;;  %v7659_v39 = vpop.f32.mrb[29].mxu1 }
 0x21b   : > { %8015 = vst [vmem:[#allocation13_spill] sm:$0xff] %v7659_v39  ;;  %v7663_v11 = vpop.f32.mrb[30].mxu1 }
 0x21c   : > { %8016 = vst [vmem:[#allocation14_spill] sm:$0xff] %v7663_v11  ;;  %v7665_v43 = vpop.f32.mrb[31].mxu1 }
 0x21d   : > { %8017 = vst [vmem:[#allocation15_spill] sm:$0xff] %v7665_v43 }
 0x221   : > { %v6505_v30 = vpop.f32.mrb[32].mxu1 }
 0x222   : > { %v6457_v20 = vpop.f32.mrb[0].mxu0  ;;  %v4804_v50 = vadd.f32 %v6505_v30, %v7670_v57  ;;  %v4795_v51 = vpop.f32.mrb[33].mxu1 }
 0x223   : > { %v6535_v52 = vadd.f32 %v6457_v20, %v6217_v3  ;;  %v3772_v53 = vpop.f32.mrb[1].mxu0  ;;  %v4796_v54 = vadd.f32 %v7670_v57, %v4795_v51  ;;  %v6506_v55 = vpop.f32.mrb[34].mxu1 }
 0x224   : > { %v4924_v12 = vmul.f32 %v4804_v50, %v4271_v32  ;;  %v6536_v7 = vadd.f32 %v3772_v53, %v1922_v5  ;;  %v6458_v19 = vpop.f32.mrb[2].mxu0  ;;  %v4807_v28 = vadd.f32 %v6506_v55, %v7670_v57  ;;  %v4798_v26 = vpop.f32.mrb[35].mxu1 }
 0x225   : > { %v4068_v61 = vadd.f32 %v6535_v52, %v7679_v10  ;;  %v4922_v63 = vmul.f32 %v4796_v54, %v4261_v23  ;;  %v6537_v0 = vadd.f32 %v6458_v19, %v6218_v4  ;;  %v3775_v1 = vpop.f32.mrb[3].mxu0  ;;  %v4799_v22 = vadd.f32 %v7670_v57, %v4798_v26  ;;  %v7688_v20 = vpop.permute.xlu1 %4305 }
 0x226   : > { %v4066_v27 = vadd.f32 %v6536_v7, %v7679_v10  ;;  %v4925_v42 = vmul.f32 %v4807_v28, %v4276_v34  ;;  %v6538_v2 = vadd.f32 %v3775_v1, %v1925_v36  ;;  %v4997_v51 = vmul.f32 %v4924_v12, %v4804_v50  ;;  %v7691_v55 = vpop.permute.xlu0 %4310 }
 0x227   : > { %v4069_v3 = vadd.f32 %v6537_v0, %v7679_v10  ;;  %v4923_v30 = vmul.f32 %v4799_v22, %v4266_v62  ;;  %v4420_v5 = vmul.f32 %v4271_v32, %v4068_v61  ;;  %v4995_v4 = vmul.f32 %v4922_v63, %v4796_v54 }
 0x228   : > { %v4418_v53 = vmul.f32 %v4261_v23, %v4066_v27  ;;  %v4067_v52 = vadd.f32 %v6538_v2, %v7679_v10  ;;  %v4998_v26 = vmul.f32 %v4925_v42, %v4807_v28 }
 0x229   : > { %v5710_v19 = vpack.c.bf16 %v4069_v3, %v4068_v61  ;;  %v4955_v7 = vadd.f32 %v4923_v30, %v4922_v63  ;;  %v6509_v43 = vpop.f32.mrb[36].mxu1  ;;  %v4421_v36 = vmul.f32 %v4276_v34, %v4069_v3  ;;  %v4996_v11 = vmul.f32 %v4923_v30, %v4799_v22 }
 0x22a   : > { %v5705_v1 = vpack.c.bf16 %v4067_v52, %v4066_v27  ;;  %v4419_v0 = vmul.f32 %v4266_v62, %v4067_v52  ;;  %v6461_v39 = vpop.f32.mrb[4].mxu0  ;;  %v4811_v38 = vpop.f32.mrb[37].mxu1  ;;  %v4491_v32 = vmul.f32 %v4418_v53, %v4066_v27  ;;  %v4820_v2 = vadd.f32 %v6509_v43, %v7670_v57 }
 0x22b   : > { %5800 = vst [vmem:[%s7125_s0 + $0x8] sm:$0xff] %v5710_v19   ;;  %v4956_v50 = vadd.f32 %v4955_v7, %v4924_v12  ;;  %v6539_v23 = vadd.f32 %v6461_v39, %v7605_v33  ;;  %v3788_v35 = vpop.f32.mrb[5].mxu0  ;;  %v6510_v54 = vpop.f32.mrb[38].mxu1  ;;  %v5027_v63 = vadd.f32 %v4996_v11, %v4995_v4  ;;  %v4493_v22 = vmul.f32 %v4420_v5, %v4068_v61 }
 0x22c   : > { %5706 = vst [vmem:[%s7125_s0] sm:$0xff] %v5705_v1   ;;  %v4451_v28 = vadd.f32 %v4419_v0, %v4418_v53  ;;  %v4492_v8 = vmul.f32 %v4419_v0, %v4067_v52  ;;  %v6540_v34 = vadd.f32 %v3788_v35, %v7607_v41  ;;  %v6462_v56 = vpop.f32.mrb[6].mxu0  ;;  %v4814_v62 = vpop.f32.mrb[39].mxu1  ;;  %v4812_v27 = vadd.f32 %v7670_v57, %v4811_v38 }
 0x22d   : > { %v4072_v30 = vadd.f32 %v6539_v23, %v7679_v10  ;;  %v4957_v12 = vadd.f32 %v4956_v50, %v4925_v42  ;;  %v3791_v19 = vpop.f32.mrb[7].mxu0  ;;  %v5028_v43 = vadd.f32 %v5027_v63, %v4997_v51  ;;  %v4494_v1 = vmul.f32 %v4421_v36, %v4069_v3  ;;  %v7704_v35 = vpop.permute.xlu1 %4315 }
 0x22e   : > { %v4452_v33 = vadd.f32 %v4451_v28, %v4420_v5  ;;  %v4523_v39 = vadd.f32 %v4492_v8, %v4491_v32  ;;  %v4070_v7 = vadd.f32 %v6540_v34, %v7679_v10  ;;  %v4928_v53 = vmul.f32 %v4820_v2, %v7661_v40  ;;  %v7707_v4 = vpop.permute.xlu0 %4320 }
 0x22f   : > { %v4926_v11 = vmul.f32 %v4812_v27, %v7653_v44  ;;  %v6541_v41 = vadd.f32 %v6462_v56, %v7609_v46  ;;  %v5029_v42 = vadd.f32 %v5028_v43, %v4998_v26  ;;  %v4424_v8 = vmul.f32 %v7661_v40, %v4072_v30 }
 0x230   : > { %v4524_v61 = vadd.f32 %v4523_v39, %v4493_v22  ;;  %v4422_v52 = vmul.f32 %v7653_v44, %v4070_v7  ;;  %v4453_v38 = vadd.f32 %v4452_v33, %v4421_v36  ;;  %v4823_v46 = vadd.f32 %v6510_v54, %v7670_v57 }
 0x231   : > { %v4958_v5 = vadd.f32 %v4957_v12, %v4926_v11  ;;  %v4999_v51 = vmul.f32 %v4926_v11, %v4812_v27  ;;  %v4073_v3 = vadd.f32 %v6541_v41, %v7679_v10  ;;  %v6513_v0 = vpop.f32.mrb[40].mxu1  ;;  %v6542_v63 = vadd.f32 %v3791_v19, %v7611_v6 }
 0x232   : > { %v4454_v32 = vadd.f32 %v4453_v38, %v4422_v52  ;;  %v4495_v50 = vmul.f32 %v4422_v52, %v4070_v7  ;;  %v4525_v23 = vadd.f32 %v4524_v61, %v4494_v1  ;;  %v6465_v56 = vpop.f32.mrb[8].mxu0  ;;  %v4827_v28 = vpop.f32.mrb[41].mxu1  ;;  %v4929_v27 = vmul.f32 %v4823_v46, %v7672_v45 }
 0x233   : > { %v5030_v44 = vadd.f32 %v5029_v42, %v4999_v51  ;;  %v5720_v36 = vpack.c.bf16 %v4073_v3, %v4072_v30  ;;  %v4425_v26 = vmul.f32 %v7672_v45, %v4073_v3  ;;  %v3804_v40 = vpop.f32.mrb[9].mxu0  ;;  %v6514_v34 = vpop.f32.mrb[42].mxu1  ;;  %v4815_v12 = vadd.f32 %v7670_v57, %v4814_v62 }
 0x234   : > { %v4526_v22 = vadd.f32 %v4525_v23, %v4495_v50  ;;  %v6543_v33 = vadd.f32 %v6465_v56, %v7613_v9  ;;  %v6466_v39 = vpop.f32.mrb[10].mxu0  ;;  %v4830_v54 = vpop.f32.mrb[43].mxu1  ;;  %v5001_v43 = vmul.f32 %v4928_v53, %v4820_v2  ;;  %v4071_v1 = vadd.f32 %v6542_v63, %v7679_v10 }
 0x235   : > { %5802 = vst [vmem:[%s7125_s0 + $0x18] sm:$0xff] %v5720_v36   ;;  %v4836_v11 = vadd.f32 %v6513_v0, %v7670_v57  ;;  %v6544_v41 = vadd.f32 %v3804_v40, %v7615_v13  ;;  %v3807_v6 = vpop.f32.mrb[11].mxu0  ;;  %v4497_v19 = vmul.f32 %v4424_v8, %v4072_v30  ;;  %v4927_v61 = vmul.f32 %v4815_v12, %v7657_v58  ;;  %v7726_v42 = vpop.permute.xlu1 %4325 }
 0x236   : > { %v4076_v45 = vadd.f32 %v6543_v33, %v7679_v10  ;;  %v4828_v62 = vadd.f32 %v7670_v57, %v4827_v28  ;;  %v4498_v9 = vmul.f32 %v4425_v26, %v4073_v3  ;;  %v5715_v52 = vpack.c.bf16 %v4071_v1, %v4070_v7  ;;  %v7729_v30 = vpop.permute.xlu0 %4330 }
 0x237   : > { %v4423_v2 = vmul.f32 %v7657_v58, %v4071_v1  ;;  %v4074_v38 = vadd.f32 %v6544_v41, %v7679_v10  ;;  %v5002_v51 = vmul.f32 %v4929_v27, %v4823_v46  ;;  %v4959_v0 = vadd.f32 %v4958_v5, %v4927_v61 }
 0x238   : > { %v5000_v13 = vmul.f32 %v4927_v61, %v4815_v12  ;;  %v4930_v50 = vmul.f32 %v4828_v62, %v7674_v60  ;;  %5801 = vst [vmem:[%s7125_s0 + $0x10] sm:$0xff] %v5715_v52   ;;  %v7733_v28 = vmul.f32 %v4836_v11, %v7691_v55  ;;  %v4428_v63 = vmul.f32 %v7691_v55, %v4076_v45 }
 0x239   : > { %v4455_v23 = vadd.f32 %v4454_v32, %v4423_v2  ;;  %v4496_v56 = vmul.f32 %v4423_v2, %v4071_v1  ;;  %v4426_v7 = vmul.f32 %v7674_v60, %v4074_v38  ;;  %v6517_v58 = vpop.f32.mrb[44].mxu1  ;;  %v4960_v3 = vadd.f32 %v4959_v0, %v4928_v53 }
 0x23a   : > { %v5031_v36 = vadd.f32 %v5030_v44, %v5000_v13  ;;  %v5003_v46 = vmul.f32 %v4930_v50, %v4828_v62  ;;  %v6469_v5 = vpop.f32.mrb[12].mxu0  ;;  %v4843_v40 = vpop.f32.mrb[45].mxu1  ;;  %v6545_v61 = vadd.f32 %v6466_v39, %v7617_v14  ;;  %v4839_v60 = vadd.f32 %v6514_v34, %v7670_v57 }
 0x23b   : > { %v4456_v12 = vadd.f32 %v4455_v23, %v4424_v8  ;;  %v4527_v33 = vadd.f32 %v4526_v22, %v4496_v56  ;;  %v4499_v41 = vmul.f32 %v4426_v7, %v4074_v38  ;;  %v3820_v32 = vpop.f32.mrb[13].mxu0  ;;  %v7738_v1 = vpop.f32.mrb[46].mxu1  ;;  %v4961_v2 = vadd.f32 %v4960_v3, %v4929_v27 }
 0x23c   : > { %v5032_v52 = vadd.f32 %v5031_v36, %v5001_v43  ;;  %v6546_v53 = vadd.f32 %v3807_v6, %v7619_v15  ;;  %v7742_v44 = vpop.f32.mrb[14].mxu0  ;;  %v7744_v55 = vpop.f32.mrb[47].mxu1  ;;  %v4077_v8 = vadd.f32 %v6545_v61, %v7679_v10  ;;  %v4831_v22 = vadd.f32 %v7670_v57, %v4830_v54 }
 0x23d   : > { %v4528_v62 = vadd.f32 %v4527_v33, %v4497_v19  ;;  %v4457_v0 = vadd.f32 %v4456_v12, %v4425_v26  ;;  %v3823_v14 = vpop.f32.mrb[15].mxu0  ;;  %v5005_v39 = vmul.f32 %v7733_v28, %v4836_v11  ;;  %v4962_v43 = vadd.f32 %v4961_v2, %v4930_v50  ;;  %v7750_v56 = vpop.permute.xlu1 %4335 }
 0x23e   : > { %v5033_v27 = vadd.f32 %v5032_v52, %v5002_v51  ;;  %v4075_v34 = vadd.f32 %v6546_v53, %v7679_v10  ;;  %v4501_v13 = vmul.f32 %v4428_v63, %v4076_v45  ;;  %v5730_v23 = vpack.c.bf16 %v4077_v8, %v4076_v45  ;;  %v7754_v36 = vpop.permute.xlu0 %4340 }
 0x23f   : > { %v4458_v15 = vadd.f32 %v4457_v0, %v4426_v7  ;;  %v4529_v6 = vadd.f32 %v4528_v62, %v4498_v9  ;;  %v4933_v19 = vmul.f32 %v4839_v60, %v7704_v35  ;;  %v4429_v51 = vmul.f32 %v7704_v35, %v4077_v8 }
 0x240   : > { %v5034_v26 = vadd.f32 %v5033_v27, %v5003_v46  ;;  %v5725_v3 = vpack.c.bf16 %v4075_v34, %v4074_v38  ;;  %v4427_v54 = vmul.f32 %v7688_v20, %v4075_v34  ;;  %5804 = vst [vmem:[%s7125_s0 + $0x28] sm:$0xff] %v5730_v23   ;;  %v4931_v50 = vmul.f32 %v4831_v22, %v7688_v20 }
 0x241   : > { %v4530_v11 = vadd.f32 %v4529_v6, %v4499_v41  ;;  %v6547_v7 = vadd.f32 %v6469_v5, %v7621_v16  ;;  %v6521_v9 = vpop.f32.mrb[48].mxu1  ;;  %v4852_v46 = vadd.f32 %v6517_v58, %v7670_v57  ;;  %v6548_v38 = vadd.f32 %v3820_v32, %v7623_v17 }
 0x242   : > { %5803 = vst [vmem:[%s7125_s0 + $0x20] sm:$0xff] %v5725_v3   ;;  %v4459_v45 = vadd.f32 %v4458_v15, %v4427_v54  ;;  %v4500_v12 = vmul.f32 %v4427_v54, %v4075_v34  ;;  %v6473_v33 = vpop.f32.mrb[16].mxu0  ;;  %v7763_v61 = vpop.f32.mrb[49].mxu1  ;;  %v4963_v52 = vadd.f32 %v4962_v43, %v4931_v50  ;;  %v5004_v41 = vmul.f32 %v4931_v50, %v4831_v22 }
 0x243   : > { %v4080_v2 = vadd.f32 %v6547_v7, %v7679_v10  ;;  %v4844_v35 = vadd.f32 %v7670_v57, %v4843_v40  ;;  %v7767_v20 = vpop.f32.mrb[17].mxu0  ;;  %v7769_v16 = vpop.f32.mrb[50].mxu1  ;;  %v5006_v5 = vmul.f32 %v4933_v19, %v4839_v60  ;;  %v4078_v58 = vadd.f32 %v6548_v38, %v7679_v10 }
 0x244   : > { %v4460_v53 = vadd.f32 %v4459_v45, %v4428_v63  ;;  %v4531_v62 = vadd.f32 %v4530_v11, %v4500_v12  ;;  %v7772_v0 = vpop.f32.mrb[18].mxu0  ;;  %v7774_v17 = vpop.f32.mrb[51].mxu1  ;;  %v4502_v32 = vmul.f32 %v4429_v51, %v4077_v8  ;;  %v4964_v22 = vadd.f32 %v4963_v52, %v7733_v28 }
 0x245   : > { %v5035_v43 = vadd.f32 %v5034_v26, %v5004_v41  ;;  %v4934_v27 = vmul.f32 %v4844_v35, %v7707_v4  ;;  %v7778_v40 = vpop.f32.mrb[19].mxu0  ;;  %v4936_v15 = vmul.f32 %v4852_v46, %v7729_v30  ;;  %v4430_v63 = vmul.f32 %v7707_v4, %v4078_v58  ;;  %v7783_v11 = vpop.permute.xlu1 %4345 }
 0x246   : > { %v4532_v34 = vadd.f32 %v4531_v62, %v4501_v13  ;;  %v4461_v60 = vadd.f32 %v4460_v53, %v4429_v51  ;;  %v4432_v23 = vmul.f32 %v7729_v30, %v4080_v2  ;;  %v4965_v3 = vadd.f32 %v4964_v22, %v4933_v19  ;;  %v7787_v7 = vpop.permute.xlu0 %4350 }
 0x247   : > { %v5036_v6 = vadd.f32 %v5035_v43, %v5005_v39  ;;  %v5007_v54 = vmul.f32 %v4934_v27, %v4844_v35  ;;  %v4503_v28 = vmul.f32 %v4430_v63, %v4078_v58  ;;  %v6549_v50 = vadd.f32 %v7742_v44, %v7625_v18 }
 0x248   : > { %v4462_v8 = vadd.f32 %v4461_v60, %v4430_v63  ;;  %v4533_v26 = vadd.f32 %v4532_v34, %v4502_v32  ;;  %v4966_v13 = vadd.f32 %v4965_v3, %v4934_v27  ;;  %v4855_v4 = vadd.f32 %v7738_v1, %v7670_v57 }
 0x249   : > { %v5037_v45 = vadd.f32 %v5036_v6, %v5006_v5  ;;  %v6550_v39 = vadd.f32 %v3823_v14, %v7627_v37  ;;  %v7792_v30 = vpop.f32.mrb[52].mxu1  ;;  %v4081_v51 = vadd.f32 %v6549_v50, %v7679_v10  ;;  %v4847_v12 = vadd.f32 %v7670_v57, %v7744_v55 }
 0x24a   : > { %v4534_v19 = vadd.f32 %v4533_v26, %v4503_v28  ;;  %v6551_v38 = vadd.f32 %v6473_v33, %v7629_v47  ;;  %v7798_v18 = vpop.f32.mrb[20].mxu0  ;;  %v7800_v44 = vpop.f32.mrb[53].mxu1  ;;  %v4937_v1 = vmul.f32 %v4855_v4, %v7750_v56  ;;  %v4868_v14 = vadd.f32 %v6521_v9, %v7670_v57 }
 0x24b   : > { %v5038_v52 = vadd.f32 %v5037_v45, %v5007_v54  ;;  %v4079_v37 = vadd.f32 %v6550_v39, %v7679_v10  ;;  %v7805_v41 = vpop.f32.mrb[21].mxu0  ;;  %v7807_v35 = vpop.f32.mrb[54].mxu1  ;;  %v5740_v55 = vpack.c.bf16 %v4081_v51, %v4080_v2  ;;  %v4433_v47 = vmul.f32 %v7750_v56, %v4081_v51 }
 0x24c   : > { %v4935_v33 = vmul.f32 %v4847_v12, %v7726_v42  ;;  %v7811_v5 = vpop.f32.mrb[22].mxu0  ;;  %v7813_v53 = vpop.f32.mrb[55].mxu1  ;;  %v4505_v62 = vmul.f32 %v4432_v23, %v4080_v2  ;;  %v5009_v32 = vmul.f32 %v4936_v15, %v4852_v46  ;;  %v5010_v27 = vmul.f32 %v4937_v1, %v4855_v4 }
 0x24d   : > { %v5735_v22 = vpack.c.bf16 %v4079_v37, %v4078_v58  ;;  %v4431_v43 = vmul.f32 %v7726_v42, %v4079_v37  ;;  %v7816_v9 = vpop.f32.mrb[23].mxu0  ;;  %5806 = vst [vmem:[%s7125_s0 + $0x38] sm:$0xff] %v5740_v55   ;;  %v7820_v60 = vadd.f32 %v6551_v38, %v7679_v10  ;;  %v7824_v3 = vmul.f32 %v4868_v14, %v7787_v7  ;;  %v4356_v2 = vpop.permute.xlu1 %4355 }
 0x24e   : > { %v4967_v34 = vadd.f32 %v4966_v13, %v4935_v33  ;;  %v5008_v63 = vmul.f32 %v4935_v33, %v4847_v12  ;;  %v6552_v46 = vadd.f32 %v7767_v20, %v7631_v21  ;;  %v4506_v42 = vmul.f32 %v4433_v47, %v4081_v51  ;;  %v7830_v26 = vpop.permute.xlu0 %4360 }
 0x24f   : > { %5805 = vst [vmem:[%s7125_s0 + $0x30] sm:$0xff] %v5735_v22   ;;  %v4463_v56 = vadd.f32 %v4462_v8, %v4431_v43  ;;  %v4504_v6 = vmul.f32 %v4431_v43, %v4079_v37  ;;  %v4860_v28 = vadd.f32 %v7670_v57, %v7763_v61  ;;  %v6553_v45 = vadd.f32 %v7772_v0, %v7633_v48 }
 0x250   : > { %v4968_v58 = vadd.f32 %v4967_v34, %v4936_v15  ;;  %v5039_v54 = vadd.f32 %v5038_v52, %v5008_v63  ;;  %v4082_v8 = vadd.f32 %v6552_v46, %v7679_v10  ;;  %v4871_v15 = vadd.f32 %v7769_v16, %v7670_v57 }
 0x251   : > { %v4464_v50 = vadd.f32 %v4463_v56, %v4432_v23  ;;  %v4535_v13 = vadd.f32 %v4534_v19, %v4504_v6  ;;  %v7835_v4 = vpop.f32.mrb[56].mxu1  ;;  %v4938_v21 = vmul.f32 %v4860_v28, %v7754_v36  ;;  %v4085_v38 = vadd.f32 %v6553_v45, %v7679_v10 }
 0x252   : > { %v5040_v39 = vadd.f32 %v5039_v54, %v5009_v32  ;;  %v4969_v20 = vadd.f32 %v4968_v58, %v4937_v1  ;;  %v7840_v51 = vpop.f32.mrb[24].mxu0  ;;  %v7842_v61 = vpop.f32.mrb[57].mxu1  ;;  %v4434_v19 = vmul.f32 %v7754_v36, %v4082_v8  ;;  %v4436_v22 = vmul.f32 %v7787_v7, %v7820_v60 }
 0x253   : > { %v4536_v23 = vadd.f32 %v4535_v13, %v4505_v62  ;;  %v4465_v12 = vadd.f32 %v4464_v50, %v4433_v47  ;;  %v7846_v48 = vpop.f32.mrb[25].mxu0  ;;  %v7848_v0 = vpop.f32.mrb[58].mxu1  ;;  %v5011_v1 = vmul.f32 %v4938_v21, %v4860_v28  ;;  %v5750_v36 = vpack.c.bf16 %v4085_v38, %v7820_v60 }
 0x254   : > { %v4970_v52 = vadd.f32 %v4969_v20, %v4938_v21  ;;  %v5041_v37 = vadd.f32 %v5040_v39, %v5010_v27  ;;  %v7850_v55 = vpop.f32.mrb[26].mxu0  ;;  %v7852_v16 = vpop.f32.mrb[59].mxu1  ;;  %v4507_v32 = vmul.f32 %v4434_v19, %v4082_v8  ;;  %v5013_v43 = vmul.f32 %v7824_v3, %v4868_v14 }
 0x255   : > { %v4466_v33 = vadd.f32 %v4465_v12, %v4434_v19  ;;  %v4537_v62 = vadd.f32 %v4536_v23, %v4506_v42  ;;  %v7855_v47 = vpop.f32.mrb[27].mxu0  ;;  %v6554_v27 = vadd.f32 %v7778_v40, %v7635_v59  ;;  %5808 = vst [vmem:[%s7125_s0 + $0x48] sm:$0xff] %v5750_v36   ;;  %v4941_v56 = vmul.f32 %v4871_v15, %v4356_v2  ;;  %v7867_v42 = vpop.permute.xlu1 %4365 }
 0x256   : > { %v5042_v34 = vadd.f32 %v5041_v37, %v5011_v1  ;;  %v4863_v6 = vadd.f32 %v7670_v57, %v7774_v17  ;;  %v6555_v46 = vadd.f32 %v7798_v18, %v7637_v24  ;;  %v4437_v58 = vmul.f32 %v4356_v2, %v4085_v38  ;;  %v4371_v40 = vpop.permute.xlu0 %4370 }
 0x257   : > { %v4538_v63 = vadd.f32 %v4537_v62, %v4507_v32  ;;  %v4083_v7 = vadd.f32 %v6554_v27, %v7679_v10  ;;  %v6556_v14 = vadd.f32 %v7805_v41, %v7639_v25  ;;  %v4876_v59 = vadd.f32 %v7670_v57, %v7800_v44 }
 0x258   : > { %v4939_v54 = vmul.f32 %v4863_v6, %v7783_v11  ;;  %v4088_v28 = vadd.f32 %v6555_v46, %v7679_v10  ;;  %v4884_v17 = vadd.f32 %v7792_v30, %v7670_v57  ;;  %v6557_v24 = vadd.f32 %v7811_v5, %v7641_v29 }
 0x259   : > { %v7880_v18 = vpop.f32.mrb[60].mxu1  ;;  %v5745_v2 = vpack.c.bf16 %v4083_v7, %v4082_v8  ;;  %v4435_v25 = vmul.f32 %v7783_v11, %v4083_v7  ;;  %v4086_v41 = vadd.f32 %v6556_v14, %v7679_v10  ;;  %v4942_v44 = vmul.f32 %v4876_v59, %v7830_v26  ;;  %v4376_v46 = vpop.permute.xlu1 %4375 }
 0x25a   : > { %v7885_v50 = vpop.f32.mrb[28].mxu0  ;;  %v7887_v13 = vpop.f32.mrb[61].mxu1  ;;  %v4509_v45 = vmul.f32 %v4436_v22, %v7820_v60  ;;  %v5014_v30 = vmul.f32 %v4941_v56, %v4871_v15  ;;  %v4971_v39 = vadd.f32 %v4970_v52, %v4939_v54  ;;  %v5012_v21 = vmul.f32 %v4939_v54, %v4863_v6 }
 0x25b   : > { %v7890_v20 = vpop.f32.mrb[29].mxu0  ;;  %v7892_v29 = vpop.f32.mrb[62].mxu1  ;;  %v4510_v5 = vmul.f32 %v4437_v58, %v4085_v38  ;;  %5807 = vst [vmem:[%s7125_s0 + $0x40] sm:$0xff] %v5745_v2   ;;  %v4467_v11 = vadd.f32 %v4466_v33, %v4435_v25  ;;  %v4508_v8 = vmul.f32 %v4435_v25, %v4083_v7  ;;  %v4438_v23 = vmul.f32 %v7830_v26, %v4086_v41 }
 0x25c   : > { %v7896_v19 = vpop.f32.mrb[30].mxu0  ;;  %v7898_v12 = vpop.f32.mrb[63].mxu1  ;;  %v4972_v1 = vadd.f32 %v4971_v39, %v7824_v3  ;;  %v5043_v60 = vadd.f32 %v5042_v34, %v5012_v21  ;;  %v4944_v15 = vmul.f32 %v4884_v17, %v4371_v40  ;;  %v4089_v52 = vadd.f32 %v6557_v24, %v7679_v10 }
 0x25d   : > { %v7902_v37 = vpop.f32.mrb[31].mxu0  ;;  %v4468_v32 = vadd.f32 %v4467_v11, %v4436_v22  ;;  %v4539_v38 = vadd.f32 %v4538_v63, %v4508_v8  ;;  %v4440_v62 = vmul.f32 %v4371_v40, %v4088_v28  ;;  %v5015_v33 = vmul.f32 %v4942_v44, %v4876_v59 }
 0x25e   : > { %v5044_v36 = vadd.f32 %v5043_v60, %v5013_v43  ;;  %v4973_v27 = vadd.f32 %v4972_v1, %v4941_v56  ;;  %v5760_v26 = vpack.c.bf16 %v4089_v52, %v4088_v28  ;;  %v4887_v6 = vadd.f32 %v7807_v35, %v7670_v57 }
 0x25f   : > { %v4540_v7 = vadd.f32 %v4539_v38, %v4509_v45  ;;  %v4469_v3 = vadd.f32 %v4468_v32, %v4437_v58  ;;  %v4511_v34 = vmul.f32 %v4438_v23, %v4086_v41  ;;  %v6558_v14 = vadd.f32 %v7816_v9, %v7643_v31  ;;  %v8020_v45 = vld [vmem:[#allocation9_spill] sm:$0xff] }
 0x260   : > { %v4974_v54 = vadd.f32 %v4973_v27, %v4942_v44  ;;  %v5045_v24 = vadd.f32 %v5044_v36, %v5014_v30  ;;  %5810 = vst [vmem:[%s7125_s0 + $0x58] sm:$0xff] %v5760_v26   ;;  %v4441_v22 = vmul.f32 %v4376_v46, %v4089_v52  ;;  %v4879_v63 = vadd.f32 %v7670_v57, %v7813_v53  ;;  %v8021_v27 = vld [vmem:[#allocation10_spill] sm:$0xff] }
 0x261   : > { %v5017_v43 = vmul.f32 %v4944_v15, %v4884_v17  ;;  %v4470_v56 = vadd.f32 %v4469_v3, %v4438_v23  ;;  %v4541_v59 = vadd.f32 %v4540_v7, %v4510_v5  ;;  %v4087_v35 = vadd.f32 %v6558_v14, %v7679_v10  ;;  %v4381_v5 = vpop.permute.xlu0 %4380 }
 0x262   : > { %v5046_v40 = vadd.f32 %v5045_v24, %v5015_v33  ;;  %v4945_v2 = vmul.f32 %v4887_v6, %v4376_v46  ;;  %v4943_v58 = vmul.f32 %v4879_v63, %v7867_v42  ;;  %v6559_v31 = vadd.f32 %v7840_v51, %v7645_v49  ;;  %v8022_v24 = vld [vmem:[#allocation11_spill] sm:$0xff] }
 0x263   : > { %v4542_v9 = vadd.f32 %v4541_v59, %v4511_v34  ;;  %v5755_v25 = vpack.c.bf16 %v4087_v35, %v4086_v41  ;;  %v4439_v44 = vmul.f32 %v7867_v42, %v4087_v35  ;;  %v6560_v53 = vadd.f32 %v7846_v48, %v8020_v45  ;;  %v4386_v48 = vpop.permute.xlu1 %4385 }
 0x264   : > { %v4513_v17 = vmul.f32 %v4440_v62, %v4088_v28  ;;  %v4514_v30 = vmul.f32 %v4441_v22, %v4089_v52  ;;  %v4975_v39 = vadd.f32 %v4974_v54, %v4943_v58  ;;  %v5016_v21 = vmul.f32 %v4943_v58, %v4879_v63 }
 0x265   : > { %5809 = vst [vmem:[%s7125_s0 + $0x50] sm:$0xff] %v5755_v25   ;;  %v4471_v11 = vadd.f32 %v4470_v56, %v4439_v44  ;;  %v4512_v8 = vmul.f32 %v4439_v44, %v4087_v35  ;;  %v4090_v23 = vadd.f32 %v6560_v53, %v7679_v10  ;;  %v4892_v49 = vadd.f32 %v7670_v57, %v7842_v61  ;;  %v4391_v34 = vpop.permute.xlu0 %4390 }
 0x266   : > { %v5018_v51 = vmul.f32 %v4945_v2, %v4887_v6  ;;  %v4976_v41 = vadd.f32 %v4975_v39, %v4944_v15  ;;  %v5047_v1 = vadd.f32 %v5046_v40, %v5016_v21  ;;  %v4900_v42 = vadd.f32 %v7835_v4, %v7670_v57 }
 0x267   : > { %v4472_v28 = vadd.f32 %v4471_v11, %v4440_v62  ;;  %v4543_v60 = vadd.f32 %v4542_v9, %v4512_v8  ;;  %v4442_v52 = vmul.f32 %v4381_v5, %v4090_v23  ;;  %v4946_v32 = vmul.f32 %v4892_v49, %v4381_v5  ;;  %v4396_v35 = vpop.permute.xlu1 %4395 }
 0x268   : > { %v5048_v38 = vadd.f32 %v5047_v1, %v5017_v43  ;;  %v4092_v33 = vadd.f32 %v6559_v31, %v7679_v10  ;;  %v4977_v36 = vadd.f32 %v4976_v41, %v4945_v2  ;;  %v6561_v26 = vadd.f32 %v7850_v55, %v8021_v27 }
 0x269   : > { %v4544_v46 = vadd.f32 %v4543_v60, %v4513_v17  ;;  %v4473_v61 = vadd.f32 %v4472_v28, %v4441_v22  ;;  %v4515_v6 = vmul.f32 %v4442_v52, %v4090_v23  ;;  %v5019_v15 = vmul.f32 %v4946_v32, %v4892_v49  ;;  %v4401_v11 = vpop.permute.xlu0 %4400 }
 0x26a   : > { %v4978_v7 = vadd.f32 %v4977_v36, %v4946_v32  ;;  %v5049_v3 = vadd.f32 %v5048_v38, %v5018_v51  ;;  %v4093_v4 = vadd.f32 %v6561_v26, %v7679_v10  ;;  %v4903_v62 = vadd.f32 %v7848_v0, %v7670_v57  ;;  %v8023_v0 = vld [vmem:[#allocation12_spill] sm:$0xff] }
 0x26b   : > { %v4474_v14 = vadd.f32 %v4473_v61, %v4442_v52  ;;  %v4545_v54 = vadd.f32 %v4544_v46, %v4514_v30  ;;  %v6562_v63 = vadd.f32 %v7855_v47, %v8022_v24  ;;  %v4895_v55 = vadd.f32 %v7670_v57, %v7852_v16  ;;  %v8024_v47 = vld [vmem:[#allocation13_spill] sm:$0xff] }
 0x26c   : > { %v4444_v22 = vmul.f32 %v4391_v34, %v4092_v33  ;;  %v4948_v43 = vmul.f32 %v4900_v42, %v4391_v34  ;;  %v5050_v56 = vadd.f32 %v5049_v3, %v5019_v15  ;;  %v5770_v59 = vpack.c.bf16 %v4093_v4, %v4092_v33 }
 0x26d   : > { %v4546_v40 = vadd.f32 %v4545_v54, %v4515_v6  ;;  %v4091_v2 = vadd.f32 %v6562_v63, %v7679_v10  ;;  %v4947_v58 = vmul.f32 %v4895_v55, %v4386_v48  ;;  %v6563_v31 = vadd.f32 %v7885_v50, %v8023_v0 }
 0x26e   : > { %5812 = vst [vmem:[%s7125_s0 + $0x68] sm:$0xff] %v5770_v59   ;;  %v4445_v9 = vmul.f32 %v4396_v35, %v4093_v4  ;;  %v4949_v25 = vmul.f32 %v4903_v62, %v4396_v35  ;;  %v6564_v44 = vadd.f32 %v7890_v20, %v8024_v47  ;;  %v4517_v30 = vmul.f32 %v4444_v22, %v4092_v33  ;;  %v8025_v33 = vld [vmem:[#allocation14_spill] sm:$0xff] }
 0x26f   : > { %v5765_v16 = vpack.c.bf16 %v4091_v2, %v4090_v23  ;;  %v4443_v45 = vmul.f32 %v4386_v48, %v4091_v2  ;;  %v4979_v53 = vadd.f32 %v4978_v7, %v4947_v58  ;;  %v5020_v17 = vmul.f32 %v4947_v58, %v4895_v55  ;;  %v8026_v7 = vld [vmem:[#allocation15_spill] sm:$0xff] }
 0x270   : > { %v5021_v39 = vmul.f32 %v4948_v43, %v4900_v42  ;;  %v4094_v21 = vadd.f32 %v6564_v44, %v7679_v10  ;;  %v4908_v5 = vadd.f32 %v7670_v57, %v7887_v13  ;;  %v4518_v41 = vmul.f32 %v4445_v9, %v4093_v4  ;;  %v4406_v42 = vpop.permute.xlu1 %4405 }
 0x271   : > { %5811 = vst [vmem:[%s7125_s0 + $0x60] sm:$0xff] %v5765_v16   ;;  %v4475_v50 = vadd.f32 %v4474_v14, %v4443_v45  ;;  %v4516_v8 = vmul.f32 %v4443_v45, %v4091_v2  ;;  %v4980_v49 = vadd.f32 %v4979_v53, %v4948_v43  ;;  %v5051_v51 = vadd.f32 %v5050_v56, %v5020_v17  ;;  %v4411_v14 = vpop.permute.xlu0 %4410 }
 0x272   : > { %v5022_v1 = vmul.f32 %v4949_v25, %v4903_v62  ;;  %v4446_v20 = vmul.f32 %v4401_v11, %v4094_v21  ;;  %v4950_v23 = vmul.f32 %v4908_v5, %v4401_v11  ;;  %v4916_v32 = vadd.f32 %v7880_v18, %v7670_v57 }
 0x273   : > { %v4476_v48 = vadd.f32 %v4475_v50, %v4444_v22  ;;  %v4547_v28 = vadd.f32 %v4546_v40, %v4516_v8  ;;  %v5052_v60 = vadd.f32 %v5051_v51, %v5021_v39  ;;  %v4981_v52 = vadd.f32 %v4980_v49, %v4949_v25 }
 0x274   : > { %v4519_v38 = vmul.f32 %v4446_v20, %v4094_v21  ;;  %v5023_v13 = vmul.f32 %v4950_v23, %v4908_v5  ;;  %v6565_v36 = vadd.f32 %v7896_v19, %v8025_v33  ;;  %v4096_v6 = vadd.f32 %v6563_v31, %v7679_v10  ;;  %v4416_v43 = vpop.permute.xlu1 %4415  ;;  %v4450_v33 = vld [vmem:[%s7110_s15] sm:$0x1] }
 0x275   : > { %v4548_v27 = vadd.f32 %v4547_v28, %v4517_v30  ;;  %v4477_v26 = vadd.f32 %v4476_v48, %v4445_v9  ;;  %v4982_v46 = vadd.f32 %v4981_v52, %v4950_v23  ;;  %v5053_v61 = vadd.f32 %v5052_v60, %v5022_v1 }
 0x276   : > { %v4097_v15 = vadd.f32 %v6565_v36, %v7679_v10  ;;  %v6566_v3 = vadd.f32 %v7902_v37, %v8026_v7  ;;  %v4911_v18 = vadd.f32 %v7670_v57, %v7898_v12  ;;  %v4919_v19 = vadd.f32 %v7892_v29, %v7670_v57 }
 0x277   : > { %v4478_v4 = vadd.f32 %v4477_v26, %v4446_v20  ;;  %v4549_v62 = vadd.f32 %v4548_v27, %v4518_v41  ;;  %v5054_v34 = vadd.f32 %v5053_v61, %v5023_v13  ;;  %v4952_v63 = vmul.f32 %v4916_v32, %v4411_v14  ;;  %v4954_v13 = vld [vmem:[%s7120_s16] sm:$0x1] }
 0x278   : > { %v5780_v54 = vpack.c.bf16 %v4097_v15, %v4096_v6  ;;  %v4095_v24 = vadd.f32 %v6566_v3, %v7679_v10  ;;  %v4951_v22 = vmul.f32 %v4911_v18, %v4406_v42  ;;  %v4448_v56 = vmul.f32 %v4411_v14, %v4096_v6  ;;  %v4994_v61 = vld [vmem:[%s7130_s28] sm:$0x1] }
 0x279   : > { %v4550_v55 = vadd.f32 %v4549_v62, %v4519_v38  ;;  %v4953_v12 = vmul.f32 %v4919_v19, %v4416_v43  ;;  %v4449_v2 = vmul.f32 %v4416_v43, %v4097_v15  ;;  %v5025_v29 = vmul.f32 %v4952_v63, %v4916_v32 }
 0x27a   : > { %5814 = vst [vmem:[%s7125_s0 + $0x78] sm:$0xff] %v5780_v54   ;;  %v5775_v37 = vpack.c.bf16 %v4095_v24, %v4094_v21  ;;  %v4447_v59 = vmul.f32 %v4406_v42, %v4095_v24  ;;  %v4983_v35 = vadd.f32 %v4982_v46, %v4951_v22  ;;  %v5024_v40 = vmul.f32 %v4951_v22, %v4911_v18 }
 0x27b   : > { %v4521_v9 = vmul.f32 %v4448_v56, %v4096_v6  ;;  %v5026_v47 = vmul.f32 %v4953_v12, %v4919_v19  ;;  %v4522_v45 = vmul.f32 %v4449_v2, %v4097_v15  ;;  %v4490_v6 = vld [vmem:[%s7115_s26] sm:$0x1] }
 0x27c   : > { %5813 = vst [vmem:[%s7125_s0 + $0x70] sm:$0xff] %v5775_v37   ;;  %v4479_v58 = vadd.f32 %v4478_v4, %v4447_v59  ;;  %v4520_v57 = vmul.f32 %v4447_v59, %v4095_v24  ;;  %v4984_v0 = vadd.f32 %v4983_v35, %v4952_v63  ;;  %v5055_v31 = vadd.f32 %v5054_v34, %v5024_v40 }
 0x27e   : > { %v4480_v10 = vadd.f32 %v4479_v58, %v4448_v56  ;;  %v4551_v25 = vadd.f32 %v4550_v55, %v4520_v57  ;;  %v4985_v44 = vadd.f32 %v4984_v0, %v4953_v12  ;;  %v5056_v16 = vadd.f32 %v5055_v31, %v5025_v29 }
 0x280   : > { %v4481_v53 = vadd.f32 %v4480_v10, %v4449_v2  ;;  %v4552_v17 = vadd.f32 %v4551_v25, %v4521_v9  ;;  %v4986_v30 = vrot.slane %v4985_v44, 4  ;;  %v5057_v39 = vadd.f32 %v5056_v16, %v5026_v47 }
 0x282   : > { %v4482_v21 = vrot.slane %v4481_v53, 4  ;;  %v4553_v5 = vadd.f32 %v4552_v17, %v4522_v45  ;;  %v4987_v11 = vadd.f32 %v4986_v30, %v4985_v44  ;;  %v5058_v50 = vrot.slane %v5057_v39, 4 }
 0x284   : > { %v4483_v8 = vadd.f32 %v4482_v21, %v4481_v53  ;;  %v4554_v49 = vrot.slane %v4553_v5, 4  ;;  %v4988_v51 = vrot.slane %v4987_v11, 2  ;;  %v5059_v41 = vadd.f32 %v5058_v50, %v5057_v39 }
 0x286   : > { %v4484_v1 = vrot.slane %v4483_v8, 2  ;;  %v4555_v20 = vadd.f32 %v4554_v49, %v4553_v5  ;;  %v4989_v23 = vadd.f32 %v4988_v51, %v4987_v11  ;;  %v5060_v48 = vrot.slane %v5059_v41, 2 }
 0x288   : > { %v4485_v28 = vadd.f32 %v4484_v1, %v4483_v8  ;;  %v4556_v60 = vrot.slane %v4555_v20, 2  ;;  %v4990_v52 = vrot.slane %v4989_v23, 1  ;;  %v5061_v42 = vadd.f32 %v5060_v48, %v5059_v41 }
 0x28a   : > { %v4486_v32 = vrot.slane %v4485_v28, 1  ;;  %v4557_v38 = vadd.f32 %v4556_v60, %v4555_v20  ;;  %v4991_v36 = vadd.f32 %v4990_v52, %v4989_v23  ;;  %v5062_v27 = vrot.slane %v5061_v42, 1 }
 0x28c   : > { %v4487_v26 = vadd.f32 %v4486_v32, %v4485_v28  ;;  %v4558_v46 = vrot.slane %v4557_v38, 1  ;;  %v4992_v15 = vadd.f32 %v4991_v36, %v4954_v13  ;;  %v5063_v7 = vadd.f32 %v5062_v27, %v5061_v42 }
 0x28e   : > { %v4488_v3 = vadd.f32 %v4487_v26, %v4450_v33  ;;  %v4559_v18 = vadd.f32 %v4558_v46, %v4557_v38  ;;  %4993 = vst [vmem:[%s7120_s16] sm:$0x1] %v4992_v15  ;;  %v5064_v4 = vadd.f32 %v5063_v7, %v4994_v61 }
 0x290   : > { %4489 = vst [vmem:[%s7110_s15] sm:$0x1] %v4488_v3  ;;  %v4560_v62 = vadd.f32 %v4559_v18, %v4490_v6  ;;  %5065 = vst [vmem:[%s7130_s28] sm:$0x1] %v5064_v4 }
 0x292   : > { %4561 = vst [vmem:[%s7115_s26] sm:$0x1] %v4560_v62 }
 0x293 PF: > { %s8027_s0 = sld [smem:[#allocation6_spill]]  ;;  %s8028_s21 = sld [smem:[#allocation4_spill]] }
 0x294   : > { %s8029_s22 = sld [smem:[#allocation5_spill]]  ;;  %s8030_s23 = sld [smem:[#allocation7_spill]] }
 0x295   : > { %s8031_s24 = sld [smem:[#allocation8_spill]] }
 0x299   : > { %s23_s25 = sadd.s32 1, %s8027_s0  }
 0x29a   : > { %p20_p11 = scmp.ge.s32.totalorder %s23_s25, 6  }
 0x29c   :  { %22 = sbr.rel (!%p20_p11) target bundleno = 5 (0x5), region = 151 }

</bundles_post_ra>
